<compile_context>
chip_gen: v7x
topology: tpu7x:2x2x1
jax: 0.10.0
libtpu: 0.0.40
codegen_flags: <defaults>
</compile_context>

<pallas_src>
import functools
import math

import jax
import jax.numpy as jnp
from jax.experimental import pallas as pl
from jax.experimental.pallas import tpu as pltpu


_SQRT2 = math.sqrt(2.0)
_NEG = float(jnp.finfo(jnp.float32).min)   # matches torch.finfo(dtype).min


# ----------------------------------------------------------------------------
# In-kernel helpers (operate on traced values, not Refs)
# ----------------------------------------------------------------------------

def _mm(x, w, b):
    return jnp.dot(x, w, preferred_element_type=jnp.float32) + b


def _silu(x):
    return x * jax.nn.sigmoid(x)


def _gelu(x):                                   # exact erf GELU == torch nn.GELU()
    return 0.5 * x * (1.0 + jax.lax.erf(x / _SQRT2))


def _layer_norm(x, g, b, eps=1e-5):
    mean = jnp.mean(x, axis=-1, keepdims=True)
    var = jnp.mean(jnp.square(x - mean), axis=-1, keepdims=True)
    return (x - mean) * jax.lax.rsqrt(var + eps) * g + b


def _softmax_attend(q, k, v, mask_add, num_heads):
    """q:(Sq,D)  k,v:(Sk,D)  mask_add:(1,Sk) additive; per-head attention."""
    _, dm = q.shape
    hd = dm // num_heads
    scale = float(hd) ** -0.5
    outs = []
    for h in range(num_heads):
        lo, hi = h * hd, (h + 1) * hd
        s = jnp.dot(q[:, lo:hi] * scale, k[:, lo:hi].T,
                    preferred_element_type=jnp.float32) + mask_add
        s = s - jnp.max(s, axis=-1, keepdims=True)
        p = jnp.exp(s)
        p = p * pl.reciprocal(jnp.sum(p, axis=-1, keepdims=True), approx=True)
        outs.append(jnp.dot(p, v[:, lo:hi], preferred_element_type=jnp.float32))
    return outs[0] if num_heads == 1 else jnp.concatenate(outs, axis=-1)


def _self_attention(x, qkv_w, qkv_b, o_w, o_b, mask_add, num_heads):
    dm = x.shape[-1]
    qkv = _mm(x, qkv_w, qkv_b)                                   # fused QKV
    o = _softmax_attend(qkv[:, :dm], qkv[:, dm:2 * dm], qkv[:, 2 * dm:],
                        mask_add, num_heads)
    return _mm(o, o_w, o_b)


def _cross_attention(xq, xkv, q_w, q_b, kv_w, kv_b, o_w, o_b, mask_add, num_heads):
    dm = xq.shape[-1]
    q = _mm(xq, q_w, q_b)
    kv = _mm(xkv, kv_w, kv_b)                                    # fused KV
    o = _softmax_attend(q, kv[:, :dm], kv[:, dm:], mask_add, num_heads)
    return _mm(o, o_w, o_b)


# ----------------------------------------------------------------------------
# Glue: sinusoidal timestep embedding (plain JAX)
# ----------------------------------------------------------------------------

def timestep_embedding(timesteps, dim, max_period=10000.0):
    half = dim // 2
    freqs = jnp.exp(-math.log(max_period) * jnp.arange(half, dtype=jnp.float32) / half)
    args = timesteps.astype(jnp.float32)[:, None] * freqs[None, :]
    emb = jnp.concatenate([jnp.cos(args), jnp.sin(args)], axis=-1)
    if dim % 2:
        emb = jnp.concatenate([emb, jnp.zeros_like(emb[:, :1])], axis=-1)
    return emb


# ----------------------------------------------------------------------------
# Full forward: one fused Pallas kernel
# ----------------------------------------------------------------------------

def forward(params, input_ids, timesteps, attention_mask,
            decoder_inputs_embeds, decoder_attention_mask, self_conditions,
            *, num_heads):
    D = params["time1_w"].shape[0]              # d_model == in_channels
    E_out = params["down2_w"].shape[1]          # embedding_dim
    B, S_dec, _ = decoder_inputs_embeds.shape
    S_enc = input_ids.shape[1]
    n_enc = params["enc"]["qkv_w"].shape[0]
    n_dec = params["dec"]["qkv_w"].shape[0]
    n_dit = params["dit"]["qkv_w"].shape[0]

    # ---- glue: gather / sinusoid / concat / slices / mask casts ------------
    temb = timestep_embedding(timesteps, D)[:, None, :]                 # (B,1,D)
    tok = params["shared"][input_ids].astype(jnp.float32)               # embed_scale = 1.0
    dec_cat = jnp.concatenate(
        [decoder_inputs_embeds, self_conditions], axis=-1).astype(jnp.float32)
    enc_pos = params["enc_pos"][2:2 + S_enc]                            # HF offset 2
    dec_pos = params["dec_pos"][2:2 + S_dec]
    enc_mask = attention_mask.astype(jnp.float32)[:, None, :]           # (B,1,S_enc)
    dec_mask = decoder_attention_mask.astype(jnp.float32)[:, None, :]   # (B,1,S_dec)

    kparams = {k: v for k, v in params.items()
               if k not in ("shared", "enc_pos", "dec_pos")}
    p_leaves, p_tree = jax.tree_util.tree_flatten(kparams)
    n_inputs = 7

    # ------------------------------------------------------------------ kernel
    def kernel(*refs):
        (tok_ref, deccat_ref, temb_ref, encm_ref, decm_ref,
         encpos_ref, decpos_ref) = refs[:n_inputs]
        out_ref = refs[-1]
        P = jax.tree_util.tree_unflatten(p_tree, refs[n_inputs:-1])

        tok_x = tok_ref[0]                      # (S_enc, E)
        dec_x = deccat_ref[0]                   # (S_dec, 2E)
        t_x = temb_ref[0]                       # (1, D)
        enc_add = (1.0 - encm_ref[0]) * _NEG    # (1, S_enc) additive key mask
        dec_add = (1.0 - decm_ref[0]) * _NEG    # (1, S_dec)
        epos = encpos_ref[...]                  # (S_enc, D)
        dpos = decpos_ref[...]                  # (S_dec, D)

        # ---- time embedding MLP: Linear -> SiLU -> Linear ----
        emb = _mm(_silu(_mm(t_x, P["time1_w"][...], P["time1_b"][...])),
                  P["time2_w"][...], P["time2_b"][...])                 # (1, D)

        # ---- decoder input up-projection (+ time emb) + top LayerNorm ----
        dec = _mm(jnp.tanh(_mm(dec_x, P["up_dec1_w"][...], P["up_dec1_b"][...])),
                  P["up_dec2_w"][...], P["up_dec2_b"][...]) + emb
        emb_inputs = _layer_norm(dec, P["ln_g"][...], P["ln_b"][...])   # dropout no-op

        # ---- encoder input up-projection ----
        enc_in = _mm(jnp.tanh(_mm(tok_x, P["up_enc1_w"][...], P["up_enc1_b"][...])),
                     P["up_enc2_w"][...], P["up_enc2_b"][...])

        # ---- BART encoder ----
        h = _layer_norm(enc_in + epos,
                        P["enc_ln_emb_g"][...], P["enc_ln_emb_b"][...])
        Ep = P["enc"]
        for l in range(n_enc):
            a = _self_attention(h, Ep["qkv_w"][l], Ep["qkv_b"][l],
                                Ep["o_w"][l], Ep["o_b"][l], enc_add, num_heads)
            h = _layer_norm(h + a, Ep["ln1_g"][l], Ep["ln1_b"][l])
            f = _mm(_gelu(_mm(h, Ep["fc1_w"][l], Ep["fc1_b"][l])),
                    Ep["fc2_w"][l], Ep["fc2_b"][l])
            h = _layer_norm(h + f, Ep["ln2_g"][l], Ep["ln2_b"][l])
        enc_h = h

        # ---- BART decoder ----
        # TODO(synk): SeqDiffuSeq's custom BartModel uses a bidirectional
        # (non-causal) decoder self-attention mask (_make_no_causal_mask), so
        # the self mask is the padding mask only; followed here.
        h = _layer_norm(emb_inputs + dpos,
                        P["dec_ln_emb_g"][...], P["dec_ln_emb_b"][...])
        Dp = P["dec"]
        for l in range(n_dec):
            a = _self_attention(h, Dp["qkv_w"][l], Dp["qkv_b"][l],
                                Dp["o_w"][l], Dp["o_b"][l], dec_add, num_heads)
            h = _layer_norm(h + a, Dp["ln1_g"][l], Dp["ln1_b"][l])
            x = _cross_attention(h, enc_h, Dp["xq_w"][l], Dp["xq_b"][l],
                                 Dp["xkv_w"][l], Dp["xkv_b"][l],
                                 Dp["xo_w"][l], Dp["xo_b"][l], enc_add, num_heads)
            h = _layer_norm(h + x, Dp["ln2_g"][l], Dp["ln2_b"][l])
            f = _mm(_gelu(_mm(h, Dp["fc1_w"][l], Dp["fc1_b"][l])),
                    Dp["fc2_w"][l], Dp["fc2_b"][l])
            h = _layer_norm(h + f, Dp["ln3_g"][l], Dp["ln3_b"][l])

        # ---- DiT blocks (c = time embedding; y is None -> 0) ----
        Tp = P["dit"]
        silu_emb = _silu(emb)                    # hoisted: block-invariant
        for l in range(n_dit):
            # adaLN on the un-broadcast (1, D) conditioning (rows along S are
            # identical in the reference, so this is exact).
            mod = _mm(silu_emb, Tp["adaln_w"][l], Tp["adaln_b"][l])     # (1, 6D)
            sh_msa, sc_msa = mod[:, 0:D], mod[:, D:2 * D]
            g_msa, sh_mlp = mod[:, 2 * D:3 * D], mod[:, 3 * D:4 * D]
            sc_mlp, g_mlp = mod[:, 4 * D:5 * D], mod[:, 5 * D:6 * D]

            residual = h
            hmod = h * (1.0 + sc_msa) + sh_msa                          # modulate
            attn = _self_attention(hmod, Tp["qkv_w"][l], Tp["qkv_b"][l],
                                   Tp["o_w"][l], Tp["o_b"][l], dec_add, num_heads)
            h1 = residual + g_msa * attn                                # dropout no-op
            mlp_in = h1 * (1.0 + sc_mlp) + sh_mlp
            mlp = _mm(_gelu(_mm(mlp_in, Tp["mlp1_w"][l], Tp["mlp1_b"][l])),
                      Tp["mlp2_w"][l], Tp["mlp2_b"][l])
            h = _layer_norm(residual + g_mlp * mlp,
                            Tp["ln1_g"][l], Tp["ln1_b"][l])

            residual = h
            x = _cross_attention(h, enc_h, Tp["xq_w"][l], Tp["xq_b"][l],
                                 Tp["xkv_w"][l], Tp["xkv_b"][l],
                                 Tp["xo_w"][l], Tp["xo_b"][l], enc_add, num_heads)
            h = _layer_norm(residual + x, Tp["ln2_g"][l], Tp["ln2_b"][l])

            residual = h
            f = _mm(_gelu(_mm(h, Tp["fc1_w"][l], Tp["fc1_b"][l])),
                    Tp["fc2_w"][l], Tp["fc2_b"][l])
            h = _layer_norm(residual + f, Tp["ln3_g"][l], Tp["ln3_b"][l])

        # ---- output down-projection: Linear -> Tanh -> Linear ----
        out = _mm(jnp.tanh(_mm(h, P["down1_w"][...], P["down1_b"][...])),
                  P["down2_w"][...], P["down2_b"][...])                 # (S_dec, E)
        out_ref[0] = out

    # ------------------------------------------------------------- block specs
    def _batch_spec(x):          # per-example input: slice along batch dim
        nd = x.ndim
        return pl.BlockSpec((1,) + x.shape[1:],
                            lambda b, _n=nd: (b,) + (0,) * (_n - 1))

    def _full_spec(x):           # shared/weight: whole array, VMEM-resident
        nd = x.ndim
        return pl.BlockSpec(x.shape, lambda b, _n=nd: (0,) * _n)

    in_specs = ([_batch_spec(tok), _batch_spec(dec_cat), _batch_spec(temb),
                 _batch_spec(enc_mask), _batch_spec(dec_mask),
                 _full_spec(enc_pos), _full_spec(dec_pos)]
                + [_full_spec(x) for x in p_leaves])

    return pl.pallas_call(
        kernel,
        grid=(B,),
        in_specs=in_specs,
        out_specs=pl.BlockSpec((1, S_dec, E_out), lambda b: (b, 0, 0)),
        out_shape=jax.ShapeDtypeStruct((B, S_dec, E_out), jnp.float32),
        compiler_params=pltpu.CompilerParams(
            dimension_semantics=("parallel",)),
    )(tok, dec_cat, temb, enc_mask, dec_mask, enc_pos, dec_pos, *p_leaves)


# ----------------------------------------------------------------------------
# Deterministic parameter construction (stacked per-layer weights)
# ----------------------------------------------------------------------------

class _KeyGen:
    def __init__(self, seed):
        self._key = jax.random.PRNGKey(seed)

    def __call__(self):
        self._key, sub = jax.random.split(self._key)
        return sub


def make_params(seed, *, d_model, ffn_dim, emb_dim, vocab_size,
                enc_layers, dec_layers, dit_depth, max_pos):
    kg = _KeyGen(seed)
    D, F, E = d_model, ffn_dim, emb_dim

    def w(din, dout):
        return jax.random.normal(kg(), (din, dout), jnp.float32) * 0.02

    def b(dout):
        return jnp.zeros((1, dout), jnp.float32)

    def sw(L, din, dout):
        return jax.random.normal(kg(), (L, din, dout), jnp.float32) * 0.02

    def sb(L, dout):
        return jnp.zeros((L, 1, dout), jnp.float32)

    def sg(L, d):
        return jnp.ones((L, 1, d), jnp.float32)

    enc = {
        "qkv_w": sw(enc_layers, D, 3 * D), "qkv_b": sb(enc_layers, 3 * D),
        "o_w": sw(enc_layers, D, D), "o_b": sb(enc_layers, D),
        "ln1_g": sg(enc_layers, D), "ln1_b": sb(enc_layers, D),
        "fc1_w": sw(enc_layers, D, F), "fc1_b": sb(enc_layers, F),
        "fc2_w": sw(enc_layers, F, D), "fc2_b": sb(enc_layers, D),
        "ln2_g": sg(enc_layers, D), "ln2_b": sb(enc_layers, D),
    }
    dec = {
        "qkv_w": sw(dec_layers, D, 3 * D), "qkv_b": sb(dec_layers, 3 * D),
        "o_w": sw(dec_layers, D, D), "o_b": sb(dec_layers, D),
        "ln1_g": sg(dec_layers, D), "ln1_b": sb(dec_layers, D),
        "xq_w": sw(dec_layers, D, D), "xq_b": sb(dec_layers, D),
        "xkv_w": sw(dec_layers, D, 2 * D), "xkv_b": sb(dec_layers, 2 * D),
        "xo_w": sw(dec_layers, D, D), "xo_b": sb(dec_layers, D),
        "ln2_g": sg(dec_layers, D), "ln2_b": sb(dec_layers, D),
        "fc1_w": sw(dec_layers, D, F), "fc1_b": sb(dec_layers, F),
        "fc2_w": sw(dec_layers, F, D), "fc2_b": sb(dec_layers, D),
        "ln3_g": sg(dec_layers, D), "ln3_b": sb(dec_layers, D),
    }
    dit = {
        "adaln_w": sw(dit_depth, D, 6 * D), "adaln_b": sb(dit_depth, 6 * D),
        "qkv_w": sw(dit_depth, D, 3 * D), "qkv_b": sb(dit_depth, 3 * D),
        "o_w": sw(dit_depth, D, D), "o_b": sb(dit_depth, D),
        "mlp1_w": sw(dit_depth, D, F), "mlp1_b": sb(dit_depth, F),
        "mlp2_w": sw(dit_depth, F, D), "mlp2_b": sb(dit_depth, D),
        "ln1_g": sg(dit_depth, D), "ln1_b": sb(dit_depth, D),
        "xq_w": sw(dit_depth, D, D), "xq_b": sb(dit_depth, D),
        "xkv_w": sw(dit_depth, D, 2 * D), "xkv_b": sb(dit_depth, 2 * D),
        "xo_w": sw(dit_depth, D, D), "xo_b": sb(dit_depth, D),
        "ln2_g": sg(dit_depth, D), "ln2_b": sb(dit_depth, D),
        "fc1_w": sw(dit_depth, D, F), "fc1_b": sb(dit_depth, F),
        "fc2_w": sw(dit_depth, F, D), "fc2_b": sb(dit_depth, D),
        "ln3_g": sg(dit_depth, D), "ln3_b": sb(dit_depth, D),
    }
    return {
        "time1_w": w(D, D), "time1_b": b(D),
        "time2_w": w(D, D), "time2_b": b(D),
        "up_dec1_w": w(2 * E, D), "up_dec1_b": b(D),
        "up_dec2_w": w(D, D), "up_dec2_b": b(D),
        "up_enc1_w": w(E, D), "up_enc1_b": b(D),
        "up_enc2_w": w(D, D), "up_enc2_b": b(D),
        "down1_w": w(D, D), "down1_b": b(D),
        "down2_w": w(D, E), "down2_b": b(E),
        "ln_g": jnp.ones((1, D), jnp.float32), "ln_b": jnp.zeros((1, D), jnp.float32),
        "enc_ln_emb_g": jnp.ones((1, D), jnp.float32),
        "enc_ln_emb_b": jnp.zeros((1, D), jnp.float32),
        "dec_ln_emb_g": jnp.ones((1, D), jnp.float32),
        "dec_ln_emb_b": jnp.zeros((1, D), jnp.float32),
        "shared": jax.random.normal(kg(), (vocab_size, E), jnp.float32) * 0.02,
        "enc_pos": jax.random.normal(kg(), (max_pos + 2, D), jnp.float32) * 0.02,
        "dec_pos": jax.random.normal(kg(), (max_pos + 2, D), jnp.float32) * 0.02,
        "enc": enc, "dec": dec, "dit": dit,
    }


# ----------------------------------------------------------------------------
# Demo
# ----------------------------------------------------------------------------

if __name__ == "__main__":
    # model sizes: in_channels = d_model = 32, model_channels (ffn) = 64,
    # embedding_dim = d_model // 4 = 8, vocab = 50, 1 head, DiT_depth = 2
    D, F, E, V, H = 32, 64, 8, 50, 1
    B, S_dec, S_enc = 2, 8, 8

    params = make_params(0, d_model=D, ffn_dim=F, emb_dim=E, vocab_size=V,
                         enc_layers=2, dec_layers=2, dit_depth=2, max_pos=64)

    key = jax.random.PRNGKey(0)
    k1, k2, k3, k4 = jax.random.split(key, 4)
    input_ids = jax.random.randint(k1, (B, S_enc), 0, V)
    timesteps = jax.random.randint(k2, (B,), 0, 1000).astype(jnp.float32)
    attention_mask = jnp.ones((B, S_enc), jnp.float32).at[1, -2:].set(0.0)
    decoder_inputs_embeds = jax.random.normal(k3, (B, S_dec, E), jnp.float32)
    decoder_attention_mask = jnp.ones((B, S_dec), jnp.float32)
    self_conditions = jax.random.normal(k4, (B, S_dec, E), jnp.float32)

    fwd = jax.jit(forward, static_argnames=("num_heads",))
    out = fwd(params, input_ids, timesteps, attention_mask,
              decoder_inputs_embeds, decoder_attention_mask, self_conditions,
              num_heads=H)
    jax.block_until_ready(out)
    assert out.shape == (B, S_dec, E), out.shape
    assert bool(jnp.all(jnp.isfinite(out)))
    print("KERNEL_OK")
</pallas_src>

<mosaic_0001>
module attributes {stable_mosaic.version = 11 : i64} {
  func.func @kernel(%arg0: i32, %arg1: memref<1x8x8xf32, #tpu.memory_space<vmem>>, %arg2: memref<1x8x16xf32, #tpu.memory_space<vmem>>, %arg3: memref<1x1x32xf32, #tpu.memory_space<vmem>>, %arg4: memref<1x1x8xf32, #tpu.memory_space<vmem>>, %arg5: memref<1x1x8xf32, #tpu.memory_space<vmem>>, %arg6: memref<8x32xf32, #tpu.memory_space<vmem>>, %arg7: memref<8x32xf32, #tpu.memory_space<vmem>>, %arg8: memref<2x1x64xf32, #tpu.memory_space<vmem>>, %arg9: memref<2x32x64xf32, #tpu.memory_space<vmem>>, %arg10: memref<2x1x32xf32, #tpu.memory_space<vmem>>, %arg11: memref<2x64x32xf32, #tpu.memory_space<vmem>>, %arg12: memref<2x1x32xf32, #tpu.memory_space<vmem>>, %arg13: memref<2x1x32xf32, #tpu.memory_space<vmem>>, %arg14: memref<2x1x32xf32, #tpu.memory_space<vmem>>, %arg15: memref<2x1x32xf32, #tpu.memory_space<vmem>>, %arg16: memref<2x1x32xf32, #tpu.memory_space<vmem>>, %arg17: memref<2x1x32xf32, #tpu.memory_space<vmem>>, %arg18: memref<2x1x32xf32, #tpu.memory_space<vmem>>, %arg19: memref<2x32x32xf32, #tpu.memory_space<vmem>>, %arg20: memref<2x1x96xf32, #tpu.memory_space<vmem>>, %arg21: memref<2x32x96xf32, #tpu.memory_space<vmem>>, %arg22: memref<2x1x64xf32, #tpu.memory_space<vmem>>, %arg23: memref<2x32x64xf32, #tpu.memory_space<vmem>>, %arg24: memref<2x1x32xf32, #tpu.memory_space<vmem>>, %arg25: memref<2x32x32xf32, #tpu.memory_space<vmem>>, %arg26: memref<2x1x32xf32, #tpu.memory_space<vmem>>, %arg27: memref<2x32x32xf32, #tpu.memory_space<vmem>>, %arg28: memref<1x32xf32, #tpu.memory_space<vmem>>, %arg29: memref<1x32xf32, #tpu.memory_space<vmem>>, %arg30: memref<2x1x192xf32, #tpu.memory_space<vmem>>, %arg31: memref<2x32x192xf32, #tpu.memory_space<vmem>>, %arg32: memref<2x1x64xf32, #tpu.memory_space<vmem>>, %arg33: memref<2x32x64xf32, #tpu.memory_space<vmem>>, %arg34: memref<2x1x32xf32, #tpu.memory_space<vmem>>, %arg35: memref<2x64x32xf32, #tpu.memory_space<vmem>>, %arg36: memref<2x1x32xf32, #tpu.memory_space<vmem>>, %arg37: memref<2x1x32xf32, #tpu.memory_space<vmem>>, %arg38: memref<2x1x32xf32, #tpu.memory_space<vmem>>, %arg39: memref<2x1x32xf32, #tpu.memory_space<vmem>>, %arg40: memref<2x1x32xf32, #tpu.memory_space<vmem>>, %arg41: memref<2x1x32xf32, #tpu.memory_space<vmem>>, %arg42: memref<2x1x64xf32, #tpu.memory_space<vmem>>, %arg43: memref<2x32x64xf32, #tpu.memory_space<vmem>>, %arg44: memref<2x1x32xf32, #tpu.memory_space<vmem>>, %arg45: memref<2x64x32xf32, #tpu.memory_space<vmem>>, %arg46: memref<2x1x32xf32, #tpu.memory_space<vmem>>, %arg47: memref<2x32x32xf32, #tpu.memory_space<vmem>>, %arg48: memref<2x1x96xf32, #tpu.memory_space<vmem>>, %arg49: memref<2x32x96xf32, #tpu.memory_space<vmem>>, %arg50: memref<2x1x64xf32, #tpu.memory_space<vmem>>, %arg51: memref<2x32x64xf32, #tpu.memory_space<vmem>>, %arg52: memref<2x1x32xf32, #tpu.memory_space<vmem>>, %arg53: memref<2x32x32xf32, #tpu.memory_space<vmem>>, %arg54: memref<2x1x32xf32, #tpu.memory_space<vmem>>, %arg55: memref<2x32x32xf32, #tpu.memory_space<vmem>>, %arg56: memref<1x32xf32, #tpu.memory_space<vmem>>, %arg57: memref<32x32xf32, #tpu.memory_space<vmem>>, %arg58: memref<1x8xf32, #tpu.memory_space<vmem>>, %arg59: memref<32x8xf32, #tpu.memory_space<vmem>>, %arg60: memref<2x1x64xf32, #tpu.memory_space<vmem>>, %arg61: memref<2x32x64xf32, #tpu.memory_space<vmem>>, %arg62: memref<2x1x32xf32, #tpu.memory_space<vmem>>, %arg63: memref<2x64x32xf32, #tpu.memory_space<vmem>>, %arg64: memref<2x1x32xf32, #tpu.memory_space<vmem>>, %arg65: memref<2x1x32xf32, #tpu.memory_space<vmem>>, %arg66: memref<2x1x32xf32, #tpu.memory_space<vmem>>, %arg67: memref<2x1x32xf32, #tpu.memory_space<vmem>>, %arg68: memref<2x1x32xf32, #tpu.memory_space<vmem>>, %arg69: memref<2x32x32xf32, #tpu.memory_space<vmem>>, %arg70: memref<2x1x96xf32, #tpu.memory_space<vmem>>, %arg71: memref<2x32x96xf32, #tpu.memory_space<vmem>>, %arg72: memref<1x32xf32, #tpu.memory_space<vmem>>, %arg73: memref<1x32xf32, #tpu.memory_space<vmem>>, %arg74: memref<1x32xf32, #tpu.memory_space<vmem>>, %arg75: memref<1x32xf32, #tpu.memory_space<vmem>>, %arg76: memref<1x32xf32, #tpu.memory_space<vmem>>, %arg77: memref<32x32xf32, #tpu.memory_space<vmem>>, %arg78: memref<1x32xf32, #tpu.memory_space<vmem>>, %arg79: memref<32x32xf32, #tpu.memory_space<vmem>>, %arg80: memref<1x32xf32, #tpu.memory_space<vmem>>, %arg81: memref<16x32xf32, #tpu.memory_space<vmem>>, %arg82: memref<1x32xf32, #tpu.memory_space<vmem>>, %arg83: memref<32x32xf32, #tpu.memory_space<vmem>>, %arg84: memref<1x32xf32, #tpu.memory_space<vmem>>, %arg85: memref<8x32xf32, #tpu.memory_space<vmem>>, %arg86: memref<1x32xf32, #tpu.memory_space<vmem>>, %arg87: memref<32x32xf32, #tpu.memory_space<vmem>>, %arg88: memref<1x8x8xf32, #tpu.memory_space<vmem>>) attributes {dimension_semantics = [#tpu.dimension_semantics<parallel>], iteration_bounds = array<i64: 2>, scalar_prefetch = 0 : i64, scratch_operands = 0 : i64, tpu.core_type = #tpu.core_type<tc>, window_params = [{transform_indices = @transform_0, window_bounds = array<i64: 1, 8, 8>}, {transform_indices = @transform_1, window_bounds = array<i64: 1, 8, 16>}, {transform_indices = @transform_2, window_bounds = array<i64: 1, 1, 32>}, {transform_indices = @transform_3, window_bounds = array<i64: 1, 1, 8>}, {transform_indices = @transform_4, window_bounds = array<i64: 1, 1, 8>}, {pipeline_mode = #tpu.pipeline_mode<synchronous>, transform_indices = @transform_5, window_bounds = array<i64: 8, 32>}, {pipeline_mode = #tpu.pipeline_mode<synchronous>, transform_indices = @transform_6, window_bounds = array<i64: 8, 32>}, {pipeline_mode = #tpu.pipeline_mode<synchronous>, transform_indices = @transform_7, window_bounds = array<i64: 2, 1, 64>}, {pipeline_mode = #tpu.pipeline_mode<synchronous>, transform_indices = @transform_8, window_bounds = array<i64: 2, 32, 64>}, {pipeline_mode = #tpu.pipeline_mode<synchronous>, transform_indices = @transform_9, window_bounds = array<i64: 2, 1, 32>}, {pipeline_mode = #tpu.pipeline_mode<synchronous>, transform_indices = @transform_10, window_bounds = array<i64: 2, 64, 32>}, {pipeline_mode = #tpu.pipeline_mode<synchronous>, transform_indices = @transform_11, window_bounds = array<i64: 2, 1, 32>}, {pipeline_mode = #tpu.pipeline_mode<synchronous>, transform_indices = @transform_12, window_bounds = array<i64: 2, 1, 32>}, {pipeline_mode = #tpu.pipeline_mode<synchronous>, transform_indices = @transform_13, window_bounds = array<i64: 2, 1, 32>}, {pipeline_mode = #tpu.pipeline_mode<synchronous>, transform_indices = @transform_14, window_bounds = array<i64: 2, 1, 32>}, {pipeline_mode = #tpu.pipeline_mode<synchronous>, transform_indices = @transform_15, window_bounds = array<i64: 2, 1, 32>}, {pipeline_mode = #tpu.pipeline_mode<synchronous>, transform_indices = @transform_16, window_bounds = array<i64: 2, 1, 32>}, {pipeline_mode = #tpu.pipeline_mode<synchronous>, transform_indices = @transform_17, window_bounds = array<i64: 2, 1, 32>}, {pipeline_mode = #tpu.pipeline_mode<synchronous>, transform_indices = @transform_18, window_bounds = array<i64: 2, 32, 32>}, {pipeline_mode = #tpu.pipeline_mode<synchronous>, transform_indices = @transform_19, window_bounds = array<i64: 2, 1, 96>}, {pipeline_mode = #tpu.pipeline_mode<synchronous>, transform_indices = @transform_20, window_bounds = array<i64: 2, 32, 96>}, {pipeline_mode = #tpu.pipeline_mode<synchronous>, transform_indices = @transform_21, window_bounds = array<i64: 2, 1, 64>}, {pipeline_mode = #tpu.pipeline_mode<synchronous>, transform_indices = @transform_22, window_bounds = array<i64: 2, 32, 64>}, {pipeline_mode = #tpu.pipeline_mode<synchronous>, transform_indices = @transform_23, window_bounds = array<i64: 2, 1, 32>}, {pipeline_mode = #tpu.pipeline_mode<synchronous>, transform_indices = @transform_24, window_bounds = array<i64: 2, 32, 32>}, {pipeline_mode = #tpu.pipeline_mode<synchronous>, transform_indices = @transform_25, window_bounds = array<i64: 2, 1, 32>}, {pipeline_mode = #tpu.pipeline_mode<synchronous>, transform_indices = @transform_26, window_bounds = array<i64: 2, 32, 32>}, {pipeline_mode = #tpu.pipeline_mode<synchronous>, transform_indices = @transform_27, window_bounds = array<i64: 1, 32>}, {pipeline_mode = #tpu.pipeline_mode<synchronous>, transform_indices = @transform_28, window_bounds = array<i64: 1, 32>}, {pipeline_mode = #tpu.pipeline_mode<synchronous>, transform_indices = @transform_29, window_bounds = array<i64: 2, 1, 192>}, {pipeline_mode = #tpu.pipeline_mode<synchronous>, transform_indices = @transform_30, window_bounds = array<i64: 2, 32, 192>}, {pipeline_mode = #tpu.pipeline_mode<synchronous>, transform_indices = @transform_31, window_bounds = array<i64: 2, 1, 64>}, {pipeline_mode = #tpu.pipeline_mode<synchronous>, transform_indices = @transform_32, window_bounds = array<i64: 2, 32, 64>}, {pipeline_mode = #tpu.pipeline_mode<synchronous>, transform_indices = @transform_33, window_bounds = array<i64: 2, 1, 32>}, {pipeline_mode = #tpu.pipeline_mode<synchronous>, transform_indices = @transform_34, window_bounds = array<i64: 2, 64, 32>}, {pipeline_mode = #tpu.pipeline_mode<synchronous>, transform_indices = @transform_35, window_bounds = array<i64: 2, 1, 32>}, {pipeline_mode = #tpu.pipeline_mode<synchronous>, transform_indices = @transform_36, window_bounds = array<i64: 2, 1, 32>}, {pipeline_mode = #tpu.pipeline_mode<synchronous>, transform_indices = @transform_37, window_bounds = array<i64: 2, 1, 32>}, {pipeline_mode = #tpu.pipeline_mode<synchronous>, transform_indices = @transform_38, window_bounds = array<i64: 2, 1, 32>}, {pipeline_mode = #tpu.pipeline_mode<synchronous>, transform_indices = @transform_39, window_bounds = array<i64: 2, 1, 32>}, {pipeline_mode = #tpu.pipeline_mode<synchronous>, transform_indices = @transform_40, window_bounds = array<i64: 2, 1, 32>}, {pipeline_mode = #tpu.pipeline_mode<synchronous>, transform_indices = @transform_41, window_bounds = array<i64: 2, 1, 64>}, {pipeline_mode = #tpu.pipeline_mode<synchronous>, transform_indices = @transform_42, window_bounds = array<i64: 2, 32, 64>}, {pipeline_mode = #tpu.pipeline_mode<synchronous>, transform_indices = @transform_43, window_bounds = array<i64: 2, 1, 32>}, {pipeline_mode = #tpu.pipeline_mode<synchronous>, transform_indices = @transform_44, window_bounds = array<i64: 2, 64, 32>}, {pipeline_mode = #tpu.pipeline_mode<synchronous>, transform_indices = @transform_45, window_bounds = array<i64: 2, 1, 32>}, {pipeline_mode = #tpu.pipeline_mode<synchronous>, transform_indices = @transform_46, window_bounds = array<i64: 2, 32, 32>}, {pipeline_mode = #tpu.pipeline_mode<synchronous>, transform_indices = @transform_47, window_bounds = array<i64: 2, 1, 96>}, {pipeline_mode = #tpu.pipeline_mode<synchronous>, transform_indices = @transform_48, window_bounds = array<i64: 2, 32, 96>}, {pipeline_mode = #tpu.pipeline_mode<synchronous>, transform_indices = @transform_49, window_bounds = array<i64: 2, 1, 64>}, {pipeline_mode = #tpu.pipeline_mode<synchronous>, transform_indices = @transform_50, window_bounds = array<i64: 2, 32, 64>}, {pipeline_mode = #tpu.pipeline_mode<synchronous>, transform_indices = @transform_51, window_bounds = array<i64: 2, 1, 32>}, {pipeline_mode = #tpu.pipeline_mode<synchronous>, transform_indices = @transform_52, window_bounds = array<i64: 2, 32, 32>}, {pipeline_mode = #tpu.pipeline_mode<synchronous>, transform_indices = @transform_53, window_bounds = array<i64: 2, 1, 32>}, {pipeline_mode = #tpu.pipeline_mode<synchronous>, transform_indices = @transform_54, window_bounds = array<i64: 2, 32, 32>}, {pipeline_mode = #tpu.pipeline_mode<synchronous>, transform_indices = @transform_55, window_bounds = array<i64: 1, 32>}, {pipeline_mode = #tpu.pipeline_mode<synchronous>, transform_indices = @transform_56, window_bounds = array<i64: 32, 32>}, {pipeline_mode = #tpu.pipeline_mode<synchronous>, transform_indices = @transform_57, window_bounds = array<i64: 1, 8>}, {pipeline_mode = #tpu.pipeline_mode<synchronous>, transform_indices = @transform_58, window_bounds = array<i64: 32, 8>}, {pipeline_mode = #tpu.pipeline_mode<synchronous>, transform_indices = @transform_59, window_bounds = array<i64: 2, 1, 64>}, {pipeline_mode = #tpu.pipeline_mode<synchronous>, transform_indices = @transform_60, window_bounds = array<i64: 2, 32, 64>}, {pipeline_mode = #tpu.pipeline_mode<synchronous>, transform_indices = @transform_61, window_bounds = array<i64: 2, 1, 32>}, {pipeline_mode = #tpu.pipeline_mode<synchronous>, transform_indices = @transform_62, window_bounds = array<i64: 2, 64, 32>}, {pipeline_mode = #tpu.pipeline_mode<synchronous>, transform_indices = @transform_63, window_bounds = array<i64: 2, 1, 32>}, {pipeline_mode = #tpu.pipeline_mode<synchronous>, transform_indices = @transform_64, window_bounds = array<i64: 2, 1, 32>}, {pipeline_mode = #tpu.pipeline_mode<synchronous>, transform_indices = @transform_65, window_bounds = array<i64: 2, 1, 32>}, {pipeline_mode = #tpu.pipeline_mode<synchronous>, transform_indices = @transform_66, window_bounds = array<i64: 2, 1, 32>}, {pipeline_mode = #tpu.pipeline_mode<synchronous>, transform_indices = @transform_67, window_bounds = array<i64: 2, 1, 32>}, {pipeline_mode = #tpu.pipeline_mode<synchronous>, transform_indices = @transform_68, window_bounds = array<i64: 2, 32, 32>}, {pipeline_mode = #tpu.pipeline_mode<synchronous>, transform_indices = @transform_69, window_bounds = array<i64: 2, 1, 96>}, {pipeline_mode = #tpu.pipeline_mode<synchronous>, transform_indices = @transform_70, window_bounds = array<i64: 2, 32, 96>}, {pipeline_mode = #tpu.pipeline_mode<synchronous>, transform_indices = @transform_71, window_bounds = array<i64: 1, 32>}, {pipeline_mode = #tpu.pipeline_mode<synchronous>, transform_indices = @transform_72, window_bounds = array<i64: 1, 32>}, {pipeline_mode = #tpu.pipeline_mode<synchronous>, transform_indices = @transform_73, window_bounds = array<i64: 1, 32>}, {pipeline_mode = #tpu.pipeline_mode<synchronous>, transform_indices = @transform_74, window_bounds = array<i64: 1, 32>}, {pipeline_mode = #tpu.pipeline_mode<synchronous>, transform_indices = @transform_75, window_bounds = array<i64: 1, 32>}, {pipeline_mode = #tpu.pipeline_mode<synchronous>, transform_indices = @transform_76, window_bounds = array<i64: 32, 32>}, {pipeline_mode = #tpu.pipeline_mode<synchronous>, transform_indices = @transform_77, window_bounds = array<i64: 1, 32>}, {pipeline_mode = #tpu.pipeline_mode<synchronous>, transform_indices = @transform_78, window_bounds = array<i64: 32, 32>}, {pipeline_mode = #tpu.pipeline_mode<synchronous>, transform_indices = @transform_79, window_bounds = array<i64: 1, 32>}, {pipeline_mode = #tpu.pipeline_mode<synchronous>, transform_indices = @transform_80, window_bounds = array<i64: 16, 32>}, {pipeline_mode = #tpu.pipeline_mode<synchronous>, transform_indices = @transform_81, window_bounds = array<i64: 1, 32>}, {pipeline_mode = #tpu.pipeline_mode<synchronous>, transform_indices = @transform_82, window_bounds = array<i64: 32, 32>}, {pipeline_mode = #tpu.pipeline_mode<synchronous>, transform_indices = @transform_83, window_bounds = array<i64: 1, 32>}, {pipeline_mode = #tpu.pipeline_mode<synchronous>, transform_indices = @transform_84, window_bounds = array<i64: 8, 32>}, {pipeline_mode = #tpu.pipeline_mode<synchronous>, transform_indices = @transform_85, window_bounds = array<i64: 1, 32>}, {pipeline_mode = #tpu.pipeline_mode<synchronous>, transform_indices = @transform_86, window_bounds = array<i64: 32, 32>}, {transform_indices = @transform_87, window_bounds = array<i64: 1, 8, 8>}]} {
    %c0 = arith.constant 0 : index
    %c0_0 = arith.constant 0 : index
    %c0_1 = arith.constant 0 : index
    %0 = vector.load %arg1[%c0, %c0_0, %c0_1] : memref<1x8x8xf32, #tpu.memory_space<vmem>>, vector<1x8x8xf32>
    %1 = vector.shape_cast %0 : vector<1x8x8xf32> to vector<8x8xf32>
    %c0_2 = arith.constant 0 : index
    %c0_3 = arith.constant 0 : index
    %c0_4 = arith.constant 0 : index
    %2 = vector.load %arg2[%c0_2, %c0_3, %c0_4] : memref<1x8x16xf32, #tpu.memory_space<vmem>>, vector<1x8x16xf32>
    %3 = vector.shape_cast %2 : vector<1x8x16xf32> to vector<8x16xf32>
    %c0_5 = arith.constant 0 : index
    %c0_6 = arith.constant 0 : index
    %c0_7 = arith.constant 0 : index
    %4 = vector.load %arg3[%c0_5, %c0_6, %c0_7] : memref<1x1x32xf32, #tpu.memory_space<vmem>>, vector<1x1x32xf32>
    %5 = vector.shape_cast %4 : vector<1x1x32xf32> to vector<1x32xf32>
    %c0_8 = arith.constant 0 : index
    %c0_9 = arith.constant 0 : index
    %c0_10 = arith.constant 0 : index
    %6 = vector.load %arg4[%c0_8, %c0_9, %c0_10] : memref<1x1x8xf32, #tpu.memory_space<vmem>>, vector<1x1x8xf32>
    %7 = vector.shape_cast %6 : vector<1x1x8xf32> to vector<1x8xf32>
    %cst = arith.constant 1.000000e+00 : f32
    %8 = vector.broadcast %cst : f32 to vector<1x8xf32>
    %9 = arith.subf %8, %7 : vector<1x8xf32>
    %cst_11 = arith.constant -3.40282347E+38 : f32
    %10 = vector.broadcast %cst_11 : f32 to vector<1x8xf32>
    %11 = arith.mulf %9, %10 : vector<1x8xf32>
    %c0_12 = arith.constant 0 : index
    %c0_13 = arith.constant 0 : index
    %c0_14 = arith.constant 0 : index
    %12 = vector.load %arg5[%c0_12, %c0_13, %c0_14] : memref<1x1x8xf32, #tpu.memory_space<vmem>>, vector<1x1x8xf32>
    %13 = vector.shape_cast %12 : vector<1x1x8xf32> to vector<1x8xf32>
    %cst_15 = arith.constant 1.000000e+00 : f32
    %14 = vector.broadcast %cst_15 : f32 to vector<1x8xf32>
    %15 = arith.subf %14, %13 : vector<1x8xf32>
    %cst_16 = arith.constant -3.40282347E+38 : f32
    %16 = vector.broadcast %cst_16 : f32 to vector<1x8xf32>
    %17 = arith.mulf %15, %16 : vector<1x8xf32>
    %c0_17 = arith.constant 0 : index
    %c0_18 = arith.constant 0 : index
    %18 = vector.load %arg6[%c0_17, %c0_18] : memref<8x32xf32, #tpu.memory_space<vmem>>, vector<8x32xf32>
    %c0_19 = arith.constant 0 : index
    %c0_20 = arith.constant 0 : index
    %19 = vector.load %arg7[%c0_19, %c0_20] : memref<8x32xf32, #tpu.memory_space<vmem>>, vector<8x32xf32>
    %c0_21 = arith.constant 0 : index
    %c0_22 = arith.constant 0 : index
    %20 = vector.load %arg77[%c0_21, %c0_22] : memref<32x32xf32, #tpu.memory_space<vmem>>, vector<32x32xf32>
    %c0_23 = arith.constant 0 : index
    %c0_24 = arith.constant 0 : index
    %21 = vector.load %arg76[%c0_23, %c0_24] : memref<1x32xf32, #tpu.memory_space<vmem>>, vector<1x32xf32>
    %cst_25 = arith.constant dense<0.000000e+00> : vector<1x32xf32>
    %22 = tpu.matmul %5, %20, %cst_25 {dimension_numbers = #tpu.dot_dimension_numbers<[1], [0], [0], [1], [0, 0, 1, 1], [], []>} : vector<1x32xf32>, vector<32x32xf32>, vector<1x32xf32> -> vector<1x32xf32>
    %23 = arith.addf %22, %21 : vector<1x32xf32>
    %24 = arith.negf %23 : vector<1x32xf32>
    %25 = math.exp %24 : vector<1x32xf32>
    %cst_26 = arith.constant 1.000000e+00 : f32
    %26 = vector.broadcast %cst_26 : f32 to vector<1x32xf32>
    %27 = arith.addf %26, %25 : vector<1x32xf32>
    %28 = arith.divf %26, %27 : vector<1x32xf32>
    %29 = arith.mulf %23, %28 : vector<1x32xf32>
    %c0_27 = arith.constant 0 : index
    %c0_28 = arith.constant 0 : index
    %30 = vector.load %arg79[%c0_27, %c0_28] : memref<32x32xf32, #tpu.memory_space<vmem>>, vector<32x32xf32>
    %c0_29 = arith.constant 0 : index
    %c0_30 = arith.constant 0 : index
    %31 = vector.load %arg78[%c0_29, %c0_30] : memref<1x32xf32, #tpu.memory_space<vmem>>, vector<1x32xf32>
    %cst_31 = arith.constant dense<0.000000e+00> : vector<1x32xf32>
    %32 = tpu.matmul %29, %30, %cst_31 {dimension_numbers = #tpu.dot_dimension_numbers<[1], [0], [0], [1], [0, 0, 1, 1], [], []>} : vector<1x32xf32>, vector<32x32xf32>, vector<1x32xf32> -> vector<1x32xf32>
    %33 = arith.addf %32, %31 : vector<1x32xf32>
    %c0_32 = arith.constant 0 : index
    %c0_33 = arith.constant 0 : index
    %34 = vector.load %arg81[%c0_32, %c0_33] : memref<16x32xf32, #tpu.memory_space<vmem>>, vector<16x32xf32>
    %c0_34 = arith.constant 0 : index
    %c0_35 = arith.constant 0 : index
    %35 = vector.load %arg80[%c0_34, %c0_35] : memref<1x32xf32, #tpu.memory_space<vmem>>, vector<1x32xf32>
    %cst_36 = arith.constant dense<0.000000e+00> : vector<8x32xf32>
    %36 = tpu.matmul %3, %34, %cst_36 {dimension_numbers = #tpu.dot_dimension_numbers<[1], [0], [0], [1], [0, 0, 1, 1], [], []>} : vector<8x16xf32>, vector<16x32xf32>, vector<8x32xf32> -> vector<8x32xf32>
    %37 = vector.broadcast %35 : vector<1x32xf32> to vector<8x32xf32>
    %38 = arith.addf %36, %37 : vector<8x32xf32>
    %39 = math.tanh %38 : vector<8x32xf32>
    %c0_37 = arith.constant 0 : index
    %c0_38 = arith.constant 0 : index
    %40 = vector.load %arg83[%c0_37, %c0_38] : memref<32x32xf32, #tpu.memory_space<vmem>>, vector<32x32xf32>
    %c0_39 = arith.constant 0 : index
    %c0_40 = arith.constant 0 : index
    %41 = vector.load %arg82[%c0_39, %c0_40] : memref<1x32xf32, #tpu.memory_space<vmem>>, vector<1x32xf32>
    %cst_41 = arith.constant dense<0.000000e+00> : vector<8x32xf32>
    %42 = tpu.matmul %39, %40, %cst_41 {dimension_numbers = #tpu.dot_dimension_numbers<[1], [0], [0], [1], [0, 0, 1, 1], [], []>} : vector<8x32xf32>, vector<32x32xf32>, vector<8x32xf32> -> vector<8x32xf32>
    %43 = vector.broadcast %41 : vector<1x32xf32> to vector<8x32xf32>
    %44 = arith.addf %42, %43 : vector<8x32xf32>
    %45 = vector.broadcast %33 : vector<1x32xf32> to vector<8x32xf32>
    %46 = arith.addf %44, %45 : vector<8x32xf32>
    %c0_42 = arith.constant 0 : index
    %c0_43 = arith.constant 0 : index
    %47 = vector.load %arg75[%c0_42, %c0_43] : memref<1x32xf32, #tpu.memory_space<vmem>>, vector<1x32xf32>
    %c0_44 = arith.constant 0 : index
    %c0_45 = arith.constant 0 : index
    %48 = vector.load %arg74[%c0_44, %c0_45] : memref<1x32xf32, #tpu.memory_space<vmem>>, vector<1x32xf32>
    %cst_46 = arith.constant dense<0.000000e+00> : vector<8xf32>
    %49 = vector.multi_reduction <add>, %46, %cst_46 [1] : vector<8x32xf32> to vector<8xf32>
    %50 = vector.shape_cast %49 : vector<8xf32> to vector<8x1xf32>
    %cst_47 = arith.constant 3.200000e+01 : f32
    %51 = vector.broadcast %cst_47 : f32 to vector<8x1xf32>
    %52 = arith.divf %50, %51 : vector<8x1xf32>
    %53 = vector.broadcast %52 : vector<8x1xf32> to vector<8x32xf32>
    %54 = arith.subf %46, %53 : vector<8x32xf32>
    %55 = arith.mulf %54, %54 : vector<8x32xf32>
    %cst_48 = arith.constant dense<0.000000e+00> : vector<8xf32>
    %56 = vector.multi_reduction <add>, %55, %cst_48 [1] : vector<8x32xf32> to vector<8xf32>
    %57 = vector.shape_cast %56 : vector<8xf32> to vector<8x1xf32>
    %cst_49 = arith.constant 3.200000e+01 : f32
    %58 = vector.broadcast %cst_49 : f32 to vector<8x1xf32>
    %59 = arith.divf %57, %58 : vector<8x1xf32>
    %60 = vector.broadcast %52 : vector<8x1xf32> to vector<8x32xf32>
    %61 = arith.subf %46, %60 : vector<8x32xf32>
    %cst_50 = arith.constant 9.99999974E-6 : f32
    %62 = vector.broadcast %cst_50 : f32 to vector<8x1xf32>
    %63 = arith.addf %59, %62 : vector<8x1xf32>
    %64 = math.rsqrt %63 : vector<8x1xf32>
    %65 = vector.broadcast %64 : vector<8x1xf32> to vector<8x32xf32>
    %66 = arith.mulf %61, %65 : vector<8x32xf32>
    %67 = vector.broadcast %47 : vector<1x32xf32> to vector<8x32xf32>
    %68 = arith.mulf %66, %67 : vector<8x32xf32>
    %69 = vector.broadcast %48 : vector<1x32xf32> to vector<8x32xf32>
    %70 = arith.addf %68, %69 : vector<8x32xf32>
    %c0_51 = arith.constant 0 : index
    %c0_52 = arith.constant 0 : index
    %71 = vector.load %arg85[%c0_51, %c0_52] : memref<8x32xf32, #tpu.memory_space<vmem>>, vector<8x32xf32>
    %c0_53 = arith.constant 0 : index
    %c0_54 = arith.constant 0 : index
    %72 = vector.load %arg84[%c0_53, %c0_54] : memref<1x32xf32, #tpu.memory_space<vmem>>, vector<1x32xf32>
    %cst_55 = arith.constant dense<0.000000e+00> : vector<8x32xf32>
    %73 = tpu.matmul %1, %71, %cst_55 {dimension_numbers = #tpu.dot_dimension_numbers<[1], [0], [0], [1], [0, 0, 1, 1], [], []>} : vector<8x8xf32>, vector<8x32xf32>, vector<8x32xf32> -> vector<8x32xf32>
    %74 = vector.broadcast %72 : vector<1x32xf32> to vector<8x32xf32>
    %75 = arith.addf %73, %74 : vector<8x32xf32>
    %76 = math.tanh %75 : vector<8x32xf32>
    %c0_56 = arith.constant 0 : index
    %c0_57 = arith.constant 0 : index
    %77 = vector.load %arg87[%c0_56, %c0_57] : memref<32x32xf32, #tpu.memory_space<vmem>>, vector<32x32xf32>
    %c0_58 = arith.constant 0 : index
    %c0_59 = arith.constant 0 : index
    %78 = vector.load %arg86[%c0_58, %c0_59] : memref<1x32xf32, #tpu.memory_space<vmem>>, vector<1x32xf32>
    %cst_60 = arith.constant dense<0.000000e+00> : vector<8x32xf32>
    %79 = tpu.matmul %76, %77, %cst_60 {dimension_numbers = #tpu.dot_dimension_numbers<[1], [0], [0], [1], [0, 0, 1, 1], [], []>} : vector<8x32xf32>, vector<32x32xf32>, vector<8x32xf32> -> vector<8x32xf32>
    %80 = vector.broadcast %78 : vector<1x32xf32> to vector<8x32xf32>
    %81 = arith.addf %79, %80 : vector<8x32xf32>
    %82 = arith.addf %81, %18 : vector<8x32xf32>
    %c0_61 = arith.constant 0 : index
    %c0_62 = arith.constant 0 : index
    %83 = vector.load %arg73[%c0_61, %c0_62] : memref<1x32xf32, #tpu.memory_space<vmem>>, vector<1x32xf32>
    %c0_63 = arith.constant 0 : index
    %c0_64 = arith.constant 0 : index
    %84 = vector.load %arg72[%c0_63, %c0_64] : memref<1x32xf32, #tpu.memory_space<vmem>>, vector<1x32xf32>
    %cst_65 = arith.constant dense<0.000000e+00> : vector<8xf32>
    %85 = vector.multi_reduction <add>, %82, %cst_65 [1] : vector<8x32xf32> to vector<8xf32>
    %86 = vector.shape_cast %85 : vector<8xf32> to vector<8x1xf32>
    %cst_66 = arith.constant 3.200000e+01 : f32
    %87 = vector.broadcast %cst_66 : f32 to vector<8x1xf32>
    %88 = arith.divf %86, %87 : vector<8x1xf32>
    %89 = vector.broadcast %88 : vector<8x1xf32> to vector<8x32xf32>
    %90 = arith.subf %82, %89 : vector<8x32xf32>
    %91 = arith.mulf %90, %90 : vector<8x32xf32>
    %cst_67 = arith.constant dense<0.000000e+00> : vector<8xf32>
    %92 = vector.multi_reduction <add>, %91, %cst_67 [1] : vector<8x32xf32> to vector<8xf32>
    %93 = vector.shape_cast %92 : vector<8xf32> to vector<8x1xf32>
    %cst_68 = arith.constant 3.200000e+01 : f32
    %94 = vector.broadcast %cst_68 : f32 to vector<8x1xf32>
    %95 = arith.divf %93, %94 : vector<8x1xf32>
    %96 = vector.broadcast %88 : vector<8x1xf32> to vector<8x32xf32>
    %97 = arith.subf %82, %96 : vector<8x32xf32>
    %cst_69 = arith.constant 9.99999974E-6 : f32
    %98 = vector.broadcast %cst_69 : f32 to vector<8x1xf32>
    %99 = arith.addf %95, %98 : vector<8x1xf32>
    %100 = math.rsqrt %99 : vector<8x1xf32>
    %101 = vector.broadcast %100 : vector<8x1xf32> to vector<8x32xf32>
    %102 = arith.mulf %97, %101 : vector<8x32xf32>
    %103 = vector.broadcast %83 : vector<1x32xf32> to vector<8x32xf32>
    %104 = arith.mulf %102, %103 : vector<8x32xf32>
    %105 = vector.broadcast %84 : vector<1x32xf32> to vector<8x32xf32>
    %106 = arith.addf %104, %105 : vector<8x32xf32>
    %c0_70 = arith.constant 0 : index
    %c0_71 = arith.constant 0 : index
    %c0_72 = arith.constant 0 : index
    %107 = vector.load %arg71[%c0_70, %c0_71, %c0_72] : memref<2x32x96xf32, #tpu.memory_space<vmem>>, vector<1x32x96xf32>
    %108 = vector.shape_cast %107 : vector<1x32x96xf32> to vector<32x96xf32>
    %c0_73 = arith.constant 0 : index
    %c0_74 = arith.constant 0 : index
    %c0_75 = arith.constant 0 : index
    %109 = vector.load %arg70[%c0_73, %c0_74, %c0_75] : memref<2x1x96xf32, #tpu.memory_space<vmem>>, vector<1x1x96xf32>
    %110 = vector.shape_cast %109 : vector<1x1x96xf32> to vector<1x96xf32>
    %c0_76 = arith.constant 0 : index
    %c0_77 = arith.constant 0 : index
    %c0_78 = arith.constant 0 : index
    %111 = vector.load %arg69[%c0_76, %c0_77, %c0_78] : memref<2x32x32xf32, #tpu.memory_space<vmem>>, vector<1x32x32xf32>
    %112 = vector.shape_cast %111 : vector<1x32x32xf32> to vector<32x32xf32>
    %c0_79 = arith.constant 0 : index
    %c0_80 = arith.constant 0 : index
    %c0_81 = arith.constant 0 : index
    %113 = vector.load %arg68[%c0_79, %c0_80, %c0_81] : memref<2x1x32xf32, #tpu.memory_space<vmem>>, vector<1x1x32xf32>
    %114 = vector.shape_cast %113 : vector<1x1x32xf32> to vector<1x32xf32>
    %cst_82 = arith.constant dense<0.000000e+00> : vector<8x96xf32>
    %115 = tpu.matmul %106, %108, %cst_82 {dimension_numbers = #tpu.dot_dimension_numbers<[1], [0], [0], [1], [0, 0, 1, 1], [], []>} : vector<8x32xf32>, vector<32x96xf32>, vector<8x96xf32> -> vector<8x96xf32>
    %116 = vector.broadcast %110 : vector<1x96xf32> to vector<8x96xf32>
    %117 = arith.addf %115, %116 : vector<8x96xf32>
    %118 = vector.extract_strided_slice %117 {offsets = [0, 0], sizes = [8, 32], strides = [1, 1]} : vector<8x96xf32> to vector<8x32xf32>
    %119 = vector.extract_strided_slice %117 {offsets = [0, 32], sizes = [8, 32], strides = [1, 1]} : vector<8x96xf32> to vector<8x32xf32>
    %120 = vector.extract_strided_slice %117 {offsets = [0, 64], sizes = [8, 32], strides = [1, 1]} : vector<8x96xf32> to vector<8x32xf32>
    %cst_83 = arith.constant 0.176776692 : f32
    %121 = vector.broadcast %cst_83 : f32 to vector<8x32xf32>
    %122 = arith.mulf %118, %121 : vector<8x32xf32>
    %123 = tpu.transpose %119, [1, 0] : vector<8x32xf32> -> vector<32x8xf32>
    %cst_84 = arith.constant dense<0.000000e+00> : vector<8x8xf32>
    %124 = tpu.matmul %122, %123, %cst_84 {dimension_numbers = #tpu.dot_dimension_numbers<[1], [0], [0], [1], [0, 0, 1, 1], [], []>} : vector<8x32xf32>, vector<32x8xf32>, vector<8x8xf32> -> vector<8x8xf32>
    %125 = vector.broadcast %11 : vector<1x8xf32> to vector<8x8xf32>
    %126 = arith.addf %124, %125 : vector<8x8xf32>
    %cst_85 = arith.constant dense<0xFF800000> : vector<8xf32>
    %127 = vector.multi_reduction <maximumf>, %126, %cst_85 [1] : vector<8x8xf32> to vector<8xf32>
    %128 = vector.shape_cast %127 : vector<8xf32> to vector<8x1xf32>
    %129 = vector.broadcast %128 : vector<8x1xf32> to vector<8x8xf32>
    %130 = arith.subf %126, %129 : vector<8x8xf32>
    %131 = math.exp %130 : vector<8x8xf32>
    %cst_86 = arith.constant dense<0.000000e+00> : vector<8xf32>
    %132 = vector.multi_reduction <add>, %131, %cst_86 [1] : vector<8x8xf32> to vector<8xf32>
    %133 = vector.shape_cast %132 : vector<8xf32> to vector<8x1xf32>
    %134 = tpu.reciprocal %133 {approx = true} : vector<8x1xf32> -> vector<8x1xf32>
    %135 = vector.broadcast %134 : vector<8x1xf32> to vector<8x8xf32>
    %136 = arith.mulf %131, %135 : vector<8x8xf32>
    %cst_87 = arith.constant dense<0.000000e+00> : vector<8x32xf32>
    %137 = tpu.matmul %136, %120, %cst_87 {dimension_numbers = #tpu.dot_dimension_numbers<[1], [0], [0], [1], [0, 0, 1, 1], [], []>} : vector<8x8xf32>, vector<8x32xf32>, vector<8x32xf32> -> vector<8x32xf32>
    %cst_88 = arith.constant dense<0.000000e+00> : vector<8x32xf32>
    %138 = tpu.matmul %137, %112, %cst_88 {dimension_numbers = #tpu.dot_dimension_numbers<[1], [0], [0], [1], [0, 0, 1, 1], [], []>} : vector<8x32xf32>, vector<32x32xf32>, vector<8x32xf32> -> vector<8x32xf32>
    %139 = vector.broadcast %114 : vector<1x32xf32> to vector<8x32xf32>
    %140 = arith.addf %138, %139 : vector<8x32xf32>
    %141 = arith.addf %106, %140 : vector<8x32xf32>
    %c0_89 = arith.constant 0 : index
    %c0_90 = arith.constant 0 : index
    %c0_91 = arith.constant 0 : index
    %142 = vector.load %arg65[%c0_89, %c0_90, %c0_91] : memref<2x1x32xf32, #tpu.memory_space<vmem>>, vector<1x1x32xf32>
    %143 = vector.shape_cast %142 : vector<1x1x32xf32> to vector<1x32xf32>
    %c0_92 = arith.constant 0 : index
    %c0_93 = arith.constant 0 : index
    %c0_94 = arith.constant 0 : index
    %144 = vector.load %arg64[%c0_92, %c0_93, %c0_94] : memref<2x1x32xf32, #tpu.memory_space<vmem>>, vector<1x1x32xf32>
    %145 = vector.shape_cast %144 : vector<1x1x32xf32> to vector<1x32xf32>
    %cst_95 = arith.constant dense<0.000000e+00> : vector<8xf32>
    %146 = vector.multi_reduction <add>, %141, %cst_95 [1] : vector<8x32xf32> to vector<8xf32>
    %147 = vector.shape_cast %146 : vector<8xf32> to vector<8x1xf32>
    %cst_96 = arith.constant 3.200000e+01 : f32
    %148 = vector.broadcast %cst_96 : f32 to vector<8x1xf32>
    %149 = arith.divf %147, %148 : vector<8x1xf32>
    %150 = vector.broadcast %149 : vector<8x1xf32> to vector<8x32xf32>
    %151 = arith.subf %141, %150 : vector<8x32xf32>
    %152 = arith.mulf %151, %151 : vector<8x32xf32>
    %cst_97 = arith.constant dense<0.000000e+00> : vector<8xf32>
    %153 = vector.multi_reduction <add>, %152, %cst_97 [1] : vector<8x32xf32> to vector<8xf32>
    %154 = vector.shape_cast %153 : vector<8xf32> to vector<8x1xf32>
    %cst_98 = arith.constant 3.200000e+01 : f32
    %155 = vector.broadcast %cst_98 : f32 to vector<8x1xf32>
    %156 = arith.divf %154, %155 : vector<8x1xf32>
    %157 = vector.broadcast %149 : vector<8x1xf32> to vector<8x32xf32>
    %158 = arith.subf %141, %157 : vector<8x32xf32>
    %cst_99 = arith.constant 9.99999974E-6 : f32
    %159 = vector.broadcast %cst_99 : f32 to vector<8x1xf32>
    %160 = arith.addf %156, %159 : vector<8x1xf32>
    %161 = math.rsqrt %160 : vector<8x1xf32>
    %162 = vector.broadcast %161 : vector<8x1xf32> to vector<8x32xf32>
    %163 = arith.mulf %158, %162 : vector<8x32xf32>
    %164 = vector.broadcast %143 : vector<1x32xf32> to vector<8x32xf32>
    %165 = arith.mulf %163, %164 : vector<8x32xf32>
    %166 = vector.broadcast %145 : vector<1x32xf32> to vector<8x32xf32>
    %167 = arith.addf %165, %166 : vector<8x32xf32>
    %c0_100 = arith.constant 0 : index
    %c0_101 = arith.constant 0 : index
    %c0_102 = arith.constant 0 : index
    %168 = vector.load %arg61[%c0_100, %c0_101, %c0_102] : memref<2x32x64xf32, #tpu.memory_space<vmem>>, vector<1x32x64xf32>
    %169 = vector.shape_cast %168 : vector<1x32x64xf32> to vector<32x64xf32>
    %c0_103 = arith.constant 0 : index
    %c0_104 = arith.constant 0 : index
    %c0_105 = arith.constant 0 : index
    %170 = vector.load %arg60[%c0_103, %c0_104, %c0_105] : memref<2x1x64xf32, #tpu.memory_space<vmem>>, vector<1x1x64xf32>
    %171 = vector.shape_cast %170 : vector<1x1x64xf32> to vector<1x64xf32>
    %cst_106 = arith.constant dense<0.000000e+00> : vector<8x64xf32>
    %172 = tpu.matmul %167, %169, %cst_106 {dimension_numbers = #tpu.dot_dimension_numbers<[1], [0], [0], [1], [0, 0, 1, 1], [], []>} : vector<8x32xf32>, vector<32x64xf32>, vector<8x64xf32> -> vector<8x64xf32>
    %173 = vector.broadcast %171 : vector<1x64xf32> to vector<8x64xf32>
    %174 = arith.addf %172, %173 : vector<8x64xf32>
    %cst_107 = arith.constant 5.000000e-01 : f32
    %175 = vector.broadcast %cst_107 : f32 to vector<8x64xf32>
    %176 = arith.mulf %175, %174 : vector<8x64xf32>
    %cst_108 = arith.constant 1.41421354 : f32
    %177 = vector.broadcast %cst_108 : f32 to vector<8x64xf32>
    %178 = arith.divf %174, %177 : vector<8x64xf32>
    %179 = math.erf %178 : vector<8x64xf32>
    %cst_109 = arith.constant 1.000000e+00 : f32
    %180 = vector.broadcast %cst_109 : f32 to vector<8x64xf32>
    %181 = arith.addf %180, %179 : vector<8x64xf32>
    %182 = arith.mulf %176, %181 : vector<8x64xf32>
    %c0_110 = arith.constant 0 : index
    %c0_111 = arith.constant 0 : index
    %c0_112 = arith.constant 0 : index
    %183 = vector.load %arg63[%c0_110, %c0_111, %c0_112] : memref<2x64x32xf32, #tpu.memory_space<vmem>>, vector<1x64x32xf32>
    %184 = vector.shape_cast %183 : vector<1x64x32xf32> to vector<64x32xf32>
    %c0_113 = arith.constant 0 : index
    %c0_114 = arith.constant 0 : index
    %c0_115 = arith.constant 0 : index
    %185 = vector.load %arg62[%c0_113, %c0_114, %c0_115] : memref<2x1x32xf32, #tpu.memory_space<vmem>>, vector<1x1x32xf32>
    %186 = vector.shape_cast %185 : vector<1x1x32xf32> to vector<1x32xf32>
    %cst_116 = arith.constant dense<0.000000e+00> : vector<8x32xf32>
    %187 = tpu.matmul %182, %184, %cst_116 {dimension_numbers = #tpu.dot_dimension_numbers<[1], [0], [0], [1], [0, 0, 1, 1], [], []>} : vector<8x64xf32>, vector<64x32xf32>, vector<8x32xf32> -> vector<8x32xf32>
    %188 = vector.broadcast %186 : vector<1x32xf32> to vector<8x32xf32>
    %189 = arith.addf %187, %188 : vector<8x32xf32>
    %190 = arith.addf %167, %189 : vector<8x32xf32>
    %c0_117 = arith.constant 0 : index
    %c0_118 = arith.constant 0 : index
    %c0_119 = arith.constant 0 : index
    %191 = vector.load %arg67[%c0_117, %c0_118, %c0_119] : memref<2x1x32xf32, #tpu.memory_space<vmem>>, vector<1x1x32xf32>
    %192 = vector.shape_cast %191 : vector<1x1x32xf32> to vector<1x32xf32>
    %c0_120 = arith.constant 0 : index
    %c0_121 = arith.constant 0 : index
    %c0_122 = arith.constant 0 : index
    %193 = vector.load %arg66[%c0_120, %c0_121, %c0_122] : memref<2x1x32xf32, #tpu.memory_space<vmem>>, vector<1x1x32xf32>
    %194 = vector.shape_cast %193 : vector<1x1x32xf32> to vector<1x32xf32>
    %cst_123 = arith.constant dense<0.000000e+00> : vector<8xf32>
    %195 = vector.multi_reduction <add>, %190, %cst_123 [1] : vector<8x32xf32> to vector<8xf32>
    %196 = vector.shape_cast %195 : vector<8xf32> to vector<8x1xf32>
    %cst_124 = arith.constant 3.200000e+01 : f32
    %197 = vector.broadcast %cst_124 : f32 to vector<8x1xf32>
    %198 = arith.divf %196, %197 : vector<8x1xf32>
    %199 = vector.broadcast %198 : vector<8x1xf32> to vector<8x32xf32>
    %200 = arith.subf %190, %199 : vector<8x32xf32>
    %201 = arith.mulf %200, %200 : vector<8x32xf32>
    %cst_125 = arith.constant dense<0.000000e+00> : vector<8xf32>
    %202 = vector.multi_reduction <add>, %201, %cst_125 [1] : vector<8x32xf32> to vector<8xf32>
    %203 = vector.shape_cast %202 : vector<8xf32> to vector<8x1xf32>
    %cst_126 = arith.constant 3.200000e+01 : f32
    %204 = vector.broadcast %cst_126 : f32 to vector<8x1xf32>
    %205 = arith.divf %203, %204 : vector<8x1xf32>
    %206 = vector.broadcast %198 : vector<8x1xf32> to vector<8x32xf32>
    %207 = arith.subf %190, %206 : vector<8x32xf32>
    %cst_127 = arith.constant 9.99999974E-6 : f32
    %208 = vector.broadcast %cst_127 : f32 to vector<8x1xf32>
    %209 = arith.addf %205, %208 : vector<8x1xf32>
    %210 = math.rsqrt %209 : vector<8x1xf32>
    %211 = vector.broadcast %210 : vector<8x1xf32> to vector<8x32xf32>
    %212 = arith.mulf %207, %211 : vector<8x32xf32>
    %213 = vector.broadcast %192 : vector<1x32xf32> to vector<8x32xf32>
    %214 = arith.mulf %212, %213 : vector<8x32xf32>
    %215 = vector.broadcast %194 : vector<1x32xf32> to vector<8x32xf32>
    %216 = arith.addf %214, %215 : vector<8x32xf32>
    %c1 = arith.constant 1 : index
    %c0_128 = arith.constant 0 : index
    %c0_129 = arith.constant 0 : index
    %217 = vector.load %arg71[%c1, %c0_128, %c0_129] : memref<2x32x96xf32, #tpu.memory_space<vmem>>, vector<1x32x96xf32>
    %218 = vector.shape_cast %217 : vector<1x32x96xf32> to vector<32x96xf32>
    %c1_130 = arith.constant 1 : index
    %c0_131 = arith.constant 0 : index
    %c0_132 = arith.constant 0 : index
    %219 = vector.load %arg70[%c1_130, %c0_131, %c0_132] : memref<2x1x96xf32, #tpu.memory_space<vmem>>, vector<1x1x96xf32>
    %220 = vector.shape_cast %219 : vector<1x1x96xf32> to vector<1x96xf32>
    %c1_133 = arith.constant 1 : index
    %c0_134 = arith.constant 0 : index
    %c0_135 = arith.constant 0 : index
    %221 = vector.load %arg69[%c1_133, %c0_134, %c0_135] : memref<2x32x32xf32, #tpu.memory_space<vmem>>, vector<1x32x32xf32>
    %222 = vector.shape_cast %221 : vector<1x32x32xf32> to vector<32x32xf32>
    %c1_136 = arith.constant 1 : index
    %c0_137 = arith.constant 0 : index
    %c0_138 = arith.constant 0 : index
    %223 = vector.load %arg68[%c1_136, %c0_137, %c0_138] : memref<2x1x32xf32, #tpu.memory_space<vmem>>, vector<1x1x32xf32>
    %224 = vector.shape_cast %223 : vector<1x1x32xf32> to vector<1x32xf32>
    %cst_139 = arith.constant dense<0.000000e+00> : vector<8x96xf32>
    %225 = tpu.matmul %216, %218, %cst_139 {dimension_numbers = #tpu.dot_dimension_numbers<[1], [0], [0], [1], [0, 0, 1, 1], [], []>} : vector<8x32xf32>, vector<32x96xf32>, vector<8x96xf32> -> vector<8x96xf32>
    %226 = vector.broadcast %220 : vector<1x96xf32> to vector<8x96xf32>
    %227 = arith.addf %225, %226 : vector<8x96xf32>
    %228 = vector.extract_strided_slice %227 {offsets = [0, 0], sizes = [8, 32], strides = [1, 1]} : vector<8x96xf32> to vector<8x32xf32>
    %229 = vector.extract_strided_slice %227 {offsets = [0, 32], sizes = [8, 32], strides = [1, 1]} : vector<8x96xf32> to vector<8x32xf32>
    %230 = vector.extract_strided_slice %227 {offsets = [0, 64], sizes = [8, 32], strides = [1, 1]} : vector<8x96xf32> to vector<8x32xf32>
    %cst_140 = arith.constant 0.176776692 : f32
    %231 = vector.broadcast %cst_140 : f32 to vector<8x32xf32>
    %232 = arith.mulf %228, %231 : vector<8x32xf32>
    %233 = tpu.transpose %229, [1, 0] : vector<8x32xf32> -> vector<32x8xf32>
    %cst_141 = arith.constant dense<0.000000e+00> : vector<8x8xf32>
    %234 = tpu.matmul %232, %233, %cst_141 {dimension_numbers = #tpu.dot_dimension_numbers<[1], [0], [0], [1], [0, 0, 1, 1], [], []>} : vector<8x32xf32>, vector<32x8xf32>, vector<8x8xf32> -> vector<8x8xf32>
    %235 = vector.broadcast %11 : vector<1x8xf32> to vector<8x8xf32>
    %236 = arith.addf %234, %235 : vector<8x8xf32>
    %cst_142 = arith.constant dense<0xFF800000> : vector<8xf32>
    %237 = vector.multi_reduction <maximumf>, %236, %cst_142 [1] : vector<8x8xf32> to vector<8xf32>
    %238 = vector.shape_cast %237 : vector<8xf32> to vector<8x1xf32>
    %239 = vector.broadcast %238 : vector<8x1xf32> to vector<8x8xf32>
    %240 = arith.subf %236, %239 : vector<8x8xf32>
    %241 = math.exp %240 : vector<8x8xf32>
    %cst_143 = arith.constant dense<0.000000e+00> : vector<8xf32>
    %242 = vector.multi_reduction <add>, %241, %cst_143 [1] : vector<8x8xf32> to vector<8xf32>
    %243 = vector.shape_cast %242 : vector<8xf32> to vector<8x1xf32>
    %244 = tpu.reciprocal %243 {approx = true} : vector<8x1xf32> -> vector<8x1xf32>
    %245 = vector.broadcast %244 : vector<8x1xf32> to vector<8x8xf32>
    %246 = arith.mulf %241, %245 : vector<8x8xf32>
    %cst_144 = arith.constant dense<0.000000e+00> : vector<8x32xf32>
    %247 = tpu.matmul %246, %230, %cst_144 {dimension_numbers = #tpu.dot_dimension_numbers<[1], [0], [0], [1], [0, 0, 1, 1], [], []>} : vector<8x8xf32>, vector<8x32xf32>, vector<8x32xf32> -> vector<8x32xf32>
    %cst_145 = arith.constant dense<0.000000e+00> : vector<8x32xf32>
    %248 = tpu.matmul %247, %222, %cst_145 {dimension_numbers = #tpu.dot_dimension_numbers<[1], [0], [0], [1], [0, 0, 1, 1], [], []>} : vector<8x32xf32>, vector<32x32xf32>, vector<8x32xf32> -> vector<8x32xf32>
    %249 = vector.broadcast %224 : vector<1x32xf32> to vector<8x32xf32>
    %250 = arith.addf %248, %249 : vector<8x32xf32>
    %251 = arith.addf %216, %250 : vector<8x32xf32>
    %c1_146 = arith.constant 1 : index
    %c0_147 = arith.constant 0 : index
    %c0_148 = arith.constant 0 : index
    %252 = vector.load %arg65[%c1_146, %c0_147, %c0_148] : memref<2x1x32xf32, #tpu.memory_space<vmem>>, vector<1x1x32xf32>
    %253 = vector.shape_cast %252 : vector<1x1x32xf32> to vector<1x32xf32>
    %c1_149 = arith.constant 1 : index
    %c0_150 = arith.constant 0 : index
    %c0_151 = arith.constant 0 : index
    %254 = vector.load %arg64[%c1_149, %c0_150, %c0_151] : memref<2x1x32xf32, #tpu.memory_space<vmem>>, vector<1x1x32xf32>
    %255 = vector.shape_cast %254 : vector<1x1x32xf32> to vector<1x32xf32>
    %cst_152 = arith.constant dense<0.000000e+00> : vector<8xf32>
    %256 = vector.multi_reduction <add>, %251, %cst_152 [1] : vector<8x32xf32> to vector<8xf32>
    %257 = vector.shape_cast %256 : vector<8xf32> to vector<8x1xf32>
    %cst_153 = arith.constant 3.200000e+01 : f32
    %258 = vector.broadcast %cst_153 : f32 to vector<8x1xf32>
    %259 = arith.divf %257, %258 : vector<8x1xf32>
    %260 = vector.broadcast %259 : vector<8x1xf32> to vector<8x32xf32>
    %261 = arith.subf %251, %260 : vector<8x32xf32>
    %262 = arith.mulf %261, %261 : vector<8x32xf32>
    %cst_154 = arith.constant dense<0.000000e+00> : vector<8xf32>
    %263 = vector.multi_reduction <add>, %262, %cst_154 [1] : vector<8x32xf32> to vector<8xf32>
    %264 = vector.shape_cast %263 : vector<8xf32> to vector<8x1xf32>
    %cst_155 = arith.constant 3.200000e+01 : f32
    %265 = vector.broadcast %cst_155 : f32 to vector<8x1xf32>
    %266 = arith.divf %264, %265 : vector<8x1xf32>
    %267 = vector.broadcast %259 : vector<8x1xf32> to vector<8x32xf32>
    %268 = arith.subf %251, %267 : vector<8x32xf32>
    %cst_156 = arith.constant 9.99999974E-6 : f32
    %269 = vector.broadcast %cst_156 : f32 to vector<8x1xf32>
    %270 = arith.addf %266, %269 : vector<8x1xf32>
    %271 = math.rsqrt %270 : vector<8x1xf32>
    %272 = vector.broadcast %271 : vector<8x1xf32> to vector<8x32xf32>
    %273 = arith.mulf %268, %272 : vector<8x32xf32>
    %274 = vector.broadcast %253 : vector<1x32xf32> to vector<8x32xf32>
    %275 = arith.mulf %273, %274 : vector<8x32xf32>
    %276 = vector.broadcast %255 : vector<1x32xf32> to vector<8x32xf32>
    %277 = arith.addf %275, %276 : vector<8x32xf32>
    %c1_157 = arith.constant 1 : index
    %c0_158 = arith.constant 0 : index
    %c0_159 = arith.constant 0 : index
    %278 = vector.load %arg61[%c1_157, %c0_158, %c0_159] : memref<2x32x64xf32, #tpu.memory_space<vmem>>, vector<1x32x64xf32>
    %279 = vector.shape_cast %278 : vector<1x32x64xf32> to vector<32x64xf32>
    %c1_160 = arith.constant 1 : index
    %c0_161 = arith.constant 0 : index
    %c0_162 = arith.constant 0 : index
    %280 = vector.load %arg60[%c1_160, %c0_161, %c0_162] : memref<2x1x64xf32, #tpu.memory_space<vmem>>, vector<1x1x64xf32>
    %281 = vector.shape_cast %280 : vector<1x1x64xf32> to vector<1x64xf32>
    %cst_163 = arith.constant dense<0.000000e+00> : vector<8x64xf32>
    %282 = tpu.matmul %277, %279, %cst_163 {dimension_numbers = #tpu.dot_dimension_numbers<[1], [0], [0], [1], [0, 0, 1, 1], [], []>} : vector<8x32xf32>, vector<32x64xf32>, vector<8x64xf32> -> vector<8x64xf32>
    %283 = vector.broadcast %281 : vector<1x64xf32> to vector<8x64xf32>
    %284 = arith.addf %282, %283 : vector<8x64xf32>
    %cst_164 = arith.constant 5.000000e-01 : f32
    %285 = vector.broadcast %cst_164 : f32 to vector<8x64xf32>
    %286 = arith.mulf %285, %284 : vector<8x64xf32>
    %cst_165 = arith.constant 1.41421354 : f32
    %287 = vector.broadcast %cst_165 : f32 to vector<8x64xf32>
    %288 = arith.divf %284, %287 : vector<8x64xf32>
    %289 = math.erf %288 : vector<8x64xf32>
    %cst_166 = arith.constant 1.000000e+00 : f32
    %290 = vector.broadcast %cst_166 : f32 to vector<8x64xf32>
    %291 = arith.addf %290, %289 : vector<8x64xf32>
    %292 = arith.mulf %286, %291 : vector<8x64xf32>
    %c1_167 = arith.constant 1 : index
    %c0_168 = arith.constant 0 : index
    %c0_169 = arith.constant 0 : index
    %293 = vector.load %arg63[%c1_167, %c0_168, %c0_169] : memref<2x64x32xf32, #tpu.memory_space<vmem>>, vector<1x64x32xf32>
    %294 = vector.shape_cast %293 : vector<1x64x32xf32> to vector<64x32xf32>
    %c1_170 = arith.constant 1 : index
    %c0_171 = arith.constant 0 : index
    %c0_172 = arith.constant 0 : index
    %295 = vector.load %arg62[%c1_170, %c0_171, %c0_172] : memref<2x1x32xf32, #tpu.memory_space<vmem>>, vector<1x1x32xf32>
    %296 = vector.shape_cast %295 : vector<1x1x32xf32> to vector<1x32xf32>
    %cst_173 = arith.constant dense<0.000000e+00> : vector<8x32xf32>
    %297 = tpu.matmul %292, %294, %cst_173 {dimension_numbers = #tpu.dot_dimension_numbers<[1], [0], [0], [1], [0, 0, 1, 1], [], []>} : vector<8x64xf32>, vector<64x32xf32>, vector<8x32xf32> -> vector<8x32xf32>
    %298 = vector.broadcast %296 : vector<1x32xf32> to vector<8x32xf32>
    %299 = arith.addf %297, %298 : vector<8x32xf32>
    %300 = arith.addf %277, %299 : vector<8x32xf32>
    %c1_174 = arith.constant 1 : index
    %c0_175 = arith.constant 0 : index
    %c0_176 = arith.constant 0 : index
    %301 = vector.load %arg67[%c1_174, %c0_175, %c0_176] : memref<2x1x32xf32, #tpu.memory_space<vmem>>, vector<1x1x32xf32>
    %302 = vector.shape_cast %301 : vector<1x1x32xf32> to vector<1x32xf32>
    %c1_177 = arith.constant 1 : index
    %c0_178 = arith.constant 0 : index
    %c0_179 = arith.constant 0 : index
    %303 = vector.load %arg66[%c1_177, %c0_178, %c0_179] : memref<2x1x32xf32, #tpu.memory_space<vmem>>, vector<1x1x32xf32>
    %304 = vector.shape_cast %303 : vector<1x1x32xf32> to vector<1x32xf32>
    %cst_180 = arith.constant dense<0.000000e+00> : vector<8xf32>
    %305 = vector.multi_reduction <add>, %300, %cst_180 [1] : vector<8x32xf32> to vector<8xf32>
    %306 = vector.shape_cast %305 : vector<8xf32> to vector<8x1xf32>
    %cst_181 = arith.constant 3.200000e+01 : f32
    %307 = vector.broadcast %cst_181 : f32 to vector<8x1xf32>
    %308 = arith.divf %306, %307 : vector<8x1xf32>
    %309 = vector.broadcast %308 : vector<8x1xf32> to vector<8x32xf32>
    %310 = arith.subf %300, %309 : vector<8x32xf32>
    %311 = arith.mulf %310, %310 : vector<8x32xf32>
    %cst_182 = arith.constant dense<0.000000e+00> : vector<8xf32>
    %312 = vector.multi_reduction <add>, %311, %cst_182 [1] : vector<8x32xf32> to vector<8xf32>
    %313 = vector.shape_cast %312 : vector<8xf32> to vector<8x1xf32>
    %cst_183 = arith.constant 3.200000e+01 : f32
    %314 = vector.broadcast %cst_183 : f32 to vector<8x1xf32>
    %315 = arith.divf %313, %314 : vector<8x1xf32>
    %316 = vector.broadcast %308 : vector<8x1xf32> to vector<8x32xf32>
    %317 = arith.subf %300, %316 : vector<8x32xf32>
    %cst_184 = arith.constant 9.99999974E-6 : f32
    %318 = vector.broadcast %cst_184 : f32 to vector<8x1xf32>
    %319 = arith.addf %315, %318 : vector<8x1xf32>
    %320 = math.rsqrt %319 : vector<8x1xf32>
    %321 = vector.broadcast %320 : vector<8x1xf32> to vector<8x32xf32>
    %322 = arith.mulf %317, %321 : vector<8x32xf32>
    %323 = vector.broadcast %302 : vector<1x32xf32> to vector<8x32xf32>
    %324 = arith.mulf %322, %323 : vector<8x32xf32>
    %325 = vector.broadcast %304 : vector<1x32xf32> to vector<8x32xf32>
    %326 = arith.addf %324, %325 : vector<8x32xf32>
    %327 = arith.addf %70, %19 : vector<8x32xf32>
    %c0_185 = arith.constant 0 : index
    %c0_186 = arith.constant 0 : index
    %328 = vector.load %arg29[%c0_185, %c0_186] : memref<1x32xf32, #tpu.memory_space<vmem>>, vector<1x32xf32>
    %c0_187 = arith.constant 0 : index
    %c0_188 = arith.constant 0 : index
    %329 = vector.load %arg28[%c0_187, %c0_188] : memref<1x32xf32, #tpu.memory_space<vmem>>, vector<1x32xf32>
    %cst_189 = arith.constant dense<0.000000e+00> : vector<8xf32>
    %330 = vector.multi_reduction <add>, %327, %cst_189 [1] : vector<8x32xf32> to vector<8xf32>
    %331 = vector.shape_cast %330 : vector<8xf32> to vector<8x1xf32>
    %cst_190 = arith.constant 3.200000e+01 : f32
    %332 = vector.broadcast %cst_190 : f32 to vector<8x1xf32>
    %333 = arith.divf %331, %332 : vector<8x1xf32>
    %334 = vector.broadcast %333 : vector<8x1xf32> to vector<8x32xf32>
    %335 = arith.subf %327, %334 : vector<8x32xf32>
    %336 = arith.mulf %335, %335 : vector<8x32xf32>
    %cst_191 = arith.constant dense<0.000000e+00> : vector<8xf32>
    %337 = vector.multi_reduction <add>, %336, %cst_191 [1] : vector<8x32xf32> to vector<8xf32>
    %338 = vector.shape_cast %337 : vector<8xf32> to vector<8x1xf32>
    %cst_192 = arith.constant 3.200000e+01 : f32
    %339 = vector.broadcast %cst_192 : f32 to vector<8x1xf32>
    %340 = arith.divf %338, %339 : vector<8x1xf32>
    %341 = vector.broadcast %333 : vector<8x1xf32> to vector<8x32xf32>
    %342 = arith.subf %327, %341 : vector<8x32xf32>
    %cst_193 = arith.constant 9.99999974E-6 : f32
    %343 = vector.broadcast %cst_193 : f32 to vector<8x1xf32>
    %344 = arith.addf %340, %343 : vector<8x1xf32>
    %345 = math.rsqrt %344 : vector<8x1xf32>
    %346 = vector.broadcast %345 : vector<8x1xf32> to vector<8x32xf32>
    %347 = arith.mulf %342, %346 : vector<8x32xf32>
    %348 = vector.broadcast %328 : vector<1x32xf32> to vector<8x32xf32>
    %349 = arith.mulf %347, %348 : vector<8x32xf32>
    %350 = vector.broadcast %329 : vector<1x32xf32> to vector<8x32xf32>
    %351 = arith.addf %349, %350 : vector<8x32xf32>
    %c0_194 = arith.constant 0 : index
    %c0_195 = arith.constant 0 : index
    %c0_196 = arith.constant 0 : index
    %352 = vector.load %arg21[%c0_194, %c0_195, %c0_196] : memref<2x32x96xf32, #tpu.memory_space<vmem>>, vector<1x32x96xf32>
    %353 = vector.shape_cast %352 : vector<1x32x96xf32> to vector<32x96xf32>
    %c0_197 = arith.constant 0 : index
    %c0_198 = arith.constant 0 : index
    %c0_199 = arith.constant 0 : index
    %354 = vector.load %arg20[%c0_197, %c0_198, %c0_199] : memref<2x1x96xf32, #tpu.memory_space<vmem>>, vector<1x1x96xf32>
    %355 = vector.shape_cast %354 : vector<1x1x96xf32> to vector<1x96xf32>
    %c0_200 = arith.constant 0 : index
    %c0_201 = arith.constant 0 : index
    %c0_202 = arith.constant 0 : index
    %356 = vector.load %arg19[%c0_200, %c0_201, %c0_202] : memref<2x32x32xf32, #tpu.memory_space<vmem>>, vector<1x32x32xf32>
    %357 = vector.shape_cast %356 : vector<1x32x32xf32> to vector<32x32xf32>
    %c0_203 = arith.constant 0 : index
    %c0_204 = arith.constant 0 : index
    %c0_205 = arith.constant 0 : index
    %358 = vector.load %arg18[%c0_203, %c0_204, %c0_205] : memref<2x1x32xf32, #tpu.memory_space<vmem>>, vector<1x1x32xf32>
    %359 = vector.shape_cast %358 : vector<1x1x32xf32> to vector<1x32xf32>
    %cst_206 = arith.constant dense<0.000000e+00> : vector<8x96xf32>
    %360 = tpu.matmul %351, %353, %cst_206 {dimension_numbers = #tpu.dot_dimension_numbers<[1], [0], [0], [1], [0, 0, 1, 1], [], []>} : vector<8x32xf32>, vector<32x96xf32>, vector<8x96xf32> -> vector<8x96xf32>
    %361 = vector.broadcast %355 : vector<1x96xf32> to vector<8x96xf32>
    %362 = arith.addf %360, %361 : vector<8x96xf32>
    %363 = vector.extract_strided_slice %362 {offsets = [0, 0], sizes = [8, 32], strides = [1, 1]} : vector<8x96xf32> to vector<8x32xf32>
    %364 = vector.extract_strided_slice %362 {offsets = [0, 32], sizes = [8, 32], strides = [1, 1]} : vector<8x96xf32> to vector<8x32xf32>
    %365 = vector.extract_strided_slice %362 {offsets = [0, 64], sizes = [8, 32], strides = [1, 1]} : vector<8x96xf32> to vector<8x32xf32>
    %cst_207 = arith.constant 0.176776692 : f32
    %366 = vector.broadcast %cst_207 : f32 to vector<8x32xf32>
    %367 = arith.mulf %363, %366 : vector<8x32xf32>
    %368 = tpu.transpose %364, [1, 0] : vector<8x32xf32> -> vector<32x8xf32>
    %cst_208 = arith.constant dense<0.000000e+00> : vector<8x8xf32>
    %369 = tpu.matmul %367, %368, %cst_208 {dimension_numbers = #tpu.dot_dimension_numbers<[1], [0], [0], [1], [0, 0, 1, 1], [], []>} : vector<8x32xf32>, vector<32x8xf32>, vector<8x8xf32> -> vector<8x8xf32>
    %370 = vector.broadcast %17 : vector<1x8xf32> to vector<8x8xf32>
    %371 = arith.addf %369, %370 : vector<8x8xf32>
    %cst_209 = arith.constant dense<0xFF800000> : vector<8xf32>
    %372 = vector.multi_reduction <maximumf>, %371, %cst_209 [1] : vector<8x8xf32> to vector<8xf32>
    %373 = vector.shape_cast %372 : vector<8xf32> to vector<8x1xf32>
    %374 = vector.broadcast %373 : vector<8x1xf32> to vector<8x8xf32>
    %375 = arith.subf %371, %374 : vector<8x8xf32>
    %376 = math.exp %375 : vector<8x8xf32>
    %cst_210 = arith.constant dense<0.000000e+00> : vector<8xf32>
    %377 = vector.multi_reduction <add>, %376, %cst_210 [1] : vector<8x8xf32> to vector<8xf32>
    %378 = vector.shape_cast %377 : vector<8xf32> to vector<8x1xf32>
    %379 = tpu.reciprocal %378 {approx = true} : vector<8x1xf32> -> vector<8x1xf32>
    %380 = vector.broadcast %379 : vector<8x1xf32> to vector<8x8xf32>
    %381 = arith.mulf %376, %380 : vector<8x8xf32>
    %cst_211 = arith.constant dense<0.000000e+00> : vector<8x32xf32>
    %382 = tpu.matmul %381, %365, %cst_211 {dimension_numbers = #tpu.dot_dimension_numbers<[1], [0], [0], [1], [0, 0, 1, 1], [], []>} : vector<8x8xf32>, vector<8x32xf32>, vector<8x32xf32> -> vector<8x32xf32>
    %cst_212 = arith.constant dense<0.000000e+00> : vector<8x32xf32>
    %383 = tpu.matmul %382, %357, %cst_212 {dimension_numbers = #tpu.dot_dimension_numbers<[1], [0], [0], [1], [0, 0, 1, 1], [], []>} : vector<8x32xf32>, vector<32x32xf32>, vector<8x32xf32> -> vector<8x32xf32>
    %384 = vector.broadcast %359 : vector<1x32xf32> to vector<8x32xf32>
    %385 = arith.addf %383, %384 : vector<8x32xf32>
    %386 = arith.addf %351, %385 : vector<8x32xf32>
    %c0_213 = arith.constant 0 : index
    %c0_214 = arith.constant 0 : index
    %c0_215 = arith.constant 0 : index
    %387 = vector.load %arg13[%c0_213, %c0_214, %c0_215] : memref<2x1x32xf32, #tpu.memory_space<vmem>>, vector<1x1x32xf32>
    %388 = vector.shape_cast %387 : vector<1x1x32xf32> to vector<1x32xf32>
    %c0_216 = arith.constant 0 : index
    %c0_217 = arith.constant 0 : index
    %c0_218 = arith.constant 0 : index
    %389 = vector.load %arg12[%c0_216, %c0_217, %c0_218] : memref<2x1x32xf32, #tpu.memory_space<vmem>>, vector<1x1x32xf32>
    %390 = vector.shape_cast %389 : vector<1x1x32xf32> to vector<1x32xf32>
    %cst_219 = arith.constant dense<0.000000e+00> : vector<8xf32>
    %391 = vector.multi_reduction <add>, %386, %cst_219 [1] : vector<8x32xf32> to vector<8xf32>
    %392 = vector.shape_cast %391 : vector<8xf32> to vector<8x1xf32>
    %cst_220 = arith.constant 3.200000e+01 : f32
    %393 = vector.broadcast %cst_220 : f32 to vector<8x1xf32>
    %394 = arith.divf %392, %393 : vector<8x1xf32>
    %395 = vector.broadcast %394 : vector<8x1xf32> to vector<8x32xf32>
    %396 = arith.subf %386, %395 : vector<8x32xf32>
    %397 = arith.mulf %396, %396 : vector<8x32xf32>
    %cst_221 = arith.constant dense<0.000000e+00> : vector<8xf32>
    %398 = vector.multi_reduction <add>, %397, %cst_221 [1] : vector<8x32xf32> to vector<8xf32>
    %399 = vector.shape_cast %398 : vector<8xf32> to vector<8x1xf32>
    %cst_222 = arith.constant 3.200000e+01 : f32
    %400 = vector.broadcast %cst_222 : f32 to vector<8x1xf32>
    %401 = arith.divf %399, %400 : vector<8x1xf32>
    %402 = vector.broadcast %394 : vector<8x1xf32> to vector<8x32xf32>
    %403 = arith.subf %386, %402 : vector<8x32xf32>
    %cst_223 = arith.constant 9.99999974E-6 : f32
    %404 = vector.broadcast %cst_223 : f32 to vector<8x1xf32>
    %405 = arith.addf %401, %404 : vector<8x1xf32>
    %406 = math.rsqrt %405 : vector<8x1xf32>
    %407 = vector.broadcast %406 : vector<8x1xf32> to vector<8x32xf32>
    %408 = arith.mulf %403, %407 : vector<8x32xf32>
    %409 = vector.broadcast %388 : vector<1x32xf32> to vector<8x32xf32>
    %410 = arith.mulf %408, %409 : vector<8x32xf32>
    %411 = vector.broadcast %390 : vector<1x32xf32> to vector<8x32xf32>
    %412 = arith.addf %410, %411 : vector<8x32xf32>
    %c0_224 = arith.constant 0 : index
    %c0_225 = arith.constant 0 : index
    %c0_226 = arith.constant 0 : index
    %413 = vector.load %arg27[%c0_224, %c0_225, %c0_226] : memref<2x32x32xf32, #tpu.memory_space<vmem>>, vector<1x32x32xf32>
    %414 = vector.shape_cast %413 : vector<1x32x32xf32> to vector<32x32xf32>
    %c0_227 = arith.constant 0 : index
    %c0_228 = arith.constant 0 : index
    %c0_229 = arith.constant 0 : index
    %415 = vector.load %arg26[%c0_227, %c0_228, %c0_229] : memref<2x1x32xf32, #tpu.memory_space<vmem>>, vector<1x1x32xf32>
    %416 = vector.shape_cast %415 : vector<1x1x32xf32> to vector<1x32xf32>
    %c0_230 = arith.constant 0 : index
    %c0_231 = arith.constant 0 : index
    %c0_232 = arith.constant 0 : index
    %417 = vector.load %arg23[%c0_230, %c0_231, %c0_232] : memref<2x32x64xf32, #tpu.memory_space<vmem>>, vector<1x32x64xf32>
    %418 = vector.shape_cast %417 : vector<1x32x64xf32> to vector<32x64xf32>
    %c0_233 = arith.constant 0 : index
    %c0_234 = arith.constant 0 : index
    %c0_235 = arith.constant 0 : index
    %419 = vector.load %arg22[%c0_233, %c0_234, %c0_235] : memref<2x1x64xf32, #tpu.memory_space<vmem>>, vector<1x1x64xf32>
    %420 = vector.shape_cast %419 : vector<1x1x64xf32> to vector<1x64xf32>
    %c0_236 = arith.constant 0 : index
    %c0_237 = arith.constant 0 : index
    %c0_238 = arith.constant 0 : index
    %421 = vector.load %arg25[%c0_236, %c0_237, %c0_238] : memref<2x32x32xf32, #tpu.memory_space<vmem>>, vector<1x32x32xf32>
    %422 = vector.shape_cast %421 : vector<1x32x32xf32> to vector<32x32xf32>
    %c0_239 = arith.constant 0 : index
    %c0_240 = arith.constant 0 : index
    %c0_241 = arith.constant 0 : index
    %423 = vector.load %arg24[%c0_239, %c0_240, %c0_241] : memref<2x1x32xf32, #tpu.memory_space<vmem>>, vector<1x1x32xf32>
    %424 = vector.shape_cast %423 : vector<1x1x32xf32> to vector<1x32xf32>
    %cst_242 = arith.constant dense<0.000000e+00> : vector<8x32xf32>
    %425 = tpu.matmul %412, %414, %cst_242 {dimension_numbers = #tpu.dot_dimension_numbers<[1], [0], [0], [1], [0, 0, 1, 1], [], []>} : vector<8x32xf32>, vector<32x32xf32>, vector<8x32xf32> -> vector<8x32xf32>
    %426 = vector.broadcast %416 : vector<1x32xf32> to vector<8x32xf32>
    %427 = arith.addf %425, %426 : vector<8x32xf32>
    %cst_243 = arith.constant dense<0.000000e+00> : vector<8x64xf32>
    %428 = tpu.matmul %326, %418, %cst_243 {dimension_numbers = #tpu.dot_dimension_numbers<[1], [0], [0], [1], [0, 0, 1, 1], [], []>} : vector<8x32xf32>, vector<32x64xf32>, vector<8x64xf32> -> vector<8x64xf32>
    %429 = vector.broadcast %420 : vector<1x64xf32> to vector<8x64xf32>
    %430 = arith.addf %428, %429 : vector<8x64xf32>
    %431 = vector.extract_strided_slice %430 {offsets = [0, 0], sizes = [8, 32], strides = [1, 1]} : vector<8x64xf32> to vector<8x32xf32>
    %432 = vector.extract_strided_slice %430 {offsets = [0, 32], sizes = [8, 32], strides = [1, 1]} : vector<8x64xf32> to vector<8x32xf32>
    %cst_244 = arith.constant 0.176776692 : f32
    %433 = vector.broadcast %cst_244 : f32 to vector<8x32xf32>
    %434 = arith.mulf %427, %433 : vector<8x32xf32>
    %435 = tpu.transpose %431, [1, 0] : vector<8x32xf32> -> vector<32x8xf32>
    %cst_245 = arith.constant dense<0.000000e+00> : vector<8x8xf32>
    %436 = tpu.matmul %434, %435, %cst_245 {dimension_numbers = #tpu.dot_dimension_numbers<[1], [0], [0], [1], [0, 0, 1, 1], [], []>} : vector<8x32xf32>, vector<32x8xf32>, vector<8x8xf32> -> vector<8x8xf32>
    %437 = vector.broadcast %11 : vector<1x8xf32> to vector<8x8xf32>
    %438 = arith.addf %436, %437 : vector<8x8xf32>
    %cst_246 = arith.constant dense<0xFF800000> : vector<8xf32>
    %439 = vector.multi_reduction <maximumf>, %438, %cst_246 [1] : vector<8x8xf32> to vector<8xf32>
    %440 = vector.shape_cast %439 : vector<8xf32> to vector<8x1xf32>
    %441 = vector.broadcast %440 : vector<8x1xf32> to vector<8x8xf32>
    %442 = arith.subf %438, %441 : vector<8x8xf32>
    %443 = math.exp %442 : vector<8x8xf32>
    %cst_247 = arith.constant dense<0.000000e+00> : vector<8xf32>
    %444 = vector.multi_reduction <add>, %443, %cst_247 [1] : vector<8x8xf32> to vector<8xf32>
    %445 = vector.shape_cast %444 : vector<8xf32> to vector<8x1xf32>
    %446 = tpu.reciprocal %445 {approx = true} : vector<8x1xf32> -> vector<8x1xf32>
    %447 = vector.broadcast %446 : vector<8x1xf32> to vector<8x8xf32>
    %448 = arith.mulf %443, %447 : vector<8x8xf32>
    %cst_248 = arith.constant dense<0.000000e+00> : vector<8x32xf32>
    %449 = tpu.matmul %448, %432, %cst_248 {dimension_numbers = #tpu.dot_dimension_numbers<[1], [0], [0], [1], [0, 0, 1, 1], [], []>} : vector<8x8xf32>, vector<8x32xf32>, vector<8x32xf32> -> vector<8x32xf32>
    %cst_249 = arith.constant dense<0.000000e+00> : vector<8x32xf32>
    %450 = tpu.matmul %449, %422, %cst_249 {dimension_numbers = #tpu.dot_dimension_numbers<[1], [0], [0], [1], [0, 0, 1, 1], [], []>} : vector<8x32xf32>, vector<32x32xf32>, vector<8x32xf32> -> vector<8x32xf32>
    %451 = vector.broadcast %424 : vector<1x32xf32> to vector<8x32xf32>
    %452 = arith.addf %450, %451 : vector<8x32xf32>
    %453 = arith.addf %412, %452 : vector<8x32xf32>
    %c0_250 = arith.constant 0 : index
    %c0_251 = arith.constant 0 : index
    %c0_252 = arith.constant 0 : index
    %454 = vector.load %arg15[%c0_250, %c0_251, %c0_252] : memref<2x1x32xf32, #tpu.memory_space<vmem>>, vector<1x1x32xf32>
    %455 = vector.shape_cast %454 : vector<1x1x32xf32> to vector<1x32xf32>
    %c0_253 = arith.constant 0 : index
    %c0_254 = arith.constant 0 : index
    %c0_255 = arith.constant 0 : index
    %456 = vector.load %arg14[%c0_253, %c0_254, %c0_255] : memref<2x1x32xf32, #tpu.memory_space<vmem>>, vector<1x1x32xf32>
    %457 = vector.shape_cast %456 : vector<1x1x32xf32> to vector<1x32xf32>
    %cst_256 = arith.constant dense<0.000000e+00> : vector<8xf32>
    %458 = vector.multi_reduction <add>, %453, %cst_256 [1] : vector<8x32xf32> to vector<8xf32>
    %459 = vector.shape_cast %458 : vector<8xf32> to vector<8x1xf32>
    %cst_257 = arith.constant 3.200000e+01 : f32
    %460 = vector.broadcast %cst_257 : f32 to vector<8x1xf32>
    %461 = arith.divf %459, %460 : vector<8x1xf32>
    %462 = vector.broadcast %461 : vector<8x1xf32> to vector<8x32xf32>
    %463 = arith.subf %453, %462 : vector<8x32xf32>
    %464 = arith.mulf %463, %463 : vector<8x32xf32>
    %cst_258 = arith.constant dense<0.000000e+00> : vector<8xf32>
    %465 = vector.multi_reduction <add>, %464, %cst_258 [1] : vector<8x32xf32> to vector<8xf32>
    %466 = vector.shape_cast %465 : vector<8xf32> to vector<8x1xf32>
    %cst_259 = arith.constant 3.200000e+01 : f32
    %467 = vector.broadcast %cst_259 : f32 to vector<8x1xf32>
    %468 = arith.divf %466, %467 : vector<8x1xf32>
    %469 = vector.broadcast %461 : vector<8x1xf32> to vector<8x32xf32>
    %470 = arith.subf %453, %469 : vector<8x32xf32>
    %cst_260 = arith.constant 9.99999974E-6 : f32
    %471 = vector.broadcast %cst_260 : f32 to vector<8x1xf32>
    %472 = arith.addf %468, %471 : vector<8x1xf32>
    %473 = math.rsqrt %472 : vector<8x1xf32>
    %474 = vector.broadcast %473 : vector<8x1xf32> to vector<8x32xf32>
    %475 = arith.mulf %470, %474 : vector<8x32xf32>
    %476 = vector.broadcast %455 : vector<1x32xf32> to vector<8x32xf32>
    %477 = arith.mulf %475, %476 : vector<8x32xf32>
    %478 = vector.broadcast %457 : vector<1x32xf32> to vector<8x32xf32>
    %479 = arith.addf %477, %478 : vector<8x32xf32>
    %c0_261 = arith.constant 0 : index
    %c0_262 = arith.constant 0 : index
    %c0_263 = arith.constant 0 : index
    %480 = vector.load %arg9[%c0_261, %c0_262, %c0_263] : memref<2x32x64xf32, #tpu.memory_space<vmem>>, vector<1x32x64xf32>
    %481 = vector.shape_cast %480 : vector<1x32x64xf32> to vector<32x64xf32>
    %c0_264 = arith.constant 0 : index
    %c0_265 = arith.constant 0 : index
    %c0_266 = arith.constant 0 : index
    %482 = vector.load %arg8[%c0_264, %c0_265, %c0_266] : memref<2x1x64xf32, #tpu.memory_space<vmem>>, vector<1x1x64xf32>
    %483 = vector.shape_cast %482 : vector<1x1x64xf32> to vector<1x64xf32>
    %cst_267 = arith.constant dense<0.000000e+00> : vector<8x64xf32>
    %484 = tpu.matmul %479, %481, %cst_267 {dimension_numbers = #tpu.dot_dimension_numbers<[1], [0], [0], [1], [0, 0, 1, 1], [], []>} : vector<8x32xf32>, vector<32x64xf32>, vector<8x64xf32> -> vector<8x64xf32>
    %485 = vector.broadcast %483 : vector<1x64xf32> to vector<8x64xf32>
    %486 = arith.addf %484, %485 : vector<8x64xf32>
    %cst_268 = arith.constant 5.000000e-01 : f32
    %487 = vector.broadcast %cst_268 : f32 to vector<8x64xf32>
    %488 = arith.mulf %487, %486 : vector<8x64xf32>
    %cst_269 = arith.constant 1.41421354 : f32
    %489 = vector.broadcast %cst_269 : f32 to vector<8x64xf32>
    %490 = arith.divf %486, %489 : vector<8x64xf32>
    %491 = math.erf %490 : vector<8x64xf32>
    %cst_270 = arith.constant 1.000000e+00 : f32
    %492 = vector.broadcast %cst_270 : f32 to vector<8x64xf32>
    %493 = arith.addf %492, %491 : vector<8x64xf32>
    %494 = arith.mulf %488, %493 : vector<8x64xf32>
    %c0_271 = arith.constant 0 : index
    %c0_272 = arith.constant 0 : index
    %c0_273 = arith.constant 0 : index
    %495 = vector.load %arg11[%c0_271, %c0_272, %c0_273] : memref<2x64x32xf32, #tpu.memory_space<vmem>>, vector<1x64x32xf32>
    %496 = vector.shape_cast %495 : vector<1x64x32xf32> to vector<64x32xf32>
    %c0_274 = arith.constant 0 : index
    %c0_275 = arith.constant 0 : index
    %c0_276 = arith.constant 0 : index
    %497 = vector.load %arg10[%c0_274, %c0_275, %c0_276] : memref<2x1x32xf32, #tpu.memory_space<vmem>>, vector<1x1x32xf32>
    %498 = vector.shape_cast %497 : vector<1x1x32xf32> to vector<1x32xf32>
    %cst_277 = arith.constant dense<0.000000e+00> : vector<8x32xf32>
    %499 = tpu.matmul %494, %496, %cst_277 {dimension_numbers = #tpu.dot_dimension_numbers<[1], [0], [0], [1], [0, 0, 1, 1], [], []>} : vector<8x64xf32>, vector<64x32xf32>, vector<8x32xf32> -> vector<8x32xf32>
    %500 = vector.broadcast %498 : vector<1x32xf32> to vector<8x32xf32>
    %501 = arith.addf %499, %500 : vector<8x32xf32>
    %502 = arith.addf %479, %501 : vector<8x32xf32>
    %c0_278 = arith.constant 0 : index
    %c0_279 = arith.constant 0 : index
    %c0_280 = arith.constant 0 : index
    %503 = vector.load %arg17[%c0_278, %c0_279, %c0_280] : memref<2x1x32xf32, #tpu.memory_space<vmem>>, vector<1x1x32xf32>
    %504 = vector.shape_cast %503 : vector<1x1x32xf32> to vector<1x32xf32>
    %c0_281 = arith.constant 0 : index
    %c0_282 = arith.constant 0 : index
    %c0_283 = arith.constant 0 : index
    %505 = vector.load %arg16[%c0_281, %c0_282, %c0_283] : memref<2x1x32xf32, #tpu.memory_space<vmem>>, vector<1x1x32xf32>
    %506 = vector.shape_cast %505 : vector<1x1x32xf32> to vector<1x32xf32>
    %cst_284 = arith.constant dense<0.000000e+00> : vector<8xf32>
    %507 = vector.multi_reduction <add>, %502, %cst_284 [1] : vector<8x32xf32> to vector<8xf32>
    %508 = vector.shape_cast %507 : vector<8xf32> to vector<8x1xf32>
    %cst_285 = arith.constant 3.200000e+01 : f32
    %509 = vector.broadcast %cst_285 : f32 to vector<8x1xf32>
    %510 = arith.divf %508, %509 : vector<8x1xf32>
    %511 = vector.broadcast %510 : vector<8x1xf32> to vector<8x32xf32>
    %512 = arith.subf %502, %511 : vector<8x32xf32>
    %513 = arith.mulf %512, %512 : vector<8x32xf32>
    %cst_286 = arith.constant dense<0.000000e+00> : vector<8xf32>
    %514 = vector.multi_reduction <add>, %513, %cst_286 [1] : vector<8x32xf32> to vector<8xf32>
    %515 = vector.shape_cast %514 : vector<8xf32> to vector<8x1xf32>
    %cst_287 = arith.constant 3.200000e+01 : f32
    %516 = vector.broadcast %cst_287 : f32 to vector<8x1xf32>
    %517 = arith.divf %515, %516 : vector<8x1xf32>
    %518 = vector.broadcast %510 : vector<8x1xf32> to vector<8x32xf32>
    %519 = arith.subf %502, %518 : vector<8x32xf32>
    %cst_288 = arith.constant 9.99999974E-6 : f32
    %520 = vector.broadcast %cst_288 : f32 to vector<8x1xf32>
    %521 = arith.addf %517, %520 : vector<8x1xf32>
    %522 = math.rsqrt %521 : vector<8x1xf32>
    %523 = vector.broadcast %522 : vector<8x1xf32> to vector<8x32xf32>
    %524 = arith.mulf %519, %523 : vector<8x32xf32>
    %525 = vector.broadcast %504 : vector<1x32xf32> to vector<8x32xf32>
    %526 = arith.mulf %524, %525 : vector<8x32xf32>
    %527 = vector.broadcast %506 : vector<1x32xf32> to vector<8x32xf32>
    %528 = arith.addf %526, %527 : vector<8x32xf32>
    %c1_289 = arith.constant 1 : index
    %c0_290 = arith.constant 0 : index
    %c0_291 = arith.constant 0 : index
    %529 = vector.load %arg21[%c1_289, %c0_290, %c0_291] : memref<2x32x96xf32, #tpu.memory_space<vmem>>, vector<1x32x96xf32>
    %530 = vector.shape_cast %529 : vector<1x32x96xf32> to vector<32x96xf32>
    %c1_292 = arith.constant 1 : index
    %c0_293 = arith.constant 0 : index
    %c0_294 = arith.constant 0 : index
    %531 = vector.load %arg20[%c1_292, %c0_293, %c0_294] : memref<2x1x96xf32, #tpu.memory_space<vmem>>, vector<1x1x96xf32>
    %532 = vector.shape_cast %531 : vector<1x1x96xf32> to vector<1x96xf32>
    %c1_295 = arith.constant 1 : index
    %c0_296 = arith.constant 0 : index
    %c0_297 = arith.constant 0 : index
    %533 = vector.load %arg19[%c1_295, %c0_296, %c0_297] : memref<2x32x32xf32, #tpu.memory_space<vmem>>, vector<1x32x32xf32>
    %534 = vector.shape_cast %533 : vector<1x32x32xf32> to vector<32x32xf32>
    %c1_298 = arith.constant 1 : index
    %c0_299 = arith.constant 0 : index
    %c0_300 = arith.constant 0 : index
    %535 = vector.load %arg18[%c1_298, %c0_299, %c0_300] : memref<2x1x32xf32, #tpu.memory_space<vmem>>, vector<1x1x32xf32>
    %536 = vector.shape_cast %535 : vector<1x1x32xf32> to vector<1x32xf32>
    %cst_301 = arith.constant dense<0.000000e+00> : vector<8x96xf32>
    %537 = tpu.matmul %528, %530, %cst_301 {dimension_numbers = #tpu.dot_dimension_numbers<[1], [0], [0], [1], [0, 0, 1, 1], [], []>} : vector<8x32xf32>, vector<32x96xf32>, vector<8x96xf32> -> vector<8x96xf32>
    %538 = vector.broadcast %532 : vector<1x96xf32> to vector<8x96xf32>
    %539 = arith.addf %537, %538 : vector<8x96xf32>
    %540 = vector.extract_strided_slice %539 {offsets = [0, 0], sizes = [8, 32], strides = [1, 1]} : vector<8x96xf32> to vector<8x32xf32>
    %541 = vector.extract_strided_slice %539 {offsets = [0, 32], sizes = [8, 32], strides = [1, 1]} : vector<8x96xf32> to vector<8x32xf32>
    %542 = vector.extract_strided_slice %539 {offsets = [0, 64], sizes = [8, 32], strides = [1, 1]} : vector<8x96xf32> to vector<8x32xf32>
    %cst_302 = arith.constant 0.176776692 : f32
    %543 = vector.broadcast %cst_302 : f32 to vector<8x32xf32>
    %544 = arith.mulf %540, %543 : vector<8x32xf32>
    %545 = tpu.transpose %541, [1, 0] : vector<8x32xf32> -> vector<32x8xf32>
    %cst_303 = arith.constant dense<0.000000e+00> : vector<8x8xf32>
    %546 = tpu.matmul %544, %545, %cst_303 {dimension_numbers = #tpu.dot_dimension_numbers<[1], [0], [0], [1], [0, 0, 1, 1], [], []>} : vector<8x32xf32>, vector<32x8xf32>, vector<8x8xf32> -> vector<8x8xf32>
    %547 = vector.broadcast %17 : vector<1x8xf32> to vector<8x8xf32>
    %548 = arith.addf %546, %547 : vector<8x8xf32>
    %cst_304 = arith.constant dense<0xFF800000> : vector<8xf32>
    %549 = vector.multi_reduction <maximumf>, %548, %cst_304 [1] : vector<8x8xf32> to vector<8xf32>
    %550 = vector.shape_cast %549 : vector<8xf32> to vector<8x1xf32>
    %551 = vector.broadcast %550 : vector<8x1xf32> to vector<8x8xf32>
    %552 = arith.subf %548, %551 : vector<8x8xf32>
    %553 = math.exp %552 : vector<8x8xf32>
    %cst_305 = arith.constant dense<0.000000e+00> : vector<8xf32>
    %554 = vector.multi_reduction <add>, %553, %cst_305 [1] : vector<8x8xf32> to vector<8xf32>
    %555 = vector.shape_cast %554 : vector<8xf32> to vector<8x1xf32>
    %556 = tpu.reciprocal %555 {approx = true} : vector<8x1xf32> -> vector<8x1xf32>
    %557 = vector.broadcast %556 : vector<8x1xf32> to vector<8x8xf32>
    %558 = arith.mulf %553, %557 : vector<8x8xf32>
    %cst_306 = arith.constant dense<0.000000e+00> : vector<8x32xf32>
    %559 = tpu.matmul %558, %542, %cst_306 {dimension_numbers = #tpu.dot_dimension_numbers<[1], [0], [0], [1], [0, 0, 1, 1], [], []>} : vector<8x8xf32>, vector<8x32xf32>, vector<8x32xf32> -> vector<8x32xf32>
    %cst_307 = arith.constant dense<0.000000e+00> : vector<8x32xf32>
    %560 = tpu.matmul %559, %534, %cst_307 {dimension_numbers = #tpu.dot_dimension_numbers<[1], [0], [0], [1], [0, 0, 1, 1], [], []>} : vector<8x32xf32>, vector<32x32xf32>, vector<8x32xf32> -> vector<8x32xf32>
    %561 = vector.broadcast %536 : vector<1x32xf32> to vector<8x32xf32>
    %562 = arith.addf %560, %561 : vector<8x32xf32>
    %563 = arith.addf %528, %562 : vector<8x32xf32>
    %c1_308 = arith.constant 1 : index
    %c0_309 = arith.constant 0 : index
    %c0_310 = arith.constant 0 : index
    %564 = vector.load %arg13[%c1_308, %c0_309, %c0_310] : memref<2x1x32xf32, #tpu.memory_space<vmem>>, vector<1x1x32xf32>
    %565 = vector.shape_cast %564 : vector<1x1x32xf32> to vector<1x32xf32>
    %c1_311 = arith.constant 1 : index
    %c0_312 = arith.constant 0 : index
    %c0_313 = arith.constant 0 : index
    %566 = vector.load %arg12[%c1_311, %c0_312, %c0_313] : memref<2x1x32xf32, #tpu.memory_space<vmem>>, vector<1x1x32xf32>
    %567 = vector.shape_cast %566 : vector<1x1x32xf32> to vector<1x32xf32>
    %cst_314 = arith.constant dense<0.000000e+00> : vector<8xf32>
    %568 = vector.multi_reduction <add>, %563, %cst_314 [1] : vector<8x32xf32> to vector<8xf32>
    %569 = vector.shape_cast %568 : vector<8xf32> to vector<8x1xf32>
    %cst_315 = arith.constant 3.200000e+01 : f32
    %570 = vector.broadcast %cst_315 : f32 to vector<8x1xf32>
    %571 = arith.divf %569, %570 : vector<8x1xf32>
    %572 = vector.broadcast %571 : vector<8x1xf32> to vector<8x32xf32>
    %573 = arith.subf %563, %572 : vector<8x32xf32>
    %574 = arith.mulf %573, %573 : vector<8x32xf32>
    %cst_316 = arith.constant dense<0.000000e+00> : vector<8xf32>
    %575 = vector.multi_reduction <add>, %574, %cst_316 [1] : vector<8x32xf32> to vector<8xf32>
    %576 = vector.shape_cast %575 : vector<8xf32> to vector<8x1xf32>
    %cst_317 = arith.constant 3.200000e+01 : f32
    %577 = vector.broadcast %cst_317 : f32 to vector<8x1xf32>
    %578 = arith.divf %576, %577 : vector<8x1xf32>
    %579 = vector.broadcast %571 : vector<8x1xf32> to vector<8x32xf32>
    %580 = arith.subf %563, %579 : vector<8x32xf32>
    %cst_318 = arith.constant 9.99999974E-6 : f32
    %581 = vector.broadcast %cst_318 : f32 to vector<8x1xf32>
    %582 = arith.addf %578, %581 : vector<8x1xf32>
    %583 = math.rsqrt %582 : vector<8x1xf32>
    %584 = vector.broadcast %583 : vector<8x1xf32> to vector<8x32xf32>
    %585 = arith.mulf %580, %584 : vector<8x32xf32>
    %586 = vector.broadcast %565 : vector<1x32xf32> to vector<8x32xf32>
    %587 = arith.mulf %585, %586 : vector<8x32xf32>
    %588 = vector.broadcast %567 : vector<1x32xf32> to vector<8x32xf32>
    %589 = arith.addf %587, %588 : vector<8x32xf32>
    %c1_319 = arith.constant 1 : index
    %c0_320 = arith.constant 0 : index
    %c0_321 = arith.constant 0 : index
    %590 = vector.load %arg27[%c1_319, %c0_320, %c0_321] : memref<2x32x32xf32, #tpu.memory_space<vmem>>, vector<1x32x32xf32>
    %591 = vector.shape_cast %590 : vector<1x32x32xf32> to vector<32x32xf32>
    %c1_322 = arith.constant 1 : index
    %c0_323 = arith.constant 0 : index
    %c0_324 = arith.constant 0 : index
    %592 = vector.load %arg26[%c1_322, %c0_323, %c0_324] : memref<2x1x32xf32, #tpu.memory_space<vmem>>, vector<1x1x32xf32>
    %593 = vector.shape_cast %592 : vector<1x1x32xf32> to vector<1x32xf32>
    %c1_325 = arith.constant 1 : index
    %c0_326 = arith.constant 0 : index
    %c0_327 = arith.constant 0 : index
    %594 = vector.load %arg23[%c1_325, %c0_326, %c0_327] : memref<2x32x64xf32, #tpu.memory_space<vmem>>, vector<1x32x64xf32>
    %595 = vector.shape_cast %594 : vector<1x32x64xf32> to vector<32x64xf32>
    %c1_328 = arith.constant 1 : index
    %c0_329 = arith.constant 0 : index
    %c0_330 = arith.constant 0 : index
    %596 = vector.load %arg22[%c1_328, %c0_329, %c0_330] : memref<2x1x64xf32, #tpu.memory_space<vmem>>, vector<1x1x64xf32>
    %597 = vector.shape_cast %596 : vector<1x1x64xf32> to vector<1x64xf32>
    %c1_331 = arith.constant 1 : index
    %c0_332 = arith.constant 0 : index
    %c0_333 = arith.constant 0 : index
    %598 = vector.load %arg25[%c1_331, %c0_332, %c0_333] : memref<2x32x32xf32, #tpu.memory_space<vmem>>, vector<1x32x32xf32>
    %599 = vector.shape_cast %598 : vector<1x32x32xf32> to vector<32x32xf32>
    %c1_334 = arith.constant 1 : index
    %c0_335 = arith.constant 0 : index
    %c0_336 = arith.constant 0 : index
    %600 = vector.load %arg24[%c1_334, %c0_335, %c0_336] : memref<2x1x32xf32, #tpu.memory_space<vmem>>, vector<1x1x32xf32>
    %601 = vector.shape_cast %600 : vector<1x1x32xf32> to vector<1x32xf32>
    %cst_337 = arith.constant dense<0.000000e+00> : vector<8x32xf32>
    %602 = tpu.matmul %589, %591, %cst_337 {dimension_numbers = #tpu.dot_dimension_numbers<[1], [0], [0], [1], [0, 0, 1, 1], [], []>} : vector<8x32xf32>, vector<32x32xf32>, vector<8x32xf32> -> vector<8x32xf32>
    %603 = vector.broadcast %593 : vector<1x32xf32> to vector<8x32xf32>
    %604 = arith.addf %602, %603 : vector<8x32xf32>
    %cst_338 = arith.constant dense<0.000000e+00> : vector<8x64xf32>
    %605 = tpu.matmul %326, %595, %cst_338 {dimension_numbers = #tpu.dot_dimension_numbers<[1], [0], [0], [1], [0, 0, 1, 1], [], []>} : vector<8x32xf32>, vector<32x64xf32>, vector<8x64xf32> -> vector<8x64xf32>
    %606 = vector.broadcast %597 : vector<1x64xf32> to vector<8x64xf32>
    %607 = arith.addf %605, %606 : vector<8x64xf32>
    %608 = vector.extract_strided_slice %607 {offsets = [0, 0], sizes = [8, 32], strides = [1, 1]} : vector<8x64xf32> to vector<8x32xf32>
    %609 = vector.extract_strided_slice %607 {offsets = [0, 32], sizes = [8, 32], strides = [1, 1]} : vector<8x64xf32> to vector<8x32xf32>
    %cst_339 = arith.constant 0.176776692 : f32
    %610 = vector.broadcast %cst_339 : f32 to vector<8x32xf32>
    %611 = arith.mulf %604, %610 : vector<8x32xf32>
    %612 = tpu.transpose %608, [1, 0] : vector<8x32xf32> -> vector<32x8xf32>
    %cst_340 = arith.constant dense<0.000000e+00> : vector<8x8xf32>
    %613 = tpu.matmul %611, %612, %cst_340 {dimension_numbers = #tpu.dot_dimension_numbers<[1], [0], [0], [1], [0, 0, 1, 1], [], []>} : vector<8x32xf32>, vector<32x8xf32>, vector<8x8xf32> -> vector<8x8xf32>
    %614 = vector.broadcast %11 : vector<1x8xf32> to vector<8x8xf32>
    %615 = arith.addf %613, %614 : vector<8x8xf32>
    %cst_341 = arith.constant dense<0xFF800000> : vector<8xf32>
    %616 = vector.multi_reduction <maximumf>, %615, %cst_341 [1] : vector<8x8xf32> to vector<8xf32>
    %617 = vector.shape_cast %616 : vector<8xf32> to vector<8x1xf32>
    %618 = vector.broadcast %617 : vector<8x1xf32> to vector<8x8xf32>
    %619 = arith.subf %615, %618 : vector<8x8xf32>
    %620 = math.exp %619 : vector<8x8xf32>
    %cst_342 = arith.constant dense<0.000000e+00> : vector<8xf32>
    %621 = vector.multi_reduction <add>, %620, %cst_342 [1] : vector<8x8xf32> to vector<8xf32>
    %622 = vector.shape_cast %621 : vector<8xf32> to vector<8x1xf32>
    %623 = tpu.reciprocal %622 {approx = true} : vector<8x1xf32> -> vector<8x1xf32>
    %624 = vector.broadcast %623 : vector<8x1xf32> to vector<8x8xf32>
    %625 = arith.mulf %620, %624 : vector<8x8xf32>
    %cst_343 = arith.constant dense<0.000000e+00> : vector<8x32xf32>
    %626 = tpu.matmul %625, %609, %cst_343 {dimension_numbers = #tpu.dot_dimension_numbers<[1], [0], [0], [1], [0, 0, 1, 1], [], []>} : vector<8x8xf32>, vector<8x32xf32>, vector<8x32xf32> -> vector<8x32xf32>
    %cst_344 = arith.constant dense<0.000000e+00> : vector<8x32xf32>
    %627 = tpu.matmul %626, %599, %cst_344 {dimension_numbers = #tpu.dot_dimension_numbers<[1], [0], [0], [1], [0, 0, 1, 1], [], []>} : vector<8x32xf32>, vector<32x32xf32>, vector<8x32xf32> -> vector<8x32xf32>
    %628 = vector.broadcast %601 : vector<1x32xf32> to vector<8x32xf32>
    %629 = arith.addf %627, %628 : vector<8x32xf32>
    %630 = arith.addf %589, %629 : vector<8x32xf32>
    %c1_345 = arith.constant 1 : index
    %c0_346 = arith.constant 0 : index
    %c0_347 = arith.constant 0 : index
    %631 = vector.load %arg15[%c1_345, %c0_346, %c0_347] : memref<2x1x32xf32, #tpu.memory_space<vmem>>, vector<1x1x32xf32>
    %632 = vector.shape_cast %631 : vector<1x1x32xf32> to vector<1x32xf32>
    %c1_348 = arith.constant 1 : index
    %c0_349 = arith.constant 0 : index
    %c0_350 = arith.constant 0 : index
    %633 = vector.load %arg14[%c1_348, %c0_349, %c0_350] : memref<2x1x32xf32, #tpu.memory_space<vmem>>, vector<1x1x32xf32>
    %634 = vector.shape_cast %633 : vector<1x1x32xf32> to vector<1x32xf32>
    %cst_351 = arith.constant dense<0.000000e+00> : vector<8xf32>
    %635 = vector.multi_reduction <add>, %630, %cst_351 [1] : vector<8x32xf32> to vector<8xf32>
    %636 = vector.shape_cast %635 : vector<8xf32> to vector<8x1xf32>
    %cst_352 = arith.constant 3.200000e+01 : f32
    %637 = vector.broadcast %cst_352 : f32 to vector<8x1xf32>
    %638 = arith.divf %636, %637 : vector<8x1xf32>
    %639 = vector.broadcast %638 : vector<8x1xf32> to vector<8x32xf32>
    %640 = arith.subf %630, %639 : vector<8x32xf32>
    %641 = arith.mulf %640, %640 : vector<8x32xf32>
    %cst_353 = arith.constant dense<0.000000e+00> : vector<8xf32>
    %642 = vector.multi_reduction <add>, %641, %cst_353 [1] : vector<8x32xf32> to vector<8xf32>
    %643 = vector.shape_cast %642 : vector<8xf32> to vector<8x1xf32>
    %cst_354 = arith.constant 3.200000e+01 : f32
    %644 = vector.broadcast %cst_354 : f32 to vector<8x1xf32>
    %645 = arith.divf %643, %644 : vector<8x1xf32>
    %646 = vector.broadcast %638 : vector<8x1xf32> to vector<8x32xf32>
    %647 = arith.subf %630, %646 : vector<8x32xf32>
    %cst_355 = arith.constant 9.99999974E-6 : f32
    %648 = vector.broadcast %cst_355 : f32 to vector<8x1xf32>
    %649 = arith.addf %645, %648 : vector<8x1xf32>
    %650 = math.rsqrt %649 : vector<8x1xf32>
    %651 = vector.broadcast %650 : vector<8x1xf32> to vector<8x32xf32>
    %652 = arith.mulf %647, %651 : vector<8x32xf32>
    %653 = vector.broadcast %632 : vector<1x32xf32> to vector<8x32xf32>
    %654 = arith.mulf %652, %653 : vector<8x32xf32>
    %655 = vector.broadcast %634 : vector<1x32xf32> to vector<8x32xf32>
    %656 = arith.addf %654, %655 : vector<8x32xf32>
    %c1_356 = arith.constant 1 : index
    %c0_357 = arith.constant 0 : index
    %c0_358 = arith.constant 0 : index
    %657 = vector.load %arg9[%c1_356, %c0_357, %c0_358] : memref<2x32x64xf32, #tpu.memory_space<vmem>>, vector<1x32x64xf32>
    %658 = vector.shape_cast %657 : vector<1x32x64xf32> to vector<32x64xf32>
    %c1_359 = arith.constant 1 : index
    %c0_360 = arith.constant 0 : index
    %c0_361 = arith.constant 0 : index
    %659 = vector.load %arg8[%c1_359, %c0_360, %c0_361] : memref<2x1x64xf32, #tpu.memory_space<vmem>>, vector<1x1x64xf32>
    %660 = vector.shape_cast %659 : vector<1x1x64xf32> to vector<1x64xf32>
    %cst_362 = arith.constant dense<0.000000e+00> : vector<8x64xf32>
    %661 = tpu.matmul %656, %658, %cst_362 {dimension_numbers = #tpu.dot_dimension_numbers<[1], [0], [0], [1], [0, 0, 1, 1], [], []>} : vector<8x32xf32>, vector<32x64xf32>, vector<8x64xf32> -> vector<8x64xf32>
    %662 = vector.broadcast %660 : vector<1x64xf32> to vector<8x64xf32>
    %663 = arith.addf %661, %662 : vector<8x64xf32>
    %cst_363 = arith.constant 5.000000e-01 : f32
    %664 = vector.broadcast %cst_363 : f32 to vector<8x64xf32>
    %665 = arith.mulf %664, %663 : vector<8x64xf32>
    %cst_364 = arith.constant 1.41421354 : f32
    %666 = vector.broadcast %cst_364 : f32 to vector<8x64xf32>
    %667 = arith.divf %663, %666 : vector<8x64xf32>
    %668 = math.erf %667 : vector<8x64xf32>
    %cst_365 = arith.constant 1.000000e+00 : f32
    %669 = vector.broadcast %cst_365 : f32 to vector<8x64xf32>
    %670 = arith.addf %669, %668 : vector<8x64xf32>
    %671 = arith.mulf %665, %670 : vector<8x64xf32>
    %c1_366 = arith.constant 1 : index
    %c0_367 = arith.constant 0 : index
    %c0_368 = arith.constant 0 : index
    %672 = vector.load %arg11[%c1_366, %c0_367, %c0_368] : memref<2x64x32xf32, #tpu.memory_space<vmem>>, vector<1x64x32xf32>
    %673 = vector.shape_cast %672 : vector<1x64x32xf32> to vector<64x32xf32>
    %c1_369 = arith.constant 1 : index
    %c0_370 = arith.constant 0 : index
    %c0_371 = arith.constant 0 : index
    %674 = vector.load %arg10[%c1_369, %c0_370, %c0_371] : memref<2x1x32xf32, #tpu.memory_space<vmem>>, vector<1x1x32xf32>
    %675 = vector.shape_cast %674 : vector<1x1x32xf32> to vector<1x32xf32>
    %cst_372 = arith.constant dense<0.000000e+00> : vector<8x32xf32>
    %676 = tpu.matmul %671, %673, %cst_372 {dimension_numbers = #tpu.dot_dimension_numbers<[1], [0], [0], [1], [0, 0, 1, 1], [], []>} : vector<8x64xf32>, vector<64x32xf32>, vector<8x32xf32> -> vector<8x32xf32>
    %677 = vector.broadcast %675 : vector<1x32xf32> to vector<8x32xf32>
    %678 = arith.addf %676, %677 : vector<8x32xf32>
    %679 = arith.addf %656, %678 : vector<8x32xf32>
    %c1_373 = arith.constant 1 : index
    %c0_374 = arith.constant 0 : index
    %c0_375 = arith.constant 0 : index
    %680 = vector.load %arg17[%c1_373, %c0_374, %c0_375] : memref<2x1x32xf32, #tpu.memory_space<vmem>>, vector<1x1x32xf32>
    %681 = vector.shape_cast %680 : vector<1x1x32xf32> to vector<1x32xf32>
    %c1_376 = arith.constant 1 : index
    %c0_377 = arith.constant 0 : index
    %c0_378 = arith.constant 0 : index
    %682 = vector.load %arg16[%c1_376, %c0_377, %c0_378] : memref<2x1x32xf32, #tpu.memory_space<vmem>>, vector<1x1x32xf32>
    %683 = vector.shape_cast %682 : vector<1x1x32xf32> to vector<1x32xf32>
    %cst_379 = arith.constant dense<0.000000e+00> : vector<8xf32>
    %684 = vector.multi_reduction <add>, %679, %cst_379 [1] : vector<8x32xf32> to vector<8xf32>
    %685 = vector.shape_cast %684 : vector<8xf32> to vector<8x1xf32>
    %cst_380 = arith.constant 3.200000e+01 : f32
    %686 = vector.broadcast %cst_380 : f32 to vector<8x1xf32>
    %687 = arith.divf %685, %686 : vector<8x1xf32>
    %688 = vector.broadcast %687 : vector<8x1xf32> to vector<8x32xf32>
    %689 = arith.subf %679, %688 : vector<8x32xf32>
    %690 = arith.mulf %689, %689 : vector<8x32xf32>
    %cst_381 = arith.constant dense<0.000000e+00> : vector<8xf32>
    %691 = vector.multi_reduction <add>, %690, %cst_381 [1] : vector<8x32xf32> to vector<8xf32>
    %692 = vector.shape_cast %691 : vector<8xf32> to vector<8x1xf32>
    %cst_382 = arith.constant 3.200000e+01 : f32
    %693 = vector.broadcast %cst_382 : f32 to vector<8x1xf32>
    %694 = arith.divf %692, %693 : vector<8x1xf32>
    %695 = vector.broadcast %687 : vector<8x1xf32> to vector<8x32xf32>
    %696 = arith.subf %679, %695 : vector<8x32xf32>
    %cst_383 = arith.constant 9.99999974E-6 : f32
    %697 = vector.broadcast %cst_383 : f32 to vector<8x1xf32>
    %698 = arith.addf %694, %697 : vector<8x1xf32>
    %699 = math.rsqrt %698 : vector<8x1xf32>
    %700 = vector.broadcast %699 : vector<8x1xf32> to vector<8x32xf32>
    %701 = arith.mulf %696, %700 : vector<8x32xf32>
    %702 = vector.broadcast %681 : vector<1x32xf32> to vector<8x32xf32>
    %703 = arith.mulf %701, %702 : vector<8x32xf32>
    %704 = vector.broadcast %683 : vector<1x32xf32> to vector<8x32xf32>
    %705 = arith.addf %703, %704 : vector<8x32xf32>
    %706 = arith.negf %33 : vector<1x32xf32>
    %707 = math.exp %706 : vector<1x32xf32>
    %cst_384 = arith.constant 1.000000e+00 : f32
    %708 = vector.broadcast %cst_384 : f32 to vector<1x32xf32>
    %709 = arith.addf %708, %707 : vector<1x32xf32>
    %710 = arith.divf %708, %709 : vector<1x32xf32>
    %711 = arith.mulf %33, %710 : vector<1x32xf32>
    %c0_385 = arith.constant 0 : index
    %c0_386 = arith.constant 0 : index
    %c0_387 = arith.constant 0 : index
    %712 = vector.load %arg31[%c0_385, %c0_386, %c0_387] : memref<2x32x192xf32, #tpu.memory_space<vmem>>, vector<1x32x192xf32>
    %713 = vector.shape_cast %712 : vector<1x32x192xf32> to vector<32x192xf32>
    %c0_388 = arith.constant 0 : index
    %c0_389 = arith.constant 0 : index
    %c0_390 = arith.constant 0 : index
    %714 = vector.load %arg30[%c0_388, %c0_389, %c0_390] : memref<2x1x192xf32, #tpu.memory_space<vmem>>, vector<1x1x192xf32>
    %715 = vector.shape_cast %714 : vector<1x1x192xf32> to vector<1x192xf32>
    %cst_391 = arith.constant dense<0.000000e+00> : vector<1x192xf32>
    %716 = tpu.matmul %711, %713, %cst_391 {dimension_numbers = #tpu.dot_dimension_numbers<[1], [0], [0], [1], [0, 0, 1, 1], [], []>} : vector<1x32xf32>, vector<32x192xf32>, vector<1x192xf32> -> vector<1x192xf32>
    %717 = arith.addf %716, %715 : vector<1x192xf32>
    %718 = vector.extract_strided_slice %717 {offsets = [0, 0], sizes = [1, 32], strides = [1, 1]} : vector<1x192xf32> to vector<1x32xf32>
    %719 = vector.extract_strided_slice %717 {offsets = [0, 32], sizes = [1, 32], strides = [1, 1]} : vector<1x192xf32> to vector<1x32xf32>
    %720 = vector.extract_strided_slice %717 {offsets = [0, 64], sizes = [1, 32], strides = [1, 1]} : vector<1x192xf32> to vector<1x32xf32>
    %721 = vector.extract_strided_slice %717 {offsets = [0, 96], sizes = [1, 32], strides = [1, 1]} : vector<1x192xf32> to vector<1x32xf32>
    %722 = vector.extract_strided_slice %717 {offsets = [0, 128], sizes = [1, 32], strides = [1, 1]} : vector<1x192xf32> to vector<1x32xf32>
    %723 = vector.extract_strided_slice %717 {offsets = [0, 160], sizes = [1, 32], strides = [1, 1]} : vector<1x192xf32> to vector<1x32xf32>
    %cst_392 = arith.constant 1.000000e+00 : f32
    %724 = vector.broadcast %cst_392 : f32 to vector<1x32xf32>
    %725 = arith.addf %724, %719 : vector<1x32xf32>
    %726 = vector.broadcast %725 : vector<1x32xf32> to vector<8x32xf32>
    %727 = arith.mulf %705, %726 : vector<8x32xf32>
    %728 = vector.broadcast %718 : vector<1x32xf32> to vector<8x32xf32>
    %729 = arith.addf %727, %728 : vector<8x32xf32>
    %c0_393 = arith.constant 0 : index
    %c0_394 = arith.constant 0 : index
    %c0_395 = arith.constant 0 : index
    %730 = vector.load %arg49[%c0_393, %c0_394, %c0_395] : memref<2x32x96xf32, #tpu.memory_space<vmem>>, vector<1x32x96xf32>
    %731 = vector.shape_cast %730 : vector<1x32x96xf32> to vector<32x96xf32>
    %c0_396 = arith.constant 0 : index
    %c0_397 = arith.constant 0 : index
    %c0_398 = arith.constant 0 : index
    %732 = vector.load %arg48[%c0_396, %c0_397, %c0_398] : memref<2x1x96xf32, #tpu.memory_space<vmem>>, vector<1x1x96xf32>
    %733 = vector.shape_cast %732 : vector<1x1x96xf32> to vector<1x96xf32>
    %c0_399 = arith.constant 0 : index
    %c0_400 = arith.constant 0 : index
    %c0_401 = arith.constant 0 : index
    %734 = vector.load %arg47[%c0_399, %c0_400, %c0_401] : memref<2x32x32xf32, #tpu.memory_space<vmem>>, vector<1x32x32xf32>
    %735 = vector.shape_cast %734 : vector<1x32x32xf32> to vector<32x32xf32>
    %c0_402 = arith.constant 0 : index
    %c0_403 = arith.constant 0 : index
    %c0_404 = arith.constant 0 : index
    %736 = vector.load %arg46[%c0_402, %c0_403, %c0_404] : memref<2x1x32xf32, #tpu.memory_space<vmem>>, vector<1x1x32xf32>
    %737 = vector.shape_cast %736 : vector<1x1x32xf32> to vector<1x32xf32>
    %cst_405 = arith.constant dense<0.000000e+00> : vector<8x96xf32>
    %738 = tpu.matmul %729, %731, %cst_405 {dimension_numbers = #tpu.dot_dimension_numbers<[1], [0], [0], [1], [0, 0, 1, 1], [], []>} : vector<8x32xf32>, vector<32x96xf32>, vector<8x96xf32> -> vector<8x96xf32>
    %739 = vector.broadcast %733 : vector<1x96xf32> to vector<8x96xf32>
    %740 = arith.addf %738, %739 : vector<8x96xf32>
    %741 = vector.extract_strided_slice %740 {offsets = [0, 0], sizes = [8, 32], strides = [1, 1]} : vector<8x96xf32> to vector<8x32xf32>
    %742 = vector.extract_strided_slice %740 {offsets = [0, 32], sizes = [8, 32], strides = [1, 1]} : vector<8x96xf32> to vector<8x32xf32>
    %743 = vector.extract_strided_slice %740 {offsets = [0, 64], sizes = [8, 32], strides = [1, 1]} : vector<8x96xf32> to vector<8x32xf32>
    %cst_406 = arith.constant 0.176776692 : f32
    %744 = vector.broadcast %cst_406 : f32 to vector<8x32xf32>
    %745 = arith.mulf %741, %744 : vector<8x32xf32>
    %746 = tpu.transpose %742, [1, 0] : vector<8x32xf32> -> vector<32x8xf32>
    %cst_407 = arith.constant dense<0.000000e+00> : vector<8x8xf32>
    %747 = tpu.matmul %745, %746, %cst_407 {dimension_numbers = #tpu.dot_dimension_numbers<[1], [0], [0], [1], [0, 0, 1, 1], [], []>} : vector<8x32xf32>, vector<32x8xf32>, vector<8x8xf32> -> vector<8x8xf32>
    %748 = vector.broadcast %17 : vector<1x8xf32> to vector<8x8xf32>
    %749 = arith.addf %747, %748 : vector<8x8xf32>
    %cst_408 = arith.constant dense<0xFF800000> : vector<8xf32>
    %750 = vector.multi_reduction <maximumf>, %749, %cst_408 [1] : vector<8x8xf32> to vector<8xf32>
    %751 = vector.shape_cast %750 : vector<8xf32> to vector<8x1xf32>
    %752 = vector.broadcast %751 : vector<8x1xf32> to vector<8x8xf32>
    %753 = arith.subf %749, %752 : vector<8x8xf32>
    %754 = math.exp %753 : vector<8x8xf32>
    %cst_409 = arith.constant dense<0.000000e+00> : vector<8xf32>
    %755 = vector.multi_reduction <add>, %754, %cst_409 [1] : vector<8x8xf32> to vector<8xf32>
    %756 = vector.shape_cast %755 : vector<8xf32> to vector<8x1xf32>
    %757 = tpu.reciprocal %756 {approx = true} : vector<8x1xf32> -> vector<8x1xf32>
    %758 = vector.broadcast %757 : vector<8x1xf32> to vector<8x8xf32>
    %759 = arith.mulf %754, %758 : vector<8x8xf32>
    %cst_410 = arith.constant dense<0.000000e+00> : vector<8x32xf32>
    %760 = tpu.matmul %759, %743, %cst_410 {dimension_numbers = #tpu.dot_dimension_numbers<[1], [0], [0], [1], [0, 0, 1, 1], [], []>} : vector<8x8xf32>, vector<8x32xf32>, vector<8x32xf32> -> vector<8x32xf32>
    %cst_411 = arith.constant dense<0.000000e+00> : vector<8x32xf32>
    %761 = tpu.matmul %760, %735, %cst_411 {dimension_numbers = #tpu.dot_dimension_numbers<[1], [0], [0], [1], [0, 0, 1, 1], [], []>} : vector<8x32xf32>, vector<32x32xf32>, vector<8x32xf32> -> vector<8x32xf32>
    %762 = vector.broadcast %737 : vector<1x32xf32> to vector<8x32xf32>
    %763 = arith.addf %761, %762 : vector<8x32xf32>
    %764 = vector.broadcast %720 : vector<1x32xf32> to vector<8x32xf32>
    %765 = arith.mulf %764, %763 : vector<8x32xf32>
    %766 = arith.addf %705, %765 : vector<8x32xf32>
    %cst_412 = arith.constant 1.000000e+00 : f32
    %767 = vector.broadcast %cst_412 : f32 to vector<1x32xf32>
    %768 = arith.addf %767, %722 : vector<1x32xf32>
    %769 = vector.broadcast %768 : vector<1x32xf32> to vector<8x32xf32>
    %770 = arith.mulf %766, %769 : vector<8x32xf32>
    %771 = vector.broadcast %721 : vector<1x32xf32> to vector<8x32xf32>
    %772 = arith.addf %770, %771 : vector<8x32xf32>
    %c0_413 = arith.constant 0 : index
    %c0_414 = arith.constant 0 : index
    %c0_415 = arith.constant 0 : index
    %773 = vector.load %arg43[%c0_413, %c0_414, %c0_415] : memref<2x32x64xf32, #tpu.memory_space<vmem>>, vector<1x32x64xf32>
    %774 = vector.shape_cast %773 : vector<1x32x64xf32> to vector<32x64xf32>
    %c0_416 = arith.constant 0 : index
    %c0_417 = arith.constant 0 : index
    %c0_418 = arith.constant 0 : index
    %775 = vector.load %arg42[%c0_416, %c0_417, %c0_418] : memref<2x1x64xf32, #tpu.memory_space<vmem>>, vector<1x1x64xf32>
    %776 = vector.shape_cast %775 : vector<1x1x64xf32> to vector<1x64xf32>
    %cst_419 = arith.constant dense<0.000000e+00> : vector<8x64xf32>
    %777 = tpu.matmul %772, %774, %cst_419 {dimension_numbers = #tpu.dot_dimension_numbers<[1], [0], [0], [1], [0, 0, 1, 1], [], []>} : vector<8x32xf32>, vector<32x64xf32>, vector<8x64xf32> -> vector<8x64xf32>
    %778 = vector.broadcast %776 : vector<1x64xf32> to vector<8x64xf32>
    %779 = arith.addf %777, %778 : vector<8x64xf32>
    %cst_420 = arith.constant 5.000000e-01 : f32
    %780 = vector.broadcast %cst_420 : f32 to vector<8x64xf32>
    %781 = arith.mulf %780, %779 : vector<8x64xf32>
    %cst_421 = arith.constant 1.41421354 : f32
    %782 = vector.broadcast %cst_421 : f32 to vector<8x64xf32>
    %783 = arith.divf %779, %782 : vector<8x64xf32>
    %784 = math.erf %783 : vector<8x64xf32>
    %cst_422 = arith.constant 1.000000e+00 : f32
    %785 = vector.broadcast %cst_422 : f32 to vector<8x64xf32>
    %786 = arith.addf %785, %784 : vector<8x64xf32>
    %787 = arith.mulf %781, %786 : vector<8x64xf32>
    %c0_423 = arith.constant 0 : index
    %c0_424 = arith.constant 0 : index
    %c0_425 = arith.constant 0 : index
    %788 = vector.load %arg45[%c0_423, %c0_424, %c0_425] : memref<2x64x32xf32, #tpu.memory_space<vmem>>, vector<1x64x32xf32>
    %789 = vector.shape_cast %788 : vector<1x64x32xf32> to vector<64x32xf32>
    %c0_426 = arith.constant 0 : index
    %c0_427 = arith.constant 0 : index
    %c0_428 = arith.constant 0 : index
    %790 = vector.load %arg44[%c0_426, %c0_427, %c0_428] : memref<2x1x32xf32, #tpu.memory_space<vmem>>, vector<1x1x32xf32>
    %791 = vector.shape_cast %790 : vector<1x1x32xf32> to vector<1x32xf32>
    %cst_429 = arith.constant dense<0.000000e+00> : vector<8x32xf32>
    %792 = tpu.matmul %787, %789, %cst_429 {dimension_numbers = #tpu.dot_dimension_numbers<[1], [0], [0], [1], [0, 0, 1, 1], [], []>} : vector<8x64xf32>, vector<64x32xf32>, vector<8x32xf32> -> vector<8x32xf32>
    %793 = vector.broadcast %791 : vector<1x32xf32> to vector<8x32xf32>
    %794 = arith.addf %792, %793 : vector<8x32xf32>
    %795 = vector.broadcast %723 : vector<1x32xf32> to vector<8x32xf32>
    %796 = arith.mulf %795, %794 : vector<8x32xf32>
    %797 = arith.addf %705, %796 : vector<8x32xf32>
    %c0_430 = arith.constant 0 : index
    %c0_431 = arith.constant 0 : index
    %c0_432 = arith.constant 0 : index
    %798 = vector.load %arg37[%c0_430, %c0_431, %c0_432] : memref<2x1x32xf32, #tpu.memory_space<vmem>>, vector<1x1x32xf32>
    %799 = vector.shape_cast %798 : vector<1x1x32xf32> to vector<1x32xf32>
    %c0_433 = arith.constant 0 : index
    %c0_434 = arith.constant 0 : index
    %c0_435 = arith.constant 0 : index
    %800 = vector.load %arg36[%c0_433, %c0_434, %c0_435] : memref<2x1x32xf32, #tpu.memory_space<vmem>>, vector<1x1x32xf32>
    %801 = vector.shape_cast %800 : vector<1x1x32xf32> to vector<1x32xf32>
    %cst_436 = arith.constant dense<0.000000e+00> : vector<8xf32>
    %802 = vector.multi_reduction <add>, %797, %cst_436 [1] : vector<8x32xf32> to vector<8xf32>
    %803 = vector.shape_cast %802 : vector<8xf32> to vector<8x1xf32>
    %cst_437 = arith.constant 3.200000e+01 : f32
    %804 = vector.broadcast %cst_437 : f32 to vector<8x1xf32>
    %805 = arith.divf %803, %804 : vector<8x1xf32>
    %806 = vector.broadcast %805 : vector<8x1xf32> to vector<8x32xf32>
    %807 = arith.subf %797, %806 : vector<8x32xf32>
    %808 = arith.mulf %807, %807 : vector<8x32xf32>
    %cst_438 = arith.constant dense<0.000000e+00> : vector<8xf32>
    %809 = vector.multi_reduction <add>, %808, %cst_438 [1] : vector<8x32xf32> to vector<8xf32>
    %810 = vector.shape_cast %809 : vector<8xf32> to vector<8x1xf32>
    %cst_439 = arith.constant 3.200000e+01 : f32
    %811 = vector.broadcast %cst_439 : f32 to vector<8x1xf32>
    %812 = arith.divf %810, %811 : vector<8x1xf32>
    %813 = vector.broadcast %805 : vector<8x1xf32> to vector<8x32xf32>
    %814 = arith.subf %797, %813 : vector<8x32xf32>
    %cst_440 = arith.constant 9.99999974E-6 : f32
    %815 = vector.broadcast %cst_440 : f32 to vector<8x1xf32>
    %816 = arith.addf %812, %815 : vector<8x1xf32>
    %817 = math.rsqrt %816 : vector<8x1xf32>
    %818 = vector.broadcast %817 : vector<8x1xf32> to vector<8x32xf32>
    %819 = arith.mulf %814, %818 : vector<8x32xf32>
    %820 = vector.broadcast %799 : vector<1x32xf32> to vector<8x32xf32>
    %821 = arith.mulf %819, %820 : vector<8x32xf32>
    %822 = vector.broadcast %801 : vector<1x32xf32> to vector<8x32xf32>
    %823 = arith.addf %821, %822 : vector<8x32xf32>
    %c0_441 = arith.constant 0 : index
    %c0_442 = arith.constant 0 : index
    %c0_443 = arith.constant 0 : index
    %824 = vector.load %arg55[%c0_441, %c0_442, %c0_443] : memref<2x32x32xf32, #tpu.memory_space<vmem>>, vector<1x32x32xf32>
    %825 = vector.shape_cast %824 : vector<1x32x32xf32> to vector<32x32xf32>
    %c0_444 = arith.constant 0 : index
    %c0_445 = arith.constant 0 : index
    %c0_446 = arith.constant 0 : index
    %826 = vector.load %arg54[%c0_444, %c0_445, %c0_446] : memref<2x1x32xf32, #tpu.memory_space<vmem>>, vector<1x1x32xf32>
    %827 = vector.shape_cast %826 : vector<1x1x32xf32> to vector<1x32xf32>
    %c0_447 = arith.constant 0 : index
    %c0_448 = arith.constant 0 : index
    %c0_449 = arith.constant 0 : index
    %828 = vector.load %arg51[%c0_447, %c0_448, %c0_449] : memref<2x32x64xf32, #tpu.memory_space<vmem>>, vector<1x32x64xf32>
    %829 = vector.shape_cast %828 : vector<1x32x64xf32> to vector<32x64xf32>
    %c0_450 = arith.constant 0 : index
    %c0_451 = arith.constant 0 : index
    %c0_452 = arith.constant 0 : index
    %830 = vector.load %arg50[%c0_450, %c0_451, %c0_452] : memref<2x1x64xf32, #tpu.memory_space<vmem>>, vector<1x1x64xf32>
    %831 = vector.shape_cast %830 : vector<1x1x64xf32> to vector<1x64xf32>
    %c0_453 = arith.constant 0 : index
    %c0_454 = arith.constant 0 : index
    %c0_455 = arith.constant 0 : index
    %832 = vector.load %arg53[%c0_453, %c0_454, %c0_455] : memref<2x32x32xf32, #tpu.memory_space<vmem>>, vector<1x32x32xf32>
    %833 = vector.shape_cast %832 : vector<1x32x32xf32> to vector<32x32xf32>
    %c0_456 = arith.constant 0 : index
    %c0_457 = arith.constant 0 : index
    %c0_458 = arith.constant 0 : index
    %834 = vector.load %arg52[%c0_456, %c0_457, %c0_458] : memref<2x1x32xf32, #tpu.memory_space<vmem>>, vector<1x1x32xf32>
    %835 = vector.shape_cast %834 : vector<1x1x32xf32> to vector<1x32xf32>
    %cst_459 = arith.constant dense<0.000000e+00> : vector<8x32xf32>
    %836 = tpu.matmul %823, %825, %cst_459 {dimension_numbers = #tpu.dot_dimension_numbers<[1], [0], [0], [1], [0, 0, 1, 1], [], []>} : vector<8x32xf32>, vector<32x32xf32>, vector<8x32xf32> -> vector<8x32xf32>
    %837 = vector.broadcast %827 : vector<1x32xf32> to vector<8x32xf32>
    %838 = arith.addf %836, %837 : vector<8x32xf32>
    %cst_460 = arith.constant dense<0.000000e+00> : vector<8x64xf32>
    %839 = tpu.matmul %326, %829, %cst_460 {dimension_numbers = #tpu.dot_dimension_numbers<[1], [0], [0], [1], [0, 0, 1, 1], [], []>} : vector<8x32xf32>, vector<32x64xf32>, vector<8x64xf32> -> vector<8x64xf32>
    %840 = vector.broadcast %831 : vector<1x64xf32> to vector<8x64xf32>
    %841 = arith.addf %839, %840 : vector<8x64xf32>
    %842 = vector.extract_strided_slice %841 {offsets = [0, 0], sizes = [8, 32], strides = [1, 1]} : vector<8x64xf32> to vector<8x32xf32>
    %843 = vector.extract_strided_slice %841 {offsets = [0, 32], sizes = [8, 32], strides = [1, 1]} : vector<8x64xf32> to vector<8x32xf32>
    %cst_461 = arith.constant 0.176776692 : f32
    %844 = vector.broadcast %cst_461 : f32 to vector<8x32xf32>
    %845 = arith.mulf %838, %844 : vector<8x32xf32>
    %846 = tpu.transpose %842, [1, 0] : vector<8x32xf32> -> vector<32x8xf32>
    %cst_462 = arith.constant dense<0.000000e+00> : vector<8x8xf32>
    %847 = tpu.matmul %845, %846, %cst_462 {dimension_numbers = #tpu.dot_dimension_numbers<[1], [0], [0], [1], [0, 0, 1, 1], [], []>} : vector<8x32xf32>, vector<32x8xf32>, vector<8x8xf32> -> vector<8x8xf32>
    %848 = vector.broadcast %11 : vector<1x8xf32> to vector<8x8xf32>
    %849 = arith.addf %847, %848 : vector<8x8xf32>
    %cst_463 = arith.constant dense<0xFF800000> : vector<8xf32>
    %850 = vector.multi_reduction <maximumf>, %849, %cst_463 [1] : vector<8x8xf32> to vector<8xf32>
    %851 = vector.shape_cast %850 : vector<8xf32> to vector<8x1xf32>
    %852 = vector.broadcast %851 : vector<8x1xf32> to vector<8x8xf32>
    %853 = arith.subf %849, %852 : vector<8x8xf32>
    %854 = math.exp %853 : vector<8x8xf32>
    %cst_464 = arith.constant dense<0.000000e+00> : vector<8xf32>
    %855 = vector.multi_reduction <add>, %854, %cst_464 [1] : vector<8x8xf32> to vector<8xf32>
    %856 = vector.shape_cast %855 : vector<8xf32> to vector<8x1xf32>
    %857 = tpu.reciprocal %856 {approx = true} : vector<8x1xf32> -> vector<8x1xf32>
    %858 = vector.broadcast %857 : vector<8x1xf32> to vector<8x8xf32>
    %859 = arith.mulf %854, %858 : vector<8x8xf32>
    %cst_465 = arith.constant dense<0.000000e+00> : vector<8x32xf32>
    %860 = tpu.matmul %859, %843, %cst_465 {dimension_numbers = #tpu.dot_dimension_numbers<[1], [0], [0], [1], [0, 0, 1, 1], [], []>} : vector<8x8xf32>, vector<8x32xf32>, vector<8x32xf32> -> vector<8x32xf32>
    %cst_466 = arith.constant dense<0.000000e+00> : vector<8x32xf32>
    %861 = tpu.matmul %860, %833, %cst_466 {dimension_numbers = #tpu.dot_dimension_numbers<[1], [0], [0], [1], [0, 0, 1, 1], [], []>} : vector<8x32xf32>, vector<32x32xf32>, vector<8x32xf32> -> vector<8x32xf32>
    %862 = vector.broadcast %835 : vector<1x32xf32> to vector<8x32xf32>
    %863 = arith.addf %861, %862 : vector<8x32xf32>
    %864 = arith.addf %823, %863 : vector<8x32xf32>
    %c0_467 = arith.constant 0 : index
    %c0_468 = arith.constant 0 : index
    %c0_469 = arith.constant 0 : index
    %865 = vector.load %arg39[%c0_467, %c0_468, %c0_469] : memref<2x1x32xf32, #tpu.memory_space<vmem>>, vector<1x1x32xf32>
    %866 = vector.shape_cast %865 : vector<1x1x32xf32> to vector<1x32xf32>
    %c0_470 = arith.constant 0 : index
    %c0_471 = arith.constant 0 : index
    %c0_472 = arith.constant 0 : index
    %867 = vector.load %arg38[%c0_470, %c0_471, %c0_472] : memref<2x1x32xf32, #tpu.memory_space<vmem>>, vector<1x1x32xf32>
    %868 = vector.shape_cast %867 : vector<1x1x32xf32> to vector<1x32xf32>
    %cst_473 = arith.constant dense<0.000000e+00> : vector<8xf32>
    %869 = vector.multi_reduction <add>, %864, %cst_473 [1] : vector<8x32xf32> to vector<8xf32>
    %870 = vector.shape_cast %869 : vector<8xf32> to vector<8x1xf32>
    %cst_474 = arith.constant 3.200000e+01 : f32
    %871 = vector.broadcast %cst_474 : f32 to vector<8x1xf32>
    %872 = arith.divf %870, %871 : vector<8x1xf32>
    %873 = vector.broadcast %872 : vector<8x1xf32> to vector<8x32xf32>
    %874 = arith.subf %864, %873 : vector<8x32xf32>
    %875 = arith.mulf %874, %874 : vector<8x32xf32>
    %cst_475 = arith.constant dense<0.000000e+00> : vector<8xf32>
    %876 = vector.multi_reduction <add>, %875, %cst_475 [1] : vector<8x32xf32> to vector<8xf32>
    %877 = vector.shape_cast %876 : vector<8xf32> to vector<8x1xf32>
    %cst_476 = arith.constant 3.200000e+01 : f32
    %878 = vector.broadcast %cst_476 : f32 to vector<8x1xf32>
    %879 = arith.divf %877, %878 : vector<8x1xf32>
    %880 = vector.broadcast %872 : vector<8x1xf32> to vector<8x32xf32>
    %881 = arith.subf %864, %880 : vector<8x32xf32>
    %cst_477 = arith.constant 9.99999974E-6 : f32
    %882 = vector.broadcast %cst_477 : f32 to vector<8x1xf32>
    %883 = arith.addf %879, %882 : vector<8x1xf32>
    %884 = math.rsqrt %883 : vector<8x1xf32>
    %885 = vector.broadcast %884 : vector<8x1xf32> to vector<8x32xf32>
    %886 = arith.mulf %881, %885 : vector<8x32xf32>
    %887 = vector.broadcast %866 : vector<1x32xf32> to vector<8x32xf32>
    %888 = arith.mulf %886, %887 : vector<8x32xf32>
    %889 = vector.broadcast %868 : vector<1x32xf32> to vector<8x32xf32>
    %890 = arith.addf %888, %889 : vector<8x32xf32>
    %c0_478 = arith.constant 0 : index
    %c0_479 = arith.constant 0 : index
    %c0_480 = arith.constant 0 : index
    %891 = vector.load %arg33[%c0_478, %c0_479, %c0_480] : memref<2x32x64xf32, #tpu.memory_space<vmem>>, vector<1x32x64xf32>
    %892 = vector.shape_cast %891 : vector<1x32x64xf32> to vector<32x64xf32>
    %c0_481 = arith.constant 0 : index
    %c0_482 = arith.constant 0 : index
    %c0_483 = arith.constant 0 : index
    %893 = vector.load %arg32[%c0_481, %c0_482, %c0_483] : memref<2x1x64xf32, #tpu.memory_space<vmem>>, vector<1x1x64xf32>
    %894 = vector.shape_cast %893 : vector<1x1x64xf32> to vector<1x64xf32>
    %cst_484 = arith.constant dense<0.000000e+00> : vector<8x64xf32>
    %895 = tpu.matmul %890, %892, %cst_484 {dimension_numbers = #tpu.dot_dimension_numbers<[1], [0], [0], [1], [0, 0, 1, 1], [], []>} : vector<8x32xf32>, vector<32x64xf32>, vector<8x64xf32> -> vector<8x64xf32>
    %896 = vector.broadcast %894 : vector<1x64xf32> to vector<8x64xf32>
    %897 = arith.addf %895, %896 : vector<8x64xf32>
    %cst_485 = arith.constant 5.000000e-01 : f32
    %898 = vector.broadcast %cst_485 : f32 to vector<8x64xf32>
    %899 = arith.mulf %898, %897 : vector<8x64xf32>
    %cst_486 = arith.constant 1.41421354 : f32
    %900 = vector.broadcast %cst_486 : f32 to vector<8x64xf32>
    %901 = arith.divf %897, %900 : vector<8x64xf32>
    %902 = math.erf %901 : vector<8x64xf32>
    %cst_487 = arith.constant 1.000000e+00 : f32
    %903 = vector.broadcast %cst_487 : f32 to vector<8x64xf32>
    %904 = arith.addf %903, %902 : vector<8x64xf32>
    %905 = arith.mulf %899, %904 : vector<8x64xf32>
    %c0_488 = arith.constant 0 : index
    %c0_489 = arith.constant 0 : index
    %c0_490 = arith.constant 0 : index
    %906 = vector.load %arg35[%c0_488, %c0_489, %c0_490] : memref<2x64x32xf32, #tpu.memory_space<vmem>>, vector<1x64x32xf32>
    %907 = vector.shape_cast %906 : vector<1x64x32xf32> to vector<64x32xf32>
    %c0_491 = arith.constant 0 : index
    %c0_492 = arith.constant 0 : index
    %c0_493 = arith.constant 0 : index
    %908 = vector.load %arg34[%c0_491, %c0_492, %c0_493] : memref<2x1x32xf32, #tpu.memory_space<vmem>>, vector<1x1x32xf32>
    %909 = vector.shape_cast %908 : vector<1x1x32xf32> to vector<1x32xf32>
    %cst_494 = arith.constant dense<0.000000e+00> : vector<8x32xf32>
    %910 = tpu.matmul %905, %907, %cst_494 {dimension_numbers = #tpu.dot_dimension_numbers<[1], [0], [0], [1], [0, 0, 1, 1], [], []>} : vector<8x64xf32>, vector<64x32xf32>, vector<8x32xf32> -> vector<8x32xf32>
    %911 = vector.broadcast %909 : vector<1x32xf32> to vector<8x32xf32>
    %912 = arith.addf %910, %911 : vector<8x32xf32>
    %913 = arith.addf %890, %912 : vector<8x32xf32>
    %c0_495 = arith.constant 0 : index
    %c0_496 = arith.constant 0 : index
    %c0_497 = arith.constant 0 : index
    %914 = vector.load %arg41[%c0_495, %c0_496, %c0_497] : memref<2x1x32xf32, #tpu.memory_space<vmem>>, vector<1x1x32xf32>
    %915 = vector.shape_cast %914 : vector<1x1x32xf32> to vector<1x32xf32>
    %c0_498 = arith.constant 0 : index
    %c0_499 = arith.constant 0 : index
    %c0_500 = arith.constant 0 : index
    %916 = vector.load %arg40[%c0_498, %c0_499, %c0_500] : memref<2x1x32xf32, #tpu.memory_space<vmem>>, vector<1x1x32xf32>
    %917 = vector.shape_cast %916 : vector<1x1x32xf32> to vector<1x32xf32>
    %cst_501 = arith.constant dense<0.000000e+00> : vector<8xf32>
    %918 = vector.multi_reduction <add>, %913, %cst_501 [1] : vector<8x32xf32> to vector<8xf32>
    %919 = vector.shape_cast %918 : vector<8xf32> to vector<8x1xf32>
    %cst_502 = arith.constant 3.200000e+01 : f32
    %920 = vector.broadcast %cst_502 : f32 to vector<8x1xf32>
    %921 = arith.divf %919, %920 : vector<8x1xf32>
    %922 = vector.broadcast %921 : vector<8x1xf32> to vector<8x32xf32>
    %923 = arith.subf %913, %922 : vector<8x32xf32>
    %924 = arith.mulf %923, %923 : vector<8x32xf32>
    %cst_503 = arith.constant dense<0.000000e+00> : vector<8xf32>
    %925 = vector.multi_reduction <add>, %924, %cst_503 [1] : vector<8x32xf32> to vector<8xf32>
    %926 = vector.shape_cast %925 : vector<8xf32> to vector<8x1xf32>
    %cst_504 = arith.constant 3.200000e+01 : f32
    %927 = vector.broadcast %cst_504 : f32 to vector<8x1xf32>
    %928 = arith.divf %926, %927 : vector<8x1xf32>
    %929 = vector.broadcast %921 : vector<8x1xf32> to vector<8x32xf32>
    %930 = arith.subf %913, %929 : vector<8x32xf32>
    %cst_505 = arith.constant 9.99999974E-6 : f32
    %931 = vector.broadcast %cst_505 : f32 to vector<8x1xf32>
    %932 = arith.addf %928, %931 : vector<8x1xf32>
    %933 = math.rsqrt %932 : vector<8x1xf32>
    %934 = vector.broadcast %933 : vector<8x1xf32> to vector<8x32xf32>
    %935 = arith.mulf %930, %934 : vector<8x32xf32>
    %936 = vector.broadcast %915 : vector<1x32xf32> to vector<8x32xf32>
    %937 = arith.mulf %935, %936 : vector<8x32xf32>
    %938 = vector.broadcast %917 : vector<1x32xf32> to vector<8x32xf32>
    %939 = arith.addf %937, %938 : vector<8x32xf32>
    %c1_506 = arith.constant 1 : index
    %c0_507 = arith.constant 0 : index
    %c0_508 = arith.constant 0 : index
    %940 = vector.load %arg31[%c1_506, %c0_507, %c0_508] : memref<2x32x192xf32, #tpu.memory_space<vmem>>, vector<1x32x192xf32>
    %941 = vector.shape_cast %940 : vector<1x32x192xf32> to vector<32x192xf32>
    %c1_509 = arith.constant 1 : index
    %c0_510 = arith.constant 0 : index
    %c0_511 = arith.constant 0 : index
    %942 = vector.load %arg30[%c1_509, %c0_510, %c0_511] : memref<2x1x192xf32, #tpu.memory_space<vmem>>, vector<1x1x192xf32>
    %943 = vector.shape_cast %942 : vector<1x1x192xf32> to vector<1x192xf32>
    %cst_512 = arith.constant dense<0.000000e+00> : vector<1x192xf32>
    %944 = tpu.matmul %711, %941, %cst_512 {dimension_numbers = #tpu.dot_dimension_numbers<[1], [0], [0], [1], [0, 0, 1, 1], [], []>} : vector<1x32xf32>, vector<32x192xf32>, vector<1x192xf32> -> vector<1x192xf32>
    %945 = arith.addf %944, %943 : vector<1x192xf32>
    %946 = vector.extract_strided_slice %945 {offsets = [0, 0], sizes = [1, 32], strides = [1, 1]} : vector<1x192xf32> to vector<1x32xf32>
    %947 = vector.extract_strided_slice %945 {offsets = [0, 32], sizes = [1, 32], strides = [1, 1]} : vector<1x192xf32> to vector<1x32xf32>
    %948 = vector.extract_strided_slice %945 {offsets = [0, 64], sizes = [1, 32], strides = [1, 1]} : vector<1x192xf32> to vector<1x32xf32>
    %949 = vector.extract_strided_slice %945 {offsets = [0, 96], sizes = [1, 32], strides = [1, 1]} : vector<1x192xf32> to vector<1x32xf32>
    %950 = vector.extract_strided_slice %945 {offsets = [0, 128], sizes = [1, 32], strides = [1, 1]} : vector<1x192xf32> to vector<1x32xf32>
    %951 = vector.extract_strided_slice %945 {offsets = [0, 160], sizes = [1, 32], strides = [1, 1]} : vector<1x192xf32> to vector<1x32xf32>
    %cst_513 = arith.constant 1.000000e+00 : f32
    %952 = vector.broadcast %cst_513 : f32 to vector<1x32xf32>
    %953 = arith.addf %952, %947 : vector<1x32xf32>
    %954 = vector.broadcast %953 : vector<1x32xf32> to vector<8x32xf32>
    %955 = arith.mulf %939, %954 : vector<8x32xf32>
    %956 = vector.broadcast %946 : vector<1x32xf32> to vector<8x32xf32>
    %957 = arith.addf %955, %956 : vector<8x32xf32>
    %c1_514 = arith.constant 1 : index
    %c0_515 = arith.constant 0 : index
    %c0_516 = arith.constant 0 : index
    %958 = vector.load %arg49[%c1_514, %c0_515, %c0_516] : memref<2x32x96xf32, #tpu.memory_space<vmem>>, vector<1x32x96xf32>
    %959 = vector.shape_cast %958 : vector<1x32x96xf32> to vector<32x96xf32>
    %c1_517 = arith.constant 1 : index
    %c0_518 = arith.constant 0 : index
    %c0_519 = arith.constant 0 : index
    %960 = vector.load %arg48[%c1_517, %c0_518, %c0_519] : memref<2x1x96xf32, #tpu.memory_space<vmem>>, vector<1x1x96xf32>
    %961 = vector.shape_cast %960 : vector<1x1x96xf32> to vector<1x96xf32>
    %c1_520 = arith.constant 1 : index
    %c0_521 = arith.constant 0 : index
    %c0_522 = arith.constant 0 : index
    %962 = vector.load %arg47[%c1_520, %c0_521, %c0_522] : memref<2x32x32xf32, #tpu.memory_space<vmem>>, vector<1x32x32xf32>
    %963 = vector.shape_cast %962 : vector<1x32x32xf32> to vector<32x32xf32>
    %c1_523 = arith.constant 1 : index
    %c0_524 = arith.constant 0 : index
    %c0_525 = arith.constant 0 : index
    %964 = vector.load %arg46[%c1_523, %c0_524, %c0_525] : memref<2x1x32xf32, #tpu.memory_space<vmem>>, vector<1x1x32xf32>
    %965 = vector.shape_cast %964 : vector<1x1x32xf32> to vector<1x32xf32>
    %cst_526 = arith.constant dense<0.000000e+00> : vector<8x96xf32>
    %966 = tpu.matmul %957, %959, %cst_526 {dimension_numbers = #tpu.dot_dimension_numbers<[1], [0], [0], [1], [0, 0, 1, 1], [], []>} : vector<8x32xf32>, vector<32x96xf32>, vector<8x96xf32> -> vector<8x96xf32>
    %967 = vector.broadcast %961 : vector<1x96xf32> to vector<8x96xf32>
    %968 = arith.addf %966, %967 : vector<8x96xf32>
    %969 = vector.extract_strided_slice %968 {offsets = [0, 0], sizes = [8, 32], strides = [1, 1]} : vector<8x96xf32> to vector<8x32xf32>
    %970 = vector.extract_strided_slice %968 {offsets = [0, 32], sizes = [8, 32], strides = [1, 1]} : vector<8x96xf32> to vector<8x32xf32>
    %971 = vector.extract_strided_slice %968 {offsets = [0, 64], sizes = [8, 32], strides = [1, 1]} : vector<8x96xf32> to vector<8x32xf32>
    %cst_527 = arith.constant 0.176776692 : f32
    %972 = vector.broadcast %cst_527 : f32 to vector<8x32xf32>
    %973 = arith.mulf %969, %972 : vector<8x32xf32>
    %974 = tpu.transpose %970, [1, 0] : vector<8x32xf32> -> vector<32x8xf32>
    %cst_528 = arith.constant dense<0.000000e+00> : vector<8x8xf32>
    %975 = tpu.matmul %973, %974, %cst_528 {dimension_numbers = #tpu.dot_dimension_numbers<[1], [0], [0], [1], [0, 0, 1, 1], [], []>} : vector<8x32xf32>, vector<32x8xf32>, vector<8x8xf32> -> vector<8x8xf32>
    %976 = vector.broadcast %17 : vector<1x8xf32> to vector<8x8xf32>
    %977 = arith.addf %975, %976 : vector<8x8xf32>
    %cst_529 = arith.constant dense<0xFF800000> : vector<8xf32>
    %978 = vector.multi_reduction <maximumf>, %977, %cst_529 [1] : vector<8x8xf32> to vector<8xf32>
    %979 = vector.shape_cast %978 : vector<8xf32> to vector<8x1xf32>
    %980 = vector.broadcast %979 : vector<8x1xf32> to vector<8x8xf32>
    %981 = arith.subf %977, %980 : vector<8x8xf32>
    %982 = math.exp %981 : vector<8x8xf32>
    %cst_530 = arith.constant dense<0.000000e+00> : vector<8xf32>
    %983 = vector.multi_reduction <add>, %982, %cst_530 [1] : vector<8x8xf32> to vector<8xf32>
    %984 = vector.shape_cast %983 : vector<8xf32> to vector<8x1xf32>
    %985 = tpu.reciprocal %984 {approx = true} : vector<8x1xf32> -> vector<8x1xf32>
    %986 = vector.broadcast %985 : vector<8x1xf32> to vector<8x8xf32>
    %987 = arith.mulf %982, %986 : vector<8x8xf32>
    %cst_531 = arith.constant dense<0.000000e+00> : vector<8x32xf32>
    %988 = tpu.matmul %987, %971, %cst_531 {dimension_numbers = #tpu.dot_dimension_numbers<[1], [0], [0], [1], [0, 0, 1, 1], [], []>} : vector<8x8xf32>, vector<8x32xf32>, vector<8x32xf32> -> vector<8x32xf32>
    %cst_532 = arith.constant dense<0.000000e+00> : vector<8x32xf32>
    %989 = tpu.matmul %988, %963, %cst_532 {dimension_numbers = #tpu.dot_dimension_numbers<[1], [0], [0], [1], [0, 0, 1, 1], [], []>} : vector<8x32xf32>, vector<32x32xf32>, vector<8x32xf32> -> vector<8x32xf32>
    %990 = vector.broadcast %965 : vector<1x32xf32> to vector<8x32xf32>
    %991 = arith.addf %989, %990 : vector<8x32xf32>
    %992 = vector.broadcast %948 : vector<1x32xf32> to vector<8x32xf32>
    %993 = arith.mulf %992, %991 : vector<8x32xf32>
    %994 = arith.addf %939, %993 : vector<8x32xf32>
    %cst_533 = arith.constant 1.000000e+00 : f32
    %995 = vector.broadcast %cst_533 : f32 to vector<1x32xf32>
    %996 = arith.addf %995, %950 : vector<1x32xf32>
    %997 = vector.broadcast %996 : vector<1x32xf32> to vector<8x32xf32>
    %998 = arith.mulf %994, %997 : vector<8x32xf32>
    %999 = vector.broadcast %949 : vector<1x32xf32> to vector<8x32xf32>
    %1000 = arith.addf %998, %999 : vector<8x32xf32>
    %c1_534 = arith.constant 1 : index
    %c0_535 = arith.constant 0 : index
    %c0_536 = arith.constant 0 : index
    %1001 = vector.load %arg43[%c1_534, %c0_535, %c0_536] : memref<2x32x64xf32, #tpu.memory_space<vmem>>, vector<1x32x64xf32>
    %1002 = vector.shape_cast %1001 : vector<1x32x64xf32> to vector<32x64xf32>
    %c1_537 = arith.constant 1 : index
    %c0_538 = arith.constant 0 : index
    %c0_539 = arith.constant 0 : index
    %1003 = vector.load %arg42[%c1_537, %c0_538, %c0_539] : memref<2x1x64xf32, #tpu.memory_space<vmem>>, vector<1x1x64xf32>
    %1004 = vector.shape_cast %1003 : vector<1x1x64xf32> to vector<1x64xf32>
    %cst_540 = arith.constant dense<0.000000e+00> : vector<8x64xf32>
    %1005 = tpu.matmul %1000, %1002, %cst_540 {dimension_numbers = #tpu.dot_dimension_numbers<[1], [0], [0], [1], [0, 0, 1, 1], [], []>} : vector<8x32xf32>, vector<32x64xf32>, vector<8x64xf32> -> vector<8x64xf32>
    %1006 = vector.broadcast %1004 : vector<1x64xf32> to vector<8x64xf32>
    %1007 = arith.addf %1005, %1006 : vector<8x64xf32>
    %cst_541 = arith.constant 5.000000e-01 : f32
    %1008 = vector.broadcast %cst_541 : f32 to vector<8x64xf32>
    %1009 = arith.mulf %1008, %1007 : vector<8x64xf32>
    %cst_542 = arith.constant 1.41421354 : f32
    %1010 = vector.broadcast %cst_542 : f32 to vector<8x64xf32>
    %1011 = arith.divf %1007, %1010 : vector<8x64xf32>
    %1012 = math.erf %1011 : vector<8x64xf32>
    %cst_543 = arith.constant 1.000000e+00 : f32
    %1013 = vector.broadcast %cst_543 : f32 to vector<8x64xf32>
    %1014 = arith.addf %1013, %1012 : vector<8x64xf32>
    %1015 = arith.mulf %1009, %1014 : vector<8x64xf32>
    %c1_544 = arith.constant 1 : index
    %c0_545 = arith.constant 0 : index
    %c0_546 = arith.constant 0 : index
    %1016 = vector.load %arg45[%c1_544, %c0_545, %c0_546] : memref<2x64x32xf32, #tpu.memory_space<vmem>>, vector<1x64x32xf32>
    %1017 = vector.shape_cast %1016 : vector<1x64x32xf32> to vector<64x32xf32>
    %c1_547 = arith.constant 1 : index
    %c0_548 = arith.constant 0 : index
    %c0_549 = arith.constant 0 : index
    %1018 = vector.load %arg44[%c1_547, %c0_548, %c0_549] : memref<2x1x32xf32, #tpu.memory_space<vmem>>, vector<1x1x32xf32>
    %1019 = vector.shape_cast %1018 : vector<1x1x32xf32> to vector<1x32xf32>
    %cst_550 = arith.constant dense<0.000000e+00> : vector<8x32xf32>
    %1020 = tpu.matmul %1015, %1017, %cst_550 {dimension_numbers = #tpu.dot_dimension_numbers<[1], [0], [0], [1], [0, 0, 1, 1], [], []>} : vector<8x64xf32>, vector<64x32xf32>, vector<8x32xf32> -> vector<8x32xf32>
    %1021 = vector.broadcast %1019 : vector<1x32xf32> to vector<8x32xf32>
    %1022 = arith.addf %1020, %1021 : vector<8x32xf32>
    %1023 = vector.broadcast %951 : vector<1x32xf32> to vector<8x32xf32>
    %1024 = arith.mulf %1023, %1022 : vector<8x32xf32>
    %1025 = arith.addf %939, %1024 : vector<8x32xf32>
    %c1_551 = arith.constant 1 : index
    %c0_552 = arith.constant 0 : index
    %c0_553 = arith.constant 0 : index
    %1026 = vector.load %arg37[%c1_551, %c0_552, %c0_553] : memref<2x1x32xf32, #tpu.memory_space<vmem>>, vector<1x1x32xf32>
    %1027 = vector.shape_cast %1026 : vector<1x1x32xf32> to vector<1x32xf32>
    %c1_554 = arith.constant 1 : index
    %c0_555 = arith.constant 0 : index
    %c0_556 = arith.constant 0 : index
    %1028 = vector.load %arg36[%c1_554, %c0_555, %c0_556] : memref<2x1x32xf32, #tpu.memory_space<vmem>>, vector<1x1x32xf32>
    %1029 = vector.shape_cast %1028 : vector<1x1x32xf32> to vector<1x32xf32>
    %cst_557 = arith.constant dense<0.000000e+00> : vector<8xf32>
    %1030 = vector.multi_reduction <add>, %1025, %cst_557 [1] : vector<8x32xf32> to vector<8xf32>
    %1031 = vector.shape_cast %1030 : vector<8xf32> to vector<8x1xf32>
    %cst_558 = arith.constant 3.200000e+01 : f32
    %1032 = vector.broadcast %cst_558 : f32 to vector<8x1xf32>
    %1033 = arith.divf %1031, %1032 : vector<8x1xf32>
    %1034 = vector.broadcast %1033 : vector<8x1xf32> to vector<8x32xf32>
    %1035 = arith.subf %1025, %1034 : vector<8x32xf32>
    %1036 = arith.mulf %1035, %1035 : vector<8x32xf32>
    %cst_559 = arith.constant dense<0.000000e+00> : vector<8xf32>
    %1037 = vector.multi_reduction <add>, %1036, %cst_559 [1] : vector<8x32xf32> to vector<8xf32>
    %1038 = vector.shape_cast %1037 : vector<8xf32> to vector<8x1xf32>
    %cst_560 = arith.constant 3.200000e+01 : f32
    %1039 = vector.broadcast %cst_560 : f32 to vector<8x1xf32>
    %1040 = arith.divf %1038, %1039 : vector<8x1xf32>
    %1041 = vector.broadcast %1033 : vector<8x1xf32> to vector<8x32xf32>
    %1042 = arith.subf %1025, %1041 : vector<8x32xf32>
    %cst_561 = arith.constant 9.99999974E-6 : f32
    %1043 = vector.broadcast %cst_561 : f32 to vector<8x1xf32>
    %1044 = arith.addf %1040, %1043 : vector<8x1xf32>
    %1045 = math.rsqrt %1044 : vector<8x1xf32>
    %1046 = vector.broadcast %1045 : vector<8x1xf32> to vector<8x32xf32>
    %1047 = arith.mulf %1042, %1046 : vector<8x32xf32>
    %1048 = vector.broadcast %1027 : vector<1x32xf32> to vector<8x32xf32>
    %1049 = arith.mulf %1047, %1048 : vector<8x32xf32>
    %1050 = vector.broadcast %1029 : vector<1x32xf32> to vector<8x32xf32>
    %1051 = arith.addf %1049, %1050 : vector<8x32xf32>
    %c1_562 = arith.constant 1 : index
    %c0_563 = arith.constant 0 : index
    %c0_564 = arith.constant 0 : index
    %1052 = vector.load %arg55[%c1_562, %c0_563, %c0_564] : memref<2x32x32xf32, #tpu.memory_space<vmem>>, vector<1x32x32xf32>
    %1053 = vector.shape_cast %1052 : vector<1x32x32xf32> to vector<32x32xf32>
    %c1_565 = arith.constant 1 : index
    %c0_566 = arith.constant 0 : index
    %c0_567 = arith.constant 0 : index
    %1054 = vector.load %arg54[%c1_565, %c0_566, %c0_567] : memref<2x1x32xf32, #tpu.memory_space<vmem>>, vector<1x1x32xf32>
    %1055 = vector.shape_cast %1054 : vector<1x1x32xf32> to vector<1x32xf32>
    %c1_568 = arith.constant 1 : index
    %c0_569 = arith.constant 0 : index
    %c0_570 = arith.constant 0 : index
    %1056 = vector.load %arg51[%c1_568, %c0_569, %c0_570] : memref<2x32x64xf32, #tpu.memory_space<vmem>>, vector<1x32x64xf32>
    %1057 = vector.shape_cast %1056 : vector<1x32x64xf32> to vector<32x64xf32>
    %c1_571 = arith.constant 1 : index
    %c0_572 = arith.constant 0 : index
    %c0_573 = arith.constant 0 : index
    %1058 = vector.load %arg50[%c1_571, %c0_572, %c0_573] : memref<2x1x64xf32, #tpu.memory_space<vmem>>, vector<1x1x64xf32>
    %1059 = vector.shape_cast %1058 : vector<1x1x64xf32> to vector<1x64xf32>
    %c1_574 = arith.constant 1 : index
    %c0_575 = arith.constant 0 : index
    %c0_576 = arith.constant 0 : index
    %1060 = vector.load %arg53[%c1_574, %c0_575, %c0_576] : memref<2x32x32xf32, #tpu.memory_space<vmem>>, vector<1x32x32xf32>
    %1061 = vector.shape_cast %1060 : vector<1x32x32xf32> to vector<32x32xf32>
    %c1_577 = arith.constant 1 : index
    %c0_578 = arith.constant 0 : index
    %c0_579 = arith.constant 0 : index
    %1062 = vector.load %arg52[%c1_577, %c0_578, %c0_579] : memref<2x1x32xf32, #tpu.memory_space<vmem>>, vector<1x1x32xf32>
    %1063 = vector.shape_cast %1062 : vector<1x1x32xf32> to vector<1x32xf32>
    %cst_580 = arith.constant dense<0.000000e+00> : vector<8x32xf32>
    %1064 = tpu.matmul %1051, %1053, %cst_580 {dimension_numbers = #tpu.dot_dimension_numbers<[1], [0], [0], [1], [0, 0, 1, 1], [], []>} : vector<8x32xf32>, vector<32x32xf32>, vector<8x32xf32> -> vector<8x32xf32>
    %1065 = vector.broadcast %1055 : vector<1x32xf32> to vector<8x32xf32>
    %1066 = arith.addf %1064, %1065 : vector<8x32xf32>
    %cst_581 = arith.constant dense<0.000000e+00> : vector<8x64xf32>
    %1067 = tpu.matmul %326, %1057, %cst_581 {dimension_numbers = #tpu.dot_dimension_numbers<[1], [0], [0], [1], [0, 0, 1, 1], [], []>} : vector<8x32xf32>, vector<32x64xf32>, vector<8x64xf32> -> vector<8x64xf32>
    %1068 = vector.broadcast %1059 : vector<1x64xf32> to vector<8x64xf32>
    %1069 = arith.addf %1067, %1068 : vector<8x64xf32>
    %1070 = vector.extract_strided_slice %1069 {offsets = [0, 0], sizes = [8, 32], strides = [1, 1]} : vector<8x64xf32> to vector<8x32xf32>
    %1071 = vector.extract_strided_slice %1069 {offsets = [0, 32], sizes = [8, 32], strides = [1, 1]} : vector<8x64xf32> to vector<8x32xf32>
    %cst_582 = arith.constant 0.176776692 : f32
    %1072 = vector.broadcast %cst_582 : f32 to vector<8x32xf32>
    %1073 = arith.mulf %1066, %1072 : vector<8x32xf32>
    %1074 = tpu.transpose %1070, [1, 0] : vector<8x32xf32> -> vector<32x8xf32>
    %cst_583 = arith.constant dense<0.000000e+00> : vector<8x8xf32>
    %1075 = tpu.matmul %1073, %1074, %cst_583 {dimension_numbers = #tpu.dot_dimension_numbers<[1], [0], [0], [1], [0, 0, 1, 1], [], []>} : vector<8x32xf32>, vector<32x8xf32>, vector<8x8xf32> -> vector<8x8xf32>
    %1076 = vector.broadcast %11 : vector<1x8xf32> to vector<8x8xf32>
    %1077 = arith.addf %1075, %1076 : vector<8x8xf32>
    %cst_584 = arith.constant dense<0xFF800000> : vector<8xf32>
    %1078 = vector.multi_reduction <maximumf>, %1077, %cst_584 [1] : vector<8x8xf32> to vector<8xf32>
    %1079 = vector.shape_cast %1078 : vector<8xf32> to vector<8x1xf32>
    %1080 = vector.broadcast %1079 : vector<8x1xf32> to vector<8x8xf32>
    %1081 = arith.subf %1077, %1080 : vector<8x8xf32>
    %1082 = math.exp %1081 : vector<8x8xf32>
    %cst_585 = arith.constant dense<0.000000e+00> : vector<8xf32>
    %1083 = vector.multi_reduction <add>, %1082, %cst_585 [1] : vector<8x8xf32> to vector<8xf32>
    %1084 = vector.shape_cast %1083 : vector<8xf32> to vector<8x1xf32>
    %1085 = tpu.reciprocal %1084 {approx = true} : vector<8x1xf32> -> vector<8x1xf32>
    %1086 = vector.broadcast %1085 : vector<8x1xf32> to vector<8x8xf32>
    %1087 = arith.mulf %1082, %1086 : vector<8x8xf32>
    %cst_586 = arith.constant dense<0.000000e+00> : vector<8x32xf32>
    %1088 = tpu.matmul %1087, %1071, %cst_586 {dimension_numbers = #tpu.dot_dimension_numbers<[1], [0], [0], [1], [0, 0, 1, 1], [], []>} : vector<8x8xf32>, vector<8x32xf32>, vector<8x32xf32> -> vector<8x32xf32>
    %cst_587 = arith.constant dense<0.000000e+00> : vector<8x32xf32>
    %1089 = tpu.matmul %1088, %1061, %cst_587 {dimension_numbers = #tpu.dot_dimension_numbers<[1], [0], [0], [1], [0, 0, 1, 1], [], []>} : vector<8x32xf32>, vector<32x32xf32>, vector<8x32xf32> -> vector<8x32xf32>
    %1090 = vector.broadcast %1063 : vector<1x32xf32> to vector<8x32xf32>
    %1091 = arith.addf %1089, %1090 : vector<8x32xf32>
    %1092 = arith.addf %1051, %1091 : vector<8x32xf32>
    %c1_588 = arith.constant 1 : index
    %c0_589 = arith.constant 0 : index
    %c0_590 = arith.constant 0 : index
    %1093 = vector.load %arg39[%c1_588, %c0_589, %c0_590] : memref<2x1x32xf32, #tpu.memory_space<vmem>>, vector<1x1x32xf32>
    %1094 = vector.shape_cast %1093 : vector<1x1x32xf32> to vector<1x32xf32>
    %c1_591 = arith.constant 1 : index
    %c0_592 = arith.constant 0 : index
    %c0_593 = arith.constant 0 : index
    %1095 = vector.load %arg38[%c1_591, %c0_592, %c0_593] : memref<2x1x32xf32, #tpu.memory_space<vmem>>, vector<1x1x32xf32>
    %1096 = vector.shape_cast %1095 : vector<1x1x32xf32> to vector<1x32xf32>
    %cst_594 = arith.constant dense<0.000000e+00> : vector<8xf32>
    %1097 = vector.multi_reduction <add>, %1092, %cst_594 [1] : vector<8x32xf32> to vector<8xf32>
    %1098 = vector.shape_cast %1097 : vector<8xf32> to vector<8x1xf32>
    %cst_595 = arith.constant 3.200000e+01 : f32
    %1099 = vector.broadcast %cst_595 : f32 to vector<8x1xf32>
    %1100 = arith.divf %1098, %1099 : vector<8x1xf32>
    %1101 = vector.broadcast %1100 : vector<8x1xf32> to vector<8x32xf32>
    %1102 = arith.subf %1092, %1101 : vector<8x32xf32>
    %1103 = arith.mulf %1102, %1102 : vector<8x32xf32>
    %cst_596 = arith.constant dense<0.000000e+00> : vector<8xf32>
    %1104 = vector.multi_reduction <add>, %1103, %cst_596 [1] : vector<8x32xf32> to vector<8xf32>
    %1105 = vector.shape_cast %1104 : vector<8xf32> to vector<8x1xf32>
    %cst_597 = arith.constant 3.200000e+01 : f32
    %1106 = vector.broadcast %cst_597 : f32 to vector<8x1xf32>
    %1107 = arith.divf %1105, %1106 : vector<8x1xf32>
    %1108 = vector.broadcast %1100 : vector<8x1xf32> to vector<8x32xf32>
    %1109 = arith.subf %1092, %1108 : vector<8x32xf32>
    %cst_598 = arith.constant 9.99999974E-6 : f32
    %1110 = vector.broadcast %cst_598 : f32 to vector<8x1xf32>
    %1111 = arith.addf %1107, %1110 : vector<8x1xf32>
    %1112 = math.rsqrt %1111 : vector<8x1xf32>
    %1113 = vector.broadcast %1112 : vector<8x1xf32> to vector<8x32xf32>
    %1114 = arith.mulf %1109, %1113 : vector<8x32xf32>
    %1115 = vector.broadcast %1094 : vector<1x32xf32> to vector<8x32xf32>
    %1116 = arith.mulf %1114, %1115 : vector<8x32xf32>
    %1117 = vector.broadcast %1096 : vector<1x32xf32> to vector<8x32xf32>
    %1118 = arith.addf %1116, %1117 : vector<8x32xf32>
    %c1_599 = arith.constant 1 : index
    %c0_600 = arith.constant 0 : index
    %c0_601 = arith.constant 0 : index
    %1119 = vector.load %arg33[%c1_599, %c0_600, %c0_601] : memref<2x32x64xf32, #tpu.memory_space<vmem>>, vector<1x32x64xf32>
    %1120 = vector.shape_cast %1119 : vector<1x32x64xf32> to vector<32x64xf32>
    %c1_602 = arith.constant 1 : index
    %c0_603 = arith.constant 0 : index
    %c0_604 = arith.constant 0 : index
    %1121 = vector.load %arg32[%c1_602, %c0_603, %c0_604] : memref<2x1x64xf32, #tpu.memory_space<vmem>>, vector<1x1x64xf32>
    %1122 = vector.shape_cast %1121 : vector<1x1x64xf32> to vector<1x64xf32>
    %cst_605 = arith.constant dense<0.000000e+00> : vector<8x64xf32>
    %1123 = tpu.matmul %1118, %1120, %cst_605 {dimension_numbers = #tpu.dot_dimension_numbers<[1], [0], [0], [1], [0, 0, 1, 1], [], []>} : vector<8x32xf32>, vector<32x64xf32>, vector<8x64xf32> -> vector<8x64xf32>
    %1124 = vector.broadcast %1122 : vector<1x64xf32> to vector<8x64xf32>
    %1125 = arith.addf %1123, %1124 : vector<8x64xf32>
    %cst_606 = arith.constant 5.000000e-01 : f32
    %1126 = vector.broadcast %cst_606 : f32 to vector<8x64xf32>
    %1127 = arith.mulf %1126, %1125 : vector<8x64xf32>
    %cst_607 = arith.constant 1.41421354 : f32
    %1128 = vector.broadcast %cst_607 : f32 to vector<8x64xf32>
    %1129 = arith.divf %1125, %1128 : vector<8x64xf32>
    %1130 = math.erf %1129 : vector<8x64xf32>
    %cst_608 = arith.constant 1.000000e+00 : f32
    %1131 = vector.broadcast %cst_608 : f32 to vector<8x64xf32>
    %1132 = arith.addf %1131, %1130 : vector<8x64xf32>
    %1133 = arith.mulf %1127, %1132 : vector<8x64xf32>
    %c1_609 = arith.constant 1 : index
    %c0_610 = arith.constant 0 : index
    %c0_611 = arith.constant 0 : index
    %1134 = vector.load %arg35[%c1_609, %c0_610, %c0_611] : memref<2x64x32xf32, #tpu.memory_space<vmem>>, vector<1x64x32xf32>
    %1135 = vector.shape_cast %1134 : vector<1x64x32xf32> to vector<64x32xf32>
    %c1_612 = arith.constant 1 : index
    %c0_613 = arith.constant 0 : index
    %c0_614 = arith.constant 0 : index
    %1136 = vector.load %arg34[%c1_612, %c0_613, %c0_614] : memref<2x1x32xf32, #tpu.memory_space<vmem>>, vector<1x1x32xf32>
    %1137 = vector.shape_cast %1136 : vector<1x1x32xf32> to vector<1x32xf32>
    %cst_615 = arith.constant dense<0.000000e+00> : vector<8x32xf32>
    %1138 = tpu.matmul %1133, %1135, %cst_615 {dimension_numbers = #tpu.dot_dimension_numbers<[1], [0], [0], [1], [0, 0, 1, 1], [], []>} : vector<8x64xf32>, vector<64x32xf32>, vector<8x32xf32> -> vector<8x32xf32>
    %1139 = vector.broadcast %1137 : vector<1x32xf32> to vector<8x32xf32>
    %1140 = arith.addf %1138, %1139 : vector<8x32xf32>
    %1141 = arith.addf %1118, %1140 : vector<8x32xf32>
    %c1_616 = arith.constant 1 : index
    %c0_617 = arith.constant 0 : index
    %c0_618 = arith.constant 0 : index
    %1142 = vector.load %arg41[%c1_616, %c0_617, %c0_618] : memref<2x1x32xf32, #tpu.memory_space<vmem>>, vector<1x1x32xf32>
    %1143 = vector.shape_cast %1142 : vector<1x1x32xf32> to vector<1x32xf32>
    %c1_619 = arith.constant 1 : index
    %c0_620 = arith.constant 0 : index
    %c0_621 = arith.constant 0 : index
    %1144 = vector.load %arg40[%c1_619, %c0_620, %c0_621] : memref<2x1x32xf32, #tpu.memory_space<vmem>>, vector<1x1x32xf32>
    %1145 = vector.shape_cast %1144 : vector<1x1x32xf32> to vector<1x32xf32>
    %cst_622 = arith.constant dense<0.000000e+00> : vector<8xf32>
    %1146 = vector.multi_reduction <add>, %1141, %cst_622 [1] : vector<8x32xf32> to vector<8xf32>
    %1147 = vector.shape_cast %1146 : vector<8xf32> to vector<8x1xf32>
    %cst_623 = arith.constant 3.200000e+01 : f32
    %1148 = vector.broadcast %cst_623 : f32 to vector<8x1xf32>
    %1149 = arith.divf %1147, %1148 : vector<8x1xf32>
    %1150 = vector.broadcast %1149 : vector<8x1xf32> to vector<8x32xf32>
    %1151 = arith.subf %1141, %1150 : vector<8x32xf32>
    %1152 = arith.mulf %1151, %1151 : vector<8x32xf32>
    %cst_624 = arith.constant dense<0.000000e+00> : vector<8xf32>
    %1153 = vector.multi_reduction <add>, %1152, %cst_624 [1] : vector<8x32xf32> to vector<8xf32>
    %1154 = vector.shape_cast %1153 : vector<8xf32> to vector<8x1xf32>
    %cst_625 = arith.constant 3.200000e+01 : f32
    %1155 = vector.broadcast %cst_625 : f32 to vector<8x1xf32>
    %1156 = arith.divf %1154, %1155 : vector<8x1xf32>
    %1157 = vector.broadcast %1149 : vector<8x1xf32> to vector<8x32xf32>
    %1158 = arith.subf %1141, %1157 : vector<8x32xf32>
    %cst_626 = arith.constant 9.99999974E-6 : f32
    %1159 = vector.broadcast %cst_626 : f32 to vector<8x1xf32>
    %1160 = arith.addf %1156, %1159 : vector<8x1xf32>
    %1161 = math.rsqrt %1160 : vector<8x1xf32>
    %1162 = vector.broadcast %1161 : vector<8x1xf32> to vector<8x32xf32>
    %1163 = arith.mulf %1158, %1162 : vector<8x32xf32>
    %1164 = vector.broadcast %1143 : vector<1x32xf32> to vector<8x32xf32>
    %1165 = arith.mulf %1163, %1164 : vector<8x32xf32>
    %1166 = vector.broadcast %1145 : vector<1x32xf32> to vector<8x32xf32>
    %1167 = arith.addf %1165, %1166 : vector<8x32xf32>
    %c0_627 = arith.constant 0 : index
    %c0_628 = arith.constant 0 : index
    %1168 = vector.load %arg57[%c0_627, %c0_628] : memref<32x32xf32, #tpu.memory_space<vmem>>, vector<32x32xf32>
    %c0_629 = arith.constant 0 : index
    %c0_630 = arith.constant 0 : index
    %1169 = vector.load %arg56[%c0_629, %c0_630] : memref<1x32xf32, #tpu.memory_space<vmem>>, vector<1x32xf32>
    %cst_631 = arith.constant dense<0.000000e+00> : vector<8x32xf32>
    %1170 = tpu.matmul %1167, %1168, %cst_631 {dimension_numbers = #tpu.dot_dimension_numbers<[1], [0], [0], [1], [0, 0, 1, 1], [], []>} : vector<8x32xf32>, vector<32x32xf32>, vector<8x32xf32> -> vector<8x32xf32>
    %1171 = vector.broadcast %1169 : vector<1x32xf32> to vector<8x32xf32>
    %1172 = arith.addf %1170, %1171 : vector<8x32xf32>
    %1173 = math.tanh %1172 : vector<8x32xf32>
    %c0_632 = arith.constant 0 : index
    %c0_633 = arith.constant 0 : index
    %1174 = vector.load %arg59[%c0_632, %c0_633] : memref<32x8xf32, #tpu.memory_space<vmem>>, vector<32x8xf32>
    %c0_634 = arith.constant 0 : index
    %c0_635 = arith.constant 0 : index
    %1175 = vector.load %arg58[%c0_634, %c0_635] : memref<1x8xf32, #tpu.memory_space<vmem>>, vector<1x8xf32>
    %cst_636 = arith.constant dense<0.000000e+00> : vector<8x8xf32>
    %1176 = tpu.matmul %1173, %1174, %cst_636 {dimension_numbers = #tpu.dot_dimension_numbers<[1], [0], [0], [1], [0, 0, 1, 1], [], []>} : vector<8x32xf32>, vector<32x8xf32>, vector<8x8xf32> -> vector<8x8xf32>
    %1177 = vector.broadcast %1175 : vector<1x8xf32> to vector<8x8xf32>
    %1178 = arith.addf %1176, %1177 : vector<8x8xf32>
    %c0_637 = arith.constant 0 : index
    %c0_638 = arith.constant 0 : index
    %c0_639 = arith.constant 0 : index
    %1179 = vector.load %arg88[%c0_637, %c0_638, %c0_639] : memref<1x8x8xf32, #tpu.memory_space<vmem>>, vector<1x8x8xf32>
    %1180 = vector.shape_cast %1179 : vector<1x8x8xf32> to vector<8x8xf32>
    %1181 = vector.shape_cast %1178 : vector<8x8xf32> to vector<1x8x8xf32>
    tpu.vector_store %arg88[%c0_637, %c0_638, %c0_639], %1181 {strides = array<i32>} : memref<1x8x8xf32, #tpu.memory_space<vmem>>, vector<1x8x8xf32>,
    return
  }
  func.func @transform_0(%arg0: i32) -> (i32, i32, i32) {
    %c0_i32 = arith.constant 0 : i32
    %c0_i32_0 = arith.constant 0 : i32
    %c0_i32_1 = arith.constant 0 : i32
    return %arg0, %c0_i32, %c0_i32_0 : i32, i32, i32
  }
  func.func @transform_1(%arg0: i32) -> (i32, i32, i32) {
    %c0_i32 = arith.constant 0 : i32
    %c0_i32_0 = arith.constant 0 : i32
    %c0_i32_1 = arith.constant 0 : i32
    return %arg0, %c0_i32, %c0_i32_0 : i32, i32, i32
  }
  func.func @transform_2(%arg0: i32) -> (i32, i32, i32) {
    %c0_i32 = arith.constant 0 : i32
    %c0_i32_0 = arith.constant 0 : i32
    %c0_i32_1 = arith.constant 0 : i32
    return %arg0, %c0_i32, %c0_i32_0 : i32, i32, i32
  }
  func.func @transform_3(%arg0: i32) -> (i32, i32, i32) {
    %c0_i32 = arith.constant 0 : i32
    %c0_i32_0 = arith.constant 0 : i32
    %c0_i32_1 = arith.constant 0 : i32
    return %arg0, %c0_i32, %c0_i32_0 : i32, i32, i32
  }
  func.func @transform_4(%arg0: i32) -> (i32, i32, i32) {
    %c0_i32 = arith.constant 0 : i32
    %c0_i32_0 = arith.constant 0 : i32
    %c0_i32_1 = arith.constant 0 : i32
    return %arg0, %c0_i32, %c0_i32_0 : i32, i32, i32
  }
  func.func @transform_5(%arg0: i32) -> (i32, i32) {
    %c0_i32 = arith.constant 0 : i32
    %c0_i32_0 = arith.constant 0 : i32
    %c0_i32_1 = arith.constant 0 : i32
    return %c0_i32, %c0_i32_0 : i32, i32
  }
  func.func @transform_6(%arg0: i32) -> (i32, i32) {
    %c0_i32 = arith.constant 0 : i32
    %c0_i32_0 = arith.constant 0 : i32
    %c0_i32_1 = arith.constant 0 : i32
    return %c0_i32, %c0_i32_0 : i32, i32
  }
  func.func @transform_7(%arg0: i32) -> (i32, i32, i32) {
    %c0_i32 = arith.constant 0 : i32
    %c0_i32_0 = arith.constant 0 : i32
    %c0_i32_1 = arith.constant 0 : i32
    %c0_i32_2 = arith.constant 0 : i32
    return %c0_i32, %c0_i32_0, %c0_i32_1 : i32, i32, i32
  }
  func.func @transform_8(%arg0: i32) -> (i32, i32, i32) {
    %c0_i32 = arith.constant 0 : i32
    %c0_i32_0 = arith.constant 0 : i32
    %c0_i32_1 = arith.constant 0 : i32
    %c0_i32_2 = arith.constant 0 : i32
    return %c0_i32, %c0_i32_0, %c0_i32_1 : i32, i32, i32
  }
  func.func @transform_9(%arg0: i32) -> (i32, i32, i32) {
    %c0_i32 = arith.constant 0 : i32
    %c0_i32_0 = arith.constant 0 : i32
    %c0_i32_1 = arith.constant 0 : i32
    %c0_i32_2 = arith.constant 0 : i32
    return %c0_i32, %c0_i32_0, %c0_i32_1 : i32, i32, i32
  }
  func.func @transform_10(%arg0: i32) -> (i32, i32, i32) {
    %c0_i32 = arith.constant 0 : i32
    %c0_i32_0 = arith.constant 0 : i32
    %c0_i32_1 = arith.constant 0 : i32
    %c0_i32_2 = arith.constant 0 : i32
    return %c0_i32, %c0_i32_0, %c0_i32_1 : i32, i32, i32
  }
  func.func @transform_11(%arg0: i32) -> (i32, i32, i32) {
    %c0_i32 = arith.constant 0 : i32
    %c0_i32_0 = arith.constant 0 : i32
    %c0_i32_1 = arith.constant 0 : i32
    %c0_i32_2 = arith.constant 0 : i32
    return %c0_i32, %c0_i32_0, %c0_i32_1 : i32, i32, i32
  }
  func.func @transform_12(%arg0: i32) -> (i32, i32, i32) {
    %c0_i32 = arith.constant 0 : i32
    %c0_i32_0 = arith.constant 0 : i32
    %c0_i32_1 = arith.constant 0 : i32
    %c0_i32_2 = arith.constant 0 : i32
    return %c0_i32, %c0_i32_0, %c0_i32_1 : i32, i32, i32
  }
  func.func @transform_13(%arg0: i32) -> (i32, i32, i32) {
    %c0_i32 = arith.constant 0 : i32
    %c0_i32_0 = arith.constant 0 : i32
    %c0_i32_1 = arith.constant 0 : i32
    %c0_i32_2 = arith.constant 0 : i32
    return %c0_i32, %c0_i32_0, %c0_i32_1 : i32, i32, i32
  }
  func.func @transform_14(%arg0: i32) -> (i32, i32, i32) {
    %c0_i32 = arith.constant 0 : i32
    %c0_i32_0 = arith.constant 0 : i32
    %c0_i32_1 = arith.constant 0 : i32
    %c0_i32_2 = arith.constant 0 : i32
    return %c0_i32, %c0_i32_0, %c0_i32_1 : i32, i32, i32
  }
  func.func @transform_15(%arg0: i32) -> (i32, i32, i32) {
    %c0_i32 = arith.constant 0 : i32
    %c0_i32_0 = arith.constant 0 : i32
    %c0_i32_1 = arith.constant 0 : i32
    %c0_i32_2 = arith.constant 0 : i32
    return %c0_i32, %c0_i32_0, %c0_i32_1 : i32, i32, i32
  }
  func.func @transform_16(%arg0: i32) -> (i32, i32, i32) {
    %c0_i32 = arith.constant 0 : i32
    %c0_i32_0 = arith.constant 0 : i32
    %c0_i32_1 = arith.constant 0 : i32
    %c0_i32_2 = arith.constant 0 : i32
    return %c0_i32, %c0_i32_0, %c0_i32_1 : i32, i32, i32
  }
  func.func @transform_17(%arg0: i32) -> (i32, i32, i32) {
    %c0_i32 = arith.constant 0 : i32
    %c0_i32_0 = arith.constant 0 : i32
    %c0_i32_1 = arith.constant 0 : i32
    %c0_i32_2 = arith.constant 0 : i32
    return %c0_i32, %c0_i32_0, %c0_i32_1 : i32, i32, i32
  }
  func.func @transform_18(%arg0: i32) -> (i32, i32, i32) {
    %c0_i32 = arith.constant 0 : i32
    %c0_i32_0 = arith.constant 0 : i32
    %c0_i32_1 = arith.constant 0 : i32
    %c0_i32_2 = arith.constant 0 : i32
    return %c0_i32, %c0_i32_0, %c0_i32_1 : i32, i32, i32
  }
  func.func @transform_19(%arg0: i32) -> (i32, i32, i32) {
    %c0_i32 = arith.constant 0 : i32
    %c0_i32_0 = arith.constant 0 : i32
    %c0_i32_1 = arith.constant 0 : i32
    %c0_i32_2 = arith.constant 0 : i32
    return %c0_i32, %c0_i32_0, %c0_i32_1 : i32, i32, i32
  }
  func.func @transform_20(%arg0: i32) -> (i32, i32, i32) {
    %c0_i32 = arith.constant 0 : i32
    %c0_i32_0 = arith.constant 0 : i32
    %c0_i32_1 = arith.constant 0 : i32
    %c0_i32_2 = arith.constant 0 : i32
    return %c0_i32, %c0_i32_0, %c0_i32_1 : i32, i32, i32
  }
  func.func @transform_21(%arg0: i32) -> (i32, i32, i32) {
    %c0_i32 = arith.constant 0 : i32
    %c0_i32_0 = arith.constant 0 : i32
    %c0_i32_1 = arith.constant 0 : i32
    %c0_i32_2 = arith.constant 0 : i32
    return %c0_i32, %c0_i32_0, %c0_i32_1 : i32, i32, i32
  }
  func.func @transform_22(%arg0: i32) -> (i32, i32, i32) {
    %c0_i32 = arith.constant 0 : i32
    %c0_i32_0 = arith.constant 0 : i32
    %c0_i32_1 = arith.constant 0 : i32
    %c0_i32_2 = arith.constant 0 : i32
    return %c0_i32, %c0_i32_0, %c0_i32_1 : i32, i32, i32
  }
  func.func @transform_23(%arg0: i32) -> (i32, i32, i32) {
    %c0_i32 = arith.constant 0 : i32
    %c0_i32_0 = arith.constant 0 : i32
    %c0_i32_1 = arith.constant 0 : i32
    %c0_i32_2 = arith.constant 0 : i32
    return %c0_i32, %c0_i32_0, %c0_i32_1 : i32, i32, i32
  }
  func.func @transform_24(%arg0: i32) -> (i32, i32, i32) {
    %c0_i32 = arith.constant 0 : i32
    %c0_i32_0 = arith.constant 0 : i32
    %c0_i32_1 = arith.constant 0 : i32
    %c0_i32_2 = arith.constant 0 : i32
    return %c0_i32, %c0_i32_0, %c0_i32_1 : i32, i32, i32
  }
  func.func @transform_25(%arg0: i32) -> (i32, i32, i32) {
    %c0_i32 = arith.constant 0 : i32
    %c0_i32_0 = arith.constant 0 : i32
    %c0_i32_1 = arith.constant 0 : i32
    %c0_i32_2 = arith.constant 0 : i32
    return %c0_i32, %c0_i32_0, %c0_i32_1 : i32, i32, i32
  }
  func.func @transform_26(%arg0: i32) -> (i32, i32, i32) {
    %c0_i32 = arith.constant 0 : i32
    %c0_i32_0 = arith.constant 0 : i32
    %c0_i32_1 = arith.constant 0 : i32
    %c0_i32_2 = arith.constant 0 : i32
    return %c0_i32, %c0_i32_0, %c0_i32_1 : i32, i32, i32
  }
  func.func @transform_27(%arg0: i32) -> (i32, i32) {
    %c0_i32 = arith.constant 0 : i32
    %c0_i32_0 = arith.constant 0 : i32
    %c0_i32_1 = arith.constant 0 : i32
    return %c0_i32, %c0_i32_0 : i32, i32
  }
  func.func @transform_28(%arg0: i32) -> (i32, i32) {
    %c0_i32 = arith.constant 0 : i32
    %c0_i32_0 = arith.constant 0 : i32
    %c0_i32_1 = arith.constant 0 : i32
    return %c0_i32, %c0_i32_0 : i32, i32
  }
  func.func @transform_29(%arg0: i32) -> (i32, i32, i32) {
    %c0_i32 = arith.constant 0 : i32
    %c0_i32_0 = arith.constant 0 : i32
    %c0_i32_1 = arith.constant 0 : i32
    %c0_i32_2 = arith.constant 0 : i32
    return %c0_i32, %c0_i32_0, %c0_i32_1 : i32, i32, i32
  }
  func.func @transform_30(%arg0: i32) -> (i32, i32, i32) {
    %c0_i32 = arith.constant 0 : i32
    %c0_i32_0 = arith.constant 0 : i32
    %c0_i32_1 = arith.constant 0 : i32
    %c0_i32_2 = arith.constant 0 : i32
    return %c0_i32, %c0_i32_0, %c0_i32_1 : i32, i32, i32
  }
  func.func @transform_31(%arg0: i32) -> (i32, i32, i32) {
    %c0_i32 = arith.constant 0 : i32
    %c0_i32_0 = arith.constant 0 : i32
    %c0_i32_1 = arith.constant 0 : i32
    %c0_i32_2 = arith.constant 0 : i32
    return %c0_i32, %c0_i32_0, %c0_i32_1 : i32, i32, i32
  }
  func.func @transform_32(%arg0: i32) -> (i32, i32, i32) {
    %c0_i32 = arith.constant 0 : i32
    %c0_i32_0 = arith.constant 0 : i32
    %c0_i32_1 = arith.constant 0 : i32
    %c0_i32_2 = arith.constant 0 : i32
    return %c0_i32, %c0_i32_0, %c0_i32_1 : i32, i32, i32
  }
  func.func @transform_33(%arg0: i32) -> (i32, i32, i32) {
    %c0_i32 = arith.constant 0 : i32
    %c0_i32_0 = arith.constant 0 : i32
    %c0_i32_1 = arith.constant 0 : i32
    %c0_i32_2 = arith.constant 0 : i32
    return %c0_i32, %c0_i32_0, %c0_i32_1 : i32, i32, i32
  }
  func.func @transform_34(%arg0: i32) -> (i32, i32, i32) {
    %c0_i32 = arith.constant 0 : i32
    %c0_i32_0 = arith.constant 0 : i32
    %c0_i32_1 = arith.constant 0 : i32
    %c0_i32_2 = arith.constant 0 : i32
    return %c0_i32, %c0_i32_0, %c0_i32_1 : i32, i32, i32
  }
  func.func @transform_35(%arg0: i32) -> (i32, i32, i32) {
    %c0_i32 = arith.constant 0 : i32
    %c0_i32_0 = arith.constant 0 : i32
    %c0_i32_1 = arith.constant 0 : i32
    %c0_i32_2 = arith.constant 0 : i32
    return %c0_i32, %c0_i32_0, %c0_i32_1 : i32, i32, i32
  }
  func.func @transform_36(%arg0: i32) -> (i32, i32, i32) {
    %c0_i32 = arith.constant 0 : i32
    %c0_i32_0 = arith.constant 0 : i32
    %c0_i32_1 = arith.constant 0 : i32
    %c0_i32_2 = arith.constant 0 : i32
    return %c0_i32, %c0_i32_0, %c0_i32_1 : i32, i32, i32
  }
  func.func @transform_37(%arg0: i32) -> (i32, i32, i32) {
    %c0_i32 = arith.constant 0 : i32
    %c0_i32_0 = arith.constant 0 : i32
    %c0_i32_1 = arith.constant 0 : i32
    %c0_i32_2 = arith.constant 0 : i32
    return %c0_i32, %c0_i32_0, %c0_i32_1 : i32, i32, i32
  }
  func.func @transform_38(%arg0: i32) -> (i32, i32, i32) {
    %c0_i32 = arith.constant 0 : i32
    %c0_i32_0 = arith.constant 0 : i32
    %c0_i32_1 = arith.constant 0 : i32
    %c0_i32_2 = arith.constant 0 : i32
    return %c0_i32, %c0_i32_0, %c0_i32_1 : i32, i32, i32
  }
  func.func @transform_39(%arg0: i32) -> (i32, i32, i32) {
    %c0_i32 = arith.constant 0 : i32
    %c0_i32_0 = arith.constant 0 : i32
    %c0_i32_1 = arith.constant 0 : i32
    %c0_i32_2 = arith.constant 0 : i32
    return %c0_i32, %c0_i32_0, %c0_i32_1 : i32, i32, i32
  }
  func.func @transform_40(%arg0: i32) -> (i32, i32, i32) {
    %c0_i32 = arith.constant 0 : i32
    %c0_i32_0 = arith.constant 0 : i32
    %c0_i32_1 = arith.constant 0 : i32
    %c0_i32_2 = arith.constant 0 : i32
    return %c0_i32, %c0_i32_0, %c0_i32_1 : i32, i32, i32
  }
  func.func @transform_41(%arg0: i32) -> (i32, i32, i32) {
    %c0_i32 = arith.constant 0 : i32
    %c0_i32_0 = arith.constant 0 : i32
    %c0_i32_1 = arith.constant 0 : i32
    %c0_i32_2 = arith.constant 0 : i32
    return %c0_i32, %c0_i32_0, %c0_i32_1 : i32, i32, i32
  }
  func.func @transform_42(%arg0: i32) -> (i32, i32, i32) {
    %c0_i32 = arith.constant 0 : i32
    %c0_i32_0 = arith.constant 0 : i32
    %c0_i32_1 = arith.constant 0 : i32
    %c0_i32_2 = arith.constant 0 : i32
    return %c0_i32, %c0_i32_0, %c0_i32_1 : i32, i32, i32
  }
  func.func @transform_43(%arg0: i32) -> (i32, i32, i32) {
    %c0_i32 = arith.constant 0 : i32
    %c0_i32_0 = arith.constant 0 : i32
    %c0_i32_1 = arith.constant 0 : i32
    %c0_i32_2 = arith.constant 0 : i32
    return %c0_i32, %c0_i32_0, %c0_i32_1 : i32, i32, i32
  }
  func.func @transform_44(%arg0: i32) -> (i32, i32, i32) {
    %c0_i32 = arith.constant 0 : i32
    %c0_i32_0 = arith.constant 0 : i32
    %c0_i32_1 = arith.constant 0 : i32
    %c0_i32_2 = arith.constant 0 : i32
    return %c0_i32, %c0_i32_0, %c0_i32_1 : i32, i32, i32
  }
  func.func @transform_45(%arg0: i32) -> (i32, i32, i32) {
    %c0_i32 = arith.constant 0 : i32
    %c0_i32_0 = arith.constant 0 : i32
    %c0_i32_1 = arith.constant 0 : i32
    %c0_i32_2 = arith.constant 0 : i32
    return %c0_i32, %c0_i32_0, %c0_i32_1 : i32, i32, i32
  }
  func.func @transform_46(%arg0: i32) -> (i32, i32, i32) {
    %c0_i32 = arith.constant 0 : i32
    %c0_i32_0 = arith.constant 0 : i32
    %c0_i32_1 = arith.constant 0 : i32
    %c0_i32_2 = arith.constant 0 : i32
    return %c0_i32, %c0_i32_0, %c0_i32_1 : i32, i32, i32
  }
  func.func @transform_47(%arg0: i32) -> (i32, i32, i32) {
    %c0_i32 = arith.constant 0 : i32
    %c0_i32_0 = arith.constant 0 : i32
    %c0_i32_1 = arith.constant 0 : i32
    %c0_i32_2 = arith.constant 0 : i32
    return %c0_i32, %c0_i32_0, %c0_i32_1 : i32, i32, i32
  }
  func.func @transform_48(%arg0: i32) -> (i32, i32, i32) {
    %c0_i32 = arith.constant 0 : i32
    %c0_i32_0 = arith.constant 0 : i32
    %c0_i32_1 = arith.constant 0 : i32
    %c0_i32_2 = arith.constant 0 : i32
    return %c0_i32, %c0_i32_0, %c0_i32_1 : i32, i32, i32
  }
  func.func @transform_49(%arg0: i32) -> (i32, i32, i32) {
    %c0_i32 = arith.constant 0 : i32
    %c0_i32_0 = arith.constant 0 : i32
    %c0_i32_1 = arith.constant 0 : i32
    %c0_i32_2 = arith.constant 0 : i32
    return %c0_i32, %c0_i32_0, %c0_i32_1 : i32, i32, i32
  }
  func.func @transform_50(%arg0: i32) -> (i32, i32, i32) {
    %c0_i32 = arith.constant 0 : i32
    %c0_i32_0 = arith.constant 0 : i32
    %c0_i32_1 = arith.constant 0 : i32
    %c0_i32_2 = arith.constant 0 : i32
    return %c0_i32, %c0_i32_0, %c0_i32_1 : i32, i32, i32
  }
  func.func @transform_51(%arg0: i32) -> (i32, i32, i32) {
    %c0_i32 = arith.constant 0 : i32
    %c0_i32_0 = arith.constant 0 : i32
    %c0_i32_1 = arith.constant 0 : i32
    %c0_i32_2 = arith.constant 0 : i32
    return %c0_i32, %c0_i32_0, %c0_i32_1 : i32, i32, i32
  }
  func.func @transform_52(%arg0: i32) -> (i32, i32, i32) {
    %c0_i32 = arith.constant 0 : i32
    %c0_i32_0 = arith.constant 0 : i32
    %c0_i32_1 = arith.constant 0 : i32
    %c0_i32_2 = arith.constant 0 : i32
    return %c0_i32, %c0_i32_0, %c0_i32_1 : i32, i32, i32
  }
  func.func @transform_53(%arg0: i32) -> (i32, i32, i32) {
    %c0_i32 = arith.constant 0 : i32
    %c0_i32_0 = arith.constant 0 : i32
    %c0_i32_1 = arith.constant 0 : i32
    %c0_i32_2 = arith.constant 0 : i32
    return %c0_i32, %c0_i32_0, %c0_i32_1 : i32, i32, i32
  }
  func.func @transform_54(%arg0: i32) -> (i32, i32, i32) {
    %c0_i32 = arith.constant 0 : i32
    %c0_i32_0 = arith.constant 0 : i32
    %c0_i32_1 = arith.constant 0 : i32
    %c0_i32_2 = arith.constant 0 : i32
    return %c0_i32, %c0_i32_0, %c0_i32_1 : i32, i32, i32
  }
  func.func @transform_55(%arg0: i32) -> (i32, i32) {
    %c0_i32 = arith.constant 0 : i32
    %c0_i32_0 = arith.constant 0 : i32
    %c0_i32_1 = arith.constant 0 : i32
    return %c0_i32, %c0_i32_0 : i32, i32
  }
  func.func @transform_56(%arg0: i32) -> (i32, i32) {
    %c0_i32 = arith.constant 0 : i32
    %c0_i32_0 = arith.constant 0 : i32
    %c0_i32_1 = arith.constant 0 : i32
    return %c0_i32, %c0_i32_0 : i32, i32
  }
  func.func @transform_57(%arg0: i32) -> (i32, i32) {
    %c0_i32 = arith.constant 0 : i32
    %c0_i32_0 = arith.constant 0 : i32
    %c0_i32_1 = arith.constant 0 : i32
    return %c0_i32, %c0_i32_0 : i32, i32
  }
  func.func @transform_58(%arg0: i32) -> (i32, i32) {
    %c0_i32 = arith.constant 0 : i32
    %c0_i32_0 = arith.constant 0 : i32
    %c0_i32_1 = arith.constant 0 : i32
    return %c0_i32, %c0_i32_0 : i32, i32
  }
  func.func @transform_59(%arg0: i32) -> (i32, i32, i32) {
    %c0_i32 = arith.constant 0 : i32
    %c0_i32_0 = arith.constant 0 : i32
    %c0_i32_1 = arith.constant 0 : i32
    %c0_i32_2 = arith.constant 0 : i32
    return %c0_i32, %c0_i32_0, %c0_i32_1 : i32, i32, i32
  }
  func.func @transform_60(%arg0: i32) -> (i32, i32, i32) {
    %c0_i32 = arith.constant 0 : i32
    %c0_i32_0 = arith.constant 0 : i32
    %c0_i32_1 = arith.constant 0 : i32
    %c0_i32_2 = arith.constant 0 : i32
    return %c0_i32, %c0_i32_0, %c0_i32_1 : i32, i32, i32
  }
  func.func @transform_61(%arg0: i32) -> (i32, i32, i32) {
    %c0_i32 = arith.constant 0 : i32
    %c0_i32_0 = arith.constant 0 : i32
    %c0_i32_1 = arith.constant 0 : i32
    %c0_i32_2 = arith.constant 0 : i32
    return %c0_i32, %c0_i32_0, %c0_i32_1 : i32, i32, i32
  }
  func.func @transform_62(%arg0: i32) -> (i32, i32, i32) {
    %c0_i32 = arith.constant 0 : i32
    %c0_i32_0 = arith.constant 0 : i32
    %c0_i32_1 = arith.constant 0 : i32
    %c0_i32_2 = arith.constant 0 : i32
    return %c0_i32, %c0_i32_0, %c0_i32_1 : i32, i32, i32
  }
  func.func @transform_63(%arg0: i32) -> (i32, i32, i32) {
    %c0_i32 = arith.constant 0 : i32
    %c0_i32_0 = arith.constant 0 : i32
    %c0_i32_1 = arith.constant 0 : i32
    %c0_i32_2 = arith.constant 0 : i32
    return %c0_i32, %c0_i32_0, %c0_i32_1 : i32, i32, i32
  }
  func.func @transform_64(%arg0: i32) -> (i32, i32, i32) {
    %c0_i32 = arith.constant 0 : i32
    %c0_i32_0 = arith.constant 0 : i32
    %c0_i32_1 = arith.constant 0 : i32
    %c0_i32_2 = arith.constant 0 : i32
    return %c0_i32, %c0_i32_0, %c0_i32_1 : i32, i32, i32
  }
  func.func @transform_65(%arg0: i32) -> (i32, i32, i32) {
    %c0_i32 = arith.constant 0 : i32
    %c0_i32_0 = arith.constant 0 : i32
    %c0_i32_1 = arith.constant 0 : i32
    %c0_i32_2 = arith.constant 0 : i32
    return %c0_i32, %c0_i32_0, %c0_i32_1 : i32, i32, i32
  }
  func.func @transform_66(%arg0: i32) -> (i32, i32, i32) {
    %c0_i32 = arith.constant 0 : i32
    %c0_i32_0 = arith.constant 0 : i32
    %c0_i32_1 = arith.constant 0 : i32
    %c0_i32_2 = arith.constant 0 : i32
    return %c0_i32, %c0_i32_0, %c0_i32_1 : i32, i32, i32
  }
  func.func @transform_67(%arg0: i32) -> (i32, i32, i32) {
    %c0_i32 = arith.constant 0 : i32
    %c0_i32_0 = arith.constant 0 : i32
    %c0_i32_1 = arith.constant 0 : i32
    %c0_i32_2 = arith.constant 0 : i32
    return %c0_i32, %c0_i32_0, %c0_i32_1 : i32, i32, i32
  }
  func.func @transform_68(%arg0: i32) -> (i32, i32, i32) {
    %c0_i32 = arith.constant 0 : i32
    %c0_i32_0 = arith.constant 0 : i32
    %c0_i32_1 = arith.constant 0 : i32
    %c0_i32_2 = arith.constant 0 : i32
    return %c0_i32, %c0_i32_0, %c0_i32_1 : i32, i32, i32
  }
  func.func @transform_69(%arg0: i32) -> (i32, i32, i32) {
    %c0_i32 = arith.constant 0 : i32
    %c0_i32_0 = arith.constant 0 : i32
    %c0_i32_1 = arith.constant 0 : i32
    %c0_i32_2 = arith.constant 0 : i32
    return %c0_i32, %c0_i32_0, %c0_i32_1 : i32, i32, i32
  }
  func.func @transform_70(%arg0: i32) -> (i32, i32, i32) {
    %c0_i32 = arith.constant 0 : i32
    %c0_i32_0 = arith.constant 0 : i32
    %c0_i32_1 = arith.constant 0 : i32
    %c0_i32_2 = arith.constant 0 : i32
    return %c0_i32, %c0_i32_0, %c0_i32_1 : i32, i32, i32
  }
  func.func @transform_71(%arg0: i32) -> (i32, i32) {
    %c0_i32 = arith.constant 0 : i32
    %c0_i32_0 = arith.constant 0 : i32
    %c0_i32_1 = arith.constant 0 : i32
    return %c0_i32, %c0_i32_0 : i32, i32
  }
  func.func @transform_72(%arg0: i32) -> (i32, i32) {
    %c0_i32 = arith.constant 0 : i32
    %c0_i32_0 = arith.constant 0 : i32
    %c0_i32_1 = arith.constant 0 : i32
    return %c0_i32, %c0_i32_0 : i32, i32
  }
  func.func @transform_73(%arg0: i32) -> (i32, i32) {
    %c0_i32 = arith.constant 0 : i32
    %c0_i32_0 = arith.constant 0 : i32
    %c0_i32_1 = arith.constant 0 : i32
    return %c0_i32, %c0_i32_0 : i32, i32
  }
  func.func @transform_74(%arg0: i32) -> (i32, i32) {
    %c0_i32 = arith.constant 0 : i32
    %c0_i32_0 = arith.constant 0 : i32
    %c0_i32_1 = arith.constant 0 : i32
    return %c0_i32, %c0_i32_0 : i32, i32
  }
  func.func @transform_75(%arg0: i32) -> (i32, i32) {
    %c0_i32 = arith.constant 0 : i32
    %c0_i32_0 = arith.constant 0 : i32
    %c0_i32_1 = arith.constant 0 : i32
    return %c0_i32, %c0_i32_0 : i32, i32
  }
  func.func @transform_76(%arg0: i32) -> (i32, i32) {
    %c0_i32 = arith.constant 0 : i32
    %c0_i32_0 = arith.constant 0 : i32
    %c0_i32_1 = arith.constant 0 : i32
    return %c0_i32, %c0_i32_0 : i32, i32
  }
  func.func @transform_77(%arg0: i32) -> (i32, i32) {
    %c0_i32 = arith.constant 0 : i32
    %c0_i32_0 = arith.constant 0 : i32
    %c0_i32_1 = arith.constant 0 : i32
    return %c0_i32, %c0_i32_0 : i32, i32
  }
  func.func @transform_78(%arg0: i32) -> (i32, i32) {
    %c0_i32 = arith.constant 0 : i32
    %c0_i32_0 = arith.constant 0 : i32
    %c0_i32_1 = arith.constant 0 : i32
    return %c0_i32, %c0_i32_0 : i32, i32
  }
  func.func @transform_79(%arg0: i32) -> (i32, i32) {
    %c0_i32 = arith.constant 0 : i32
    %c0_i32_0 = arith.constant 0 : i32
    %c0_i32_1 = arith.constant 0 : i32
    return %c0_i32, %c0_i32_0 : i32, i32
  }
  func.func @transform_80(%arg0: i32) -> (i32, i32) {
    %c0_i32 = arith.constant 0 : i32
    %c0_i32_0 = arith.constant 0 : i32
    %c0_i32_1 = arith.constant 0 : i32
    return %c0_i32, %c0_i32_0 : i32, i32
  }
  func.func @transform_81(%arg0: i32) -> (i32, i32) {
    %c0_i32 = arith.constant 0 : i32
    %c0_i32_0 = arith.constant 0 : i32
    %c0_i32_1 = arith.constant 0 : i32
    return %c0_i32, %c0_i32_0 : i32, i32
  }
  func.func @transform_82(%arg0: i32) -> (i32, i32) {
    %c0_i32 = arith.constant 0 : i32
    %c0_i32_0 = arith.constant 0 : i32
    %c0_i32_1 = arith.constant 0 : i32
    return %c0_i32, %c0_i32_0 : i32, i32
  }
  func.func @transform_83(%arg0: i32) -> (i32, i32) {
    %c0_i32 = arith.constant 0 : i32
    %c0_i32_0 = arith.constant 0 : i32
    %c0_i32_1 = arith.constant 0 : i32
    return %c0_i32, %c0_i32_0 : i32, i32
  }
  func.func @transform_84(%arg0: i32) -> (i32, i32) {
    %c0_i32 = arith.constant 0 : i32
    %c0_i32_0 = arith.constant 0 : i32
    %c0_i32_1 = arith.constant 0 : i32
    return %c0_i32, %c0_i32_0 : i32, i32
  }
  func.func @transform_85(%arg0: i32) -> (i32, i32) {
    %c0_i32 = arith.constant 0 : i32
    %c0_i32_0 = arith.constant 0 : i32
    %c0_i32_1 = arith.constant 0 : i32
    return %c0_i32, %c0_i32_0 : i32, i32
  }
  func.func @transform_86(%arg0: i32) -> (i32, i32) {
    %c0_i32 = arith.constant 0 : i32
    %c0_i32_0 = arith.constant 0 : i32
    %c0_i32_1 = arith.constant 0 : i32
    return %c0_i32, %c0_i32_0 : i32, i32
  }
  func.func @transform_87(%arg0: i32) -> (i32, i32, i32) {
    %c0_i32 = arith.constant 0 : i32
    %c0_i32_0 = arith.constant 0 : i32
    %c0_i32_1 = arith.constant 0 : i32
    return %arg0, %c0_i32, %c0_i32_0 : i32, i32, i32
  }
}

</mosaic_0001>

<bundles_post_ra>
// kernel: forward.1
= control target key start
LH: loop header
LB: loop body
LE: loop exit
PB: predicated region body
PF: predicated region fallthrough
CT: control target
= control target key end

     0   :  { %s14481_s6 = smov 1   ;;  %s14482_s10 = smov 2   ;;  %s16688_s0 = inlined_call_operand.smem [shape: u32[88], index: -1, kind: input, shape index: {}] }
   0x1   :  { %s14638_s5 = sld [smem:[%s16688_s0]]   ;;  %s14483_s14 = smov 3  }
   0x2   :  { %s14643_s9 = sld [smem:[%s16688_s0 + %s14481_s6]]   ;;  %s14484_s18 = smov 4  }
   0x3   :  { %s14648_s13 = sld [smem:[%s16688_s0 + %s14482_s10]]   ;;  %s14485_s22 = smov 5  }
   0x4   :  { %s14653_s17 = sld [smem:[%s16688_s0 + %s14483_s14]]   ;;  %s14486_s26 = smov 6  }
   0x5   :  { %s14658_s21 = sld [smem:[%s16688_s0 + %s14484_s18]]   ;;  %s14487_s30 = smov 7  }
   0x6   :  { %s14663_s25 = sld [smem:[%s16688_s0 + %s14485_s22]]   ;;  %s14488_s4 = smov 8  }
   0x7   :  { %16831 = sst [smem:[#allocation108_spill]] %s14638_s5  ;;  %s14489_s10 = smov 9  }
   0x8   :  { %16832 = sst [smem:[#allocation109_spill]] %s14643_s9  ;;  %s14490_s15 = smov 10  }
   0x9   :  { %16833 = sst [smem:[#allocation110_spill]] %s14648_s13  ;;  %s14491_s20 = smov 11  }
   0xa   :  { %16834 = sst [smem:[#allocation111_spill]] %s14653_s17  ;;  %s14493_s1 = smov 13  }
   0xb   :  { %16835 = sst [smem:[#allocation112_spill]] %s14658_s21  ;;  %s14494_s7 = smov 14  }
   0xc   :  { %16836 = sst [smem:[#allocation113_spill]] %s14663_s25  ;;  %s14496_s22 = smov 16  }
   0xd   :  { %s14668_s29 = sld [smem:[%s16688_s0 + %s14486_s26]]   ;;  %s14492_s26 = smov 12  }
   0xe   :  { %s14673_s3 = sld [smem:[%s16688_s0 + %s14487_s30]]   ;;  %s14497_s28 = smov 17  }
   0xf   :  { %s14678_s8 = sld [smem:[%s16688_s0 + %s14488_s4]]  }
  0x10   :  { %s14683_s14 = sld [smem:[%s16688_s0 + %s14489_s10]]  }
  0x11   :  { %s14688_s19 = sld [smem:[%s16688_s0 + %s14490_s15]]   ;;  %s14495_s15 = smov 15  }
  0x12   :  { %s14693_s24 = sld [smem:[%s16688_s0 + %s14491_s20]]  }
  0x13   :  { %16837 = sst [smem:[#allocation114_spill]] %s14668_s29 }
  0x14   :  { %16838 = sst [smem:[#allocation115_spill]] %s14673_s3 }
  0x15   :  { %16839 = sst [smem:[#allocation116_spill]] %s14678_s8 }
  0x16   :  { %16840 = sst [smem:[#allocation117_spill]] %s14683_s14 }
  0x17   :  { %16841 = sst [smem:[#allocation118_spill]] %s14688_s19 }
  0x18   :  { %16842 = sst [smem:[#allocation119_spill]] %s14693_s24 }
  0x19   :  { %s14698_s30 = sld [smem:[%s16688_s0 + %s14492_s26]]  }
  0x1a   :  { %s14703_s6 = sld [smem:[%s16688_s0 + %s14493_s1]]  }
  0x1b   :  { %s14708_s12 = sld [smem:[%s16688_s0 + %s14494_s7]]   ;;  %s14498_s7 = smov 18  }
  0x1c   :  { %s14713_s20 = sld [smem:[%s16688_s0 + %s14495_s15]]   ;;  %s14499_s15 = smov 19  }
  0x1d   :  { %s14718_s27 = sld [smem:[%s16688_s0 + %s14496_s22]]   ;;  %s14500_s22 = smov 20  }
  0x1e   :  { %s14723_s4 = sld [smem:[%s16688_s0 + %s14497_s28]]   ;;  %s14501_s28 = smov 21  }
  0x1f   :  { %s14728_s19 = sld [smem:[%s16688_s0 + %s14498_s7]]   ;;  %s14502_s7 = smov 22  }
  0x20   :  { %16843 = sst [smem:[#allocation120_spill]] %s14703_s6 }
  0x21   :  { %16844 = sst [smem:[#allocation121_spill]] %s14708_s12 }
  0x22   :  { %16845 = sst [smem:[#allocation122_spill]] %s14713_s20 }
  0x23   :  { %s14733_s8 = sld [smem:[%s16688_s0 + %s14499_s15]]   ;;  %s14503_s15 = smov 23  }
  0x24   :  { %16846 = sst [smem:[#allocation123_spill]] %s14723_s4 }
  0x25   :  { %16847 = sst [smem:[#allocation124_spill]] %s14728_s19 }
  0x26   :  { %s14738_s21 = sld [smem:[%s16688_s0 + %s14500_s22]]   ;;  %s14504_s22 = smov 24  }
  0x27   :  { %s14743_s29 = sld [smem:[%s16688_s0 + %s14501_s28]]   ;;  %s14505_s28 = smov 25  }
  0x28   :  { %s14748_s19 = sld [smem:[%s16688_s0 + %s14502_s7]]   ;;  %s14506_s7 = smov 26  }
  0x29   :  { %16848 = sst [smem:[#allocation125_spill]] %s14733_s8 }
  0x2a   :  { %s14753_s17 = sld [smem:[%s16688_s0 + %s14503_s15]]   ;;  %s14507_s15 = smov 27  }
  0x2b   :  { %s14763_s25 = sld [smem:[%s16688_s0 + %s14505_s28]]   ;;  %s14509_s28 = smov 29  }
  0x2c   :  { %16849 = sst [smem:[#allocation126_spill]] %s14738_s21 }
  0x2d   :  { %16850 = sst [smem:[#allocation127_spill]] %s14743_s29 }
  0x2e   :  { %16851 = sst [smem:[#allocation128_spill]] %s14748_s19 }
  0x2f   :  { %s14758_s21 = sld [smem:[%s16688_s0 + %s14504_s22]]   ;;  %s14508_s22 = smov 28  }
  0x30   :  { %s14768_s19 = sld [smem:[%s16688_s0 + %s14506_s7]]   ;;  %s14510_s7 = smov 30  }
  0x31   :  { %16853 = sst [smem:[#allocation130_spill]] %s14763_s25 }
  0x32   :  { %s14773_s5 = sld [smem:[%s16688_s0 + %s14507_s15]]   ;;  %s14511_s15 = smov 31  }
  0x33   :  { %s14783_s9 = sld [smem:[%s16688_s0 + %s14509_s28]]   ;;  %s14513_s28 = smov 33  }
  0x34   :  { %s14793_s13 = sld [smem:[%s16688_s0 + %s14511_s15]]   ;;  %s14515_s15 = smov 35  }
  0x35   :  { %16852 = sst [smem:[#allocation129_spill]] %s14758_s21 }
  0x36   :  { %16854 = sst [smem:[#allocation131_spill]] %s14768_s19 }
  0x37   :  { %s14778_s21 = sld [smem:[%s16688_s0 + %s14508_s22]]   ;;  %s14512_s22 = smov 32  }
  0x38   :  { %16855 = sst [smem:[#allocation132_spill]] %s14773_s5 }
  0x39   :  { %16857 = sst [smem:[#allocation134_spill]] %s14783_s9 }
  0x3a   :  { %s14788_s19 = sld [smem:[%s16688_s0 + %s14510_s7]]   ;;  %s14514_s7 = smov 34  }
  0x3b   :  { %16859 = sst [smem:[#allocation136_spill]] %s14793_s13 }
  0x3c   :  { %s14803_s25 = sld [smem:[%s16688_s0 + %s14513_s28]]   ;;  %s14517_s28 = smov 37  }
  0x3d   :  { %16856 = sst [smem:[#allocation133_spill]] %s14778_s21 }
  0x3e   :  { %s14798_s21 = sld [smem:[%s16688_s0 + %s14512_s22]]   ;;  %s14516_s22 = smov 36  }
  0x3f   :  { %s14813_s13 = sld [smem:[%s16688_s0 + %s14515_s15]]   ;;  %s14519_s15 = smov 39  }
  0x40   :  { %16858 = sst [smem:[#allocation135_spill]] %s14788_s19 }
  0x41   :  { %s14808_s19 = sld [smem:[%s16688_s0 + %s14514_s7]]   ;;  %s14518_s7 = smov 38  }
  0x42   :  { %s14823_s29 = sld [smem:[%s16688_s0 + %s14517_s28]]   ;;  %s14521_s28 = smov 41  }
  0x44   :  { %16860 = sst [smem:[#allocation137_spill]] %s14798_s21 }
  0x45   :  { %16862 = sst [smem:[#allocation139_spill]] %s14813_s13 }
  0x46   :  { %s14818_s21 = sld [smem:[%s16688_s0 + %s14516_s22]]   ;;  %s14520_s22 = smov 40  }
  0x47   :  { %16861 = sst [smem:[#allocation138_spill]] %s14808_s19 }
  0x48   :  { %16863 = sst [smem:[#allocation140_spill]] %s14823_s29 }
  0x49   :  { %s14828_s19 = sld [smem:[%s16688_s0 + %s14518_s7]]   ;;  %s14522_s7 = smov 42  }
  0x4a   :  { %s14833_s13 = sld [smem:[%s16688_s0 + %s14519_s15]]   ;;  %s14523_s15 = smov 43  }
  0x4b   :  { %s14838_s4 = sld [smem:[%s16688_s0 + %s14520_s22]]   ;;  %s14524_s22 = smov 44  }
  0x4c   :  { %s14843_s29 = sld [smem:[%s16688_s0 + %s14521_s28]]   ;;  %s14525_s28 = smov 45  }
  0x4d   :  { %s14848_s20 = sld [smem:[%s16688_s0 + %s14522_s7]]   ;;  %s14526_s7 = smov 46  }
  0x4e   :  { %s14858_s6 = sld [smem:[%s16688_s0 + %s14524_s22]]   ;;  %s14528_s22 = smov 48  }
  0x50   :  { %16864 = sst [smem:[#allocation141_spill]] %s14833_s13 }
  0x51   :  { %16865 = sst [smem:[#allocation142_spill]] %s14838_s4 }
  0x52   :  { %16866 = sst [smem:[#allocation143_spill]] %s14843_s29 }
  0x53   :  { %16867 = sst [smem:[#allocation144_spill]] %s14848_s20 }
  0x54   :  { %s14853_s13 = sld [smem:[%s16688_s0 + %s14523_s15]]   ;;  %s14527_s15 = smov 47  }
  0x55   :  { %16868 = sst [smem:[#allocation145_spill]] %s14858_s6 }
  0x56   :  { %s14863_s29 = sld [smem:[%s16688_s0 + %s14525_s28]]   ;;  %s14529_s28 = smov 49  }
  0x57   :  { %s14868_s20 = sld [smem:[%s16688_s0 + %s14526_s7]]   ;;  %s14530_s7 = smov 50  }
  0x58   :  { %s14873_s24 = sld [smem:[%s16688_s0 + %s14527_s15]]   ;;  %s14531_s15 = smov 51  }
  0x59   :  { %s14878_s6 = sld [smem:[%s16688_s0 + %s14528_s22]]   ;;  %s14532_s22 = smov 52  }
  0x5a   :  { %s14893_s3 = sld [smem:[%s16688_s0 + %s14531_s15]]   ;;  %s14535_s15 = smov 55  }
  0x5c   :  { %16869 = sst [smem:[#allocation146_spill]] %s14863_s29 }
  0x5d   :  { %16870 = sst [smem:[#allocation147_spill]] %s14868_s20 }
  0x5e   :  { %s14883_s29 = sld [smem:[%s16688_s0 + %s14529_s28]]   ;;  %s14533_s28 = smov 53  }
  0x5f   :  { %16871 = sst [smem:[#allocation148_spill]] %s14878_s6 }
  0x60   :  { %s14888_s20 = sld [smem:[%s16688_s0 + %s14530_s7]]   ;;  %s14534_s7 = smov 54  }
  0x61   :  { %16874 = sst [smem:[#allocation151_spill]] %s14893_s3 }
  0x62   :  { %s14898_s6 = sld [smem:[%s16688_s0 + %s14532_s22]]   ;;  %s14536_s22 = smov 56  }
  0x63   :  { %s14913_s3 = sld [smem:[%s16688_s0 + %s14535_s15]]   ;;  %s14539_s15 = smov 59  }
  0x64   :  { %16872 = sst [smem:[#allocation149_spill]] %s14883_s29 }
  0x65   :  { %s14903_s29 = sld [smem:[%s16688_s0 + %s14533_s28]]   ;;  %s14537_s28 = smov 57  }
  0x66   :  { %16873 = sst [smem:[#allocation150_spill]] %s14888_s20 }
  0x67   :  { %s14908_s20 = sld [smem:[%s16688_s0 + %s14534_s7]]   ;;  %s14538_s7 = smov 58  }
  0x68   :  { %16875 = sst [smem:[#allocation152_spill]] %s14898_s6 }
  0x69   :  { %16878 = sst [smem:[#allocation155_spill]] %s14913_s3 }
  0x6a   :  { %s14918_s6 = sld [smem:[%s16688_s0 + %s14536_s22]]   ;;  %s14540_s22 = smov 60  }
  0x6b   :  { %16876 = sst [smem:[#allocation153_spill]] %s14903_s29 }
  0x6c   :  { %s14923_s29 = sld [smem:[%s16688_s0 + %s14537_s28]]   ;;  %s14541_s28 = smov 61  }
  0x6d   :  { %16877 = sst [smem:[#allocation154_spill]] %s14908_s20 }
  0x6e   :  { %s14928_s20 = sld [smem:[%s16688_s0 + %s14538_s7]]   ;;  %s14542_s7 = smov 62  }
  0x6f   :  { %s14933_s3 = sld [smem:[%s16688_s0 + %s14539_s15]]   ;;  %s14543_s15 = smov 63  }
  0x70   :  { %16879 = sst [smem:[#allocation156_spill]] %s14918_s6 }
  0x71   :  { %s14938_s6 = sld [smem:[%s16688_s0 + %s14540_s22]]   ;;  %s14544_s22 = smov 64  }
  0x72   :  { %16880 = sst [smem:[#allocation157_spill]] %s14923_s29 }
  0x73   :  { %s14943_s29 = sld [smem:[%s16688_s0 + %s14541_s28]]   ;;  %s14545_s28 = smov 65  }
  0x74   :  { %16881 = sst [smem:[#allocation158_spill]] %s14928_s20 }
  0x75   :  { %16882 = sst [smem:[#allocation159_spill]] %s14933_s3 }
  0x76   :  { %s14948_s20 = sld [smem:[%s16688_s0 + %s14542_s7]]   ;;  %s14546_s7 = smov 66  }
  0x77   :  { %16883 = sst [smem:[#allocation160_spill]] %s14938_s6 }
  0x78   :  { %s14953_s3 = sld [smem:[%s16688_s0 + %s14543_s15]]   ;;  %s14547_s15 = smov 67  }
  0x79   :  { %16884 = sst [smem:[#allocation161_spill]] %s14943_s29 }
  0x7a   :  { %s14958_s6 = sld [smem:[%s16688_s0 + %s14544_s22]]   ;;  %s14548_s22 = smov 68  }
  0x7b   :  { %s14963_s29 = sld [smem:[%s16688_s0 + %s14545_s28]]   ;;  %s14549_s28 = smov 69  }
  0x7c   :  { %16885 = sst [smem:[#allocation162_spill]] %s14948_s20 }
  0x7d   :  { %s14968_s20 = sld [smem:[%s16688_s0 + %s14546_s7]]   ;;  %s14550_s7 = smov 70  }
  0x7e   :  { %16886 = sst [smem:[#allocation163_spill]] %s14953_s3 }
  0x7f   :  { %s14973_s3 = sld [smem:[%s16688_s0 + %s14547_s15]]   ;;  %s14551_s15 = smov 71  }
  0x80   :  { %16887 = sst [smem:[#allocation164_spill]] %s14958_s6 }
  0x81   :  { %16888 = sst [smem:[#allocation165_spill]] %s14963_s29 }
  0x82   :  { %s14978_s6 = sld [smem:[%s16688_s0 + %s14548_s22]]   ;;  %s14552_s22 = smov 72  }
  0x83   :  { %16889 = sst [smem:[#allocation166_spill]] %s14968_s20 }
  0x84   :  { %s14983_s29 = sld [smem:[%s16688_s0 + %s14549_s28]]   ;;  %s14553_s28 = smov 73  }
  0x85   :  { %16890 = sst [smem:[#allocation167_spill]] %s14973_s3 }
  0x86   :  { %s14988_s20 = sld [smem:[%s16688_s0 + %s14550_s7]]   ;;  %s14554_s7 = smov 74  }
  0x87   :  { %s14993_s3 = sld [smem:[%s16688_s0 + %s14551_s15]]   ;;  %s14555_s15 = smov 75  }
  0x88   :  { %16891 = sst [smem:[#allocation168_spill]] %s14978_s6 }
  0x89   :  { %s14998_s6 = sld [smem:[%s16688_s0 + %s14552_s22]]   ;;  %s14556_s22 = smov 76  }
  0x8a   :  { %16892 = sst [smem:[#allocation169_spill]] %s14983_s29 }
  0x8b   :  { %s15003_s29 = sld [smem:[%s16688_s0 + %s14553_s28]]   ;;  %s14557_s28 = smov 77  }
  0x8c   :  { %16893 = sst [smem:[#allocation170_spill]] %s14988_s20 }
  0x8d   :  { %16894 = sst [smem:[#allocation171_spill]] %s14993_s3 }
  0x8e   :  { %s15008_s20 = sld [smem:[%s16688_s0 + %s14554_s7]]   ;;  %s14558_s7 = smov 78  }
  0x8f   :  { %16895 = sst [smem:[#allocation172_spill]] %s14998_s6 }
  0x90   :  { %s15013_s3 = sld [smem:[%s16688_s0 + %s14555_s15]]   ;;  %s14559_s15 = smov 79  }
  0x91   :  { %16896 = sst [smem:[#allocation173_spill]] %s15003_s29 }
  0x92   :  { %s15018_s6 = sld [smem:[%s16688_s0 + %s14556_s22]]   ;;  %s14560_s22 = smov 80  }
  0x93   :  { %s15023_s29 = sld [smem:[%s16688_s0 + %s14557_s28]]   ;;  %s14561_s28 = smov 81  }
  0x94   :  { %16897 = sst [smem:[#allocation174_spill]] %s15008_s20 }
  0x95   :  { %s15028_s20 = sld [smem:[%s16688_s0 + %s14558_s7]]   ;;  %s14562_s7 = smov 82  }
  0x96   :  { %16898 = sst [smem:[#allocation175_spill]] %s15013_s3 }
  0x97   :  { %s15033_s3 = sld [smem:[%s16688_s0 + %s14559_s15]]   ;;  %s14563_s15 = smov 83  }
  0x98   :  { %16899 = sst [smem:[#allocation176_spill]] %s15018_s6 }
  0x99   :  { %16900 = sst [smem:[#allocation177_spill]] %s15023_s29 }
  0x9a   :  { %s15038_s6 = sld [smem:[%s16688_s0 + %s14560_s22]]   ;;  %s14564_s22 = smov 84  }
  0x9b   :  { %16901 = sst [smem:[#allocation178_spill]] %s15028_s20 }
  0x9c   :  { %s15043_s29 = sld [smem:[%s16688_s0 + %s14561_s28]]   ;;  %s14565_s28 = smov 85  }
  0x9d   :  { %16902 = sst [smem:[#allocation179_spill]] %s15033_s3 }
  0x9e   :  { %s15048_s20 = sld [smem:[%s16688_s0 + %s14562_s7]]   ;;  %s14566_s7 = smov 86  }
  0x9f   :  { %s15053_s3 = sld [smem:[%s16688_s0 + %s14563_s15]]   ;;  %s14567_s15 = smov 87  }
  0xa0   :  { %16903 = sst [smem:[#allocation180_spill]] %s15038_s6 }
  0xa1   :  { %s15058_s6 = sld [smem:[%s16688_s0 + %s14564_s22]]  }
  0xa2   :  { %16904 = sst [smem:[#allocation181_spill]] %s15043_s29 }
  0xa3   :  { %s15063_s29 = sld [smem:[%s16688_s0 + %s14565_s28]]  }
  0xa4   :  { %16905 = sst [smem:[#allocation182_spill]] %s15048_s20 }
  0xa5   :  { %16906 = sst [smem:[#allocation183_spill]] %s15053_s3 }
  0xa6   :  { %s15068_s20 = sld [smem:[%s16688_s0 + %s14566_s7]]  }
  0xa7   :  { %16907 = sst [smem:[#allocation184_spill]] %s15058_s6 }
  0xa8   :  { %s15073_s3 = sld [smem:[%s16688_s0 + %s14567_s15]]  }
  0xa9   :  { %180 = vsyncpa [#allocation3], 0 }
  0xaa   :  { %181 = vsyncpa [#allocation6], 0 }
  0xab   :  { %182 = vsyncpa [#allocation9], 0 }
  0xac   :  { %183 = vsyncpa [#allocation12], 0 }
  0xad   :  { %184 = vsyncpa [#allocation15], 0 }
  0xae   :  { %185 = vsyncpa [#allocation18], 0 }
  0xaf   :  { %186 = vsyncpa [#allocation21], 0 }
  0xb0   :  { %187 = vsyncpa [#allocation24], 0 }
  0xb1   :  { %188 = vsyncpa [#allocation27], 0 }
  0xb2   :  { %189 = vsyncpa [#allocation30], 0 }
  0xb3   :  { %190 = vsyncpa [#allocation33], 0 }
  0xb4   :  { %191 = vsyncpa [#allocation36], 0 }
  0xb5   :  { %192 = vsyncpa [#allocation39], 0 }
  0xb6   :  { %193 = vsyncpa [#allocation42], 0 }
  0xb7   :  { %194 = vsyncpa [#allocation45], 0 }
  0xb8   :  { %195 = vsyncpa [#allocation48], 0 }
  0xb9   :  { %196 = vsyncpa [#allocation51], 0 }
  0xba   :  { %197 = vsyncpa [#allocation54], 0 }
  0xbb   :  { %198 = vsyncpa [#allocation57], 0 }
  0xbc   :  { %199 = vsyncpa [#allocation60], 0 }
  0xbd   :  { %200 = vsyncpa [#allocation63], 0 }
  0xbe   :  { %201 = vsyncpa [#allocation66], 0 }
  0xbf   :  { %202 = vsyncpa [#allocation69], 0 }
  0xc0   :  { %203 = vsyncpa [#allocation72], 0 }
  0xc1   :  { %204 = vsyncpa [#allocation75], 0 }
  0xc2   :  { %205 = vsyncpa [#allocation78], 0 }
  0xc3   :  { %206 = vsyncpa [#allocation4], 0 }
  0xc4   :  { %208 = vsyncpa [#allocation4 + $0x1], 0  ;;  %s15075_s0 = smov 0   ;;  %s15077_s22 = smov 0  }
  0xc5   :  { %16908 = sst [smem:[#allocation185_spill]] %s15075_s0  ;;  %s15079_s23 = smov 0  }
  0xc6   :  { %s15081_s26 = smov 0  }
  0xc7 LB: > { %s16910_s6 = sld [smem:[#allocation184_spill]]  ;;  %s16911_s12 = sld [smem:[#allocation121_spill]]  ;;  %s14475_s23 = sphi %s15079_s23, %s17014_s23   ;;  %s14471_s22 = sphi %s15077_s22, %s17016_s22   ;;  %s14479_s26 = sphi %s15081_s26, %s17012_s26  }
  0xc8   : > { %s16912_s9 = sld [smem:[#allocation134_spill]]  ;;  %s16913_s8 = sld [smem:[#allocation125_spill]] }
  0xc9   : > { %s16914_s5 = sld [smem:[#allocation132_spill]]  ;;  %s16915_s4 = sld [smem:[#allocation142_spill]] }
  0xca   : > { %s16916_s14 = sld [smem:[#allocation117_spill]]  ;;  %s16917_s0 = sld [smem:[#allocation185_spill]] }
  0xcb   : > { %16919 = sst [smem:[#allocation186_spill]] %s14475_s23  ;;  %s15096_s28 = sadd.s32 4294967295, %s14479_s26  }
  0xcc   : > { %s10671_s1 = sadd.s32 4294967294, %s14479_s26   ;;  %s15100_s2 = sadd.s32 1, %s14479_s26  }
  0xcd   : > { %16920 = sst [smem:[#allocation187_spill]] %s15100_s2  ;;  %s2073_s7 = sadd.s32 1, %s14475_s23 }
  0xce   : > { %s2070_s10 = ssub.s32 %s14479_s26, %s15100_s2  ;;  %p2083_p0 = scmp.ne.s32.totalorder %s14475_s23, %s14471_s22 }
  0xcf   : > { %p2071_p1 = scmp.eq.s32.totalorder %s2070_s10, 0  ;;  %p2084_p2 = scmp.eq.s32.totalorder %s15096_s28, 1 }
  0xd0   : > { %16918 = sst [smem:[#allocation185_spill]] %s16917_s0  ;;  %p2089_p3 = scmp.ne.s32.totalorder %s14471_s22, %s16917_s0 }
  0xd1   : > { %p2090_p4 = scmp.eq.s32.totalorder %s10671_s1, 1  ;;  %p15113_p5 = por %p2084_p2, %p2083_p0 }
  0xd2   : > { %s15111_s11 = scalar_select %p2071_p1, %s14475_s23, %s2073_s7  }
  0xd3   : > { %s16922_s15 = scalar_select %p15113_p5, 1, 0 }
  0xd4   : > { %16921 = sst [smem:[#allocation188_spill]] %s15111_s11  ;;  %p15117_p6 = por %p2090_p4, %p2089_p3 }
  0xd5   : > { %p10672_p7 = scmp.ge.s32.totalorder %s14479_s26, 1  ;;  %p2097_p8 = scmp.lt.s32.totalorder %s14479_s26, 3 }
  0xd6   : > { %s16923_s16 = scalar_select %p15117_p6, 1, 0 }
  0xd7   : > { %p15123_p9 = pnand %p10672_p7, %p2097_p8 }
  0xd8   : > { %16924 = sst [smem:[#allocation189_spill]] %s16923_s16  ;;  %p12596_p10 = scmp.eq.s32.totalorder (!%p15123_p9), %s15096_s28, 0 }
  0xd9   : > { %2101 = sbr.rel (%p15123_p9) target bundleno = 1485 (0x5cd), region = 12  ;;  %s14568_s1 = smov (!%p15123_p9), [#allocation5]  }
  0xda   : > { %s2131_s7 = sshll.u32 (!%p15123_p9), %s14568_s1, 4  ;;  %s14569_s10 = smov (!%p15123_p9), [#allocation8]   ;;  %s2132_s7 = int_to_ptr.vmem [resolvable:$true] %s2131_s7 }
  0xdb   : > { %s2160_s11 = sshll.u32 (!%p15123_p9), %s14569_s10, 4  ;;  %s12987_s23 = scalar_lea.hbm (!%p15123_p9), %s16916_s14, 32  ;;  %s2161_s11 = int_to_ptr.vmem [resolvable:$true] %s2160_s11 }
  0xdc   : > { %p12988_p11 = scmp.ne.s32.totalorder (!%p15123_p9), %s16916_s14, %s12987_s23  ;;  %p12993_p0 = scmp.lt.u32.totalorder (!%p15123_p9), %s12987_s23, %s16916_s14 }
  0xde   : > { %p12989_p12 = pnand (!%p15123_p9), %p12988_p11, %p12596_p10 }
  0xe0   : > { %p12990_p13 = pneg %p12989_p12 }
  0xe2   : > { %p12995_p1 = pnand %p12993_p0, %p12990_p13 }
  0xe4   : > { %12998 = shalt.err (!%p12995_p1)
}
  0xe5   : > { %s12999_s2 = scalar_lea.vmem %s2132_s7, 32  ;;  %p13006_p7 = scmp.lt.s32.totalorder %s2132_s7, %s2132_s7 }
  0xe6   : > { %p13000_p2 = scmp.ne.s32.totalorder %s2132_s7, %s12999_s2  ;;  %p13007_p8 = scmp.lt.s32.totalorder %s12999_s2, %s12999_s2 }
  0xe8   : > { %p13001_p3 = pnand %p13000_p2, %p12596_p10  ;;  %p13008_p6 = por %p13007_p8, %p13006_p7 }
  0xea   : > { %p13002_p4 = pneg %p13001_p3 }
  0xec   : > { %p13009_p5 = pnand %p13008_p6, %p13002_p4 }
  0xee   : > { %13012 = shalt.err (!%p13009_p5)
}
  0xef   : > { %s16759_s1 = smov 16   ;;  %s16761_s23 = smov 1  }
  0xf0   : > { %12389 = dma.hbm_to_vmem [thread:$0]  (%p12596_p10), %s16916_s14, 32, %s2132_s7, [#allocation6], %s16759_s1, %s16759_s1, %s16761_s23  }
  0xf1   : > { %s13013_s10 = scalar_lea.hbm %s14698_s30, 32 }
  0xf2   : > { %p13014_p11 = scmp.ne.s32.totalorder %s14698_s30, %s13013_s10  ;;  %p13019_p5 = scmp.lt.u32.totalorder %s13013_s10, %s14698_s30 }
  0xf4   : > { %p13015_p12 = pnand %p13014_p11, %p12596_p10 }
  0xf6   : > { %p13016_p6 = pneg %p13015_p12 }
  0xf8   : > { %p13021_p13 = pnand %p13019_p5, %p13016_p6 }
  0xfa   : > { %13024 = shalt.err (!%p13021_p13)
}
  0xfb   : > { %s13025_s2 = scalar_lea.vmem %s2161_s11, 32  ;;  %p13032_p3 = scmp.lt.s32.totalorder %s2161_s11, %s2161_s11 }
  0xfc   : > { %p13026_p0 = scmp.ne.s32.totalorder %s2161_s11, %s13025_s2  ;;  %p13033_p4 = scmp.lt.s32.totalorder %s13025_s2, %s13025_s2 }
  0xfe   : > { %p13027_p1 = pnand %p13026_p0, %p12596_p10  ;;  %p13034_p7 = por %p13033_p4, %p13032_p3 }
 0x100   : > { %p13028_p2 = pneg %p13027_p1 }
 0x102   : > { %p13035_p8 = pnand %p13034_p7, %p13028_p2 }
 0x104   : > { %13038 = shalt.err (!%p13035_p8)
}
 0x105   : > { %12393 = dma.hbm_to_vmem [thread:$0]  (%p12596_p10), %s14698_s30, 32, %s2161_s11, [#allocation9], %s16759_s1, %s16759_s1, %s16761_s23  }
 0x106   : > { %s14572_s7 = smov [#allocation11]   ;;  %s14573_s14 = smov [#allocation14]  }
 0x107   : > { %s2186_s10 = sshll.u32 %s14572_s7, 4  ;;  %s2212_s16 = sshll.u32 %s14573_s14, 4  ;;  %s2187_s10 = int_to_ptr.vmem [resolvable:$true] %s2186_s10  ;;  %s2213_s16 = int_to_ptr.vmem [resolvable:$true] %s2212_s16 }
 0x108   : > { %s13039_s2 = scalar_lea.hbm %s16911_s12, 32 }
 0x109   : > { %p13040_p11 = scmp.ne.s32.totalorder %s16911_s12, %s13039_s2  ;;  %p13045_p5 = scmp.lt.u32.totalorder %s13039_s2, %s16911_s12 }
 0x10b   : > { %p13041_p12 = pnand %p13040_p11, %p12596_p10 }
 0x10d   : > { %p13042_p6 = pneg %p13041_p12 }
 0x10f   : > { %p13047_p13 = pnand %p13045_p5, %p13042_p6 }
 0x111   : > { %13050 = shalt.err (!%p13047_p13)
}
 0x112   : > { %s13051_s0 = scalar_lea.vmem %s2187_s10, 32  ;;  %p13058_p3 = scmp.lt.s32.totalorder %s2187_s10, %s2187_s10 }
 0x113   : > { %p13052_p0 = scmp.ne.s32.totalorder %s2187_s10, %s13051_s0  ;;  %p13059_p4 = scmp.lt.s32.totalorder %s13051_s0, %s13051_s0 }
 0x115   : > { %p13053_p1 = pnand %p13052_p0, %p12596_p10  ;;  %p13060_p7 = por %p13059_p4, %p13058_p3 }
 0x117   : > { %p13054_p2 = pneg %p13053_p1 }
 0x119   : > { %p13061_p8 = pnand %p13060_p7, %p13054_p2 }
 0x11b   : > { %13064 = shalt.err (!%p13061_p8)
}
 0x11c   : > { %12397 = dma.hbm_to_vmem [thread:$0]  (%p12596_p10), %s16911_s12, 32, %s2187_s10, [#allocation12], %s16759_s1, %s16759_s1, %s16761_s23  }
 0x11d   : > { %s13065_s14 = scalar_lea.hbm %s14718_s27, 32 }
 0x11e   : > { %p13066_p11 = scmp.ne.s32.totalorder %s14718_s27, %s13065_s14  ;;  %p13071_p5 = scmp.lt.u32.totalorder %s13065_s14, %s14718_s27 }
 0x120   : > { %p13067_p12 = pnand %p13066_p11, %p12596_p10 }
 0x122   : > { %p13068_p6 = pneg %p13067_p12 }
 0x124   : > { %p13073_p13 = pnand %p13071_p5, %p13068_p6 }
 0x126   : > { %13076 = shalt.err (!%p13073_p13)
}
 0x127   : > { %s13077_s0 = scalar_lea.vmem %s2213_s16, 32  ;;  %p13084_p3 = scmp.lt.s32.totalorder %s2213_s16, %s2213_s16 }
 0x128   : > { %p13078_p0 = scmp.ne.s32.totalorder %s2213_s16, %s13077_s0  ;;  %p13085_p4 = scmp.lt.s32.totalorder %s13077_s0, %s13077_s0 }
 0x12a   : > { %p13079_p1 = pnand %p13078_p0, %p12596_p10  ;;  %p13086_p7 = por %p13085_p4, %p13084_p3 }
 0x12c   : > { %p13080_p2 = pneg %p13079_p1 }
 0x12e   : > { %p13087_p8 = pnand %p13086_p7, %p13080_p2 }
 0x130   : > { %13090 = shalt.err (!%p13087_p8)
}
 0x131   : > { %12401 = dma.hbm_to_vmem [thread:$0]  (%p12596_p10), %s14718_s27, 32, %s2213_s16, [#allocation15], %s16759_s1, %s16759_s1, %s16761_s23  }
 0x132   : > { %s14574_s11 = smov [#allocation17]   ;;  %s14575_s10 = smov [#allocation20]  }
 0x133   : > { %s2241_s7 = sshll.u32 %s14574_s11, 4  ;;  %s2273_s2 = sshll.u32 %s14575_s10, 4  ;;  %s2242_s7 = int_to_ptr.vmem [resolvable:$true] %s2241_s7  ;;  %s2274_s2 = int_to_ptr.vmem [resolvable:$true] %s2273_s2 }
 0x134   : > { %s13091_s14 = scalar_lea.hbm %s16913_s8, 32 }
 0x135   : > { %p13092_p11 = scmp.ne.s32.totalorder %s16913_s8, %s13091_s14  ;;  %p13097_p5 = scmp.lt.u32.totalorder %s13091_s14, %s16913_s8 }
 0x137   : > { %p13093_p12 = pnand %p13092_p11, %p12596_p10 }
 0x139   : > { %p13094_p6 = pneg %p13093_p12 }
 0x13b   : > { %p13099_p13 = pnand %p13097_p5, %p13094_p6 }
 0x13d   : > { %13102 = shalt.err (!%p13099_p13)
}
 0x13e   : > { %s13103_s0 = scalar_lea.vmem %s2242_s7, 32  ;;  %p13110_p3 = scmp.lt.s32.totalorder %s2242_s7, %s2242_s7 }
 0x13f   : > { %p13104_p0 = scmp.ne.s32.totalorder %s2242_s7, %s13103_s0  ;;  %p13111_p4 = scmp.lt.s32.totalorder %s13103_s0, %s13103_s0 }
 0x141   : > { %p13105_p1 = pnand %p13104_p0, %p12596_p10  ;;  %p13112_p7 = por %p13111_p4, %p13110_p3 }
 0x143   : > { %p13106_p2 = pneg %p13105_p1 }
 0x145   : > { %p13113_p8 = pnand %p13112_p7, %p13106_p2 }
 0x147   : > { %13116 = shalt.err (!%p13113_p8)
}
 0x148   : > { %12405 = dma.hbm_to_vmem [thread:$0]  (%p12596_p10), %s16913_s8, 32, %s2242_s7, [#allocation18], %s16759_s1, %s16759_s1, %s16761_s23  }
 0x149   : > { %s13117_s16 = scalar_lea.hbm %s14753_s17, 32 }
 0x14a   : > { %p13118_p11 = scmp.ne.s32.totalorder %s14753_s17, %s13117_s16  ;;  %p13123_p5 = scmp.lt.u32.totalorder %s13117_s16, %s14753_s17 }
 0x14c   : > { %p13119_p12 = pnand %p13118_p11, %p12596_p10 }
 0x14e   : > { %p13120_p6 = pneg %p13119_p12 }
 0x150   : > { %p13125_p13 = pnand %p13123_p5, %p13120_p6 }
 0x152   : > { %13128 = shalt.err (!%p13125_p13)
}
 0x153   : > { %s13129_s11 = scalar_lea.vmem %s2274_s2, 32  ;;  %p13136_p3 = scmp.lt.s32.totalorder %s2274_s2, %s2274_s2 }
 0x154   : > { %p13130_p0 = scmp.ne.s32.totalorder %s2274_s2, %s13129_s11  ;;  %p13137_p4 = scmp.lt.s32.totalorder %s13129_s11, %s13129_s11 }
 0x156   : > { %p13131_p1 = pnand %p13130_p0, %p12596_p10  ;;  %p13138_p7 = por %p13137_p4, %p13136_p3 }
 0x158   : > { %p13132_p2 = pneg %p13131_p1 }
 0x15a   : > { %p13139_p8 = pnand %p13138_p7, %p13132_p2 }
 0x15c   : > { %13142 = shalt.err (!%p13139_p8)
}
 0x15d   : > { %12409 = dma.hbm_to_vmem [thread:$0]  (%p12596_p10), %s14753_s17, 32, %s2274_s2, [#allocation21], %s16759_s1, %s16759_s1, %s16761_s23  }
 0x15e   : > { %s14576_s7 = smov [#allocation23]   ;;  %s14577_s14 = smov [#allocation26]  }
 0x15f   : > { %s2306_s10 = sshll.u32 %s14576_s7, 4  ;;  %s2327_s0 = sshll.u32 %s14577_s14, 4  ;;  %s2307_s10 = int_to_ptr.vmem [resolvable:$true] %s2306_s10  ;;  %s2328_s0 = int_to_ptr.vmem [resolvable:$true] %s2327_s0 }
 0x160   : > { %s13143_s16 = scalar_lea.hbm %s16914_s5, 16 }
 0x161   : > { %p13144_p11 = scmp.ne.s32.totalorder %s16914_s5, %s13143_s16  ;;  %p13149_p5 = scmp.lt.u32.totalorder %s13143_s16, %s16914_s5 }
 0x163   : > { %p13145_p12 = pnand %p13144_p11, %p12596_p10 }
 0x165   : > { %p13146_p6 = pneg %p13145_p12 }
 0x167   : > { %p13151_p13 = pnand %p13149_p5, %p13146_p6 }
 0x169   : > { %13154 = shalt.err (!%p13151_p13)
}
 0x16a   : > { %s13155_s11 = scalar_lea.vmem %s2307_s10, 16  ;;  %s13161_s2 = scalar_lea.vmem %s2307_s10, 32 }
 0x16b   : > { %p13156_p0 = scmp.ne.s32.totalorder %s2307_s10, %s13155_s11  ;;  %p13162_p3 = scmp.lt.s32.totalorder %s2307_s10, %s2307_s10 }
 0x16c   : > { %p13163_p4 = scmp.lt.s32.totalorder %s13161_s2, %s13155_s11 }
 0x16d   : > { %p13157_p1 = pnand %p13156_p0, %p12596_p10 }
 0x16e   : > { %p13164_p7 = por %p13163_p4, %p13162_p3 }
 0x16f   : > { %p13158_p2 = pneg %p13157_p1 }
 0x171   : > { %p13165_p8 = pnand %p13164_p7, %p13158_p2 }
 0x173   : > { %13168 = shalt.err (!%p13165_p8)
}
 0x174   : > { %12413 = dma.hbm_to_vmem [thread:$0]  (%p12596_p10), %s16914_s5, 16, %s2307_s10, [#allocation24]  }
 0x175   : > { %s13169_s7 = scalar_lea.hbm %s16912_s9, 64 }
 0x176   : > { %p13170_p11 = scmp.ne.s32.totalorder %s16912_s9, %s13169_s7  ;;  %p13175_p5 = scmp.lt.u32.totalorder %s13169_s7, %s16912_s9 }
 0x178   : > { %p13171_p12 = pnand %p13170_p11, %p12596_p10 }
 0x17a   : > { %p13172_p6 = pneg %p13171_p12 }
 0x17c   : > { %p13177_p13 = pnand %p13175_p5, %p13172_p6 }
 0x17e   : > { %13180 = shalt.err (!%p13177_p13)
}
 0x17f   : > { %s13181_s14 = scalar_lea.vmem %s2328_s0, 64  ;;  %p13188_p3 = scmp.lt.s32.totalorder %s2328_s0, %s2328_s0 }
 0x180   : > { %p13182_p0 = scmp.ne.s32.totalorder %s2328_s0, %s13181_s14  ;;  %p13189_p4 = scmp.lt.s32.totalorder %s13181_s14, %s13181_s14 }
 0x182   : > { %p13183_p1 = pnand %p13182_p0, %p12596_p10  ;;  %p13190_p7 = por %p13189_p4, %p13188_p3 }
 0x184   : > { %p13184_p2 = pneg %p13183_p1 }
 0x186   : > { %p13191_p8 = pnand %p13190_p7, %p13184_p2 }
 0x188   : > { %13194 = shalt.err (!%p13191_p8)
}
 0x189   : > { %s14578_s10 = smov 32   ;;  %s14579_s16 = smov 2  }
 0x18a   : > { %12417 = dma.hbm_to_vmem [thread:$0]  (%p12596_p10), %s16912_s9, 64, %s2328_s0, [#allocation27], %s14578_s10, %s14578_s10, %s14579_s16  }
 0x18b   : > { %s14580_s11 = smov [#allocation29]   ;;  %s14581_s7 = smov [#allocation32]  }
 0x18c   : > { %s2359_s2 = sshll.u32 %s14580_s11, 4  ;;  %s2388_s1 = sshll.u32 %s14581_s7, 4  ;;  %s2360_s2 = int_to_ptr.vmem [resolvable:$true] %s2359_s2  ;;  %s2389_s1 = int_to_ptr.vmem [resolvable:$true] %s2388_s1 }
 0x18d   : > { %s13195_s23 = scalar_lea.hbm %s14803_s25, 32 }
 0x18e   : > { %p13196_p11 = scmp.ne.s32.totalorder %s14803_s25, %s13195_s23  ;;  %p13201_p5 = scmp.lt.u32.totalorder %s13195_s23, %s14803_s25 }
 0x190   : > { %p13197_p12 = pnand %p13196_p11, %p12596_p10 }
 0x192   : > { %p13198_p6 = pneg %p13197_p12 }
 0x194   : > { %p13203_p13 = pnand %p13201_p5, %p13198_p6 }
 0x196   : > { %13206 = shalt.err (!%p13203_p13)
}
 0x197   : > { %s13207_s14 = scalar_lea.vmem %s2360_s2, 32  ;;  %p13214_p3 = scmp.lt.s32.totalorder %s2360_s2, %s2360_s2 }
 0x198   : > { %p13208_p0 = scmp.ne.s32.totalorder %s2360_s2, %s13207_s14  ;;  %p13215_p4 = scmp.lt.s32.totalorder %s13207_s14, %s13207_s14 }
 0x19a   : > { %p13209_p1 = pnand %p13208_p0, %p12596_p10  ;;  %p13216_p7 = por %p13215_p4, %p13214_p3 }
 0x19c   : > { %p13210_p2 = pneg %p13209_p1 }
 0x19e   : > { %p13217_p8 = pnand %p13216_p7, %p13210_p2 }
 0x1a0   : > { %13220 = shalt.err (!%p13217_p8)
}
 0x1a1   : > { %s16926_s0 = smov 1   ;;  %s16927_s10 = smov 16  }
 0x1a2   : > { %12421 = dma.hbm_to_vmem [thread:$0]  (%p12596_p10), %s14803_s25, 32, %s2360_s2, [#allocation30], %s16927_s10, %s16927_s10, %s16926_s0  }
 0x1a3   : > { %s13221_s23 = scalar_lea.hbm %s14818_s21, 32 }
 0x1a4   : > { %p13222_p11 = scmp.ne.s32.totalorder %s14818_s21, %s13221_s23  ;;  %p13227_p5 = scmp.lt.u32.totalorder %s13221_s23, %s14818_s21 }
 0x1a6   : > { %p13223_p12 = pnand %p13222_p11, %p12596_p10 }
 0x1a8   : > { %p13224_p6 = pneg %p13223_p12 }
 0x1aa   : > { %p13229_p13 = pnand %p13227_p5, %p13224_p6 }
 0x1ac   : > { %13232 = shalt.err (!%p13229_p13)
}
 0x1ad   : > { %s13233_s16 = scalar_lea.vmem %s2389_s1, 32  ;;  %p13240_p3 = scmp.lt.s32.totalorder %s2389_s1, %s2389_s1 }
 0x1ae   : > { %p13234_p0 = scmp.ne.s32.totalorder %s2389_s1, %s13233_s16  ;;  %p13241_p4 = scmp.lt.s32.totalorder %s13233_s16, %s13233_s16 }
 0x1b0   : > { %p13235_p1 = pnand %p13234_p0, %p12596_p10  ;;  %p13242_p7 = por %p13241_p4, %p13240_p3 }
 0x1b2   : > { %p13236_p2 = pneg %p13235_p1 }
 0x1b4   : > { %p13243_p8 = pnand %p13242_p7, %p13236_p2 }
 0x1b6   : > { %13246 = shalt.err (!%p13243_p8)
}
 0x1b7   : > { %12425 = dma.hbm_to_vmem [thread:$0]  (%p12596_p10), %s14818_s21, 32, %s2389_s1, [#allocation33], %s16927_s10, %s16927_s10, %s16926_s0  }
 0x1b8   : > { %s14582_s11 = smov [#allocation35]   ;;  %s14583_s7 = smov [#allocation38]  }
 0x1b9   : > { %s2414_s2 = sshll.u32 %s14582_s11, 4  ;;  %s2440_s14 = sshll.u32 %s14583_s7, 4  ;;  %s2415_s2 = int_to_ptr.vmem [resolvable:$true] %s2414_s2  ;;  %s2441_s14 = int_to_ptr.vmem [resolvable:$true] %s2440_s14 }
 0x1ba   : > { %s13247_s23 = scalar_lea.hbm %s14828_s19, 32 }
 0x1bb   : > { %p13248_p11 = scmp.ne.s32.totalorder %s14828_s19, %s13247_s23  ;;  %p13253_p5 = scmp.lt.u32.totalorder %s13247_s23, %s14828_s19 }
 0x1bd   : > { %p13249_p12 = pnand %p13248_p11, %p12596_p10 }
 0x1bf   : > { %p13250_p6 = pneg %p13249_p12 }
 0x1c1   : > { %p13255_p13 = pnand %p13253_p5, %p13250_p6 }
 0x1c3   : > { %13258 = shalt.err (!%p13255_p13)
}
 0x1c4   : > { %s13259_s16 = scalar_lea.vmem %s2415_s2, 32  ;;  %p13266_p3 = scmp.lt.s32.totalorder %s2415_s2, %s2415_s2 }
 0x1c5   : > { %p13260_p0 = scmp.ne.s32.totalorder %s2415_s2, %s13259_s16  ;;  %p13267_p4 = scmp.lt.s32.totalorder %s13259_s16, %s13259_s16 }
 0x1c7   : > { %p13261_p1 = pnand %p13260_p0, %p12596_p10  ;;  %p13268_p7 = por %p13267_p4, %p13266_p3 }
 0x1c9   : > { %p13262_p2 = pneg %p13261_p1 }
 0x1cb   : > { %p13269_p8 = pnand %p13268_p7, %p13262_p2 }
 0x1cd   : > { %13272 = shalt.err (!%p13269_p8)
}
 0x1ce   : > { %12429 = dma.hbm_to_vmem [thread:$0]  (%p12596_p10), %s14828_s19, 32, %s2415_s2, [#allocation36], %s16927_s10, %s16927_s10, %s16926_s0  }
 0x1cf   : > { %s13273_s1 = scalar_lea.hbm %s16915_s4, 32 }
 0x1d0   : > { %p13274_p11 = scmp.ne.s32.totalorder %s16915_s4, %s13273_s1  ;;  %p13279_p5 = scmp.lt.u32.totalorder %s13273_s1, %s16915_s4 }
 0x1d2   : > { %p13275_p12 = pnand %p13274_p11, %p12596_p10 }
 0x1d4   : > { %p13276_p6 = pneg %p13275_p12 }
 0x1d6   : > { %p13281_p13 = pnand %p13279_p5, %p13276_p6 }
 0x1d8   : > { %13284 = shalt.err (!%p13281_p13)
}
 0x1d9   : > { %s13285_s11 = scalar_lea.vmem %s2441_s14, 32  ;;  %p13292_p3 = scmp.lt.s32.totalorder %s2441_s14, %s2441_s14 }
 0x1da   : > { %p13286_p0 = scmp.ne.s32.totalorder %s2441_s14, %s13285_s11  ;;  %p13293_p4 = scmp.lt.s32.totalorder %s13285_s11, %s13285_s11 }
 0x1dc   : > { %p13287_p1 = pnand %p13286_p0, %p12596_p10  ;;  %p13294_p7 = por %p13293_p4, %p13292_p3 }
 0x1de   : > { %p13288_p2 = pneg %p13287_p1 }
 0x1e0   : > { %p13295_p8 = pnand %p13294_p7, %p13288_p2 }
 0x1e2   : > { %13298 = shalt.err (!%p13295_p8)
}
 0x1e3   : > { %12433 = dma.hbm_to_vmem [thread:$0]  (%p12596_p10), %s16915_s4, 32, %s2441_s14, [#allocation39], %s16927_s10, %s16927_s10, %s16926_s0  }
 0x1e4   : > { %s14584_s2 = smov [#allocation41]   ;;  %s14585_s23 = smov [#allocation44]  }
 0x1e5   : > { %s2469_s7 = sshll.u32 %s14584_s2, 4  ;;  %s2501_s16 = sshll.u32 %s14585_s23, 4  ;;  %s2470_s7 = int_to_ptr.vmem [resolvable:$true] %s2469_s7  ;;  %s2502_s16 = int_to_ptr.vmem [resolvable:$true] %s2501_s16 }
 0x1e6   : > { %s13299_s1 = scalar_lea.hbm %s14853_s13, 32 }
 0x1e7   : > { %p13300_p11 = scmp.ne.s32.totalorder %s14853_s13, %s13299_s1  ;;  %p13305_p5 = scmp.lt.u32.totalorder %s13299_s1, %s14853_s13 }
 0x1e9   : > { %p13301_p12 = pnand %p13300_p11, %p12596_p10 }
 0x1eb   : > { %p13302_p6 = pneg %p13301_p12 }
 0x1ed   : > { %p13307_p13 = pnand %p13305_p5, %p13302_p6 }
 0x1ef   : > { %13310 = shalt.err (!%p13307_p13)
}
 0x1f0   : > { %s13311_s11 = scalar_lea.vmem %s2470_s7, 32  ;;  %p13318_p3 = scmp.lt.s32.totalorder %s2470_s7, %s2470_s7 }
 0x1f1   : > { %p13312_p0 = scmp.ne.s32.totalorder %s2470_s7, %s13311_s11  ;;  %p13319_p4 = scmp.lt.s32.totalorder %s13311_s11, %s13311_s11 }
 0x1f3   : > { %p13313_p1 = pnand %p13312_p0, %p12596_p10  ;;  %p13320_p7 = por %p13319_p4, %p13318_p3 }
 0x1f5   : > { %p13314_p2 = pneg %p13313_p1 }
 0x1f7   : > { %p13321_p8 = pnand %p13320_p7, %p13314_p2 }
 0x1f9   : > { %13324 = shalt.err (!%p13321_p8)
}
 0x1fa   : > { %12437 = dma.hbm_to_vmem [thread:$0]  (%p12596_p10), %s14853_s13, 32, %s2470_s7, [#allocation42], %s16927_s10, %s16927_s10, %s16926_s0  }
 0x1fb   : > { %s13325_s14 = scalar_lea.hbm %s14873_s24, 32 }
 0x1fc   : > { %p13326_p11 = scmp.ne.s32.totalorder %s14873_s24, %s13325_s14  ;;  %p13331_p5 = scmp.lt.u32.totalorder %s13325_s14, %s14873_s24 }
 0x1fe   : > { %p13327_p12 = pnand %p13326_p11, %p12596_p10 }
 0x200   : > { %p13328_p6 = pneg %p13327_p12 }
 0x202   : > { %p13333_p13 = pnand %p13331_p5, %p13328_p6 }
 0x204   : > { %13336 = shalt.err (!%p13333_p13)
}
 0x205   : > { %s13337_s2 = scalar_lea.vmem %s2502_s16, 32  ;;  %p13344_p3 = scmp.lt.s32.totalorder %s2502_s16, %s2502_s16 }
 0x206   : > { %p13338_p0 = scmp.ne.s32.totalorder %s2502_s16, %s13337_s2  ;;  %p13345_p4 = scmp.lt.s32.totalorder %s13337_s2, %s13337_s2 }
 0x208   : > { %p13339_p1 = pnand %p13338_p0, %p12596_p10  ;;  %p13346_p7 = por %p13345_p4, %p13344_p3 }
 0x20a   : > { %p13340_p2 = pneg %p13339_p1 }
 0x20c   : > { %p13347_p8 = pnand %p13346_p7, %p13340_p2 }
 0x20e   : > { %13350 = shalt.err (!%p13347_p8)
}
 0x20f   : > { %s16928_s7 = sld [smem:[#allocation151_spill]]  ;;  %s14586_s23 = smov [#allocation47]  }
 0x210   : > { %12441 = dma.hbm_to_vmem [thread:$0]  (%p12596_p10), %s14873_s24, 32, %s2502_s16, [#allocation45], %s16927_s10, %s16927_s10, %s16926_s0  }
 0x211   : > { %s2533_s1 = sshll.u32 %s14586_s23, 4  ;;  %s14587_s11 = smov [#allocation50]   ;;  %s2534_s1 = int_to_ptr.vmem [resolvable:$true] %s2533_s1 }
 0x212   : > { %s2566_s14 = sshll.u32 %s14587_s11, 4  ;;  %s2567_s14 = int_to_ptr.vmem [resolvable:$true] %s2566_s14 }
 0x215   : > { %s13351_s2 = scalar_lea.hbm %s16928_s7, 32 }
 0x216   : > { %p13352_p11 = scmp.ne.s32.totalorder %s16928_s7, %s13351_s2  ;;  %p13357_p5 = scmp.lt.u32.totalorder %s13351_s2, %s16928_s7 }
 0x218   : > { %p13353_p12 = pnand %p13352_p11, %p12596_p10 }
 0x21a   : > { %p13354_p6 = pneg %p13353_p12 }
 0x21c   : > { %p13359_p13 = pnand %p13357_p5, %p13354_p6 }
 0x21e   : > { %13362 = shalt.err (!%p13359_p13)
}
 0x21f   : > { %s13363_s4 = scalar_lea.vmem %s2534_s1, 32  ;;  %p13370_p3 = scmp.lt.s32.totalorder %s2534_s1, %s2534_s1 }
 0x220   : > { %p13364_p0 = scmp.ne.s32.totalorder %s2534_s1, %s13363_s4  ;;  %p13371_p4 = scmp.lt.s32.totalorder %s13363_s4, %s13363_s4 }
 0x222   : > { %p13365_p1 = pnand %p13364_p0, %p12596_p10  ;;  %p13372_p7 = por %p13371_p4, %p13370_p3 }
 0x224   : > { %p13366_p2 = pneg %p13365_p1 }
 0x226   : > { %p13373_p8 = pnand %p13372_p7, %p13366_p2 }
 0x228   : > { %13376 = shalt.err (!%p13373_p8)
}
 0x229   : > { %s16929_s16 = sld [smem:[#allocation155_spill]] }
 0x22a   : > { %12445 = dma.hbm_to_vmem [thread:$0]  (%p12596_p10), %s16928_s7, 32, %s2534_s1, [#allocation48], %s16927_s10, %s16927_s10, %s16926_s0  }
 0x22f   : > { %s13377_s23 = scalar_lea.hbm %s16929_s16, 16 }
 0x230   : > { %p13378_p11 = scmp.ne.s32.totalorder %s16929_s16, %s13377_s23  ;;  %p13383_p5 = scmp.lt.u32.totalorder %s13377_s23, %s16929_s16 }
 0x232   : > { %p13379_p12 = pnand %p13378_p11, %p12596_p10 }
 0x234   : > { %p13380_p6 = pneg %p13379_p12 }
 0x236   : > { %p13385_p13 = pnand %p13383_p5, %p13380_p6 }
 0x238   : > { %13388 = shalt.err (!%p13385_p13)
}
 0x239   : > { %s13389_s4 = scalar_lea.vmem %s2567_s14, 16  ;;  %s13395_s11 = scalar_lea.vmem %s2567_s14, 32 }
 0x23a   : > { %p13390_p0 = scmp.ne.s32.totalorder %s2567_s14, %s13389_s4  ;;  %p13396_p3 = scmp.lt.s32.totalorder %s2567_s14, %s2567_s14 }
 0x23b   : > { %p13397_p4 = scmp.lt.s32.totalorder %s13395_s11, %s13389_s4 }
 0x23c   : > { %p13391_p1 = pnand %p13390_p0, %p12596_p10 }
 0x23d   : > { %p13398_p7 = por %p13397_p4, %p13396_p3 }
 0x23e   : > { %p13392_p2 = pneg %p13391_p1 }
 0x240   : > { %p13399_p8 = pnand %p13398_p7, %p13392_p2 }
 0x242   : > { %13402 = shalt.err (!%p13399_p8)
}
 0x243   : > { %s16930_s1 = sld [smem:[#allocation159_spill]]  ;;  %s14588_s2 = smov [#allocation53]  }
 0x244   : > { %12449 = dma.hbm_to_vmem [thread:$0]  (%p12596_p10), %s16929_s16, 16, %s2567_s14, [#allocation51]  }
 0x245   : > { %s2593_s23 = sshll.u32 %s14588_s2, 4  ;;  %s14589_s5 = smov [#allocation56]   ;;  %s2594_s23 = int_to_ptr.vmem [resolvable:$true] %s2593_s23 }
 0x246   : > { %s2625_s7 = sshll.u32 %s14589_s5, 4  ;;  %s2626_s7 = int_to_ptr.vmem [resolvable:$true] %s2625_s7 }
 0x249   : > { %s13403_s8 = scalar_lea.hbm %s16930_s1, 32 }
 0x24a   : > { %p13404_p11 = scmp.ne.s32.totalorder %s16930_s1, %s13403_s8  ;;  %p13409_p5 = scmp.lt.u32.totalorder %s13403_s8, %s16930_s1 }
 0x24c   : > { %p13405_p12 = pnand %p13404_p11, %p12596_p10 }
 0x24e   : > { %p13406_p6 = pneg %p13405_p12 }
 0x250   : > { %p13411_p13 = pnand %p13409_p5, %p13406_p6 }
 0x252   : > { %13414 = shalt.err (!%p13411_p13)
}
 0x253   : > { %s13415_s4 = scalar_lea.vmem %s2594_s23, 32  ;;  %p13422_p3 = scmp.lt.s32.totalorder %s2594_s23, %s2594_s23 }
 0x254   : > { %p13416_p0 = scmp.ne.s32.totalorder %s2594_s23, %s13415_s4  ;;  %p13423_p4 = scmp.lt.s32.totalorder %s13415_s4, %s13415_s4 }
 0x256   : > { %p13417_p1 = pnand %p13416_p0, %p12596_p10  ;;  %p13424_p7 = por %p13423_p4, %p13422_p3 }
 0x258   : > { %p13418_p2 = pneg %p13417_p1 }
 0x25a   : > { %p13425_p8 = pnand %p13424_p7, %p13418_p2 }
 0x25c   : > { %13428 = shalt.err (!%p13425_p8)
}
 0x25d   : > { %s16931_s5 = sld [smem:[#allocation163_spill]] }
 0x25e   : > { %12453 = dma.hbm_to_vmem [thread:$0]  (%p12596_p10), %s16930_s1, 32, %s2594_s23, [#allocation54], %s16927_s10, %s16927_s10, %s16926_s0  }
 0x263   : > { %s13429_s8 = scalar_lea.hbm %s16931_s5, 32 }
 0x264   : > { %p13430_p11 = scmp.ne.s32.totalorder %s16931_s5, %s13429_s8  ;;  %p13435_p5 = scmp.lt.u32.totalorder %s13429_s8, %s16931_s5 }
 0x266   : > { %p13431_p12 = pnand %p13430_p11, %p12596_p10 }
 0x268   : > { %p13432_p6 = pneg %p13431_p12 }
 0x26a   : > { %p13437_p13 = pnand %p13435_p5, %p13432_p6 }
 0x26c   : > { %13440 = shalt.err (!%p13437_p13)
}
 0x26d   : > { %s13441_s14 = scalar_lea.vmem %s2626_s7, 32  ;;  %p13448_p3 = scmp.lt.s32.totalorder %s2626_s7, %s2626_s7 }
 0x26e   : > { %p13442_p0 = scmp.ne.s32.totalorder %s2626_s7, %s13441_s14  ;;  %p13449_p4 = scmp.lt.s32.totalorder %s13441_s14, %s13441_s14 }
 0x270   : > { %p13443_p1 = pnand %p13442_p0, %p12596_p10  ;;  %p13450_p7 = por %p13449_p4, %p13448_p3 }
 0x272   : > { %p13444_p2 = pneg %p13443_p1 }
 0x274   : > { %p13451_p8 = pnand %p13450_p7, %p13444_p2 }
 0x276   : > { %13454 = shalt.err (!%p13451_p8)
}
 0x277   : > { %s16932_s11 = sld [smem:[#allocation165_spill]]  ;;  %s14590_s2 = smov [#allocation59]  }
 0x278   : > { %12457 = dma.hbm_to_vmem [thread:$0]  (%p12596_p10), %s16931_s5, 32, %s2626_s7, [#allocation57], %s16927_s10, %s16927_s10, %s16926_s0  }
 0x279   : > { %s2651_s23 = sshll.u32 %s14590_s2, 4  ;;  %s14591_s4 = smov [#allocation62]   ;;  %s2652_s23 = int_to_ptr.vmem [resolvable:$true] %s2651_s23 }
 0x27a   : > { %s2677_s8 = sshll.u32 %s14591_s4, 4  ;;  %s2678_s8 = int_to_ptr.vmem [resolvable:$true] %s2677_s8 }
 0x27d   : > { %s13455_s14 = scalar_lea.hbm %s16932_s11, 32 }
 0x27e   : > { %p13456_p11 = scmp.ne.s32.totalorder %s16932_s11, %s13455_s14  ;;  %p13461_p5 = scmp.lt.u32.totalorder %s13455_s14, %s16932_s11 }
 0x280   : > { %p13457_p12 = pnand %p13456_p11, %p12596_p10 }
 0x282   : > { %p13458_p6 = pneg %p13457_p12 }
 0x284   : > { %p13463_p13 = pnand %p13461_p5, %p13458_p6 }
 0x286   : > { %13466 = shalt.err (!%p13463_p13)
}
 0x287   : > { %s13467_s1 = scalar_lea.vmem %s2652_s23, 32  ;;  %p13474_p3 = scmp.lt.s32.totalorder %s2652_s23, %s2652_s23 }
 0x288   : > { %p13468_p0 = scmp.ne.s32.totalorder %s2652_s23, %s13467_s1  ;;  %p13475_p4 = scmp.lt.s32.totalorder %s13467_s1, %s13467_s1 }
 0x28a   : > { %p13469_p1 = pnand %p13468_p0, %p12596_p10  ;;  %p13476_p7 = por %p13475_p4, %p13474_p3 }
 0x28c   : > { %p13470_p2 = pneg %p13469_p1 }
 0x28e   : > { %p13477_p8 = pnand %p13476_p7, %p13470_p2 }
 0x290   : > { %13480 = shalt.err (!%p13477_p8)
}
 0x291   : > { %s16933_s7 = sld [smem:[#allocation167_spill]] }
 0x292   : > { %12461 = dma.hbm_to_vmem [thread:$0]  (%p12596_p10), %s16932_s11, 32, %s2652_s23, [#allocation60], %s16927_s10, %s16927_s10, %s16926_s0  }
 0x297   : > { %s13481_s2 = scalar_lea.hbm %s16933_s7, 32 }
 0x298   : > { %p13482_p11 = scmp.ne.s32.totalorder %s16933_s7, %s13481_s2  ;;  %p13487_p5 = scmp.lt.u32.totalorder %s13481_s2, %s16933_s7 }
 0x29a   : > { %p13483_p12 = pnand %p13482_p11, %p12596_p10 }
 0x29c   : > { %p13484_p6 = pneg %p13483_p12 }
 0x29e   : > { %p13489_p13 = pnand %p13487_p5, %p13484_p6 }
 0x2a0   : > { %13492 = shalt.err (!%p13489_p13)
}
 0x2a1   : > { %s13493_s1 = scalar_lea.vmem %s2678_s8, 32  ;;  %p13500_p3 = scmp.lt.s32.totalorder %s2678_s8, %s2678_s8 }
 0x2a2   : > { %p13494_p0 = scmp.ne.s32.totalorder %s2678_s8, %s13493_s1  ;;  %p13501_p4 = scmp.lt.s32.totalorder %s13493_s1, %s13493_s1 }
 0x2a4   : > { %p13495_p1 = pnand %p13494_p0, %p12596_p10  ;;  %p13502_p7 = por %p13501_p4, %p13500_p3 }
 0x2a6   : > { %p13496_p2 = pneg %p13495_p1 }
 0x2a8   : > { %p13503_p8 = pnand %p13502_p7, %p13496_p2 }
 0x2aa   : > { %13506 = shalt.err (!%p13503_p8)
}
 0x2ab   : > { %s16934_s23 = sld [smem:[#allocation171_spill]]  ;;  %s14592_s14 = smov [#allocation65]  }
 0x2ac   : > { %12465 = dma.hbm_to_vmem [thread:$0]  (%p12596_p10), %s16933_s7, 32, %s2678_s8, [#allocation63], %s16927_s10, %s16927_s10, %s16926_s0  }
 0x2ad   : > { %s2710_s2 = sshll.u32 %s14592_s14, 4  ;;  %s14593_s5 = smov [#allocation68]   ;;  %s2711_s2 = int_to_ptr.vmem [resolvable:$true] %s2710_s2 }
 0x2ae   : > { %s2732_s9 = sshll.u32 %s14593_s5, 4  ;;  %s2733_s9 = int_to_ptr.vmem [resolvable:$true] %s2732_s9 }
 0x2b1   : > { %s16935_s4 = smov %s16934_s23  ;;  %s13507_s1 = scalar_lea.hbm %s16934_s23, 16 }
 0x2b2   : > { %p13508_p11 = scmp.ne.s32.totalorder %s16935_s4, %s13507_s1  ;;  %p13513_p5 = scmp.lt.u32.totalorder %s13507_s1, %s16935_s4 }
 0x2b4   : > { %p13509_p12 = pnand %p13508_p11, %p12596_p10 }
 0x2b6   : > { %p13510_p6 = pneg %p13509_p12 }
 0x2b8   : > { %p13515_p13 = pnand %p13513_p5, %p13510_p6 }
 0x2ba   : > { %13518 = shalt.err (!%p13515_p13)
}
 0x2bb   : > { %s13519_s11 = scalar_lea.vmem %s2711_s2, 16  ;;  %s13525_s8 = scalar_lea.vmem %s2711_s2, 32 }
 0x2bc   : > { %p13520_p0 = scmp.ne.s32.totalorder %s2711_s2, %s13519_s11  ;;  %p13526_p3 = scmp.lt.s32.totalorder %s2711_s2, %s2711_s2 }
 0x2bd   : > { %p13527_p4 = scmp.lt.s32.totalorder %s13525_s8, %s13519_s11 }
 0x2be   : > { %p13521_p1 = pnand %p13520_p0, %p12596_p10 }
 0x2bf   : > { %p13528_p7 = por %p13527_p4, %p13526_p3 }
 0x2c0   : > { %p13522_p2 = pneg %p13521_p1 }
 0x2c2   : > { %p13529_p8 = pnand %p13528_p7, %p13522_p2 }
 0x2c4   : > { %13532 = shalt.err (!%p13529_p8)
}
 0x2c5   : > { %s16936_s5 = sld [smem:[#allocation173_spill]] }
 0x2c6   : > { %12469 = dma.hbm_to_vmem [thread:$0]  (%p12596_p10), %s16935_s4, 16, %s2711_s2, [#allocation66]  }
 0x2cb   : > { %s13533_s23 = scalar_lea.hbm %s16936_s5, 16 }
 0x2cc   : > { %p13534_p11 = scmp.ne.s32.totalorder %s16936_s5, %s13533_s23  ;;  %p13539_p5 = scmp.lt.u32.totalorder %s13533_s23, %s16936_s5 }
 0x2ce   : > { %p13535_p12 = pnand %p13534_p11, %p12596_p10 }
 0x2d0   : > { %p13536_p6 = pneg %p13535_p12 }
 0x2d2   : > { %p13541_p13 = pnand %p13539_p5, %p13536_p6 }
 0x2d4   : > { %13544 = shalt.err (!%p13541_p13)
}
 0x2d5   : > { %s13545_s11 = scalar_lea.vmem %s2733_s9, 16  ;;  %s13551_s14 = scalar_lea.vmem %s2733_s9, 32 }
 0x2d6   : > { %p13546_p0 = scmp.ne.s32.totalorder %s2733_s9, %s13545_s11  ;;  %p13552_p3 = scmp.lt.s32.totalorder %s2733_s9, %s2733_s9 }
 0x2d7   : > { %p13553_p4 = scmp.lt.s32.totalorder %s13551_s14, %s13545_s11 }
 0x2d8   : > { %p13547_p1 = pnand %p13546_p0, %p12596_p10 }
 0x2d9   : > { %p13554_p7 = por %p13553_p4, %p13552_p3 }
 0x2da   : > { %p13548_p2 = pneg %p13547_p1 }
 0x2dc   : > { %p13555_p8 = pnand %p13554_p7, %p13548_p2 }
 0x2de   : > { %13558 = shalt.err (!%p13555_p8)
}
 0x2df   : > { %s16937_s2 = sld [smem:[#allocation175_spill]]  ;;  %s14594_s1 = smov [#allocation71]  }
 0x2e0   : > { %12473 = dma.hbm_to_vmem [thread:$0]  (%p12596_p10), %s16936_s5, 16, %s2733_s9, [#allocation69]  }
 0x2e1   : > { %s2754_s8 = sshll.u32 %s14594_s1, 4  ;;  %s14595_s23 = smov [#allocation74]   ;;  %s2755_s8 = int_to_ptr.vmem [resolvable:$true] %s2754_s8 }
 0x2e2   : > { %s2782_s4 = sshll.u32 %s14595_s23, 4  ;;  %s2783_s4 = int_to_ptr.vmem [resolvable:$true] %s2782_s4 }
 0x2e5   : > { %s13559_s7 = scalar_lea.hbm %s16937_s2, 16 }
 0x2e6   : > { %p13560_p11 = scmp.ne.s32.totalorder %s16937_s2, %s13559_s7  ;;  %p13565_p5 = scmp.lt.u32.totalorder %s13559_s7, %s16937_s2 }
 0x2e8   : > { %p13561_p12 = pnand %p13560_p11, %p12596_p10 }
 0x2ea   : > { %p13562_p6 = pneg %p13561_p12 }
 0x2ec   : > { %p13567_p13 = pnand %p13565_p5, %p13562_p6 }
 0x2ee   : > { %13570 = shalt.err (!%p13567_p13)
}
 0x2ef   : > { %s13571_s11 = scalar_lea.vmem %s2755_s8, 16  ;;  %s13577_s9 = scalar_lea.vmem %s2755_s8, 32 }
 0x2f0   : > { %p13572_p0 = scmp.ne.s32.totalorder %s2755_s8, %s13571_s11  ;;  %p13578_p3 = scmp.lt.s32.totalorder %s2755_s8, %s2755_s8 }
 0x2f1   : > { %p13579_p4 = scmp.lt.s32.totalorder %s13577_s9, %s13571_s11 }
 0x2f2   : > { %p13573_p1 = pnand %p13572_p0, %p12596_p10 }
 0x2f3   : > { %p13580_p7 = por %p13579_p4, %p13578_p3 }
 0x2f4   : > { %p13574_p2 = pneg %p13573_p1 }
 0x2f6   : > { %p13581_p8 = pnand %p13580_p7, %p13574_p2 }
 0x2f8   : > { %13584 = shalt.err (!%p13581_p8)
}
 0x2f9   : > { %s16938_s14 = sld [smem:[#allocation179_spill]] }
 0x2fa   : > { %12477 = dma.hbm_to_vmem [thread:$0]  (%p12596_p10), %s16937_s2, 16, %s2755_s8, [#allocation72]  }
 0x2ff   : > { %s13585_s7 = scalar_lea.hbm %s16938_s14, 16 }
 0x300   : > { %p13586_p11 = scmp.ne.s32.totalorder %s16938_s14, %s13585_s7  ;;  %p13591_p5 = scmp.lt.u32.totalorder %s13585_s7, %s16938_s14 }
 0x302   : > { %p13587_p12 = pnand %p13586_p11, %p12596_p10 }
 0x304   : > { %p13588_p6 = pneg %p13587_p12 }
 0x306   : > { %p13593_p13 = pnand %p13591_p5, %p13588_p6 }
 0x308   : > { %13596 = shalt.err (!%p13593_p13)
}
 0x309   : > { %s13597_s1 = scalar_lea.vmem %s2783_s4, 16  ;;  %s13603_s23 = scalar_lea.vmem %s2783_s4, 32 }
 0x30a   : > { %p13598_p0 = scmp.ne.s32.totalorder %s2783_s4, %s13597_s1  ;;  %p13604_p3 = scmp.lt.s32.totalorder %s2783_s4, %s2783_s4 }
 0x30b   : > { %p13605_p4 = scmp.lt.s32.totalorder %s13603_s23, %s13597_s1 }
 0x30c   : > { %p13599_p1 = pnand %p13598_p0, %p12596_p10 }
 0x30d   : > { %p13606_p7 = por %p13605_p4, %p13604_p3 }
 0x30e   : > { %p13600_p2 = pneg %p13599_p1 }
 0x310   : > { %p13607_p8 = pnand %p13606_p7, %p13600_p2 }
 0x312   : > { %13610 = shalt.err (!%p13607_p8)
}
 0x313   : > { %s16939_s8 = sld [smem:[#allocation183_spill]]  ;;  %s14596_s11 = smov [#allocation77]  }
 0x314   : > { %12481 = dma.hbm_to_vmem [thread:$0]  (%p12596_p10), %s16938_s14, 16, %s2783_s4, [#allocation75]  }
 0x315   : > { %s2810_s9 = sshll.u32 %s14596_s11, 4  ;;  %s2811_s9 = int_to_ptr.vmem [resolvable:$true] %s2810_s9 }
 0x319   : > { %s13611_s7 = scalar_lea.hbm %s16939_s8, 16 }
 0x31a   : > { %p13612_p11 = scmp.ne.s32.totalorder %s16939_s8, %s13611_s7  ;;  %p13617_p5 = scmp.lt.u32.totalorder %s13611_s7, %s16939_s8 }
 0x31c   : > { %p13613_p12 = pnand %p13612_p11, %p12596_p10 }
 0x31e   : > { %p13614_p6 = pneg %p13613_p12 }
 0x320   : > { %p13619_p13 = pnand %p13617_p5, %p13614_p6 }
 0x322   : > { %13622 = shalt.err (!%p13619_p13)
}
 0x323   : > { %s13623_s1 = scalar_lea.vmem %s2811_s9, 16  ;;  %s13629_s23 = scalar_lea.vmem %s2811_s9, 32 }
 0x324   : > { %p13624_p0 = scmp.ne.s32.totalorder %s2811_s9, %s13623_s1  ;;  %p13630_p3 = scmp.lt.s32.totalorder %s2811_s9, %s2811_s9 }
 0x325   : > { %p13631_p4 = scmp.lt.s32.totalorder %s13629_s23, %s13623_s1 }
 0x326   : > { %p13625_p1 = pnand %p13624_p0, %p12596_p10 }
 0x327   : > { %p13632_p7 = por %p13631_p4, %p13630_p3 }
 0x328   : > { %p13626_p2 = pneg %p13625_p1 }
 0x32a   : > { %p13633_p8 = pnand %p13632_p7, %p13626_p2 }
 0x32c   : > { %13636 = shalt.err (!%p13633_p8)
}
 0x32d   : > { %s16940_s4 = sld [smem:[#allocation115_spill]]  ;;  %s14597_s11 = smov [#allocation2]  }
 0x32e   : > { %12485 = dma.hbm_to_vmem [thread:$0]  (%p12596_p10), %s16939_s8, 16, %s2811_s9, [#allocation78]  }
 0x32f   : > { %s2115_s7 = sshll.u32 %s14597_s11, 4  ;;  %s14598_s2 = smov [#allocation7]   ;;  %s2116_s7 = int_to_ptr.vmem [resolvable:$true] %s2115_s7 }
 0x330   : > { %s2147_s5 = sshll.u32 %s14598_s2, 4  ;;  %s2148_s5 = int_to_ptr.vmem [resolvable:$true] %s2147_s5 }
 0x333   : > { %s13637_s12 = scalar_lea.hbm %s16940_s4, 32 }
 0x334   : > { %p13638_p11 = scmp.ne.s32.totalorder %s16940_s4, %s13637_s12  ;;  %p13643_p5 = scmp.lt.u32.totalorder %s13637_s12, %s16940_s4 }
 0x336   : > { %p13639_p12 = pnand %p13638_p11, %p12596_p10 }
 0x338   : > { %p13640_p6 = pneg %p13639_p12 }
 0x33a   : > { %p13645_p13 = pnand %p13643_p5, %p13640_p6 }
 0x33c   : > { %13648 = shalt.err (!%p13645_p13)
}
 0x33d   : > { %s13649_s1 = scalar_lea.vmem %s2116_s7, 32  ;;  %p13656_p3 = scmp.lt.s32.totalorder %s2116_s7, %s2116_s7 }
 0x33e   : > { %p13650_p0 = scmp.ne.s32.totalorder %s2116_s7, %s13649_s1  ;;  %p13657_p4 = scmp.lt.s32.totalorder %s13649_s1, %s13649_s1 }
 0x340   : > { %p13651_p1 = pnand %p13650_p0, %p12596_p10  ;;  %p13658_p7 = por %p13657_p4, %p13656_p3 }
 0x342   : > { %p13652_p2 = pneg %p13651_p1 }
 0x344   : > { %p13659_p8 = pnand %p13658_p7, %p13652_p2 }
 0x346   : > { %13662 = shalt.err (!%p13659_p8)
}
 0x347   : > { %s16941_s12 = sld [smem:[#allocation119_spill]] }
 0x348   : > { %12387 = dma.hbm_to_vmem [thread:$0]  (%p12596_p10), %s16940_s4, 32, %s2116_s7, [#allocation3], %s16927_s10, %s16927_s10, %s16926_s0  }
 0x34d   : > { %s13663_s2 = scalar_lea.hbm %s16941_s12, 32 }
 0x34e   : > { %p13664_p11 = scmp.ne.s32.totalorder %s16941_s12, %s13663_s2  ;;  %p13669_p5 = scmp.lt.u32.totalorder %s13663_s2, %s16941_s12 }
 0x350   : > { %p13665_p12 = pnand %p13664_p11, %p12596_p10 }
 0x352   : > { %p13666_p6 = pneg %p13665_p12 }
 0x354   : > { %p13671_p13 = pnand %p13669_p5, %p13666_p6 }
 0x356   : > { %13674 = shalt.err (!%p13671_p13)
}
 0x357   : > { %s13675_s9 = scalar_lea.vmem %s2148_s5, 32  ;;  %p13682_p3 = scmp.lt.s32.totalorder %s2148_s5, %s2148_s5 }
 0x358   : > { %p13676_p0 = scmp.ne.s32.totalorder %s2148_s5, %s13675_s9  ;;  %p13683_p4 = scmp.lt.s32.totalorder %s13675_s9, %s13675_s9 }
 0x35a   : > { %p13677_p1 = pnand %p13676_p0, %p12596_p10  ;;  %p13684_p7 = por %p13683_p4, %p13682_p3 }
 0x35c   : > { %p13678_p2 = pneg %p13677_p1 }
 0x35e   : > { %p13685_p8 = pnand %p13684_p7, %p13678_p2 }
 0x360   : > { %13688 = shalt.err (!%p13685_p8)
}
 0x361   : > { %s16942_s23 = sld [smem:[#allocation120_spill]]  ;;  %s14599_s7 = smov [#allocation10]  }
 0x362   : > { %12391 = dma.hbm_to_vmem [thread:$0]  (%p12596_p10), %s16941_s12, 32, %s2148_s5, [#allocation6], %s16927_s10, %s16927_s10, %s16926_s0  }
 0x363   : > { %s2173_s1 = sshll.u32 %s14599_s7, 4  ;;  %s14600_s2 = smov [#allocation13]   ;;  %s2174_s1 = int_to_ptr.vmem [resolvable:$true] %s2173_s1 }
 0x364   : > { %s2199_s4 = sshll.u32 %s14600_s2, 4  ;;  %s2200_s4 = int_to_ptr.vmem [resolvable:$true] %s2199_s4 }
 0x367   : > { %s16943_s11 = smov %s16942_s23  ;;  %s13689_s9 = scalar_lea.hbm %s16942_s23, 32 }
 0x368   : > { %p13690_p11 = scmp.ne.s32.totalorder %s16943_s11, %s13689_s9  ;;  %p13695_p5 = scmp.lt.u32.totalorder %s13689_s9, %s16943_s11 }
 0x36a   : > { %p13691_p12 = pnand %p13690_p11, %p12596_p10 }
 0x36c   : > { %p13692_p6 = pneg %p13691_p12 }
 0x36e   : > { %p13697_p13 = pnand %p13695_p5, %p13692_p6 }
 0x370   : > { %13700 = shalt.err (!%p13697_p13)
}
 0x371   : > { %s13701_s8 = scalar_lea.vmem %s2174_s1, 32  ;;  %p13708_p3 = scmp.lt.s32.totalorder %s2174_s1, %s2174_s1 }
 0x372   : > { %p13702_p0 = scmp.ne.s32.totalorder %s2174_s1, %s13701_s8  ;;  %p13709_p4 = scmp.lt.s32.totalorder %s13701_s8, %s13701_s8 }
 0x374   : > { %p13703_p1 = pnand %p13702_p0, %p12596_p10  ;;  %p13710_p7 = por %p13709_p4, %p13708_p3 }
 0x376   : > { %p13704_p2 = pneg %p13703_p1 }
 0x378   : > { %p13711_p8 = pnand %p13710_p7, %p13704_p2 }
 0x37a   : > { %13714 = shalt.err (!%p13711_p8)
}
 0x37b   : > { %s16944_s5 = sld [smem:[#allocation122_spill]] }
 0x37c   : > { %12395 = dma.hbm_to_vmem [thread:$0]  (%p12596_p10), %s16943_s11, 32, %s2174_s1, [#allocation9], %s16927_s10, %s16927_s10, %s16926_s0  }
 0x381   : > { %s13715_s23 = scalar_lea.hbm %s16944_s5, 32 }
 0x382   : > { %p13716_p11 = scmp.ne.s32.totalorder %s16944_s5, %s13715_s23  ;;  %p13721_p5 = scmp.lt.u32.totalorder %s13715_s23, %s16944_s5 }
 0x384   : > { %p13717_p12 = pnand %p13716_p11, %p12596_p10 }
 0x386   : > { %p13718_p6 = pneg %p13717_p12 }
 0x388   : > { %p13723_p13 = pnand %p13721_p5, %p13718_p6 }
 0x38a   : > { %13726 = shalt.err (!%p13723_p13)
}
 0x38b   : > { %s13727_s8 = scalar_lea.vmem %s2200_s4, 32  ;;  %p13734_p3 = scmp.lt.s32.totalorder %s2200_s4, %s2200_s4 }
 0x38c   : > { %p13728_p0 = scmp.ne.s32.totalorder %s2200_s4, %s13727_s8  ;;  %p13735_p4 = scmp.lt.s32.totalorder %s13727_s8, %s13727_s8 }
 0x38e   : > { %p13729_p1 = pnand %p13728_p0, %p12596_p10  ;;  %p13736_p7 = por %p13735_p4, %p13734_p3 }
 0x390   : > { %p13730_p2 = pneg %p13729_p1 }
 0x392   : > { %p13737_p8 = pnand %p13736_p7, %p13730_p2 }
 0x394   : > { %13740 = shalt.err (!%p13737_p8)
}
 0x395   : > { %s16945_s7 = sld [smem:[#allocation123_spill]]  ;;  %s14601_s1 = smov [#allocation16]  }
 0x396   : > { %12399 = dma.hbm_to_vmem [thread:$0]  (%p12596_p10), %s16944_s5, 32, %s2200_s4, [#allocation12], %s16927_s10, %s16927_s10, %s16926_s0  }
 0x397   : > { %s2225_s2 = sshll.u32 %s14601_s1, 4  ;;  %s14602_s9 = smov [#allocation19]   ;;  %s2226_s2 = int_to_ptr.vmem [resolvable:$true] %s2225_s2 }
 0x398   : > { %s2257_s23 = sshll.u32 %s14602_s9, 4  ;;  %s2258_s23 = int_to_ptr.vmem [resolvable:$true] %s2257_s23 }
 0x39b   : > { %s13741_s8 = scalar_lea.hbm %s16945_s7, 32 }
 0x39c   : > { %p13742_p11 = scmp.ne.s32.totalorder %s16945_s7, %s13741_s8  ;;  %p13747_p5 = scmp.lt.u32.totalorder %s13741_s8, %s16945_s7 }
 0x39e   : > { %p13743_p12 = pnand %p13742_p11, %p12596_p10 }
 0x3a0   : > { %p13744_p6 = pneg %p13743_p12 }
 0x3a2   : > { %p13749_p13 = pnand %p13747_p5, %p13744_p6 }
 0x3a4   : > { %13752 = shalt.err (!%p13749_p13)
}
 0x3a5   : > { %s13753_s11 = scalar_lea.vmem %s2226_s2, 32  ;;  %p13760_p3 = scmp.lt.s32.totalorder %s2226_s2, %s2226_s2 }
 0x3a6   : > { %p13754_p0 = scmp.ne.s32.totalorder %s2226_s2, %s13753_s11  ;;  %p13761_p4 = scmp.lt.s32.totalorder %s13753_s11, %s13753_s11 }
 0x3a8   : > { %p13755_p1 = pnand %p13754_p0, %p12596_p10  ;;  %p13762_p7 = por %p13761_p4, %p13760_p3 }
 0x3aa   : > { %p13756_p2 = pneg %p13755_p1 }
 0x3ac   : > { %p13763_p8 = pnand %p13762_p7, %p13756_p2 }
 0x3ae   : > { %13766 = shalt.err (!%p13763_p8)
}
 0x3af   : > { %s16946_s4 = sld [smem:[#allocation127_spill]] }
 0x3b0   : > { %12403 = dma.hbm_to_vmem [thread:$0]  (%p12596_p10), %s16945_s7, 32, %s2226_s2, [#allocation15], %s16927_s10, %s16927_s10, %s16926_s0  }
 0x3b5   : > { %s13767_s1 = scalar_lea.hbm %s16946_s4, 32 }
 0x3b6   : > { %p13768_p11 = scmp.ne.s32.totalorder %s16946_s4, %s13767_s1  ;;  %p13773_p5 = scmp.lt.u32.totalorder %s13767_s1, %s16946_s4 }
 0x3b8   : > { %p13769_p12 = pnand %p13768_p11, %p12596_p10 }
 0x3ba   : > { %p13770_p6 = pneg %p13769_p12 }
 0x3bc   : > { %p13775_p13 = pnand %p13773_p5, %p13770_p6 }
 0x3be   : > { %13778 = shalt.err (!%p13775_p13)
}
 0x3bf   : > { %s13779_s11 = scalar_lea.vmem %s2258_s23, 32  ;;  %p13786_p3 = scmp.lt.s32.totalorder %s2258_s23, %s2258_s23 }
 0x3c0   : > { %p13780_p0 = scmp.ne.s32.totalorder %s2258_s23, %s13779_s11  ;;  %p13787_p4 = scmp.lt.s32.totalorder %s13779_s11, %s13779_s11 }
 0x3c2   : > { %p13781_p1 = pnand %p13780_p0, %p12596_p10  ;;  %p13788_p7 = por %p13787_p4, %p13786_p3 }
 0x3c4   : > { %p13782_p2 = pneg %p13781_p1 }
 0x3c6   : > { %p13789_p8 = pnand %p13788_p7, %p13782_p2 }
 0x3c8   : > { %13792 = shalt.err (!%p13789_p8)
}
 0x3c9   : > { %s16947_s2 = sld [smem:[#allocation130_spill]]  ;;  %s14603_s9 = smov [#allocation22]  }
 0x3ca   : > { %12407 = dma.hbm_to_vmem [thread:$0]  (%p12596_p10), %s16946_s4, 32, %s2258_s23, [#allocation18], %s16927_s10, %s16927_s10, %s16926_s0  }
 0x3cb   : > { %s2289_s8 = sshll.u32 %s14603_s9, 4  ;;  %s14604_s1 = smov [#allocation25]   ;;  %s2290_s8 = int_to_ptr.vmem [resolvable:$true] %s2289_s8 }
 0x3cc   : > { %s2317_s5 = sshll.u32 %s14604_s1, 4  ;;  %s2318_s5 = int_to_ptr.vmem [resolvable:$true] %s2317_s5 }
 0x3cf   : > { %s13793_s11 = scalar_lea.hbm %s16947_s2, 32 }
 0x3d0   : > { %p13794_p11 = scmp.ne.s32.totalorder %s16947_s2, %s13793_s11  ;;  %p13799_p5 = scmp.lt.u32.totalorder %s13793_s11, %s16947_s2 }
 0x3d2   : > { %p13795_p12 = pnand %p13794_p11, %p12596_p10 }
 0x3d4   : > { %p13796_p6 = pneg %p13795_p12 }
 0x3d6   : > { %p13801_p13 = pnand %p13799_p5, %p13796_p6 }
 0x3d8   : > { %13804 = shalt.err (!%p13801_p13)
}
 0x3d9   : > { %s13805_s7 = scalar_lea.vmem %s2290_s8, 32  ;;  %p13812_p3 = scmp.lt.s32.totalorder %s2290_s8, %s2290_s8 }
 0x3da   : > { %p13806_p0 = scmp.ne.s32.totalorder %s2290_s8, %s13805_s7  ;;  %p13813_p4 = scmp.lt.s32.totalorder %s13805_s7, %s13805_s7 }
 0x3dc   : > { %p13807_p1 = pnand %p13806_p0, %p12596_p10  ;;  %p13814_p7 = por %p13813_p4, %p13812_p3 }
 0x3de   : > { %p13808_p2 = pneg %p13807_p1 }
 0x3e0   : > { %p13815_p8 = pnand %p13814_p7, %p13808_p2 }
 0x3e2   : > { %13818 = shalt.err (!%p13815_p8)
}
 0x3e3   : > { %s16948_s23 = sld [smem:[#allocation133_spill]] }
 0x3e4   : > { %12411 = dma.hbm_to_vmem [thread:$0]  (%p12596_p10), %s16947_s2, 32, %s2290_s8, [#allocation21], %s16927_s10, %s16927_s10, %s16926_s0  }
 0x3e9   : > { %s16949_s9 = smov %s16948_s23  ;;  %s13819_s1 = scalar_lea.hbm %s16948_s23, 16 }
 0x3ea   : > { %p13820_p11 = scmp.ne.s32.totalorder %s16949_s9, %s13819_s1  ;;  %p13825_p5 = scmp.lt.u32.totalorder %s13819_s1, %s16949_s9 }
 0x3ec   : > { %p13821_p12 = pnand %p13820_p11, %p12596_p10 }
 0x3ee   : > { %p13822_p6 = pneg %p13821_p12 }
 0x3f0   : > { %p13827_p13 = pnand %p13825_p5, %p13822_p6 }
 0x3f2   : > { %13830 = shalt.err (!%p13827_p13)
}
 0x3f3   : > { %s13831_s7 = scalar_lea.vmem %s2318_s5, 16  ;;  %s13837_s11 = scalar_lea.vmem %s2318_s5, 32 }
 0x3f4   : > { %p13832_p0 = scmp.ne.s32.totalorder %s2318_s5, %s13831_s7  ;;  %p13838_p3 = scmp.lt.s32.totalorder %s2318_s5, %s2318_s5 }
 0x3f5   : > { %p13839_p4 = scmp.lt.s32.totalorder %s13837_s11, %s13831_s7 }
 0x3f6   : > { %p13833_p1 = pnand %p13832_p0, %p12596_p10 }
 0x3f7   : > { %p13840_p7 = por %p13839_p4, %p13838_p3 }
 0x3f8   : > { %p13834_p2 = pneg %p13833_p1 }
 0x3fa   : > { %p13841_p8 = pnand %p13840_p7, %p13834_p2 }
 0x3fc   : > { %13844 = shalt.err (!%p13841_p8)
}
 0x3fd   : > { %s16950_s8 = sld [smem:[#allocation136_spill]]  ;;  %s14605_s23 = smov [#allocation28]  }
 0x3fe   : > { %12415 = dma.hbm_to_vmem [thread:$0]  (%p12596_p10), %s16949_s9, 16, %s2318_s5, [#allocation24]  }
 0x3ff   : > { %s2343_s1 = sshll.u32 %s14605_s23, 4  ;;  %s14606_s2 = smov [#allocation31]   ;;  %s2344_s1 = int_to_ptr.vmem [resolvable:$true] %s2343_s1 }
 0x400   : > { %s2375_s4 = sshll.u32 %s14606_s2, 4  ;;  %s2376_s4 = int_to_ptr.vmem [resolvable:$true] %s2375_s4 }
 0x403   : > { %s13845_s12 = scalar_lea.hbm %s16950_s8, 32 }
 0x404   : > { %p13846_p11 = scmp.ne.s32.totalorder %s16950_s8, %s13845_s12  ;;  %p13851_p5 = scmp.lt.u32.totalorder %s13845_s12, %s16950_s8 }
 0x406   : > { %p13847_p12 = pnand %p13846_p11, %p12596_p10 }
 0x408   : > { %p13848_p6 = pneg %p13847_p12 }
 0x40a   : > { %p13853_p13 = pnand %p13851_p5, %p13848_p6 }
 0x40c   : > { %13856 = shalt.err (!%p13853_p13)
}
 0x40d   : > { %s13857_s7 = scalar_lea.vmem %s2344_s1, 32  ;;  %p13864_p3 = scmp.lt.s32.totalorder %s2344_s1, %s2344_s1 }
 0x40e   : > { %p13858_p0 = scmp.ne.s32.totalorder %s2344_s1, %s13857_s7  ;;  %p13865_p4 = scmp.lt.s32.totalorder %s13857_s7, %s13857_s7 }
 0x410   : > { %p13859_p1 = pnand %p13858_p0, %p12596_p10  ;;  %p13866_p7 = por %p13865_p4, %p13864_p3 }
 0x412   : > { %p13860_p2 = pneg %p13859_p1 }
 0x414   : > { %p13867_p8 = pnand %p13866_p7, %p13860_p2 }
 0x416   : > { %13870 = shalt.err (!%p13867_p8)
}
 0x417   : > { %s16951_s12 = sld [smem:[#allocation139_spill]] }
 0x418   : > { %12419 = dma.hbm_to_vmem [thread:$0]  (%p12596_p10), %s16950_s8, 32, %s2344_s1, [#allocation27], %s16927_s10, %s16927_s10, %s16926_s0  }
 0x41d   : > { %s13871_s5 = scalar_lea.hbm %s16951_s12, 32 }
 0x41e   : > { %p13872_p11 = scmp.ne.s32.totalorder %s16951_s12, %s13871_s5  ;;  %p13877_p5 = scmp.lt.u32.totalorder %s13871_s5, %s16951_s12 }
 0x420   : > { %p13873_p12 = pnand %p13872_p11, %p12596_p10 }
 0x422   : > { %p13874_p6 = pneg %p13873_p12 }
 0x424   : > { %p13879_p13 = pnand %p13877_p5, %p13874_p6 }
 0x426   : > { %13882 = shalt.err (!%p13879_p13)
}
 0x427   : > { %s13883_s2 = scalar_lea.vmem %s2376_s4, 32  ;;  %p13890_p3 = scmp.lt.s32.totalorder %s2376_s4, %s2376_s4 }
 0x428   : > { %p13884_p0 = scmp.ne.s32.totalorder %s2376_s4, %s13883_s2  ;;  %p13891_p4 = scmp.lt.s32.totalorder %s13883_s2, %s13883_s2 }
 0x42a   : > { %p13885_p1 = pnand %p13884_p0, %p12596_p10  ;;  %p13892_p7 = por %p13891_p4, %p13890_p3 }
 0x42c   : > { %p13886_p2 = pneg %p13885_p1 }
 0x42e   : > { %p13893_p8 = pnand %p13892_p7, %p13886_p2 }
 0x430   : > { %13896 = shalt.err (!%p13893_p8)
}
 0x431   : > { %s16952_s11 = sld [smem:[#allocation140_spill]]  ;;  %s14607_s23 = smov [#allocation34]  }
 0x432   : > { %12423 = dma.hbm_to_vmem [thread:$0]  (%p12596_p10), %s16951_s12, 32, %s2376_s4, [#allocation30], %s16927_s10, %s16927_s10, %s16926_s0  }
 0x433   : > { %s2401_s1 = sshll.u32 %s14607_s23, 4  ;;  %s14608_s7 = smov [#allocation37]   ;;  %s2402_s1 = int_to_ptr.vmem [resolvable:$true] %s2401_s1 }
 0x434   : > { %s2427_s5 = sshll.u32 %s14608_s7, 4  ;;  %s2428_s5 = int_to_ptr.vmem [resolvable:$true] %s2427_s5 }
 0x437   : > { %s13897_s2 = scalar_lea.hbm %s16952_s11, 32 }
 0x438   : > { %p13898_p11 = scmp.ne.s32.totalorder %s16952_s11, %s13897_s2  ;;  %p13903_p5 = scmp.lt.u32.totalorder %s13897_s2, %s16952_s11 }
 0x43a   : > { %p13899_p12 = pnand %p13898_p11, %p12596_p10 }
 0x43c   : > { %p13900_p6 = pneg %p13899_p12 }
 0x43e   : > { %p13905_p13 = pnand %p13903_p5, %p13900_p6 }
 0x440   : > { %13908 = shalt.err (!%p13905_p13)
}
 0x441   : > { %s13909_s8 = scalar_lea.vmem %s2402_s1, 32  ;;  %p13916_p3 = scmp.lt.s32.totalorder %s2402_s1, %s2402_s1 }
 0x442   : > { %p13910_p0 = scmp.ne.s32.totalorder %s2402_s1, %s13909_s8  ;;  %p13917_p4 = scmp.lt.s32.totalorder %s13909_s8, %s13909_s8 }
 0x444   : > { %p13911_p1 = pnand %p13910_p0, %p12596_p10  ;;  %p13918_p7 = por %p13917_p4, %p13916_p3 }
 0x446   : > { %p13912_p2 = pneg %p13911_p1 }
 0x448   : > { %p13919_p8 = pnand %p13918_p7, %p13912_p2 }
 0x44a   : > { %13922 = shalt.err (!%p13919_p8)
}
 0x44b   : > { %s16953_s4 = sld [smem:[#allocation141_spill]] }
 0x44c   : > { %12427 = dma.hbm_to_vmem [thread:$0]  (%p12596_p10), %s16952_s11, 32, %s2402_s1, [#allocation33], %s16927_s10, %s16927_s10, %s16926_s0  }
 0x451   : > { %s13923_s23 = scalar_lea.hbm %s16953_s4, 32 }
 0x452   : > { %p13924_p11 = scmp.ne.s32.totalorder %s16953_s4, %s13923_s23  ;;  %p13929_p5 = scmp.lt.u32.totalorder %s13923_s23, %s16953_s4 }
 0x454   : > { %p13925_p12 = pnand %p13924_p11, %p12596_p10 }
 0x456   : > { %p13926_p6 = pneg %p13925_p12 }
 0x458   : > { %p13931_p13 = pnand %p13929_p5, %p13926_p6 }
 0x45a   : > { %13934 = shalt.err (!%p13931_p13)
}
 0x45b   : > { %s13935_s8 = scalar_lea.vmem %s2428_s5, 32  ;;  %p13942_p3 = scmp.lt.s32.totalorder %s2428_s5, %s2428_s5 }
 0x45c   : > { %p13936_p0 = scmp.ne.s32.totalorder %s2428_s5, %s13935_s8  ;;  %p13943_p4 = scmp.lt.s32.totalorder %s13935_s8, %s13935_s8 }
 0x45e   : > { %p13937_p1 = pnand %p13936_p0, %p12596_p10  ;;  %p13944_p7 = por %p13943_p4, %p13942_p3 }
 0x460   : > { %p13938_p2 = pneg %p13937_p1 }
 0x462   : > { %p13945_p8 = pnand %p13944_p7, %p13938_p2 }
 0x464   : > { %13948 = shalt.err (!%p13945_p8)
}
 0x465   : > { %s16954_s1 = sld [smem:[#allocation143_spill]]  ;;  %s14609_s7 = smov [#allocation40]  }
 0x466   : > { %12431 = dma.hbm_to_vmem [thread:$0]  (%p12596_p10), %s16953_s4, 32, %s2428_s5, [#allocation36], %s16927_s10, %s16927_s10, %s16926_s0  }
 0x467   : > { %s2453_s2 = sshll.u32 %s14609_s7, 4  ;;  %s14610_s23 = smov [#allocation43]   ;;  %s2454_s2 = int_to_ptr.vmem [resolvable:$true] %s2453_s2 }
 0x468   : > { %s2485_s9 = sshll.u32 %s14610_s23, 4  ;;  %s2486_s9 = int_to_ptr.vmem [resolvable:$true] %s2485_s9 }
 0x46b   : > { %s13949_s8 = scalar_lea.hbm %s16954_s1, 32 }
 0x46c   : > { %p13950_p11 = scmp.ne.s32.totalorder %s16954_s1, %s13949_s8  ;;  %p13955_p5 = scmp.lt.u32.totalorder %s13949_s8, %s16954_s1 }
 0x46e   : > { %p13951_p12 = pnand %p13950_p11, %p12596_p10 }
 0x470   : > { %p13952_p6 = pneg %p13951_p12 }
 0x472   : > { %p13957_p13 = pnand %p13955_p5, %p13952_p6 }
 0x474   : > { %13960 = shalt.err (!%p13957_p13)
}
 0x475   : > { %s13961_s11 = scalar_lea.vmem %s2454_s2, 32  ;;  %p13968_p3 = scmp.lt.s32.totalorder %s2454_s2, %s2454_s2 }
 0x476   : > { %p13962_p0 = scmp.ne.s32.totalorder %s2454_s2, %s13961_s11  ;;  %p13969_p4 = scmp.lt.s32.totalorder %s13961_s11, %s13961_s11 }
 0x478   : > { %p13963_p1 = pnand %p13962_p0, %p12596_p10  ;;  %p13970_p7 = por %p13969_p4, %p13968_p3 }
 0x47a   : > { %p13964_p2 = pneg %p13963_p1 }
 0x47c   : > { %p13971_p8 = pnand %p13970_p7, %p13964_p2 }
 0x47e   : > { %13974 = shalt.err (!%p13971_p8)
}
 0x47f   : > { %s16955_s5 = sld [smem:[#allocation146_spill]] }
 0x480   : > { %12435 = dma.hbm_to_vmem [thread:$0]  (%p12596_p10), %s16954_s1, 32, %s2454_s2, [#allocation39], %s16927_s10, %s16927_s10, %s16926_s0  }
 0x485   : > { %s13975_s7 = scalar_lea.hbm %s16955_s5, 32 }
 0x486   : > { %p13976_p11 = scmp.ne.s32.totalorder %s16955_s5, %s13975_s7  ;;  %p13981_p5 = scmp.lt.u32.totalorder %s13975_s7, %s16955_s5 }
 0x488   : > { %p13977_p12 = pnand %p13976_p11, %p12596_p10 }
 0x48a   : > { %p13978_p6 = pneg %p13977_p12 }
 0x48c   : > { %p13983_p13 = pnand %p13981_p5, %p13978_p6 }
 0x48e   : > { %13986 = shalt.err (!%p13983_p13)
}
 0x48f   : > { %s13987_s11 = scalar_lea.vmem %s2486_s9, 32  ;;  %p13994_p3 = scmp.lt.s32.totalorder %s2486_s9, %s2486_s9 }
 0x490   : > { %p13988_p0 = scmp.ne.s32.totalorder %s2486_s9, %s13987_s11  ;;  %p13995_p4 = scmp.lt.s32.totalorder %s13987_s11, %s13987_s11 }
 0x492   : > { %p13989_p1 = pnand %p13988_p0, %p12596_p10  ;;  %p13996_p7 = por %p13995_p4, %p13994_p3 }
 0x494   : > { %p13990_p2 = pneg %p13989_p1 }
 0x496   : > { %p13997_p8 = pnand %p13996_p7, %p13990_p2 }
 0x498   : > { %14000 = shalt.err (!%p13997_p8)
}
 0x499   : > { %s16956_s2 = sld [smem:[#allocation149_spill]]  ;;  %s14611_s23 = smov [#allocation46]  }
 0x49a   : > { %12439 = dma.hbm_to_vmem [thread:$0]  (%p12596_p10), %s16955_s5, 32, %s2486_s9, [#allocation42], %s16927_s10, %s16927_s10, %s16926_s0  }
 0x49b   : > { %s2517_s8 = sshll.u32 %s14611_s23, 4  ;;  %s14612_s7 = smov [#allocation49]   ;;  %s2518_s8 = int_to_ptr.vmem [resolvable:$true] %s2517_s8 }
 0x49c   : > { %s2549_s1 = sshll.u32 %s14612_s7, 4  ;;  %s2550_s1 = int_to_ptr.vmem [resolvable:$true] %s2549_s1 }
 0x49f   : > { %s14001_s11 = scalar_lea.hbm %s16956_s2, 32 }
 0x4a0   : > { %p14002_p11 = scmp.ne.s32.totalorder %s16956_s2, %s14001_s11  ;;  %p14007_p5 = scmp.lt.u32.totalorder %s14001_s11, %s16956_s2 }
 0x4a2   : > { %p14003_p12 = pnand %p14002_p11, %p12596_p10 }
 0x4a4   : > { %p14004_p6 = pneg %p14003_p12 }
 0x4a6   : > { %p14009_p13 = pnand %p14007_p5, %p14004_p6 }
 0x4a8   : > { %14012 = shalt.err (!%p14009_p13)
}
 0x4a9   : > { %s14013_s4 = scalar_lea.vmem %s2518_s8, 32  ;;  %p14020_p3 = scmp.lt.s32.totalorder %s2518_s8, %s2518_s8 }
 0x4aa   : > { %p14014_p0 = scmp.ne.s32.totalorder %s2518_s8, %s14013_s4  ;;  %p14021_p4 = scmp.lt.s32.totalorder %s14013_s4, %s14013_s4 }
 0x4ac   : > { %p14015_p1 = pnand %p14014_p0, %p12596_p10  ;;  %p14022_p7 = por %p14021_p4, %p14020_p3 }
 0x4ae   : > { %p14016_p2 = pneg %p14015_p1 }
 0x4b0   : > { %p14023_p8 = pnand %p14022_p7, %p14016_p2 }
 0x4b2   : > { %14026 = shalt.err (!%p14023_p8)
}
 0x4b3   : > { %s16957_s9 = sld [smem:[#allocation153_spill]] }
 0x4b4   : > { %12443 = dma.hbm_to_vmem [thread:$0]  (%p12596_p10), %s16956_s2, 32, %s2518_s8, [#allocation45], %s16927_s10, %s16927_s10, %s16926_s0  }
 0x4b9   : > { %s14027_s23 = scalar_lea.hbm %s16957_s9, 32 }
 0x4ba   : > { %p14028_p11 = scmp.ne.s32.totalorder %s16957_s9, %s14027_s23  ;;  %p14033_p5 = scmp.lt.u32.totalorder %s14027_s23, %s16957_s9 }
 0x4bc   : > { %p14029_p12 = pnand %p14028_p11, %p12596_p10 }
 0x4be   : > { %p14030_p6 = pneg %p14029_p12 }
 0x4c0   : > { %p14035_p13 = pnand %p14033_p5, %p14030_p6 }
 0x4c2   : > { %14038 = shalt.err (!%p14035_p13)
}
 0x4c3   : > { %s14039_s4 = scalar_lea.vmem %s2550_s1, 32  ;;  %p14046_p3 = scmp.lt.s32.totalorder %s2550_s1, %s2550_s1 }
 0x4c4   : > { %p14040_p0 = scmp.ne.s32.totalorder %s2550_s1, %s14039_s4  ;;  %p14047_p4 = scmp.lt.s32.totalorder %s14039_s4, %s14039_s4 }
 0x4c6   : > { %p14041_p1 = pnand %p14040_p0, %p12596_p10  ;;  %p14048_p7 = por %p14047_p4, %p14046_p3 }
 0x4c8   : > { %p14042_p2 = pneg %p14041_p1 }
 0x4ca   : > { %p14049_p8 = pnand %p14048_p7, %p14042_p2 }
 0x4cc   : > { %14052 = shalt.err (!%p14049_p8)
}
 0x4cd   : > { %s16958_s8 = sld [smem:[#allocation157_spill]]  ;;  %s14613_s7 = smov [#allocation52]  }
 0x4ce   : > { %12447 = dma.hbm_to_vmem [thread:$0]  (%p12596_p10), %s16957_s9, 32, %s2550_s1, [#allocation48], %s16927_s10, %s16927_s10, %s16926_s0  }
 0x4cf   : > { %s2580_s11 = sshll.u32 %s14613_s7, 4  ;;  %s14614_s23 = smov [#allocation55]   ;;  %s2581_s11 = int_to_ptr.vmem [resolvable:$true] %s2580_s11 }
 0x4d0   : > { %s2609_s2 = sshll.u32 %s14614_s23, 4  ;;  %s2610_s2 = int_to_ptr.vmem [resolvable:$true] %s2609_s2 }
 0x4d3   : > { %s14053_s4 = scalar_lea.hbm %s16958_s8, 16 }
 0x4d4   : > { %p14054_p11 = scmp.ne.s32.totalorder %s16958_s8, %s14053_s4  ;;  %p14059_p5 = scmp.lt.u32.totalorder %s14053_s4, %s16958_s8 }
 0x4d6   : > { %p14055_p12 = pnand %p14054_p11, %p12596_p10 }
 0x4d8   : > { %p14056_p6 = pneg %p14055_p12 }
 0x4da   : > { %p14061_p13 = pnand %p14059_p5, %p14056_p6 }
 0x4dc   : > { %14064 = shalt.err (!%p14061_p13)
}
 0x4dd   : > { %s14065_s5 = scalar_lea.vmem %s2581_s11, 16  ;;  %s14071_s1 = scalar_lea.vmem %s2581_s11, 32 }
 0x4de   : > { %p14066_p0 = scmp.ne.s32.totalorder %s2581_s11, %s14065_s5  ;;  %p14072_p3 = scmp.lt.s32.totalorder %s2581_s11, %s2581_s11 }
 0x4df   : > { %p14073_p4 = scmp.lt.s32.totalorder %s14071_s1, %s14065_s5 }
 0x4e0   : > { %p14067_p1 = pnand %p14066_p0, %p12596_p10 }
 0x4e1   : > { %p14074_p7 = por %p14073_p4, %p14072_p3 }
 0x4e2   : > { %p14068_p2 = pneg %p14067_p1 }
 0x4e4   : > { %p14075_p8 = pnand %p14074_p7, %p14068_p2 }
 0x4e6   : > { %14078 = shalt.err (!%p14075_p8)
}
 0x4e7   : > { %s16959_s7 = sld [smem:[#allocation161_spill]] }
 0x4e8   : > { %12451 = dma.hbm_to_vmem [thread:$0]  (%p12596_p10), %s16958_s8, 16, %s2581_s11, [#allocation51]  }
 0x4ed   : > { %s14079_s23 = scalar_lea.hbm %s16959_s7, 32 }
 0x4ee   : > { %p14080_p11 = scmp.ne.s32.totalorder %s16959_s7, %s14079_s23  ;;  %p14085_p5 = scmp.lt.u32.totalorder %s14079_s23, %s16959_s7 }
 0x4f0   : > { %p14081_p12 = pnand %p14080_p11, %p12596_p10 }
 0x4f2   : > { %p14082_p6 = pneg %p14081_p12 }
 0x4f4   : > { %p14087_p13 = pnand %p14085_p5, %p14082_p6 }
 0x4f6   : > { %14090 = shalt.err (!%p14087_p13)
}
 0x4f7   : > { %s14091_s5 = scalar_lea.vmem %s2610_s2, 32  ;;  %p14098_p3 = scmp.lt.s32.totalorder %s2610_s2, %s2610_s2 }
 0x4f8   : > { %p14092_p0 = scmp.ne.s32.totalorder %s2610_s2, %s14091_s5  ;;  %p14099_p4 = scmp.lt.s32.totalorder %s14091_s5, %s14091_s5 }
 0x4fa   : > { %p14093_p1 = pnand %p14092_p0, %p12596_p10  ;;  %p14100_p7 = por %p14099_p4, %p14098_p3 }
 0x4fc   : > { %p14094_p2 = pneg %p14093_p1 }
 0x4fe   : > { %p14101_p8 = pnand %p14100_p7, %p14094_p2 }
 0x500   : > { %14104 = shalt.err (!%p14101_p8)
}
 0x501   : > { %s16960_s11 = sld [smem:[#allocation164_spill]]  ;;  %s14615_s4 = smov [#allocation58]  }
 0x502   : > { %12455 = dma.hbm_to_vmem [thread:$0]  (%p12596_p10), %s16959_s7, 32, %s2610_s2, [#allocation54], %s16927_s10, %s16927_s10, %s16926_s0  }
 0x503   : > { %s2638_s1 = sshll.u32 %s14615_s4, 4  ;;  %s14616_s23 = smov [#allocation61]   ;;  %s2639_s1 = int_to_ptr.vmem [resolvable:$true] %s2638_s1 }
 0x504   : > { %s2664_s8 = sshll.u32 %s14616_s23, 4  ;;  %s2665_s8 = int_to_ptr.vmem [resolvable:$true] %s2664_s8 }
 0x507   : > { %s14105_s5 = scalar_lea.hbm %s16960_s11, 32 }
 0x508   : > { %p14106_p11 = scmp.ne.s32.totalorder %s16960_s11, %s14105_s5  ;;  %p14111_p5 = scmp.lt.u32.totalorder %s14105_s5, %s16960_s11 }
 0x50a   : > { %p14107_p12 = pnand %p14106_p11, %p12596_p10 }
 0x50c   : > { %p14108_p6 = pneg %p14107_p12 }
 0x50e   : > { %p14113_p13 = pnand %p14111_p5, %p14108_p6 }
 0x510   : > { %14116 = shalt.err (!%p14113_p13)
}
 0x511   : > { %s14117_s9 = scalar_lea.vmem %s2639_s1, 32  ;;  %p14124_p3 = scmp.lt.s32.totalorder %s2639_s1, %s2639_s1 }
 0x512   : > { %p14118_p0 = scmp.ne.s32.totalorder %s2639_s1, %s14117_s9  ;;  %p14125_p4 = scmp.lt.s32.totalorder %s14117_s9, %s14117_s9 }
 0x514   : > { %p14119_p1 = pnand %p14118_p0, %p12596_p10  ;;  %p14126_p7 = por %p14125_p4, %p14124_p3 }
 0x516   : > { %p14120_p2 = pneg %p14119_p1 }
 0x518   : > { %p14127_p8 = pnand %p14126_p7, %p14120_p2 }
 0x51a   : > { %14130 = shalt.err (!%p14127_p8)
}
 0x51b   : > { %s16961_s2 = sld [smem:[#allocation166_spill]] }
 0x51c   : > { %12459 = dma.hbm_to_vmem [thread:$0]  (%p12596_p10), %s16960_s11, 32, %s2639_s1, [#allocation57], %s16927_s10, %s16927_s10, %s16926_s0  }
 0x521   : > { %s14131_s4 = scalar_lea.hbm %s16961_s2, 32 }
 0x522   : > { %p14132_p11 = scmp.ne.s32.totalorder %s16961_s2, %s14131_s4  ;;  %p14137_p5 = scmp.lt.u32.totalorder %s14131_s4, %s16961_s2 }
 0x524   : > { %p14133_p12 = pnand %p14132_p11, %p12596_p10 }
 0x526   : > { %p14134_p6 = pneg %p14133_p12 }
 0x528   : > { %p14139_p13 = pnand %p14137_p5, %p14134_p6 }
 0x52a   : > { %14142 = shalt.err (!%p14139_p13)
}
 0x52b   : > { %s14143_s9 = scalar_lea.vmem %s2665_s8, 32  ;;  %p14150_p3 = scmp.lt.s32.totalorder %s2665_s8, %s2665_s8 }
 0x52c   : > { %p14144_p0 = scmp.ne.s32.totalorder %s2665_s8, %s14143_s9  ;;  %p14151_p4 = scmp.lt.s32.totalorder %s14143_s9, %s14143_s9 }
 0x52e   : > { %p14145_p1 = pnand %p14144_p0, %p12596_p10  ;;  %p14152_p7 = por %p14151_p4, %p14150_p3 }
 0x530   : > { %p14146_p2 = pneg %p14145_p1 }
 0x532   : > { %p14153_p8 = pnand %p14152_p7, %p14146_p2 }
 0x534   : > { %14156 = shalt.err (!%p14153_p8)
}
 0x535   : > { %s16962_s1 = sld [smem:[#allocation169_spill]]  ;;  %s14617_s23 = smov [#allocation64]  }
 0x536   : > { %12463 = dma.hbm_to_vmem [thread:$0]  (%p12596_p10), %s16961_s2, 32, %s2665_s8, [#allocation60], %s16927_s10, %s16927_s10, %s16926_s0  }
 0x537   : > { %s2693_s5 = sshll.u32 %s14617_s23, 4  ;;  %s14618_s4 = smov [#allocation67]   ;;  %s2694_s5 = int_to_ptr.vmem [resolvable:$true] %s2693_s5 }
 0x538   : > { %s2721_s7 = sshll.u32 %s14618_s4, 4  ;;  %s2722_s7 = int_to_ptr.vmem [resolvable:$true] %s2721_s7 }
 0x53b   : > { %s14157_s9 = scalar_lea.hbm %s16962_s1, 32 }
 0x53c   : > { %p14158_p11 = scmp.ne.s32.totalorder %s16962_s1, %s14157_s9  ;;  %p14163_p5 = scmp.lt.u32.totalorder %s14157_s9, %s16962_s1 }
 0x53e   : > { %p14159_p12 = pnand %p14158_p11, %p12596_p10 }
 0x540   : > { %p14160_p6 = pneg %p14159_p12 }
 0x542   : > { %p14165_p13 = pnand %p14163_p5, %p14160_p6 }
 0x544   : > { %14168 = shalt.err (!%p14165_p13)
}
 0x545   : > { %s14169_s11 = scalar_lea.vmem %s2694_s5, 32  ;;  %p14176_p3 = scmp.lt.s32.totalorder %s2694_s5, %s2694_s5 }
 0x546   : > { %p14170_p0 = scmp.ne.s32.totalorder %s2694_s5, %s14169_s11  ;;  %p14177_p4 = scmp.lt.s32.totalorder %s14169_s11, %s14169_s11 }
 0x548   : > { %p14171_p1 = pnand %p14170_p0, %p12596_p10  ;;  %p14178_p7 = por %p14177_p4, %p14176_p3 }
 0x54a   : > { %p14172_p2 = pneg %p14171_p1 }
 0x54c   : > { %p14179_p8 = pnand %p14178_p7, %p14172_p2 }
 0x54e   : > { %14182 = shalt.err (!%p14179_p8)
}
 0x54f   : > { %s16963_s8 = sld [smem:[#allocation172_spill]] }
 0x550   : > { %12467 = dma.hbm_to_vmem [thread:$0]  (%p12596_p10), %s16962_s1, 32, %s2694_s5, [#allocation63], %s16927_s10, %s16927_s10, %s16926_s0  }
 0x555   : > { %s14183_s23 = scalar_lea.hbm %s16963_s8, 16 }
 0x556   : > { %p14184_p11 = scmp.ne.s32.totalorder %s16963_s8, %s14183_s23  ;;  %p14189_p5 = scmp.lt.u32.totalorder %s14183_s23, %s16963_s8 }
 0x558   : > { %p14185_p12 = pnand %p14184_p11, %p12596_p10 }
 0x55a   : > { %p14186_p6 = pneg %p14185_p12 }
 0x55c   : > { %p14191_p13 = pnand %p14189_p5, %p14186_p6 }
 0x55e   : > { %14194 = shalt.err (!%p14191_p13)
}
 0x55f   : > { %s14195_s11 = scalar_lea.vmem %s2722_s7, 16  ;;  %s14201_s4 = scalar_lea.vmem %s2722_s7, 32 }
 0x560   : > { %p14196_p0 = scmp.ne.s32.totalorder %s2722_s7, %s14195_s11  ;;  %p14202_p3 = scmp.lt.s32.totalorder %s2722_s7, %s2722_s7 }
 0x561   : > { %p14203_p4 = scmp.lt.s32.totalorder %s14201_s4, %s14195_s11 }
 0x562   : > { %p14197_p1 = pnand %p14196_p0, %p12596_p10 }
 0x563   : > { %p14204_p7 = por %p14203_p4, %p14202_p3 }
 0x564   : > { %p14198_p2 = pneg %p14197_p1 }
 0x566   : > { %p14205_p8 = pnand %p14204_p7, %p14198_p2 }
 0x568   : > { %14208 = shalt.err (!%p14205_p8)
}
 0x569   : > { %s16964_s0 = sld [smem:[#allocation174_spill]]  ;;  %s14619_s5 = smov [#allocation70]  }
 0x56a   : > { %12471 = dma.hbm_to_vmem [thread:$0]  (%p12596_p10), %s16963_s8, 16, %s2722_s7, [#allocation66]  }
 0x56b   : > { %s2743_s9 = sshll.u32 %s14619_s5, 4  ;;  %s14620_s23 = smov [#allocation73]   ;;  %s2744_s9 = int_to_ptr.vmem [resolvable:$true] %s2743_s9 }
 0x56c   : > { %s2768_s1 = sshll.u32 %s14620_s23, 4  ;;  %s2769_s1 = int_to_ptr.vmem [resolvable:$true] %s2768_s1 }
 0x56f   : > { %s16965_s10 = smov %s16964_s0  ;;  %s14209_s2 = scalar_lea.hbm %s16964_s0, 16 }
 0x570   : > { %p14210_p11 = scmp.ne.s32.totalorder %s16965_s10, %s14209_s2  ;;  %p14215_p5 = scmp.lt.u32.totalorder %s14209_s2, %s16965_s10 }
 0x572   : > { %p14211_p12 = pnand %p14210_p11, %p12596_p10 }
 0x574   : > { %p14212_p6 = pneg %p14211_p12 }
 0x576   : > { %p14217_p13 = pnand %p14215_p5, %p14212_p6 }
 0x578   : > { %14220 = shalt.err (!%p14217_p13)
}
 0x579   : > { %s14221_s11 = scalar_lea.vmem %s2744_s9, 16  ;;  %s14227_s7 = scalar_lea.vmem %s2744_s9, 32 }
 0x57a   : > { %p14222_p0 = scmp.ne.s32.totalorder %s2744_s9, %s14221_s11  ;;  %p14228_p3 = scmp.lt.s32.totalorder %s2744_s9, %s2744_s9 }
 0x57b   : > { %p14229_p4 = scmp.lt.s32.totalorder %s14227_s7, %s14221_s11 }
 0x57c   : > { %p14223_p1 = pnand %p14222_p0, %p12596_p10 }
 0x57d   : > { %p14230_p7 = por %p14229_p4, %p14228_p3 }
 0x57e   : > { %p14224_p2 = pneg %p14223_p1 }
 0x580   : > { %p14231_p8 = pnand %p14230_p7, %p14224_p2 }
 0x582   : > { %14234 = shalt.err (!%p14231_p8)
}
 0x583   : > { %s16966_s4 = sld [smem:[#allocation177_spill]] }
 0x584   : > { %12475 = dma.hbm_to_vmem [thread:$0]  (%p12596_p10), %s16965_s10, 16, %s2744_s9, [#allocation69]  }
 0x589   : > { %s14235_s2 = scalar_lea.hbm %s16966_s4, 16 }
 0x58a   : > { %p14236_p11 = scmp.ne.s32.totalorder %s16966_s4, %s14235_s2  ;;  %p14241_p5 = scmp.lt.u32.totalorder %s14235_s2, %s16966_s4 }
 0x58c   : > { %p14237_p12 = pnand %p14236_p11, %p12596_p10 }
 0x58e   : > { %p14238_p6 = pneg %p14237_p12 }
 0x590   : > { %p14243_p13 = pnand %p14241_p5, %p14238_p6 }
 0x592   : > { %14246 = shalt.err (!%p14243_p13)
}
 0x593   : > { %s14247_s0 = scalar_lea.vmem %s2769_s1, 16  ;;  %s14253_s5 = scalar_lea.vmem %s2769_s1, 32 }
 0x594   : > { %p14248_p0 = scmp.ne.s32.totalorder %s2769_s1, %s14247_s0  ;;  %p14254_p3 = scmp.lt.s32.totalorder %s2769_s1, %s2769_s1 }
 0x595   : > { %p14255_p4 = scmp.lt.s32.totalorder %s14253_s5, %s14247_s0 }
 0x596   : > { %p14249_p1 = pnand %p14248_p0, %p12596_p10 }
 0x597   : > { %p14256_p7 = por %p14255_p4, %p14254_p3 }
 0x598   : > { %p14250_p2 = pneg %p14249_p1 }
 0x59a   : > { %p14257_p8 = pnand %p14256_p7, %p14250_p2 }
 0x59c   : > { %14260 = shalt.err (!%p14257_p8)
}
 0x59d   : > { %s16967_s9 = sld [smem:[#allocation181_spill]]  ;;  %s14621_s23 = smov [#allocation76]  }
 0x59e   : > { %12479 = dma.hbm_to_vmem [thread:$0]  (%p12596_p10), %s16966_s4, 16, %s2769_s1, [#allocation72]  }
 0x59f   : > { %s2796_s11 = sshll.u32 %s14621_s23, 4  ;;  %s14622_s7 = smov [#allocation79]   ;;  %s2797_s11 = int_to_ptr.vmem [resolvable:$true] %s2796_s11 }
 0x5a0   : > { %s2821_s2 = sshll.u32 %s14622_s7, 4  ;;  %s2822_s2 = int_to_ptr.vmem [resolvable:$true] %s2821_s2 }
 0x5a3   : > { %s14261_s8 = scalar_lea.hbm %s16967_s9, 16 }
 0x5a4   : > { %p14262_p11 = scmp.ne.s32.totalorder %s16967_s9, %s14261_s8  ;;  %p14267_p5 = scmp.lt.u32.totalorder %s14261_s8, %s16967_s9 }
 0x5a6   : > { %p14263_p12 = pnand %p14262_p11, %p12596_p10 }
 0x5a8   : > { %p14264_p6 = pneg %p14263_p12 }
 0x5aa   : > { %p14269_p13 = pnand %p14267_p5, %p14264_p6 }
 0x5ac   : > { %14272 = shalt.err (!%p14269_p13)
}
 0x5ad   : > { %s14273_s0 = scalar_lea.vmem %s2797_s11, 16  ;;  %s14279_s1 = scalar_lea.vmem %s2797_s11, 32 }
 0x5ae   : > { %p14274_p0 = scmp.ne.s32.totalorder %s2797_s11, %s14273_s0  ;;  %p14280_p3 = scmp.lt.s32.totalorder %s2797_s11, %s2797_s11 }
 0x5af   : > { %p14281_p4 = scmp.lt.s32.totalorder %s14279_s1, %s14273_s0 }
 0x5b0   : > { %p14275_p1 = pnand %p14274_p0, %p12596_p10 }
 0x5b1   : > { %p14282_p7 = por %p14281_p4, %p14280_p3 }
 0x5b2   : > { %p14276_p2 = pneg %p14275_p1 }
 0x5b4   : > { %p14283_p8 = pnand %p14282_p7, %p14276_p2 }
 0x5b6   : > { %14286 = shalt.err (!%p14283_p8)
}
 0x5b7   : > { %12483 = dma.hbm_to_vmem [thread:$0]  (%p12596_p10), %s16967_s9, 16, %s2797_s11, [#allocation75]  }
 0x5b8   : > { %s14287_s8 = scalar_lea.hbm %s16910_s6, 128 }
 0x5b9   : > { %p14288_p11 = scmp.ne.s32.totalorder %s16910_s6, %s14287_s8  ;;  %p14293_p5 = scmp.lt.u32.totalorder %s14287_s8, %s16910_s6 }
 0x5bb   : > { %p14289_p12 = pnand %p14288_p11, %p12596_p10 }
 0x5bd   : > { %p14290_p6 = pneg %p14289_p12 }
 0x5bf   : > { %p14295_p13 = pnand %p14293_p5, %p14290_p6 }
 0x5c1   : > { %14298 = shalt.err (!%p14295_p13)
}
 0x5c2   : > { %s14299_s5 = scalar_lea.vmem %s2822_s2, 128  ;;  %p14306_p3 = scmp.lt.s32.totalorder %s2822_s2, %s2822_s2 }
 0x5c3   : > { %p14300_p0 = scmp.ne.s32.totalorder %s2822_s2, %s14299_s5  ;;  %p14307_p4 = scmp.lt.s32.totalorder %s14299_s5, %s14299_s5 }
 0x5c5   : > { %p14301_p1 = pnand %p14300_p0, %p12596_p10  ;;  %p14308_p7 = por %p14307_p4, %p14306_p3 }
 0x5c7   : > { %p14302_p2 = pneg %p14301_p1 }
 0x5c9   : > { %p14309_p8 = pnand %p14308_p7, %p14302_p2 }
 0x5cb   : > { %14312 = shalt.err (!%p14309_p8)
}
 0x5cc   : > { %12487 = dma.hbm_to_vmem [thread:$0]  (%p12596_p10), %s16910_s6, 128, %s2822_s2, [#allocation78]  }
 0x5cd PF: > { %2872 = sbr.rel (%p15123_p9) target bundleno = 23984 (0x5db0), region = 368  ;;  %p12647_p11 = scmp.eq.s32.totalorder (!%p15123_p9), %s15096_s28, 0 }
 0x5d4   : > { %14358 = dma.done.wait (%p12647_p11), [#allocation3], 32  }
 0x5d5   : > { %14360 = vsyncadd (%p12647_p11), [#allocation3], 4294967264 }
 0x5d6   : > { %14362 = dma.done.wait (%p12647_p11), [#allocation6], 64  }
 0x5d7   : > { %14364 = vsyncadd (%p12647_p11), [#allocation6], 4294967232 }
 0x5d8   : > { %14366 = dma.done.wait (%p12647_p11), [#allocation9], 64  }
 0x5d9   : > { %14368 = vsyncadd (%p12647_p11), [#allocation9], 4294967232 }
 0x5da   : > { %14370 = dma.done.wait (%p12647_p11), [#allocation12], 64  }
 0x5db   : > { %14372 = vsyncadd (%p12647_p11), [#allocation12], 4294967232 }
 0x5dc   : > { %14374 = dma.done.wait (%p12647_p11), [#allocation15], 64  }
 0x5dd   : > { %14376 = vsyncadd (%p12647_p11), [#allocation15], 4294967232 }
 0x5de   : > { %14378 = dma.done.wait (%p12647_p11), [#allocation18], 64  }
 0x5df   : > { %14380 = vsyncadd (%p12647_p11), [#allocation18], 4294967232 }
 0x5e0   : > { %14382 = dma.done.wait (%p12647_p11), [#allocation21], 64  }
 0x5e1   : > { %14384 = vsyncadd (%p12647_p11), [#allocation21], 4294967232 }
 0x5e2   : > { %14386 = dma.done.wait (%p12647_p11), [#allocation24], 32  }
 0x5e3   : > { %14388 = vsyncadd (%p12647_p11), [#allocation24], 4294967264 }
 0x5e4   : > { %14390 = dma.done.wait (%p12647_p11), [#allocation27], 96  }
 0x5e5   : > { %14392 = vsyncadd (%p12647_p11), [#allocation27], 4294967200 }
 0x5e6   : > { %14394 = dma.done.wait (%p12647_p11), [#allocation30], 64  }
 0x5e7   : > { %14396 = vsyncadd (%p12647_p11), [#allocation30], 4294967232 }
 0x5e8   : > { %14398 = dma.done.wait (%p12647_p11), [#allocation33], 64  }
 0x5e9   : > { %14400 = vsyncadd (%p12647_p11), [#allocation33], 4294967232 }
 0x5ea   : > { %14402 = dma.done.wait (%p12647_p11), [#allocation36], 64  }
 0x5eb   : > { %14404 = vsyncadd (%p12647_p11), [#allocation36], 4294967232 }
 0x5ec   : > { %14406 = dma.done.wait (%p12647_p11), [#allocation39], 64  }
 0x5ed   : > { %14408 = vsyncadd (%p12647_p11), [#allocation39], 4294967232 }
 0x5ee   : > { %14410 = dma.done.wait (%p12647_p11), [#allocation42], 64  }
 0x5ef   : > { %14412 = vsyncadd (%p12647_p11), [#allocation42], 4294967232 }
 0x5f0   : > { %14414 = dma.done.wait (%p12647_p11), [#allocation45], 64  }
 0x5f1   : > { %14416 = vsyncadd (%p12647_p11), [#allocation45], 4294967232 }
 0x5f2   : > { %14418 = dma.done.wait (%p12647_p11), [#allocation48], 64  }
 0x5f3   : > { %14420 = vsyncadd (%p12647_p11), [#allocation48], 4294967232 }
 0x5f4   : > { %14422 = dma.done.wait (%p12647_p11), [#allocation51], 32  }
 0x5f5   : > { %14424 = vsyncadd (%p12647_p11), [#allocation51], 4294967264 }
 0x5f6   : > { %14426 = dma.done.wait (%p12647_p11), [#allocation54], 64  }
 0x5f7   : > { %14428 = vsyncadd (%p12647_p11), [#allocation54], 4294967232 }
 0x5f8   : > { %14430 = dma.done.wait (%p12647_p11), [#allocation57], 64  }
 0x5f9   : > { %14432 = vsyncadd (%p12647_p11), [#allocation57], 4294967232 }
 0x5fa   : > { %14434 = dma.done.wait (%p12647_p11), [#allocation60], 64  }
 0x5fb   : > { %14436 = vsyncadd (%p12647_p11), [#allocation60], 4294967232 }
 0x5fc   : > { %14438 = dma.done.wait (%p12647_p11), [#allocation63], 64  }
 0x5fd   : > { %14440 = vsyncadd (%p12647_p11), [#allocation63], 4294967232 }
 0x5fe   : > { %14442 = dma.done.wait (%p12647_p11), [#allocation66], 32  }
 0x5ff   : > { %14444 = vsyncadd (%p12647_p11), [#allocation66], 4294967264 }
 0x600   : > { %14446 = dma.done.wait (%p12647_p11), [#allocation69], 32  }
 0x601   : > { %14448 = vsyncadd (%p12647_p11), [#allocation69], 4294967264 }
 0x602   : > { %14450 = dma.done.wait (%p12647_p11), [#allocation72], 32  }
 0x603   : > { %14452 = vsyncadd (%p12647_p11), [#allocation72], 4294967264 }
 0x604   : > { %14454 = dma.done.wait (%p12647_p11), [#allocation75], 32  }
 0x605   : > { %14456 = vsyncadd (%p12647_p11), [#allocation75], 4294967264 }
 0x606   : > { %14458 = dma.done.wait (%p12647_p11), [#allocation78], 144  }
 0x607   : > { %14460 = vsyncadd (%p12647_p11), [#allocation78], 4294967152  ;;  %s16968_s18 = sld [smem:[#allocation176_spill]]  ;;  %v14623_v0 = vmov 0.0|0.0   ;;  %s16969_s23 = sld [smem:[#allocation110_spill]]  ;;  %vm14624_vm0 = vmmov 0   ;;  %v3636_v59 = vlaneseq }
 0x608   : > { %12043 = vmatprep.subr.bf16.mxu0 %v14623_v0  ;;  %s16970_s11 = sld [smem:[#allocation180_spill]]  ;;  %v14625_v1 = vmov 0.0   ;;  %12049 = vmatprep.subr.bf16.mxu1 %v14623_v0  ;;  %p3276_p9 = scmp.lt.s32.totalorder %s15096_s28, 1  ;;  %vm3309_vm1 = vcmask 261120   ;;  %vm3477_vm2 = vcmask 130048   ;;  %v3671_v13 = vld [vmem:[#allocation79] sm:$0xff] }
 0x609   : > { %11369 = vmatprep.mubr.msk.f32.mxu0 %vm14624_vm0, %v14625_v1  ;;  %11380 = vmatprep.mubr.msk.f32.mxu1 %vm14624_vm0, %v14625_v1  ;;  %s16971_s7 = sld [smem:[#allocation109_spill]]  ;;  %s16972_s1 = sld [smem:[#allocation108_spill]]  ;;  %vm3679_vm3 = vcmask 64512   ;;  %v3754_v15 = vld [vmem:[%s15068_s20] sm:$0xff]  ;;  %v3755_v16 = vld [vmem:[%s15068_s20 + $0x8] sm:$0xff]  ;;  %v3756_v18 = vld [vmem:[%s15068_s20 + $0x10] sm:$0xff] }
 0x60a   : > { %s15866_s2 = scalar_select %p3276_p9, %s15096_s28, 1  ;;  %v12065_v17 = vpack.c.bf16 %v3755_v16, %v3754_v15  ;;  %v3757_v19 = vld [vmem:[%s15068_s20 + $0x18] sm:$0xff]  ;;  %v10789_v34 = vld [vmem:[#allocation77] ss:$0 sm:$0xff]  ;;  %v10783_v41 = vld [vmem:[#allocation74] ss:$0 sm:$0xff] }
 0x60b   : > { %v12068_v20 = vpack.c.bf16 %v3757_v19, %v3756_v18  ;;  %v3308_v27 = vld [vmem:[#allocation71] sm:$0x1]  ;;  %v10791_v52 = vld [vmem:[%s15063_s29] ss:$0 sm:$0xff]  ;;  %v15918_v62 = vshrl.u32 %v3636_v59, 7  ;;  %vm4343_vm4 = vcmask 523264  }
 0x60c   : > { %s10778_s8 = sshll.u32 %s15866_s2, 3  ;;  %v3394_v63 = vld [vmem:[#allocation73] sm:$0x1]  ;;  %s16984_s4 = smov 64  }
 0x60d   : > { %v3304_v2 = vld [vmem:[%s16968_s18] sm:$0xff]  ;;  %v3305_v3 = vld [vmem:[%s16968_s18 + $0x8] sm:$0xff]  ;;  %v3306_v4 = vld [vmem:[%s16968_s18 + $0x10] sm:$0xff]  ;;  %s3286_s0 = scalar_lea.vmem %s16969_s23, %s15866_s2  ;;  %s16991_s6 = sld [smem:[#allocation129_spill]] }
 0x60e   : > { %v12044_v5 = vpack.c.bf16 %v3305_v3, %v3304_v2  ;;  %v3307_v6 = vld [vmem:[%s16968_s18 + $0x18] sm:$0xff]  ;;  %v3468_v8 = vld [vmem:[%s16970_s11] sm:$0xff]  ;;  %v3469_v9 = vld [vmem:[%s16970_s11 + $0x8] sm:$0xff]  ;;  %v15923_v3 = vsub.s32 0, %v15918_v62  ;;  %s17001_s9 = sld [smem:[#allocation152_spill]]  ;;  %s17002_s10 = sld [smem:[#allocation137_spill]] }
 0x60f   : > { %v12047_v7 = vpack.c.bf16 %v3307_v6, %v3306_v4  ;;  %v3295_v10 = vld [vmem:[%s3286_s0] sm:$0x1]  ;;  %v12056_v11 = vpack.c.bf16 %v3469_v9, %v3468_v8  ;;  %s3283_s5 = scalar_lea.vmem %s16971_s7, %s10778_s8  ;;  %s3279_s23 = scalar_lea.vmem %s16972_s1, %s10778_s8  ;;  %v10785_v4 = vld [vmem:[#allocation76] ss:$0 sm:$0xff] }
 0x610   : > { %12045 = vmatpush3.bf16.msra.mxu0 %v12044_v5  ;;  %v3294_v12 = vld [vmem:[%s3283_s5] sm:$0xff]  ;;  %s16973_s7 = sld [smem:[#allocation178_spill]]  ;;  %s16974_s0 = sld [smem:[#allocation182_spill]] }
 0x611   : > { %12046 = vmatprep.subr.bf16.mxu0 %v14623_v0  ;;  %v3293_v14 = vld [vmem:[%s3279_s23] sm:$0xff]  ;;  %s16976_s8 = sld [smem:[#allocation113_spill]]  ;;  %s16977_s5 = sld [smem:[#allocation170_spill]] }
 0x612   : > { %s16978_s23 = sld [smem:[#allocation111_spill]]  ;;  %s17003_s11 = sld [smem:[#allocation138_spill]] }
 0x613   : > { %p17008_p12 = scmp.ne.s32.totalorder %s16922_s15, 0 }
 0x614   : > { %12048 = vmatpush3.bf16.msra.mxu0 %v12047_v7 }
 0x615   : > { %12055 = vmatprep.subr.bf16.mxu0 %v14623_v0 }
 0x616   : > { %v3390_v21 = vld [vmem:[%s16973_s7] sm:$0xff]  ;;  %v3391_v22 = vld [vmem:[%s16973_s7 + $0x8] sm:$0xff]  ;;  %v3392_v24 = vld [vmem:[%s16973_s7 + $0x10] sm:$0xff]  ;;  %s16975_s1 = smov %s16974_s0 }
 0x617   : > { %11370 = vmatmul.mubr.msk.f32.vlgmr.msra.gmra.mrb[0].mxu0 %vm3309_vm1, %v3295_v10  ;;  %v12050_v23 = vpack.c.bf16 %v3391_v22, %v3390_v21  ;;  %v3393_v25 = vld [vmem:[%s16973_s7 + $0x18] sm:$0xff]  ;;  %v3552_v43 = vld [vmem:[%s16974_s0] sm:$0xff]  ;;  %v3553_v44 = vld [vmem:[%s16975_s1 + $0x8] sm:$0xff]  ;;  %s16801_s0 = smov 96   ;;  %s16992_s7 = sld [smem:[#allocation116_spill]] }
 0x618   : > { %12057 = vmatpush3.bf16.msra.mxu0 %v12056_v11  ;;  %11387 = vmatprep.mubr.msk.f32.mxu0 %vm14624_vm0, %v14625_v1  ;;  %v12053_v26 = vpack.c.bf16 %v3393_v25, %v3392_v24  ;;  %v12059_v46 = vpack.c.bf16 %v3553_v44, %v3552_v43  ;;  %v3554_v48 = vld [vmem:[%s16975_s1 + $0x10] sm:$0xff]  ;;  %v3555_v49 = vld [vmem:[%s16975_s1 + $0x18] sm:$0xff]  ;;  %v3302_v54 = vld [vmem:[%s16976_s8] sm:$0xff]  ;;  %s3289_s8 = scalar_lea.vmem %s16978_s23, %s15866_s2  ;;  %s16979_s1 = sld [smem:[#allocation168_spill]] }
 0x619   : > { %11401 = vmatprep.subr.mxu0 %v14625_v1  ;;  %12051 = vmatpush3.bf16.msra.mxu1 %v12050_v23  ;;  %v12062_v50 = vpack.c.bf16 %v3555_v49, %v3554_v48  ;;  %v3868_v15 = vld [vmem:[%s16977_s5] sm:$0xff]  ;;  %v3869_v16 = vld [vmem:[%s16977_s5 + $0x8] sm:$0xff]  ;;  %v3870_v18 = vld [vmem:[%s16977_s5 + $0x10] sm:$0xff]  ;;  %s16799_s23 = smov 64  }
 0x61a   : > { %12052 = vmatprep.subr.bf16.mxu1 %v14623_v0  ;;  %v3871_v19 = vld [vmem:[%s16977_s5 + $0x18] sm:$0xff]  ;;  %v10793_v25 = vld [vmem:[#allocation67] ss:$0 sm:$0xff] }
 0x61b   : > { %11388 = vmatmul.mubr.msk.f32.vlgmr.msra.gmra.mrb[2].mxu0 %vm3477_vm2, %v3294_v12 }
 0x61c   : > { %11402 = vmatpush3.msra.mxu0 %v3671_v13  ;;  %11403 = vmatprep.mubr.msk.f32.mxu0 %vm14624_vm0, %v14625_v1 }
 0x61d   : > { %12064 = vmatprep.subr.bf16.mxu0 %v14623_v0  ;;  %12054 = vmatpush3.bf16.msra.mxu1 %v12053_v26 }
 0x61e   : > { %12058 = vmatprep.subr.bf16.mxu1 %v14623_v0  ;;  %v3873_v49 = vld [vmem:[%s16979_s1] sm:$0xff] }
 0x61f   : > { %11404 = vmatmul.mubr.msk.f32.vlgmr.msra.gmra.mrb[4].mxu0 %vm3679_vm3, %v3293_v14 }
 0x620   : > { %11414 = vmatprep.mubr.msk.f32.mxu0 %vm14624_vm0, %v14625_v1  ;;  %12066 = vmatpush3.bf16.msra.mxu0 %v12065_v17  ;;  %v12071_v17 = vpack.c.bf16 %v3869_v16, %v3868_v15 }
 0x621   : > { %12067 = vmatprep.subr.bf16.mxu0 %v14623_v0 }
 0x624   : > { %12069 = vmatpush3.bf16.msra.mxu0 %v12068_v20  ;;  %v12074_v20 = vpack.c.bf16 %v3871_v19, %v3870_v18 }
 0x625   : > { %11428 = vmatprep.subr.mxu0 %v14625_v1 }
 0x6ea   : > { %v3379_v28 = vpop.f32.mrb[0].mxu0 }
 0x6eb   : > { %v3380_v29 = vadd.f32 %v3379_v28, %v3308_v27  ;;  %v11371_v30 = vpop.f32.mrb[1].mxu0  ;;  %v10794_v27 = vld [vmem:[#allocation65] ss:$0 sm:$0xff] }
 0x6ec   : > { %v10795_v30 = vld [vmem:[#allocation64] ss:$0 sm:$0xff] }
 0x6ed   : > { %v10781_v31 = vmul.f32 -1.442695, %v3380_v29 }
 0x6ee   : > { %v3547_v32 = vpop.f32.mrb[2].mxu0 }
 0x6ef   : > { %12879 = vpow2.f32 %v10781_v31  ;;  %v11389_v33 = vpop.f32.mrb[3].mxu0  ;;  %v3548_v42 = vadd.f32 %v10783_v41, %v3547_v32 }
 0x6f2   : > { %v3749_v35 = vpop.f32.mrb[4].mxu0 }
 0x6f3   : > { %v3750_v36 = vadd.f32 %v10789_v34, %v3749_v35  ;;  %v11405_v37 = vpop.f32.mrb[5].mxu0 }
 0x6f5   : > { %12881 = vtanh.f32 %v3750_v36  ;;  %v3296_v36 = vld [vmem:[%s3289_s8] sm:$0x1]  ;;  %s16980_s8 = sld [smem:[#allocation160_spill]] }
 0x6f6   : > { %v3297_v37 = vsub.f32 1.0, %v3296_v36 }
 0x6f9   : > { %v12880_v38 = vpop.eup %12879 }
 0x6fa   : > { %v3386_v39 = vadd.f32 1.0, %v12880_v38  ;;  %v3298_v38 = vmul.f32 -3.4028235e+38, %v3297_v37 }
 0x6fb   : > { %v4239_v15 = vld [vmem:[%s16980_s8 + $0x8] sm:$0xff]  ;;  %v4241_v18 = vld [vmem:[%s16980_s8 + $0x18] sm:$0xff] }
 0x6fc   : > { %12883 = vrcp.f32 %v3386_v39  ;;  %v15948_v39 = vrot.slane %v3298_v38, %v15923_v3 }
 0x6fd   : > { %12885 = vtanh.f32 %v3548_v42 }
 0x6ff   : > { %v12882_v40 = vpop.eup %12881 }
 0x700   : > { %11415 = vmatmul.mubr.msk.f32.vlgmr.msra.gmra.mrb[6].mxu0 %vm3309_vm1, %v12882_v40 }
 0x701   : > { %11430 = vmatprep.mubr.msk.f32.mxu0 %vm14624_vm0, %v14625_v1 }
 0x706   : > { %v12884_v45 = vpop.eup %12883 }
 0x707   : > { %v3389_v47 = vmul.f32 %v12884_v45, %v3380_v29  ;;  %v12886_v51 = vpop.eup %12885 }
 0x709   : > { %11381 = vmatmul.mubr.msk.f32.vlgmr.msra.gmra.mrb[0].mxu1 %vm3309_vm1, %v3389_v47 }
 0x70a   : > { %12060 = vmatpush3.bf16.msra.mxu1 %v12059_v46  ;;  %11398 = vmatprep.mubr.msk.f32.mxu1 %vm14624_vm0, %v14625_v1 }
 0x70b   : > { %12061 = vmatprep.subr.bf16.mxu1 %v14623_v0 }
 0x70e   : > { %12063 = vmatpush3.bf16.msra.mxu1 %v12062_v50  ;;  %v3874_v50 = vld [vmem:[%s16979_s1 + $0x8] sm:$0xff] }
 0x70f   : > { %12070 = vmatprep.subr.bf16.mxu1 %v14623_v0 }
 0x711   : > { %11399 = vmatmul.mubr.msk.f32.vlgmr.msra.gmra.mrb[2].mxu1 %vm3309_vm1, %v12886_v51  ;;  %v3875_v51 = vld [vmem:[%s16979_s1 + $0x10] sm:$0xff] }
 0x712   : > { %11425 = vmatprep.mubr.msk.f32.mxu1 %vm14624_vm0, %v14625_v1  ;;  %12072 = vmatpush3.bf16.msra.mxu1 %v12071_v17  ;;  %v4240_v17 = vld [vmem:[%s16980_s8 + $0x10] sm:$0xff] }
 0x713   : > { %12073 = vmatprep.subr.bf16.mxu1 %v14623_v0  ;;  %v12086_v19 = vpack.c.bf16 %v4241_v18, %v4240_v17 }
 0x716   : > { %12075 = vmatpush3.bf16.msra.mxu1 %v12074_v20 }
 0x717   : > { %11433 = vmatprep.subr.mxu1 %v14625_v1 }
 0x7d3   : > { %v3834_v53 = vpop.f32.mrb[6].mxu0 }
 0x7d4   : > { %v3835_v55 = vadd.f32 %v10791_v52, %v3834_v53  ;;  %v11416_v56 = vpop.f32.mrb[7].mxu0  ;;  %v12077_v52 = vpack.c.bf16 %v3874_v50, %v3873_v49  ;;  %v3876_v53 = vld [vmem:[%s16979_s1 + $0x18] sm:$0xff] }
 0x7d6   : > { %v3838_v57 = vadd.f32 %v3835_v55, %v3302_v54  ;;  %v12080_v54 = vpack.c.bf16 %v3876_v53, %v3875_v51  ;;  %v10806_v51 = vld [vmem:[#allocation55] ss:$0 sm:$0xff] }
 0x7d8   : > { %v3841_v58 = vsel %vm3309_vm1, %v3838_v57, 0.0 }
 0x7d9   : > { %3842 = vadd.xlane.f32.xlu0 %v3841_v58 }
 0x7dc   : > { %v3464_v60 = vpop.f32.mrb[0].mxu1 }
 0x7dd   : > { %v11382_v61 = vpop.f32.mrb[1].mxu1  ;;  %v15920_v2 = vadd.f32 %v3464_v60, %v3394_v63 }
 0x7de   : > { %v10800_v61 = vld [vmem:[#allocation62] ss:$0 sm:$0xff] }
 0x7df   : > { %v3639_v8 = vrot.slane %v15920_v2, %v15923_v3 }
 0x7e4   : > { %v3632_v5 = vpop.f32.mrb[2].mxu1 }
 0x7e5   : > { %v3633_v6 = vadd.f32 %v10785_v4, %v3632_v5  ;;  %v11400_v7 = vpop.f32.mrb[3].mxu1 }
 0x7e7   : > { %v15927_v9 = vadd.f32 %v3639_v8, %v3633_v6 }
 0x866   : > { %v3843_v10 = vpop.xlane.xlu0 %3842 }
 0x867   : > { %v3844_v11 = vmul.f32 0.03125, %v3843_v10 }
 0x869   : > { %v3845_v12 = vsub.f32 %v3838_v57, %v3844_v11 }
 0x86b   : > { %v3846_v13 = vmul.f32 %v3845_v12, %v3845_v12 }
 0x86d   : > { %v3847_v14 = vsel %vm3309_vm1, %v3846_v13, 0.0 }
 0x86e   : > { %3848 = vadd.xlane.f32.xlu0 %v3847_v14  ;;  %v4238_v14 = vld [vmem:[%s16980_s8] sm:$0xff] }
 0x86f   : > { %v12083_v16 = vpack.c.bf16 %v4239_v15, %v4238_v14  ;;  %v10808_v14 = vld [vmem:[#allocation61] ss:$0 sm:$0xff] }
 0x8fb   : > { %v3849_v21 = vpop.xlane.xlu0 %3848 }
 0x8fc   : > { %v3850_v22 = vmul.f32 0.03125, %v3849_v21 }
 0x8fe   : > { %v3851_v23 = vadd.f32 1e-05, %v3850_v22 }
 0x900   : > { %12887 = vrsqrt.f32 %v3851_v23 }
 0x90a   : > { %v12888_v24 = vpop.eup %12887 }
 0x90b   : > { %v3853_v26 = vmul.f32 %v12888_v24, %v3845_v12  ;;  %v10802_v24 = vld [vmem:[#allocation58] ss:$0 sm:$0xff] }
 0x90d   : > { %v3860_v28 = vmul.f32 %v10793_v25, %v3853_v26  ;;  %v10803_v26 = vld [vmem:[#allocation56] ss:$0 sm:$0xff] }
 0x90f   : > { %v3867_v29 = vadd.f32 %v10794_v27, %v3860_v28 }
 0x911   : > { %11426 = vmatmul.mubr.msk.f32.vlgmr.msra.gmra.mrb[4].mxu1 %vm3309_vm1, %v3867_v29 }
 0x912   : > { %11435 = vmatprep.mubr.msk.f32.mxu1 %vm14624_vm0, %v14625_v1 }
 0x9e4   : > { %v3953_v31 = vpop.f32.mrb[4].mxu1 }
 0x9e5   : > { %v3954_v32 = vadd.f32 %v10795_v30, %v3953_v31  ;;  %v11427_v33 = vpop.f32.mrb[5].mxu1 }
 0x9e7   : > { %3965 = vrot.lane.b32.xlu1 %v3954_v32, %s16801_s0  ;;  %v3957_v35 = vmul.f32 0.17677669, %v3954_v32 }
 0xa59   : > { %v3966_v34 = vpop.permute.xlu1 %3965 }
 0xa5a   : > { %11429 = vmatpush3.xpose.msk.msra.mxu0 %vm3309_vm1, %v3966_v34 }
 0xa5b   : > { %12076 = vmatprep.subr.bf16.mxu0 %v14623_v0 }
 0xa5d   : > { %11431 = vmatmul.mubr.msk.f32.vlgmr.msra.gmra.mrb[8].mxu0 %vm3309_vm1, %v3957_v35 }
 0xa5e   : > { %11446 = vmatprep.mubr.msk.f32.mxu0 %vm14624_vm0, %v14625_v1  ;;  %12078 = vmatpush3.bf16.msra.mxu0 %v12077_v52 }
 0xa5f   : > { %12079 = vmatprep.subr.bf16.mxu0 %v14623_v0 }
 0xa62   : > { %12081 = vmatpush3.bf16.msra.mxu0 %v12080_v54 }
 0xa63   : > { %12088 = vmatprep.subr.bf16.mxu0 %v14623_v0 }
 0xb30   : > { %v4038_v40 = vpop.f32.mrb[8].mxu0 }
 0xb31   : > { %v4039_v41 = vadd.f32 %v4038_v40, %v15948_v39  ;;  %v11432_v42 = vpop.f32.mrb[9].mxu0 }
 0xb32   : > { %v10804_v42 = vld [vmem:[#allocation53] ss:$0 sm:$0xff] }
 0xb33   : > { %v4042_v43 = vsel %vm3679_vm3, %v4039_v41, -inf }
 0xb34   : > { %4043 = vmax.xlane.f32.xlu1 %v4042_v43 }
 0xbc1   : > { %v4044_v44 = vpop.xlane.xlu1 %4043 }
 0xbc2   : > { %v4045_v45 = vsub.f32 %v4039_v41, %v4044_v44 }
 0xbc4   : > { %v4046_v46 = vmul.f32 1.442695, %v4045_v45 }
 0xbc6   : > { %12889 = vpow2.f32 %v4046_v46 }
 0xbd0   : > { %v12890_v47 = vpop.eup %12889 }
 0xbd1   : > { %v4048_v48 = vsel %vm3679_vm3, %v12890_v47, 0.0 }
 0xbd2   : > { %4049 = vadd.xlane.f32.xlu0 %v4048_v48 }
 0xbe8   : > { %4053 = vrot.lane.b32.xlu0 %v3954_v32, %s16799_s23  ;;  %s16981_s23 = sld [smem:[#allocation162_spill]] }
 0xbee   : > { %s16982_s0 = smov %s16981_s23 }
 0xbef   : > { %v4329_v30 = vld [vmem:[%s16982_s0 + $0x8] sm:$0xff]  ;;  %v4330_v32 = vld [vmem:[%s16982_s0 + $0x10] sm:$0xff]  ;;  %v4331_v33 = vld [vmem:[%s16982_s0 + $0x18] sm:$0xff] }
 0xbf0   : > { %v12092_v34 = vpack.c.bf16 %v4331_v33, %v4330_v32  ;;  %v4332_v35 = vld [vmem:[%s16982_s0 + $0x20] sm:$0xff]  ;;  %v4333_v36 = vld [vmem:[%s16982_s0 + $0x28] sm:$0xff]  ;;  %v4334_v38 = vld [vmem:[%s16982_s0 + $0x30] sm:$0xff] }
 0xbf1   : > { %v12095_v37 = vpack.c.bf16 %v4333_v36, %v4332_v35  ;;  %v4335_v40 = vld [vmem:[%s16982_s0 + $0x38] sm:$0xff]  ;;  %v3643_v35 = vsel %vm3309_vm1, %v15927_v9, 0.0 }
 0xbf2   : > { %v12098_v41 = vpack.c.bf16 %v4335_v40, %v4334_v38 }
 0xc5f   : > { %v4050_v55 = vpop.xlane.xlu0 %4049 }
 0xc60   : > { %12891 = vrcp.f32 %v4050_v55 }
 0xc63   : > { %v4054_v56 = vpop.permute.xlu0 %4053 }
 0xc64   : > { %11434 = vmatpush3.msra.mxu1 %v4054_v56 }
 0xc65   : > { %12082 = vmatprep.subr.bf16.mxu1 %v14623_v0 }
 0xc6a   : > { %v12892_v57 = vpop.eup %12891 }
 0xc6b   : > { %v4052_v58 = vmul.f32 %v12892_v57, %v12890_v47 }
 0xc6d   : > { %11436 = vmatmul.mubr.msk.f32.vlgmr.msra.gmra.mrb[6].mxu1 %vm3679_vm3, %v4052_v58 }
 0xc6e   : > { %11457 = vmatprep.mubr.msk.f32.mxu1 %vm14624_vm0, %v14625_v1  ;;  %12084 = vmatpush3.bf16.msra.mxu1 %v12083_v16  ;;  %v10809_v16 = vld [vmem:[#allocation59] ss:$0 sm:$0xff] }
 0xc6f   : > { %12085 = vmatprep.subr.bf16.mxu1 %v14623_v0 }
 0xc72   : > { %12087 = vmatpush3.bf16.msra.mxu1 %v12086_v19  ;;  %v10818_v19 = vld [vmem:[#allocation64 + $0x1] ss:$0 sm:$0xff] }
 0xc73   : > { %12100 = vmatprep.subr.bf16.mxu1 %v14623_v0 }
 0xd40   : > { %v4125_v59 = vpop.f32.mrb[6].mxu1 }
 0xd41   : > { %v11437_v60 = vpop.f32.mrb[7].mxu1  ;;  %11447 = vmatmul.mubr.msk.f32.vlgmr.msra.gmra.mrb[10].mxu0 %vm3309_vm1, %v4125_v59 }
 0xd42   : > { %11476 = vmatprep.mubr.msk.f32.mxu0 %vm14624_vm0, %v14625_v1 }
 0xe14   : > { %v4204_v63 = vpop.f32.mrb[10].mxu0 }
 0xe15   : > { %v4205_v4 = vadd.f32 %v10800_v61, %v4204_v63  ;;  %v11448_v5 = vpop.f32.mrb[11].mxu0  ;;  %v10810_v63 = vld [vmem:[%s16977_s5 + $0x20] sm:$0xff] }
 0xe17   : > { %v4208_v6 = vadd.f32 %v4205_v4, %v3867_v29  ;;  %v4328_v29 = vld [vmem:[%s16981_s23] sm:$0xff]  ;;  %v10811_v4 = vld [vmem:[%s16977_s5 + $0x28] sm:$0xff]  ;;  %s16983_s23 = smov 96  }
 0xe18   : > { %v12089_v31 = vpack.c.bf16 %v4329_v30, %v4328_v29  ;;  %v12101_v5 = vpack.c.bf16 %v10811_v4, %v10810_v63 }
 0xe19   : > { %v4211_v7 = vsel %vm3309_vm1, %v4208_v6, 0.0 }
 0xe1a   : > { %4212 = vadd.xlane.f32.xlu0 %v4211_v7  ;;  %12090 = vmatpush3.bf16.msra.mxu0 %v12089_v31  ;;  %v10813_v7 = vld [vmem:[%s16977_s5 + $0x38] sm:$0xff] }
 0xe1b   : > { %12091 = vmatprep.subr.bf16.mxu0 %v14623_v0 }
 0xe1e   : > { %12093 = vmatpush3.bf16.msra.mxu0 %v12092_v34 }
 0xe1f   : > { %12094 = vmatprep.subr.bf16.mxu0 %v14623_v0 }
 0xe22   : > { %12096 = vmatpush3.bf16.msra.mxu0 %v12095_v37 }
 0xe23   : > { %12097 = vmatprep.subr.bf16.mxu0 %v14623_v0 }
 0xe26   : > { %12099 = vmatpush3.bf16.msra.mxu0 %v12098_v41 }
 0xe27   : > { %12106 = vmatprep.subr.bf16.mxu0 %v14623_v0 }
 0xea7   : > { %v4213_v8 = vpop.xlane.xlu0 %4212 }
 0xea8   : > { %v4214_v10 = vmul.f32 0.03125, %v4213_v8 }
 0xeaa   : > { %v4215_v11 = vsub.f32 %v4208_v6, %v4214_v10  ;;  %v10812_v6 = vld [vmem:[%s16977_s5 + $0x30] sm:$0xff]  ;;  %s16985_s5 = sld [smem:[#allocation114_spill]] }
 0xeab   : > { %v12104_v8 = vpack.c.bf16 %v10813_v7, %v10812_v6 }
 0xeac   : > { %v4216_v12 = vmul.f32 %v4215_v11, %v4215_v11 }
 0xeae   : > { %v4217_v13 = vsel %vm3309_vm1, %v4216_v12, 0.0 }
 0xeaf   : > { %4218 = vadd.xlane.f32.xlu1 %v4217_v13 }
 0xeb0   : > { %v3303_v6 = vld [vmem:[%s16985_s5] sm:$0xff]  ;;  %s16986_s5 = sld [smem:[#allocation126_spill]] }
 0xf3c   : > { %v4219_v20 = vpop.xlane.xlu1 %4218 }
 0xf3d   : > { %v4220_v21 = vmul.f32 0.03125, %v4219_v20 }
 0xf3f   : > { %v4221_v22 = vadd.f32 1e-05, %v4220_v21 }
 0xf41   : > { %12893 = vrsqrt.f32 %v4221_v22 }
 0xf4b   : > { %v12894_v23 = vpop.eup %12893 }
 0xf4c   : > { %v4223_v25 = vmul.f32 %v12894_v23, %v4215_v11 }
 0xf4e   : > { %v4230_v27 = vmul.f32 %v10802_v24, %v4223_v25 }
 0xf50   : > { %v4237_v28 = vadd.f32 %v10803_v26, %v4230_v27 }
 0xf52   : > { %11458 = vmatmul.mubr.msk.f32.vlgmr.msra.gmra.mrb[8].mxu1 %vm3309_vm1, %v4237_v28 }
 0xf53   : > { %11487 = vmatprep.mubr.msk.f32.mxu1 %vm14624_vm0, %v14625_v1  ;;  %12102 = vmatpush3.bf16.msra.mxu1 %v12101_v5 }
 0xf54   : > { %12103 = vmatprep.subr.bf16.mxu1 %v14623_v0 }
 0xf57   : > { %12105 = vmatpush3.bf16.msra.mxu1 %v12104_v8 }
 0xf58   : > { %11490 = vmatprep.subr.mxu1 %v14625_v1 }
0x1025   : > { %v4318_v43 = vpop.f32.mrb[8].mxu1 }
0x1026   : > { %v4319_v44 = vadd.f32 %v10804_v42, %v4318_v43  ;;  %v11459_v45 = vpop.f32.mrb[9].mxu1 }
0x1027   : > { %v10814_v45 = vld [vmem:[%s16979_s1 + $0x20] sm:$0xff] }
0x1028   : > { %v4324_v46 = vmul.f32 0.70710677, %v4319_v44  ;;  %v4322_v48 = vmul.f32 0.5, %v4319_v44 }
0x102a   : > { %12895 = verf.f32 %v4324_v46  ;;  %v10815_v46 = vld [vmem:[%s16979_s1 + $0x28] sm:$0xff] }
0x1034   : > { %v12896_v47 = vpop.eup %12895 }
0x1035   : > { %v4326_v49 = vadd.f32 1.0, %v12896_v47  ;;  %v10816_v47 = vld [vmem:[%s16979_s1 + $0x30] sm:$0xff] }
0x1037   : > { %v4327_v50 = vmul.f32 %v4326_v49, %v4322_v48  ;;  %v12107_v48 = vpack.c.bf16 %v10815_v46, %v10814_v45  ;;  %v10817_v49 = vld [vmem:[%s16979_s1 + $0x38] sm:$0xff]  ;;  %v5062_v46 = vld [vmem:[%s16986_s5 + $0x10] sm:$0xff] }
0x1039   : > { %11477 = vmatmul.mubr.msk.f32.vlgmr.msra.gmra.mrb[12].mxu0 %vm4343_vm4, %v4327_v50  ;;  %v12110_v50 = vpack.c.bf16 %v10817_v49, %v10816_v47  ;;  %v5063_v47 = vld [vmem:[%s16986_s5 + $0x18] sm:$0xff] }
0x103a   : > { %11508 = vmatprep.mubr.msk.f32.mxu0 %vm14624_vm0, %v14625_v1  ;;  %12108 = vmatpush3.bf16.msra.mxu0 %v12107_v48  ;;  %v10845_v48 = vld [vmem:[#allocation25] ss:$0 sm:$0xff]  ;;  %v12134_v49 = vpack.c.bf16 %v5063_v47, %v5062_v46 }
0x103b   : > { %12109 = vmatprep.subr.bf16.mxu0 %v14623_v0 }
0x103e   : > { %12111 = vmatpush3.bf16.msra.mxu0 %v12110_v50 }
0x103f   : > { %12118 = vmatprep.subr.bf16.mxu0 %v14623_v0 }
0x110c   : > { %v4413_v52 = vpop.f32.mrb[12].mxu0 }
0x110d   : > { %v4414_v53 = vadd.f32 %v10806_v51, %v4413_v52  ;;  %v11478_v54 = vpop.f32.mrb[13].mxu0 }
0x110f   : > { %v4417_v55 = vadd.f32 %v4414_v53, %v4237_v28 }
0x1111   : > { %v4420_v56 = vsel %vm3309_vm1, %v4417_v55, 0.0 }
0x1112   : > { %4421 = vadd.xlane.f32.xlu1 %v4420_v56 }
0x119f   : > { %v4422_v57 = vpop.xlane.xlu1 %4421 }
0x11a0   : > { %v4423_v58 = vmul.f32 0.03125, %v4422_v57  ;;  %v10787_v57 = vld [vmem:[#allocation70] ss:$0 sm:$0xff] }
0x11a2   : > { %v4424_v59 = vsub.f32 %v4417_v55, %v4423_v58 }
0x11a4   : > { %v4425_v60 = vmul.f32 %v4424_v59, %v4424_v59 }
0x11a6   : > { %v4426_v61 = vsel %vm3309_vm1, %v4425_v60, 0.0  ;;  %v10788_v60 = vld [vmem:[#allocation68] ss:$0 sm:$0xff] }
0x11a7   : > { %4427 = vadd.xlane.f32.xlu1 %v4426_v61 }
0x1234   : > { %v4428_v10 = vpop.xlane.xlu1 %4427 }
0x1235   : > { %v4429_v11 = vmul.f32 0.03125, %v4428_v10 }
0x1237   : > { %v4430_v12 = vadd.f32 1e-05, %v4429_v11 }
0x1239   : > { %12897 = vrsqrt.f32 %v4430_v12 }
0x1243   : > { %v12898_v13 = vpop.eup %12897 }
0x1244   : > { %v4432_v15 = vmul.f32 %v12898_v13, %v4424_v59  ;;  %v10823_v59 = vld [vmem:[#allocation62 + $0x1] ss:$0 sm:$0xff] }
0x1246   : > { %v4439_v17 = vmul.f32 %v10808_v14, %v4432_v15 }
0x1248   : > { %v16001_v18 = vadd.f32 %v10809_v16, %v4439_v17 }
0x124a   : > { %11488 = vmatmul.mubr.msk.f32.vlgmr.msra.gmra.mrb[10].mxu1 %vm3309_vm1, %v16001_v18 }
0x124b   : > { %11492 = vmatprep.mubr.msk.f32.mxu1 %vm14624_vm0, %v14625_v1 }
0x131d   : > { %v4536_v20 = vpop.f32.mrb[10].mxu1 }
0x131e   : > { %v4537_v21 = vadd.f32 %v10818_v19, %v4536_v20  ;;  %v11489_v22 = vpop.f32.mrb[11].mxu1 }
0x131f   : > { %v10827_v22 = vld [vmem:[%s16980_s8 + $0x20] sm:$0xff] }
0x1320   : > { %4542 = vrot.lane.b32.xlu1 %v4537_v21, %s16983_s23  ;;  %v4540_v24 = vmul.f32 0.17677669, %v4537_v21 }
0x1324   : > { %4630 = vrot.lane.b32.xlu1 %v4537_v21, %s16984_s4 }
0x1392   : > { %v4543_v23 = vpop.permute.xlu1 %4542 }
0x1393   : > { %11491 = vmatpush3.xpose.msk.msra.mxu1 %vm3309_vm1, %v4543_v23  ;;  %v10828_v23 = vld [vmem:[%s16980_s8 + $0x28] sm:$0xff] }
0x1394   : > { %11495 = vmatprep.subr.mxu1 %v14625_v1 }
0x1396   : > { %v4631_v25 = vpop.permute.xlu1 %4630  ;;  %11493 = vmatmul.mubr.msk.f32.vlgmr.msra.gmra.mrb[12].mxu1 %vm3309_vm1, %v4540_v24  ;;  %v12113_v24 = vpack.c.bf16 %v10828_v23, %v10827_v22 }
0x1397   : > { %11496 = vmatpush3.msra.mxu1 %v4631_v25  ;;  %11497 = vmatprep.mubr.msk.f32.mxu1 %vm14624_vm0, %v14625_v1  ;;  %v10829_v25 = vld [vmem:[%s16980_s8 + $0x30] sm:$0xff] }
0x1398   : > { %12112 = vmatprep.subr.bf16.mxu1 %v14623_v0 }
0x1469   : > { %v4615_v26 = vpop.f32.mrb[12].mxu1 }
0x146a   : > { %v4616_v27 = vadd.f32 %v4615_v26, %v15948_v39  ;;  %v11494_v28 = vpop.f32.mrb[13].mxu1  ;;  %v10830_v26 = vld [vmem:[%s16980_s8 + $0x38] sm:$0xff]  ;;  %s16993_s8 = sld [smem:[#allocation118_spill]] }
0x146c   : > { %v4619_v29 = vsel %vm3679_vm3, %v4616_v27, -inf }
0x146d   : > { %4620 = vmax.xlane.f32.xlu0 %v4619_v29 }
0x14fa   : > { %v4621_v30 = vpop.xlane.xlu0 %4620 }
0x14fb   : > { %v4622_v31 = vsub.f32 %v4616_v27, %v4621_v30  ;;  %v12116_v27 = vpack.c.bf16 %v10830_v26, %v10829_v25 }
0x14fd   : > { %v4623_v32 = vmul.f32 1.442695, %v4622_v31 }
0x14ff   : > { %12899 = vpow2.f32 %v4623_v32 }
0x1509   : > { %v12900_v33 = vpop.eup %12899 }
0x150a   : > { %v4625_v34 = vsel %vm3679_vm3, %v12900_v33, 0.0 }
0x150b   : > { %4626 = vadd.xlane.f32.xlu0 %v4625_v34 }
0x150f   : > { %3644 = vadd.xlane.f32.xlu0 %v3643_v35  ;;  %v10825_v35 = vld [vmem:[#allocation58 + $0x1] ss:$0 sm:$0xff] }
0x1598   : > { %v4627_v36 = vpop.xlane.xlu0 %4626 }
0x1599   : > { %12901 = vrcp.f32 %v4627_v36 }
0x159c   : > { %v3645_v37 = vpop.xlane.xlu0 %3644 }
0x159d   : > { %v3647_v38 = vmul.f32 0.03125, %v3645_v37  ;;  %v5060_v37 = vld [vmem:[%s16986_s5] sm:$0xff] }
0x159f   : > { %v3648_v40 = vsub.f32 %v15927_v9, %v3647_v38  ;;  %v5061_v38 = vld [vmem:[%s16986_s5 + $0x8] sm:$0xff] }
0x15a1   : > { %v3649_v41 = vmul.f32 %v3648_v40, %v3648_v40 }
0x15a3   : > { %v12902_v42 = vpop.eup %12901  ;;  %v3650_v43 = vsel %vm3309_vm1, %v3649_v41, 0.0 }
0x15a4   : > { %v4629_v44 = vmul.f32 %v12902_v42, %v12900_v33  ;;  %3651 = vadd.xlane.f32.xlu1 %v3650_v43  ;;  %v12131_v43 = vpack.c.bf16 %v5061_v38, %v5060_v37 }
0x15a6   : > { %11498 = vmatmul.mubr.msk.f32.vlgmr.msra.gmra.mrb[14].mxu1 %vm3679_vm3, %v4629_v44 }
0x15a7   : > { %11519 = vmatprep.mubr.msk.f32.mxu1 %vm14624_vm0, %v14625_v1  ;;  %12114 = vmatpush3.bf16.msra.mxu1 %v12113_v24 }
0x15a8   : > { %12115 = vmatprep.subr.bf16.mxu1 %v14623_v0 }
0x15ab   : > { %12117 = vmatpush3.bf16.msra.mxu1 %v12116_v27 }
0x15ac   : > { %12130 = vmatprep.subr.bf16.mxu1 %v14623_v0 }
0x1631   : > { %v3652_v52 = vpop.xlane.xlu1 %3651 }
0x1632   : > { %v3653_v53 = vmul.f32 0.03125, %v3652_v52  ;;  %v10833_v52 = vld [vmem:[%s16982_s0 + $0x40] sm:$0xff] }
0x1634   : > { %v3654_v54 = vadd.f32 1e-05, %v3653_v53  ;;  %v10834_v53 = vld [vmem:[%s16982_s0 + $0x48] sm:$0xff] }
0x1636   : > { %12903 = vrsqrt.f32 %v3654_v54  ;;  %v12119_v54 = vpack.c.bf16 %v10834_v53, %v10833_v52 }
0x1640   : > { %v12904_v55 = vpop.eup %12903 }
0x1641   : > { %v3656_v56 = vmul.f32 %v12904_v55, %v3648_v40  ;;  %v10826_v40 = vld [vmem:[#allocation56 + $0x1] ss:$0 sm:$0xff]  ;;  %v10835_v55 = vld [vmem:[%s16982_s0 + $0x50] sm:$0xff] }
0x1643   : > { %v3663_v58 = vmul.f32 %v10787_v57, %v3656_v56  ;;  %v10836_v56 = vld [vmem:[%s16982_s0 + $0x58] sm:$0xff] }
0x1644   : > { %v12122_v57 = vpack.c.bf16 %v10836_v56, %v10835_v55 }
0x1645   : > { %v3670_v5 = vadd.f32 %v10788_v60, %v3663_v58  ;;  %v10837_v58 = vld [vmem:[%s16982_s0 + $0x60] sm:$0xff] }
0x1647   : > { %v5030_v10 = vadd.f32 %v3670_v5, %v3303_v6  ;;  %v10831_v5 = vld [vmem:[#allocation53 + $0x1] ss:$0 sm:$0xff] }
0x1649   : > { %v5033_v11 = vsel %vm3309_vm1, %v5030_v10, 0.0 }
0x1679   : > { %v4702_v9 = vpop.f32.mrb[14].mxu1 }
0x167a   : > { %v11499_v51 = vpop.f32.mrb[15].mxu1  ;;  %11509 = vmatmul.mubr.msk.f32.vlgmr.msra.gmra.mrb[14].mxu0 %vm3309_vm1, %v4702_v9  ;;  %v10846_v9 = vld [vmem:[#allocation23] ss:$0 sm:$0xff] }
0x167b   : > { %11538 = vmatprep.mubr.msk.f32.mxu0 %vm14624_vm0, %v14625_v1  ;;  %12120 = vmatpush3.bf16.msra.mxu0 %v12119_v54 }
0x167c   : > { %12121 = vmatprep.subr.bf16.mxu0 %v14623_v0 }
0x167f   : > { %12123 = vmatpush3.bf16.msra.mxu0 %v12122_v57 }
0x1680   : > { %12124 = vmatprep.subr.bf16.mxu0 %v14623_v0 }
0x174d   : > { %v4781_v61 = vpop.f32.mrb[14].mxu0 }
0x174e   : > { %v4782_v63 = vadd.f32 %v10823_v59, %v4781_v61  ;;  %v11510_v4 = vpop.f32.mrb[15].mxu0  ;;  %v10838_v59 = vld [vmem:[%s16982_s0 + $0x68] sm:$0xff]  ;;  %v10839_v61 = vld [vmem:[%s16982_s0 + $0x70] sm:$0xff] }
0x174f   : > { %v12125_v60 = vpack.c.bf16 %v10838_v59, %v10837_v58 }
0x1750   : > { %v4785_v7 = vadd.f32 %v4782_v63, %v16001_v18  ;;  %v10840_v63 = vld [vmem:[%s16982_s0 + $0x78] sm:$0xff]  ;;  %s16987_s0 = sld [smem:[#allocation112_spill]] }
0x1751   : > { %12126 = vmatpush3.bf16.msra.mxu0 %v12125_v60  ;;  %v12128_v4 = vpack.c.bf16 %v10840_v63, %v10839_v61 }
0x1752   : > { %v4790_v8 = vsel %vm3309_vm1, %v4785_v7, 0.0  ;;  %12127 = vmatprep.subr.bf16.mxu0 %v14623_v0 }
0x1753   : > { %4791 = vadd.xlane.f32.xlu0 %v4790_v8 }
0x1755   : > { %12129 = vmatpush3.bf16.msra.mxu0 %v12128_v4 }
0x1756   : > { %12136 = vmatprep.subr.bf16.mxu0 %v14623_v0  ;;  %s3292_s1 = scalar_lea.vmem %s16987_s0, %s15866_s2  ;;  %s16988_s2 = sld [smem:[#allocation124_spill]] }
0x1757   : > { %5034 = vadd.xlane.f32.xlu0 %v5033_v11  ;;  %v10847_v11 = vld [vmem:[#allocation17] ss:$0 sm:$0xff]  ;;  %v3299_v24 = vld [vmem:[%s3292_s1] sm:$0x1]  ;;  %s16989_s1 = sld [smem:[#allocation128_spill]]  ;;  %s16990_s0 = sld [smem:[#allocation131_spill]] }
0x1758   : > { %v3300_v25 = vsub.f32 1.0, %v3299_v24 }
0x175a   : > { %v3301_v26 = vmul.f32 -3.4028235e+38, %v3300_v25 }
0x175c   : > { %v16090_v27 = vrot.slane %v3301_v26, %v15923_v3  ;;  %v5067_v52 = vld [vmem:[%s16988_s2 + $0x10] sm:$0xff]  ;;  %v5068_v54 = vld [vmem:[%s16988_s2 + $0x18] sm:$0xff] }
0x175d   : > { %v12140_v55 = vpack.c.bf16 %v5068_v54, %v5067_v52  ;;  %v5435_v59 = vld [vmem:[%s16989_s1] sm:$0xff]  ;;  %v5436_v60 = vld [vmem:[%s16989_s1 + $0x8] sm:$0xff] }
0x175e   : > { %v12149_v63 = vpack.c.bf16 %v5436_v60, %v5435_v59  ;;  %v5440_v60 = vld [vmem:[%s16991_s6] sm:$0xff] }
0x17e0   : > { %v4792_v12 = vpop.xlane.xlu0 %4791 }
0x17e1   : > { %v4793_v13 = vmul.f32 0.03125, %v4792_v12 }
0x17e3   : > { %v4794_v14 = vsub.f32 %v4785_v7, %v4793_v13 }
0x17e4   : > { %v5035_v15 = vpop.xlane.xlu0 %5034 }
0x17e5   : > { %v5036_v16 = vmul.f32 0.03125, %v5035_v15  ;;  %v4795_v17 = vmul.f32 %v4794_v14, %v4794_v14 }
0x17e7   : > { %v5037_v19 = vsub.f32 %v5030_v10, %v5036_v16  ;;  %v4796_v18 = vsel %vm3309_vm1, %v4795_v17, 0.0 }
0x17e8   : > { %4797 = vadd.xlane.f32.xlu0 %v4796_v18 }
0x17e9   : > { %v5038_v20 = vmul.f32 %v5037_v19, %v5037_v19 }
0x17eb   : > { %v5039_v21 = vsel %vm3309_vm1, %v5038_v20, 0.0 }
0x17ec   : > { %5040 = vadd.xlane.f32.xlu0 %v5039_v21 }
0x1875   : > { %v4798_v28 = vpop.xlane.xlu0 %4797 }
0x1876   : > { %v4799_v29 = vmul.f32 0.03125, %v4798_v28 }
0x1878   : > { %v4800_v30 = vadd.f32 1e-05, %v4799_v29 }
0x1879   : > { %v5041_v31 = vpop.xlane.xlu0 %5040 }
0x187a   : > { %12905 = vrsqrt.f32 %v4800_v30  ;;  %v5042_v32 = vmul.f32 0.03125, %v5041_v31 }
0x187c   : > { %v5043_v33 = vadd.f32 1e-05, %v5042_v32 }
0x187e   : > { %12907 = vrsqrt.f32 %v5043_v33 }
0x1884   : > { %v12906_v34 = vpop.eup %12905 }
0x1885   : > { %v4802_v36 = vmul.f32 %v12906_v34, %v4794_v14 }
0x1887   : > { %v4809_v41 = vmul.f32 %v10825_v35, %v4802_v36  ;;  %v10841_v35 = vld [vmem:[#allocation55 + $0x1] ss:$0 sm:$0xff] }
0x1888   : > { %v12908_v42 = vpop.eup %12907 }
0x1889   : > { %v5045_v44 = vmul.f32 %v12908_v42, %v5037_v19  ;;  %v16048_v45 = vadd.f32 %v10826_v40, %v4809_v41 }
0x188b   : > { %11520 = vmatmul.mubr.msk.f32.vlgmr.msra.gmra.mrb[16].mxu1 %vm3309_vm1, %v16048_v45  ;;  %v5052_v50 = vmul.f32 %v10845_v48, %v5045_v44 }
0x188c   : > { %12132 = vmatpush3.bf16.msra.mxu1 %v12131_v43  ;;  %11549 = vmatprep.mubr.msk.f32.mxu1 %vm14624_vm0, %v14625_v1 }
0x188d   : > { %12133 = vmatprep.subr.bf16.mxu1 %v14623_v0  ;;  %v16057_v51 = vadd.f32 %v10846_v9, %v5052_v50  ;;  %v5066_v9 = vld [vmem:[%s16988_s2 + $0x8] sm:$0xff] }
0x1890   : > { %12135 = vmatpush3.bf16.msra.mxu1 %v12134_v49 }
0x1891   : > { %11552 = vmatprep.subr.mxu1 %v14625_v1 }
0x1893   : > { %11550 = vmatmul.mubr.msk.f32.vlgmr.msra.gmra.mrb[18].mxu1 %vm3309_vm1, %v16057_v51 }
0x1894   : > { %11554 = vmatprep.mubr.msk.f32.mxu1 %vm14624_vm0, %v14625_v1 }
0x195e   : > { %v4899_v6 = vpop.f32.mrb[16].mxu1 }
0x195f   : > { %v4900_v7 = vadd.f32 %v10831_v5, %v4899_v6  ;;  %v11521_v8 = vpop.f32.mrb[17].mxu1  ;;  %v5437_v5 = vld [vmem:[%s16989_s1 + $0x10] sm:$0xff]  ;;  %v5438_v6 = vld [vmem:[%s16989_s1 + $0x18] sm:$0xff] }
0x1960   : > { %v10843_v8 = vld [vmem:[#allocation61 + $0x1] ss:$0 sm:$0xff] }
0x1961   : > { %v4904_v10 = vmul.f32 0.70710677, %v4900_v7  ;;  %v4903_v16 = vmul.f32 0.5, %v4900_v7 }
0x1963   : > { %12909 = verf.f32 %v4904_v10 }
0x1966   : > { %v5145_v12 = vpop.f32.mrb[18].mxu1 }
0x1967   : > { %v5146_v13 = vadd.f32 %v10847_v11, %v5145_v12  ;;  %v11551_v14 = vpop.f32.mrb[19].mxu1  ;;  %v12152_v11 = vpack.c.bf16 %v5438_v6, %v5437_v5  ;;  %v5443_v5 = vld [vmem:[%s16991_s6 + $0x18] sm:$0xff] }
0x1969   : > { %5157 = vrot.lane.b32.xlu0 %v5146_v13, %s16983_s23  ;;  %v5149_v20 = vmul.f32 0.17677669, %v5146_v13 }
0x196d   : > { %v12910_v15 = vpop.eup %12909  ;;  %5245 = vrot.lane.b32.xlu0 %v5146_v13, %s16984_s4  ;;  %v10844_v13 = vld [vmem:[#allocation59 + $0x1] ss:$0 sm:$0xff] }
0x196e   : > { %v4906_v17 = vadd.f32 1.0, %v12910_v15  ;;  %v10852_v15 = vld [vmem:[#allocation16] ss:$0 sm:$0xff] }
0x1970   : > { %v4907_v19 = vmul.f32 %v4906_v17, %v4903_v16 }
0x1972   : > { %11539 = vmatmul.mubr.msk.f32.vlgmr.msra.gmra.mrb[16].mxu0 %vm4343_vm4, %v4907_v19 }
0x1973   : > { %11570 = vmatprep.mubr.msk.f32.mxu0 %vm14624_vm0, %v14625_v1 }
0x19db   : > { %v5158_v18 = vpop.permute.xlu0 %5157 }
0x19dc   : > { %11553 = vmatpush3.xpose.msk.msra.mxu1 %vm3309_vm1, %v5158_v18 }
0x19dd   : > { %11557 = vmatprep.subr.mxu1 %v14625_v1 }
0x19df   : > { %v5246_v21 = vpop.permute.xlu0 %5245  ;;  %11555 = vmatmul.mubr.msk.f32.vlgmr.msra.gmra.mrb[20].mxu1 %vm3309_vm1, %v5149_v20 }
0x19e0   : > { %11558 = vmatpush3.msra.mxu1 %v5246_v21  ;;  %11559 = vmatprep.mubr.msk.f32.mxu1 %vm14624_vm0, %v14625_v1 }
0x19e1   : > { %12142 = vmatprep.subr.bf16.mxu1 %v14623_v0 }
0x1a45   : > { %v4994_v22 = vpop.f32.mrb[16].mxu0 }
0x1a46   : > { %v11540_v23 = vpop.f32.mrb[17].mxu0  ;;  %v4995_v36 = vadd.f32 %v10841_v35, %v4994_v22 }
0x1a48   : > { %v4998_v40 = vadd.f32 %v4995_v36, %v16048_v45  ;;  %v5065_v45 = vld [vmem:[%s16988_s2] sm:$0xff] }
0x1a49   : > { %v12137_v53 = vpack.c.bf16 %v5066_v9, %v5065_v45 }
0x1a4a   : > { %v5003_v41 = vsel %vm3309_vm1, %v4998_v40, 0.0 }
0x1a4b   : > { %12138 = vmatpush3.bf16.msra.mxu0 %v12137_v53 }
0x1a4c   : > { %12139 = vmatprep.subr.bf16.mxu0 %v14623_v0 }
0x1a4f   : > { %12141 = vmatpush3.bf16.msra.mxu0 %v12140_v55 }
0x1a50   : > { %12148 = vmatprep.subr.bf16.mxu0 %v14623_v0 }
0x1ab2   : > { %v5230_v28 = vpop.f32.mrb[20].mxu1 }
0x1ab3   : > { %v5231_v29 = vadd.f32 %v5230_v28, %v16090_v27  ;;  %v11556_v30 = vpop.f32.mrb[21].mxu1 }
0x1ab4   : > { %v5431_v30 = vld [vmem:[%s16990_s0 + $0x8] sm:$0xff] }
0x1ab5   : > { %v5234_v31 = vsel %vm3679_vm3, %v5231_v29, -inf }
0x1ab6   : > { %5235 = vmax.xlane.f32.xlu1 %v5234_v31 }
0x1b43   : > { %v5236_v32 = vpop.xlane.xlu1 %5235 }
0x1b44   : > { %v5237_v33 = vsub.f32 %v5231_v29, %v5236_v32  ;;  %v5430_v29 = vld [vmem:[%s16990_s0] sm:$0xff]  ;;  %v5433_v32 = vld [vmem:[%s16990_s0 + $0x18] sm:$0xff] }
0x1b45   : > { %v12143_v31 = vpack.c.bf16 %v5431_v30, %v5430_v29  ;;  %v5878_v30 = vld [vmem:[%s16992_s7 + $0x10] sm:$0xff] }
0x1b46   : > { %v5238_v34 = vmul.f32 1.442695, %v5237_v33 }
0x1b48   : > { %12911 = vpow2.f32 %v5238_v34 }
0x1b52   : > { %v12912_v37 = vpop.eup %12911 }
0x1b53   : > { %v5240_v38 = vsel %vm3679_vm3, %v12912_v37, 0.0 }
0x1b54   : > { %5241 = vadd.xlane.f32.xlu1 %v5240_v38  ;;  %v10854_v38 = vld [vmem:[#allocation8] ss:$0 sm:$0xff] }
0x1b58   : > { %5004 = vadd.xlane.f32.xlu1 %v5003_v41  ;;  %v10855_v41 = vld [vmem:[#allocation7] ss:$0 sm:$0xff] }
0x1be1   : > { %v5242_v42 = vpop.xlane.xlu1 %5241 }
0x1be2   : > { %12913 = vrcp.f32 %v5242_v42  ;;  %v10858_v42 = vld [vmem:[#allocation19] ss:$0 sm:$0xff] }
0x1be5   : > { %v5005_v43 = vpop.xlane.xlu1 %5004 }
0x1be6   : > { %v5006_v44 = vmul.f32 0.03125, %v5005_v43 }
0x1be8   : > { %v5007_v46 = vsub.f32 %v4998_v40, %v5006_v44 }
0x1bea   : > { %v5008_v47 = vmul.f32 %v5007_v46, %v5007_v46 }
0x1bec   : > { %v12914_v48 = vpop.eup %12913  ;;  %v5009_v49 = vsel %vm3309_vm1, %v5008_v47, 0.0  ;;  %v10856_v47 = vld [vmem:[#allocation22] ss:$0 sm:$0xff] }
0x1bed   : > { %v5244_v50 = vmul.f32 %v12914_v48, %v12912_v37  ;;  %5010 = vadd.xlane.f32.xlu1 %v5009_v49 }
0x1bef   : > { %11560 = vmatmul.mubr.msk.f32.vlgmr.msra.gmra.mrb[22].mxu1 %vm3679_vm3, %v5244_v50 }
0x1bf0   : > { %11581 = vmatprep.mubr.msk.f32.mxu1 %vm14624_vm0, %v14625_v1  ;;  %12144 = vmatpush3.bf16.msra.mxu1 %v12143_v31  ;;  %v5879_v31 = vld [vmem:[%s16992_s7 + $0x18] sm:$0xff] }
0x1bf1   : > { %12145 = vmatprep.subr.bf16.mxu1 %v14623_v0 }
0x1c7a   : > { %v5011_v56 = vpop.xlane.xlu1 %5010 }
0x1c7b   : > { %v5012_v57 = vmul.f32 0.03125, %v5011_v56 }
0x1c7d   : > { %v5013_v58 = vadd.f32 1e-05, %v5012_v57 }
0x1c7f   : > { %12915 = vrsqrt.f32 %v5013_v58 }
0x1c89   : > { %v12916_v61 = vpop.eup %12915 }
0x1c8a   : > { %v5015_v4 = vmul.f32 %v12916_v61, %v5007_v46  ;;  %v5441_v61 = vld [vmem:[%s16991_s6 + $0x8] sm:$0xff] }
0x1c8c   : > { %v5022_v12 = vmul.f32 %v10843_v8, %v5015_v4  ;;  %v12155_v4 = vpack.c.bf16 %v5441_v61, %v5440_v60 }
0x1c8e   : > { %v16115_v14 = vadd.f32 %v10844_v13, %v5022_v12 }
0x1cc2   : > { %v5317_v7 = vpop.f32.mrb[22].mxu1 }
0x1cc3   : > { %v11561_v10 = vpop.f32.mrb[23].mxu1  ;;  %11571 = vmatmul.mubr.msk.f32.vlgmr.msra.gmra.mrb[18].mxu0 %vm3309_vm1, %v5317_v7 }
0x1cc4   : > { %12150 = vmatpush3.bf16.msra.mxu0 %v12149_v63  ;;  %11592 = vmatprep.mubr.msk.f32.mxu0 %vm14624_vm0, %v14625_v1  ;;  %v5442_v63 = vld [vmem:[%s16991_s6 + $0x10] sm:$0xff] }
0x1cc5   : > { %12151 = vmatprep.subr.bf16.mxu0 %v14623_v0  ;;  %v12158_v6 = vpack.c.bf16 %v5443_v5, %v5442_v63 }
0x1cc8   : > { %12153 = vmatpush3.bf16.msra.mxu0 %v12152_v11 }
0x1cc9   : > { %12154 = vmatprep.subr.bf16.mxu0 %v14623_v0 }
0x1ccb   : > { %11593 = vmatmul.mubr.msk.f32.vlgmr.msra.gmra.mrb[20].mxu0 %vm3309_vm1, %v16115_v14 }
0x1ccc   : > { %11613 = vmatprep.mubr.msk.f32.mxu0 %vm14624_vm0, %v14625_v1  ;;  %12156 = vmatpush3.bf16.msra.mxu0 %v12155_v4  ;;  %v10869_v4 = vld [vmem:[#allocation5] ss:$0 sm:$0xff] }
0x1ccd   : > { %12157 = vmatprep.subr.bf16.mxu0 %v14623_v0 }
0x1cd0   : > { %12159 = vmatpush3.bf16.msra.mxu0 %v12158_v6 }
0x1cd1   : > { %12166 = vmatprep.subr.bf16.mxu0 %v14623_v0 }
0x1d96   : > { %v5396_v16 = vpop.f32.mrb[18].mxu0 }
0x1d97   : > { %v5397_v17 = vadd.f32 %v10852_v15, %v5396_v16  ;;  %v11572_v19 = vpop.f32.mrb[19].mxu0  ;;  %v10863_v15 = vld [vmem:[#allocation20] ss:$0 sm:$0xff] }
0x1d99   : > { %v5400_v18 = vadd.f32 %v5397_v17, %v16057_v51  ;;  %v5432_v51 = vld [vmem:[%s16990_s0 + $0x10] sm:$0xff] }
0x1d9a   : > { %v12146_v33 = vpack.c.bf16 %v5433_v32, %v5432_v51  ;;  %v12164_v51 = vpack.c.bf16 %v5879_v31, %v5878_v30  ;;  %v10872_v30 = vld [vmem:[#allocation13] ss:$0 sm:$0xff] }
0x1d9b   : > { %v5403_v20 = vsel %vm3309_vm1, %v5400_v18, 0.0 }
0x1d9c   : > { %5404 = vadd.xlane.f32.xlu0 %v5403_v20  ;;  %12147 = vmatpush3.bf16.msra.mxu1 %v12146_v33 }
0x1d9d   : > { %11595 = vmatprep.subr.mxu1 %v14625_v1 }
0x1d9e   : > { %v5599_v21 = vpop.f32.mrb[20].mxu0 }
0x1d9f   : > { %v11594_v22 = vpop.f32.mrb[21].mxu0  ;;  %v5600_v46 = vadd.f32 %v10858_v42, %v5599_v21  ;;  %v5965_v42 = vld [vmem:[%s16993_s8] sm:$0xff] }
0x1e29   : > { %v5405_v23 = vpop.xlane.xlu0 %5404 }
0x1e2a   : > { %v5406_v24 = vmul.f32 0.03125, %v5405_v23 }
0x1e2c   : > { %v5407_v25 = vsub.f32 %v5400_v18, %v5406_v24 }
0x1e2e   : > { %v5408_v26 = vmul.f32 %v5407_v25, %v5407_v25 }
0x1e30   : > { %v5409_v28 = vsel %vm3309_vm1, %v5408_v26, 0.0  ;;  %v5876_v26 = vld [vmem:[%s16992_s7] sm:$0xff] }
0x1e31   : > { %5410 = vadd.xlane.f32.xlu1 %v5409_v28  ;;  %v5877_v28 = vld [vmem:[%s16992_s7 + $0x8] sm:$0xff] }
0x1e32   : > { %v12161_v29 = vpack.c.bf16 %v5877_v28, %v5876_v26  ;;  %v10871_v28 = vld [vmem:[#allocation14] ss:$0 sm:$0xff] }
0x1ebe   : > { %v5411_v34 = vpop.xlane.xlu1 %5410 }
0x1ebf   : > { %v5412_v35 = vmul.f32 0.03125, %v5411_v34 }
0x1ec1   : > { %v5413_v36 = vadd.f32 1e-05, %v5412_v35 }
0x1ec3   : > { %12917 = vrsqrt.f32 %v5413_v36  ;;  %v10865_v36 = vld [vmem:[#allocation11] ss:$0 sm:$0xff] }
0x1ecd   : > { %v12918_v37 = vpop.eup %12917 }
0x1ece   : > { %v5415_v40 = vmul.f32 %v12918_v37, %v5407_v25 }
0x1ed0   : > { %v5422_v43 = vmul.f32 %v10854_v38, %v5415_v40  ;;  %v10866_v38 = vld [vmem:[#allocation10] ss:$0 sm:$0xff] }
0x1ed2   : > { %v5429_v44 = vadd.f32 %v10855_v41, %v5422_v43  ;;  %v5966_v43 = vld [vmem:[%s16993_s8 + $0x8] sm:$0xff] }
0x1ed4   : > { %11582 = vmatmul.mubr.msk.f32.vlgmr.msra.gmra.mrb[24].mxu1 %vm3309_vm1, %v5429_v44 }
0x1ed5   : > { %11596 = vmatpush3.xpose.msk.msra.mxu1 %vm3309_vm1, %v5600_v46  ;;  %11597 = vmatprep.mubr.msk.f32.mxu1 %vm14624_vm0, %v14625_v1 }
0x1ed6   : > { %11600 = vmatprep.subr.mxu1 %v14625_v1 }
0x1fa7   : > { %v5520_v48 = vpop.f32.mrb[24].mxu1 }
0x1fa8   : > { %v5521_v49 = vadd.f32 %v10856_v47, %v5520_v48  ;;  %v11583_v50 = vpop.f32.mrb[25].mxu1  ;;  %v5968_v47 = vld [vmem:[%s16993_s8 + $0x18] sm:$0xff] }
0x1fa9   : > { %v5970_v50 = vld [vmem:[%s16993_s8 + $0x28] sm:$0xff] }
0x1faa   : > { %v5603_v45 = vmul.f32 0.17677669, %v5521_v49  ;;  %v5969_v49 = vld [vmem:[%s16993_s8 + $0x20] sm:$0xff] }
0x1fac   : > { %11598 = vmatmul.mubr.msk.f32.vlgmr.msra.gmra.mrb[26].mxu1 %vm3309_vm1, %v5603_v45  ;;  %v12173_v45 = vpack.c.bf16 %v5970_v50, %v5969_v49  ;;  %v10877_v49 = vld [vmem:[%s16988_s2 + $0x20] sm:$0xff]  ;;  %v10878_v50 = vld [vmem:[%s16988_s2 + $0x28] sm:$0xff] }
0x1fad   : > { %11602 = vmatprep.mubr.msk.f32.mxu1 %vm14624_vm0, %v14625_v1 }
0x207f   : > { %v5676_v9 = vpop.f32.mrb[26].mxu1 }
0x2080   : > { %v5677_v52 = vadd.f32 %v5676_v9, %v15948_v39  ;;  %v11599_v53 = vpop.f32.mrb[27].mxu1  ;;  %v5971_v9 = vld [vmem:[%s16993_s8 + $0x30] sm:$0xff] }
0x2082   : > { %v5680_v54 = vsel %vm3679_vm3, %v5677_v52, -inf }
0x2083   : > { %5681 = vmax.xlane.f32.xlu1 %v5680_v54  ;;  %v10867_v54 = vld [vmem:[#allocation2] ss:$0 sm:$0xff] }
0x2110   : > { %v5682_v55 = vpop.xlane.xlu1 %5681 }
0x2111   : > { %v5683_v56 = vsub.f32 %v5677_v52, %v5682_v55  ;;  %v5972_v52 = vld [vmem:[%s16993_s8 + $0x38] sm:$0xff] }
0x2112   : > { %v12176_v53 = vpack.c.bf16 %v5972_v52, %v5971_v9  ;;  %v12185_v9 = vpack.c.bf16 %v10878_v50, %v10877_v49  ;;  %v10880_v52 = vld [vmem:[%s16988_s2 + $0x38] sm:$0xff] }
0x2113   : > { %v5684_v57 = vmul.f32 1.442695, %v5683_v56 }
0x2115   : > { %12919 = vpow2.f32 %v5684_v57 }
0x211f   : > { %v12920_v58 = vpop.eup %12919 }
0x2120   : > { %v5686_v59 = vsel %vm3679_vm3, %v12920_v58, 0.0 }
0x2121   : > { %5687 = vadd.xlane.f32.xlu1 %v5686_v59 }
0x2132   : > { %5691 = vrot.lane.b32.xlu1 %v5600_v46, %s16983_s23  ;;  %v5967_v46 = vld [vmem:[%s16993_s8 + $0x10] sm:$0xff] }
0x2133   : > { %v12170_v48 = vpack.c.bf16 %v5968_v47, %v5967_v46 }
0x21ae   : > { %v5688_v7 = vpop.xlane.xlu1 %5687 }
0x21af   : > { %12921 = vrcp.f32 %v5688_v7 }
0x21b2   : > { %v5692_v8 = vpop.permute.xlu1 %5691 }
0x21b3   : > { %11601 = vmatpush3.msra.mxu1 %v5692_v8 }
0x21b4   : > { %12160 = vmatprep.subr.bf16.mxu1 %v14623_v0 }
0x21b9   : > { %v12922_v10 = vpop.eup %12921 }
0x21ba   : > { %v5690_v11 = vmul.f32 %v12922_v10, %v12920_v58 }
0x21bc   : > { %11603 = vmatmul.mubr.msk.f32.vlgmr.msra.gmra.mrb[28].mxu1 %vm3679_vm3, %v5690_v11 }
0x21bd   : > { %11624 = vmatprep.mubr.msk.f32.mxu1 %vm14624_vm0, %v14625_v1  ;;  %12162 = vmatpush3.bf16.msra.mxu1 %v12161_v29 }
0x21be   : > { %12163 = vmatprep.subr.bf16.mxu1 %v14623_v0 }
0x21c1   : > { %12165 = vmatpush3.bf16.msra.mxu1 %v12164_v51 }
0x21c2   : > { %12178 = vmatprep.subr.bf16.mxu1 %v14623_v0 }
0x228f   : > { %v5763_v12 = vpop.f32.mrb[28].mxu1 }
0x2290   : > { %v11604_v13 = vpop.f32.mrb[29].mxu1  ;;  %11614 = vmatmul.mubr.msk.f32.vlgmr.msra.gmra.mrb[22].mxu0 %vm3309_vm1, %v5763_v12 }
0x2291   : > { %11643 = vmatprep.mubr.msk.f32.mxu0 %vm14624_vm0, %v14625_v1 }
0x2363   : > { %v5842_v16 = vpop.f32.mrb[22].mxu0 }
0x2364   : > { %v5843_v17 = vadd.f32 %v10863_v15, %v5842_v16  ;;  %v11615_v19 = vpop.f32.mrb[23].mxu0 }
0x2365   : > { %v10874_v19 = vld [vmem:[%s16986_s5 + $0x28] sm:$0xff] }
0x2366   : > { %v5846_v18 = vadd.f32 %v5843_v17, %v5429_v44  ;;  %v12167_v44 = vpack.c.bf16 %v5966_v43, %v5965_v42  ;;  %v10873_v17 = vld [vmem:[%s16986_s5 + $0x20] sm:$0xff] }
0x2368   : > { %v5849_v20 = vsel %vm3309_vm1, %v5846_v18, 0.0  ;;  %12168 = vmatpush3.bf16.msra.mxu0 %v12167_v44 }
0x2369   : > { %5850 = vadd.xlane.f32.xlu0 %v5849_v20  ;;  %12169 = vmatprep.subr.bf16.mxu0 %v14623_v0  ;;  %v10875_v20 = vld [vmem:[%s16986_s5 + $0x30] sm:$0xff] }
0x236c   : > { %12171 = vmatpush3.bf16.msra.mxu0 %v12170_v48 }
0x236d   : > { %12172 = vmatprep.subr.bf16.mxu0 %v14623_v0 }
0x2370   : > { %12174 = vmatpush3.bf16.msra.mxu0 %v12173_v45  ;;  %v10879_v45 = vld [vmem:[%s16988_s2 + $0x30] sm:$0xff]  ;;  %s16996_s2 = sld [smem:[#allocation147_spill]] }
0x2371   : > { %12175 = vmatprep.subr.bf16.mxu0 %v14623_v0 }
0x2374   : > { %12177 = vmatpush3.bf16.msra.mxu0 %v12176_v53  ;;  %v12188_v53 = vpack.c.bf16 %v10880_v52, %v10879_v45 }
0x2375   : > { %12184 = vmatprep.subr.bf16.mxu0 %v14623_v0 }
0x23f6   : > { %v5851_v21 = vpop.xlane.xlu0 %5850 }
0x23f7   : > { %v5852_v22 = vmul.f32 0.03125, %v5851_v21  ;;  %v10876_v21 = vld [vmem:[%s16986_s5 + $0x38] sm:$0xff]  ;;  %s16997_s5 = sld [smem:[#allocation144_spill]] }
0x23f9   : > { %v5853_v23 = vsub.f32 %v5846_v18, %v5852_v22  ;;  %v12179_v18 = vpack.c.bf16 %v10874_v19, %v10873_v17  ;;  %v12182_v22 = vpack.c.bf16 %v10876_v21, %v10875_v20 }
0x23fb   : > { %v5854_v24 = vmul.f32 %v5853_v23, %v5853_v23 }
0x23fd   : > { %v5855_v25 = vsel %vm3309_vm1, %v5854_v24, 0.0 }
0x23fe   : > { %5856 = vadd.xlane.f32.xlu0 %v5855_v25 }
0x248b   : > { %v5857_v32 = vpop.xlane.xlu0 %5856 }
0x248c   : > { %v5858_v33 = vmul.f32 0.03125, %v5857_v32  ;;  %v10881_v32 = vld [vmem:[#allocation17 + $0x1] ss:$0 sm:$0xff] }
0x248e   : > { %v5859_v34 = vadd.f32 1e-05, %v5858_v33 }
0x2490   : > { %12923 = vrsqrt.f32 %v5859_v34 }
0x249a   : > { %v12924_v35 = vpop.eup %12923 }
0x249b   : > { %v5861_v37 = vmul.f32 %v12924_v35, %v5853_v23 }
0x249d   : > { %v5868_v40 = vmul.f32 %v10865_v36, %v5861_v37 }
0x249f   : > { %v5875_v41 = vadd.f32 %v10866_v38, %v5868_v40 }
0x24a1   : > { %11625 = vmatmul.mubr.msk.f32.vlgmr.msra.gmra.mrb[30].mxu1 %vm3309_vm1, %v5875_v41 }
0x24a2   : > { %11654 = vmatprep.mubr.msk.f32.mxu1 %vm14624_vm0, %v14625_v1  ;;  %12180 = vmatpush3.bf16.msra.mxu1 %v12179_v18 }
0x24a3   : > { %12181 = vmatprep.subr.bf16.mxu1 %v14623_v0 }
0x24a6   : > { %12183 = vmatpush3.bf16.msra.mxu1 %v12182_v22  ;;  %v10890_v22 = vld [vmem:[%s16990_s0 + $0x20] sm:$0xff] }
0x24a7   : > { %11657 = vmatprep.subr.mxu1 %v14625_v1 }
0x2574   : > { %v5956_v55 = vpop.f32.mrb[30].mxu1 }
0x2575   : > { %v5957_v56 = vadd.f32 %v10867_v54, %v5956_v55  ;;  %v11626_v57 = vpop.f32.mrb[31].mxu1 }
0x2577   : > { %v5961_v58 = vmul.f32 0.70710677, %v5957_v56  ;;  %v5960_v60 = vmul.f32 0.5, %v5957_v56 }
0x2579   : > { %12925 = verf.f32 %v5961_v58  ;;  %v10894_v58 = vld [vmem:[%s16989_s1 + $0x20] sm:$0xff] }
0x2583   : > { %v12926_v59 = vpop.eup %12925 }
0x2584   : > { %v5963_v61 = vadd.f32 1.0, %v12926_v59  ;;  %v10895_v59 = vld [vmem:[%s16989_s1 + $0x28] sm:$0xff] }
0x2586   : > { %v5964_v63 = vmul.f32 %v5963_v61, %v5960_v60  ;;  %v12197_v60 = vpack.c.bf16 %v10895_v59, %v10894_v58  ;;  %v10896_v61 = vld [vmem:[%s16989_s1 + $0x30] sm:$0xff]  ;;  %v10901_v58 = vld [vmem:[%s16991_s6 + $0x38] sm:$0xff] }
0x2588   : > { %11644 = vmatmul.mubr.msk.f32.vlgmr.msra.gmra.mrb[24].mxu0 %vm4343_vm4, %v5964_v63  ;;  %v10897_v63 = vld [vmem:[%s16989_s1 + $0x38] sm:$0xff]  ;;  %s16995_s1 = sld [smem:[#allocation148_spill]] }
0x2589   : > { %11675 = vmatprep.mubr.msk.f32.mxu0 %vm14624_vm0, %v14625_v1  ;;  %12186 = vmatpush3.bf16.msra.mxu0 %v12185_v9 }
0x258a   : > { %12187 = vmatprep.subr.bf16.mxu0 %v14623_v0 }
0x258d   : > { %12189 = vmatpush3.bf16.msra.mxu0 %v12188_v53 }
0x258e   : > { %12196 = vmatprep.subr.bf16.mxu0 %v14623_v0 }
0x265b   : > { %v6049_v5 = vpop.f32.mrb[24].mxu0 }
0x265c   : > { %v6050_v6 = vadd.f32 %v10869_v4, %v6049_v5  ;;  %v11645_v7 = vpop.f32.mrb[25].mxu0 }
0x265d   : > { %v10886_v7 = vld [vmem:[#allocation16 + $0x1] ss:$0 sm:$0xff] }
0x265e   : > { %v6053_v8 = vadd.f32 %v6050_v6, %v5875_v41  ;;  %v12200_v6 = vpack.c.bf16 %v10897_v63, %v10896_v61 }
0x2660   : > { %v6056_v10 = vsel %vm3309_vm1, %v6053_v8, 0.0 }
0x2661   : > { %6057 = vadd.xlane.f32.xlu1 %v6056_v10 }
0x26ee   : > { %v6058_v11 = vpop.xlane.xlu1 %6057 }
0x26ef   : > { %v6059_v12 = vmul.f32 0.03125, %v6058_v11 }
0x26f1   : > { %v6060_v13 = vsub.f32 %v6053_v8, %v6059_v12 }
0x26f3   : > { %v6061_v15 = vmul.f32 %v6060_v13, %v6060_v13 }
0x26f5   : > { %v6062_v16 = vsel %vm3309_vm1, %v6061_v15, 0.0 }
0x26f6   : > { %6063 = vadd.xlane.f32.xlu0 %v6062_v16 }
0x2783   : > { %v6064_v23 = vpop.xlane.xlu0 %6063 }
0x2784   : > { %v6065_v24 = vmul.f32 0.03125, %v6064_v23  ;;  %v10891_v23 = vld [vmem:[%s16990_s0 + $0x28] sm:$0xff] }
0x2786   : > { %v6066_v25 = vadd.f32 1e-05, %v6065_v24  ;;  %v12191_v24 = vpack.c.bf16 %v10891_v23, %v10890_v22  ;;  %v10915_v23 = vld [vmem:[%s16992_s7 + $0x30] sm:$0xff] }
0x2788   : > { %12927 = vrsqrt.f32 %v6066_v25  ;;  %v10892_v25 = vld [vmem:[%s16990_s0 + $0x30] sm:$0xff] }
0x2792   : > { %v12928_v26 = vpop.eup %12927 }
0x2793   : > { %v6068_v29 = vmul.f32 %v12928_v26, %v6060_v13  ;;  %v10893_v26 = vld [vmem:[%s16990_s0 + $0x38] sm:$0xff]  ;;  %s16994_s0 = sld [smem:[#allocation135_spill]] }
0x2795   : > { %v6075_v31 = vmul.f32 %v10871_v28, %v6068_v29  ;;  %v12194_v28 = vpack.c.bf16 %v10893_v26, %v10892_v25 }
0x2797   : > { %v16190_v51 = vadd.f32 %v10872_v30, %v6075_v31 }
0x2799   : > { %11655 = vmatmul.mubr.msk.f32.vlgmr.msra.gmra.mrb[32].mxu1 %vm3309_vm1, %v16190_v51  ;;  %v7125_v25 = vld [vmem:[%s16994_s0 + $0x8] sm:$0xff] }
0x279a   : > { %11659 = vmatprep.mubr.msk.f32.mxu1 %vm14624_vm0, %v14625_v1 }
0x286c   : > { %v6172_v33 = vpop.f32.mrb[32].mxu1 }
0x286d   : > { %v6173_v34 = vadd.f32 %v10881_v32, %v6172_v33  ;;  %v11656_v35 = vpop.f32.mrb[33].mxu1  ;;  %v10888_v32 = vld [vmem:[#allocation8 + $0x1] ss:$0 sm:$0xff] }
0x286e   : > { %v10904_v35 = vld [vmem:[#allocation19 + $0x1] ss:$0 sm:$0xff] }
0x286f   : > { %6178 = vrot.lane.b32.xlu0 %v6173_v34, %s16983_s23  ;;  %v6176_v37 = vmul.f32 0.17677669, %v6173_v34 }
0x28e1   : > { %v6179_v36 = vpop.permute.xlu0 %6178 }
0x28e2   : > { %11658 = vmatpush3.xpose.msk.msra.mxu1 %vm3309_vm1, %v6179_v36 }
0x28e3   : > { %11662 = vmatprep.subr.mxu1 %v14625_v1 }
0x28e5   : > { %11660 = vmatmul.mubr.msk.f32.vlgmr.msra.gmra.mrb[34].mxu1 %vm3309_vm1, %v6176_v37 }
0x28e6   : > { %11664 = vmatprep.mubr.msk.f32.mxu1 %vm14624_vm0, %v14625_v1 }
0x29b8   : > { %v6251_v38 = vpop.f32.mrb[34].mxu1 }
0x29b9   : > { %v6252_v40 = vadd.f32 %v6251_v38, %v16090_v27  ;;  %v11661_v41 = vpop.f32.mrb[35].mxu1 }
0x29bb   : > { %v6255_v42 = vsel %vm3679_vm3, %v6252_v40, -inf }
0x29bc   : > { %6256 = vmax.xlane.f32.xlu0 %v6255_v42 }
0x2a49   : > { %v6257_v43 = vpop.xlane.xlu0 %6256 }
0x2a4a   : > { %v6258_v44 = vsub.f32 %v6252_v40, %v6257_v43  ;;  %v10902_v40 = vld [vmem:[#allocation22 + $0x1] ss:$0 sm:$0xff] }
0x2a4c   : > { %v6259_v46 = vmul.f32 1.442695, %v6258_v44 }
0x2a4e   : > { %12929 = vpow2.f32 %v6259_v46 }
0x2a58   : > { %v12930_v47 = vpop.eup %12929 }
0x2a59   : > { %v6261_v48 = vsel %vm3679_vm3, %v12930_v47, 0.0 }
0x2a5a   : > { %6262 = vadd.xlane.f32.xlu1 %v6261_v48 }
0x2a6b   : > { %6266 = vrot.lane.b32.xlu1 %v6173_v34, %s16984_s4  ;;  %v10889_v34 = vld [vmem:[#allocation7 + $0x1] ss:$0 sm:$0xff] }
0x2ae7   : > { %v6263_v54 = vpop.xlane.xlu1 %6262 }
0x2ae8   : > { %12931 = vrcp.f32 %v6263_v54  ;;  %v10898_v54 = vld [vmem:[%s16991_s6 + $0x20] sm:$0xff] }
0x2aeb   : > { %v6267_v55 = vpop.permute.xlu1 %6266 }
0x2aec   : > { %11663 = vmatpush3.msra.mxu1 %v6267_v55  ;;  %v10899_v55 = vld [vmem:[%s16991_s6 + $0x28] sm:$0xff] }
0x2aed   : > { %12190 = vmatprep.subr.bf16.mxu1 %v14623_v0 }
0x2af2   : > { %v12932_v56 = vpop.eup %12931 }
0x2af3   : > { %v6265_v57 = vmul.f32 %v12932_v56, %v12930_v47  ;;  %v10900_v56 = vld [vmem:[%s16991_s6 + $0x30] sm:$0xff]  ;;  %s16998_s6 = sld [smem:[#allocation145_spill]] }
0x2af4   : > { %v12206_v59 = vpack.c.bf16 %v10901_v58, %v10900_v56  ;;  %v10921_v56 = vld [vmem:[%s16993_s8 + $0x50] sm:$0xff]  ;;  %v10923_v58 = vld [vmem:[%s16993_s8 + $0x60] sm:$0xff] }
0x2af5   : > { %11665 = vmatmul.mubr.msk.f32.vlgmr.msra.gmra.mrb[36].mxu1 %vm3679_vm3, %v6265_v57  ;;  %v12203_v57 = vpack.c.bf16 %v10899_v55, %v10898_v54  ;;  %v10920_v54 = vld [vmem:[%s16993_s8 + $0x48] sm:$0xff] }
0x2af6   : > { %11686 = vmatprep.mubr.msk.f32.mxu1 %vm14624_vm0, %v14625_v1  ;;  %12192 = vmatpush3.bf16.msra.mxu1 %v12191_v24  ;;  %v10916_v24 = vld [vmem:[%s16992_s7 + $0x38] sm:$0xff] }
0x2af7   : > { %12193 = vmatprep.subr.bf16.mxu1 %v14623_v0  ;;  %v12212_v26 = vpack.c.bf16 %v10916_v24, %v10915_v23 }
0x2afa   : > { %12195 = vmatpush3.bf16.msra.mxu1 %v12194_v28  ;;  %v7127_v28 = vld [vmem:[%s16994_s0 + $0x18] sm:$0xff] }
0x2afb   : > { %11700 = vmatprep.subr.mxu1 %v14625_v1 }
0x2bc8   : > { %v6338_v4 = vpop.f32.mrb[36].mxu1 }
0x2bc9   : > { %v11666_v5 = vpop.f32.mrb[37].mxu1  ;;  %11676 = vmatmul.mubr.msk.f32.vlgmr.msra.gmra.mrb[26].mxu0 %vm3309_vm1, %v6338_v4 }
0x2bca   : > { %12198 = vmatpush3.bf16.msra.mxu0 %v12197_v60  ;;  %11697 = vmatprep.mubr.msk.f32.mxu0 %vm14624_vm0, %v14625_v1 }
0x2bcb   : > { %12199 = vmatprep.subr.bf16.mxu0 %v14623_v0 }
0x2bce   : > { %12201 = vmatpush3.bf16.msra.mxu0 %v12200_v6 }
0x2bcf   : > { %12202 = vmatprep.subr.bf16.mxu0 %v14623_v0 }
0x2bd1   : > { %11698 = vmatmul.mubr.msk.f32.vlgmr.msra.gmra.mrb[28].mxu0 %vm3309_vm1, %v16115_v14 }
0x2bd2   : > { %11718 = vmatprep.mubr.msk.f32.mxu0 %vm14624_vm0, %v14625_v1  ;;  %12204 = vmatpush3.bf16.msra.mxu0 %v12203_v57  ;;  %v10922_v57 = vld [vmem:[%s16993_s8 + $0x58] sm:$0xff] }
0x2bd3   : > { %12205 = vmatprep.subr.bf16.mxu0 %v14623_v0 }
0x2bd6   : > { %12207 = vmatpush3.bf16.msra.mxu0 %v12206_v59  ;;  %v10924_v59 = vld [vmem:[%s16993_s8 + $0x68] sm:$0xff] }
0x2bd7   : > { %12214 = vmatprep.subr.bf16.mxu0 %v14623_v0 }
0x2c9c   : > { %v6417_v8 = vpop.f32.mrb[26].mxu0 }
0x2c9d   : > { %v6418_v10 = vadd.f32 %v10886_v7, %v6417_v8  ;;  %v11677_v11 = vpop.f32.mrb[27].mxu0  ;;  %v10909_v7 = vld [vmem:[#allocation20 + $0x1] ss:$0 sm:$0xff] }
0x2c9f   : > { %v6421_v12 = vadd.f32 %v6418_v10, %v16190_v51 }
0x2ca1   : > { %v6426_v13 = vsel %vm3309_vm1, %v6421_v12, 0.0 }
0x2ca2   : > { %6427 = vadd.xlane.f32.xlu1 %v6426_v13 }
0x2ca4   : > { %v6625_v15 = vpop.f32.mrb[28].mxu0 }
0x2ca5   : > { %v11699_v16 = vpop.f32.mrb[29].mxu0  ;;  %v6626_v38 = vadd.f32 %v10904_v35, %v6625_v15 }
0x2d2f   : > { %v6428_v17 = vpop.xlane.xlu1 %6427 }
0x2d30   : > { %v6429_v19 = vmul.f32 0.03125, %v6428_v17 }
0x2d32   : > { %v6430_v18 = vsub.f32 %v6421_v12, %v6429_v19 }
0x2d34   : > { %v6431_v20 = vmul.f32 %v6430_v18, %v6430_v18 }
0x2d36   : > { %v6432_v21 = vsel %vm3309_vm1, %v6431_v20, 0.0  ;;  %v10913_v20 = vld [vmem:[%s16992_s7 + $0x20] sm:$0xff] }
0x2d37   : > { %6433 = vadd.xlane.f32.xlu0 %v6432_v21  ;;  %v10914_v21 = vld [vmem:[%s16992_s7 + $0x28] sm:$0xff]  ;;  %s16817_s7 = smov 32  }
0x2d38   : > { %v12209_v22 = vpack.c.bf16 %v10914_v21, %v10913_v20 }
0x2dc4   : > { %v6434_v29 = vpop.xlane.xlu0 %6433 }
0x2dc5   : > { %v6435_v30 = vmul.f32 0.03125, %v6434_v29  ;;  %v12226_v29 = vpack.c.bf16 %v7127_v28, %v7125_v25 }
0x2dc7   : > { %v6436_v31 = vadd.f32 1e-05, %v6435_v30  ;;  %v10931_v30 = vmul.f32 -1.442695, %v15920_v2 }
0x2dc9   : > { %12933 = vrsqrt.f32 %v6436_v31 }
0x2dd3   : > { %v12934_v51 = vpop.eup %12933 }
0x2dd4   : > { %v6438_v33 = vmul.f32 %v12934_v51, %v6430_v18 }
0x2dd6   : > { %v6445_v36 = vmul.f32 %v10888_v32, %v6438_v33 }
0x2dd8   : > { %v6452_v37 = vadd.f32 %v10889_v34, %v6445_v36  ;;  %v10911_v36 = vld [vmem:[#allocation11 + $0x1] ss:$0 sm:$0xff] }
0x2dda   : > { %11687 = vmatmul.mubr.msk.f32.vlgmr.msra.gmra.mrb[38].mxu1 %vm3309_vm1, %v6452_v37 }
0x2ddb   : > { %11701 = vmatpush3.xpose.msk.msra.mxu1 %vm3309_vm1, %v6626_v38  ;;  %11702 = vmatprep.mubr.msk.f32.mxu1 %vm14624_vm0, %v14625_v1 }
0x2ddc   : > { %11705 = vmatprep.subr.mxu1 %v14625_v1 }
0x2ead   : > { %v6549_v41 = vpop.f32.mrb[38].mxu1 }
0x2eae   : > { %v6550_v42 = vadd.f32 %v10902_v40, %v6549_v41  ;;  %v11688_v43 = vpop.f32.mrb[39].mxu1  ;;  %v7126_v40 = vld [vmem:[%s16994_s0 + $0x10] sm:$0xff]  ;;  %v10912_v41 = vld [vmem:[#allocation10 + $0x1] ss:$0 sm:$0xff] }
0x2eaf   : > { %v7131_v43 = vld [vmem:[%s16994_s0 + $0x38] sm:$0xff] }
0x2eb0   : > { %v6629_v44 = vmul.f32 0.17677669, %v6550_v42  ;;  %v7129_v42 = vld [vmem:[%s16994_s0 + $0x28] sm:$0xff] }
0x2eb2   : > { %11703 = vmatmul.mubr.msk.f32.vlgmr.msra.gmra.mrb[40].mxu1 %vm3309_vm1, %v6629_v44 }
0x2eb3   : > { %11707 = vmatprep.mubr.msk.f32.mxu1 %vm14624_vm0, %v14625_v1 }
0x2f85   : > { %v6702_v46 = vpop.f32.mrb[40].mxu1 }
0x2f86   : > { %v6703_v47 = vadd.f32 %v6702_v46, %v15948_v39  ;;  %v11704_v48 = vpop.f32.mrb[41].mxu1 }
0x2f87   : > { %v12230_v48 = vpack.c.bf16 %v7131_v43, %v7129_v42  ;;  %v7236_v42 = vld [vmem:[%s16995_s1 + $0x18] sm:$0xff] }
0x2f88   : > { %v6706_v49 = vsel %vm3679_vm3, %v6703_v47, -inf }
0x2f89   : > { %6707 = vmax.xlane.f32.xlu0 %v6706_v49  ;;  %v7128_v49 = vld [vmem:[%s16994_s0 + $0x20] sm:$0xff] }
0x3016   : > { %v6708_v50 = vpop.xlane.xlu0 %6707 }
0x3017   : > { %v6709_v45 = vsub.f32 %v6703_v47, %v6708_v50  ;;  %v7130_v50 = vld [vmem:[%s16994_s0 + $0x30] sm:$0xff] }
0x3019   : > { %v6710_v9 = vmul.f32 1.442695, %v6709_v45  ;;  %v12232_v45 = vpack.c.bf16 %v7130_v50, %v7128_v49  ;;  %v10929_v49 = vld [vmem:[#allocation14 + $0x1] ss:$0 sm:$0xff] }
0x301b   : > { %12935 = vpow2.f32 %v6710_v9 }
0x3025   : > { %v12936_v52 = vpop.eup %12935 }
0x3026   : > { %v6712_v53 = vsel %vm3679_vm3, %v12936_v52, 0.0 }
0x3027   : > { %6713 = vadd.xlane.f32.xlu0 %v6712_v53  ;;  %v10919_v53 = vld [vmem:[%s16993_s8 + $0x40] sm:$0xff] }
0x3028   : > { %v12215_v55 = vpack.c.bf16 %v10920_v54, %v10919_v53 }
0x303d   : > { %6717 = vrot.lane.b32.xlu0 %v6626_v38, %s16983_s23  ;;  %v7124_v38 = vld [vmem:[%s16994_s0] sm:$0xff] }
0x303e   : > { %v12228_v46 = vpack.c.bf16 %v7126_v40, %v7124_v38  ;;  %v7234_v38 = vld [vmem:[%s16995_s1 + $0x8] sm:$0xff] }
0x30b4   : > { %v6714_v60 = vpop.xlane.xlu0 %6713 }
0x30b5   : > { %12937 = vrcp.f32 %v6714_v60  ;;  %v12221_v60 = vpack.c.bf16 %v10924_v59, %v10923_v58 }
0x30b6   : > { %12939 = vpow2.f32 %v10931_v30 }
0x30b8   : > { %v6718_v61 = vpop.permute.xlu0 %6717 }
0x30b9   : > { %11706 = vmatpush3.msra.mxu1 %v6718_v61  ;;  %v10925_v61 = vld [vmem:[%s16993_s8 + $0x70] sm:$0xff] }
0x30ba   : > { %12208 = vmatprep.subr.bf16.mxu1 %v14623_v0 }
0x30bf   : > { %v12938_v63 = vpop.eup %12937 }
0x30c0   : > { %v6716_v4 = vmul.f32 %v12938_v63, %v12936_v52  ;;  %v12940_v33 = vpop.eup %12939  ;;  %v10926_v63 = vld [vmem:[%s16993_s8 + $0x78] sm:$0xff]  ;;  %s16999_s8 = sld [smem:[#allocation154_spill]] }
0x30c1   : > { %v7120_v34 = vadd.f32 1.0, %v12940_v33 }
0x30c2   : > { %11708 = vmatmul.mubr.msk.f32.vlgmr.msra.gmra.mrb[42].mxu1 %vm3679_vm3, %v6716_v4  ;;  %v12224_v4 = vpack.c.bf16 %v10926_v63, %v10925_v61 }
0x30c3   : > { %11729 = vmatprep.mubr.msk.f32.mxu1 %vm14624_vm0, %v14625_v1  ;;  %12210 = vmatpush3.bf16.msra.mxu1 %v12209_v22  ;;  %v10927_v22 = vld [vmem:[#allocation5 + $0x1] ss:$0 sm:$0xff] }
0x30c4   : > { %12211 = vmatprep.subr.bf16.mxu1 %v14623_v0 }
0x30c7   : > { %12213 = vmatpush3.bf16.msra.mxu1 %v12212_v26 }
0x30c8   : > { %12227 = vmatprep.subr.bf16.mxu1 %v12226_v29 }
0x3195   : > { %v6789_v5 = vpop.f32.mrb[42].mxu1 }
0x3196   : > { %v11709_v6 = vpop.f32.mrb[43].mxu1  ;;  %11719 = vmatmul.mubr.msk.f32.vlgmr.msra.gmra.mrb[30].mxu0 %vm3309_vm1, %v6789_v5  ;;  %v10917_v5 = vld [vmem:[#allocation2 + $0x1] ss:$0 sm:$0xff] }
0x3197   : > { %11748 = vmatprep.mubr.msk.f32.mxu0 %vm14624_vm0, %v14625_v1  ;;  %12216 = vmatpush3.bf16.msra.mxu0 %v12215_v55 }
0x3198   : > { %12217 = vmatprep.subr.bf16.mxu0 %v14623_v0 }
0x3269   : > { %v6868_v8 = vpop.f32.mrb[30].mxu0 }
0x326a   : > { %v6869_v10 = vadd.f32 %v10909_v7, %v6868_v8  ;;  %v11720_v11 = vpop.f32.mrb[31].mxu0 }
0x326c   : > { %v6872_v12 = vadd.f32 %v6869_v10, %v6452_v37  ;;  %v7140_v10 = vsub.s32 1, %v15918_v62  ;;  %v10959_v62 = vld [vmem:[#allocation29] ss:$0 sm:$0xff] }
0x326e   : > { %v6877_v13 = vsel %vm3309_vm1, %v6872_v12, 0.0 }
0x326f   : > { %6878 = vadd.xlane.f32.xlu1 %v6877_v13 }
0x32fc   : > { %v6879_v15 = vpop.xlane.xlu1 %6878 }
0x32fd   : > { %v6880_v16 = vmul.f32 0.03125, %v6879_v15 }
0x32ff   : > { %v6881_v17 = vsub.f32 %v6872_v12, %v6880_v16  ;;  %v7132_v12 = vld [vmem:[#allocation26] sm:$0x3] }
0x3300   : > { %v7141_v13 = vrot.slane %v7132_v12, %v7140_v10  ;;  %v7137_v33 = vrot.slane %v7132_v12, %v15923_v3 }
0x3301   : > { %v6882_v19 = vmul.f32 %v6881_v17, %v6881_v17 }
0x3303   : > { %v6883_v18 = vsel %vm3309_vm1, %v6882_v19, 0.0 }
0x3304   : > { %6884 = vadd.xlane.f32.xlu0 %v6883_v18 }
0x3391   : > { %v6885_v31 = vpop.xlane.xlu0 %6884 }
0x3392   : > { %v6886_v51 = vmul.f32 0.03125, %v6885_v31 }
0x3394   : > { %v6887_v32 = vadd.f32 1e-05, %v6886_v51 }
0x3396   : > { %12941 = vrsqrt.f32 %v6887_v32 }
0x3397   : > { %12943 = vrcp.f32 %v7120_v34 }
0x33a0   : > { %v12942_v35 = vpop.eup %12941 }
0x33a1   : > { %v6889_v37 = vmul.f32 %v12942_v35, %v6881_v17  ;;  %v12944_v9 = vpop.eup %12943 }
0x33a2   : > { %v16282_v52 = vmul.f32 %v12944_v9, %v15920_v2  ;;  %v12218_v2 = vpack.c.bf16 %v10922_v57, %v10921_v56 }
0x33a3   : > { %v6896_v44 = vmul.f32 %v10911_v36, %v6889_v37  ;;  %v7233_v37 = vld [vmem:[%s16995_s1] sm:$0xff] }
0x33a4   : > { %12219 = vmatpush3.bf16.msra.mxu0 %v12218_v2  ;;  %v12235_v40 = vpack.c.bf16 %v7234_v38, %v7233_v37  ;;  %v10933_v2 = vld [vmem:[#allocation44] ss:$0 sm:$0xff] }
0x33a5   : > { %v6903_v47 = vadd.f32 %v10912_v41, %v6896_v44  ;;  %12220 = vmatprep.subr.bf16.mxu0 %v14623_v0  ;;  %v7235_v41 = vld [vmem:[%s16995_s1 + $0x10] sm:$0xff]  ;;  %v7591_v37 = vld [vmem:[%s16997_s5 + $0x18] sm:$0xff] }
0x33a6   : > { %v12238_v43 = vpack.c.bf16 %v7236_v42, %v7235_v41 }
0x33a7   : > { %11730 = vmatmul.mubr.msk.f32.vlgmr.msra.gmra.mrb[44].mxu1 %vm3309_vm1, %v6903_v47 }
0x33a8   : > { %12229 = vmatpush1.bf16.msra.mxu1 %v12228_v46  ;;  %7211 = vmatprep.mubr.f32.mxu1 %v14625_v1 }
0x33a9   : > { %12231 = vmatprep.subr.bf16.mxu1 %v12230_v48  ;;  %12222 = vmatpush3.bf16.msra.mxu0 %v12221_v60 }
0x33aa   : > { %12223 = vmatprep.subr.bf16.mxu0 %v14623_v0 }
0x33ac   : > { %12233 = vmatpush1.bf16.msra.mxu1 %v12232_v45  ;;  %v10930_v45 = vld [vmem:[#allocation13 + $0x1] ss:$0 sm:$0xff] }
0x33ad   : > { %12234 = vmatprep.subr.bf16.mxu1 %v14623_v0  ;;  %12225 = vmatpush3.bf16.msra.mxu0 %v12224_v4 }
0x33ae   : > { %11762 = vmatprep.subr.mxu0 %v14625_v1 }
0x33af   : > { %10932 = vmatmul.mubr.msk.f32.vlgmr.msra.gmra.mrb[46].mxu1 %vm3309_vm1, %v16282_v52 }
0x33b0   : > { %11759 = vmatprep.mubr.msk.f32.mxu1 %vm14624_vm0, %v14625_v1  ;;  %12236 = vmatpush3.bf16.msra.mxu1 %v12235_v40 }
0x33b1   : > { %12237 = vmatprep.subr.bf16.mxu1 %v14623_v0 }
0x33b4   : > { %12239 = vmatpush3.bf16.msra.mxu1 %v12238_v43 }
0x33b5   : > { %11767 = vmatprep.subr.mxu1 %v14625_v1 }
0x347a   : > { %v6986_v6 = vpop.f32.mrb[44].mxu1 }
0x347b   : > { %v6987_v7 = vadd.f32 %v10917_v5, %v6986_v6  ;;  %v11731_v8 = vpop.f32.mrb[45].mxu1 }
0x347d   : > { %v6991_v11 = vmul.f32 0.70710677, %v6987_v7  ;;  %v6990_v18 = vmul.f32 0.5, %v6987_v7 }
0x347f   : > { %12945 = verf.f32 %v6991_v11 }
0x3482   : > { %v7213_v15 = vpop.f32.mrb[46].mxu1 }
0x3483   : > { %v7215_v16 = vpop.f32.mrb[47].mxu1  ;;  %v7214_v34 = vadd.f32 %v7213_v15, %v7137_v33 }
0x3484   : > { %v16304_v17 = vadd.f32 %v7215_v16, %v7141_v13 }
0x3485   : > { %v7218_v35 = vadd.f32 1.0, %v7214_v34  ;;  %v16323_v55 = vrot.slane %v7214_v34, %v15923_v3 }
0x3486   : > { %v7577_v42 = vadd.f32 1.0, %v16304_v17 }
0x3487   : > { %v7222_v36 = vrot.slane %v7218_v35, %v15923_v3 }
0x3489   : > { %v12946_v19 = vpop.eup %12945 }
0x348a   : > { %v6993_v20 = vadd.f32 1.0, %v12946_v19  ;;  %v7238_v19 = vld [vmem:[%s16996_s2] sm:$0xff] }
0x348c   : > { %v6994_v21 = vmul.f32 %v6993_v20, %v6990_v18  ;;  %v7239_v18 = vld [vmem:[%s16996_s2 + $0x8] sm:$0xff]  ;;  %v7240_v20 = vld [vmem:[%s16996_s2 + $0x10] sm:$0xff] }
0x348e   : > { %11749 = vmatmul.mubr.msk.f32.vlgmr.msra.gmra.mrb[32].mxu0 %vm4343_vm4, %v6994_v21  ;;  %v12241_v21 = vpack.c.bf16 %v7239_v18, %v7238_v19 }
0x348f   : > { %11764 = vmatprep.mubr.msk.f32.mxu0 %vm14624_vm0, %v14625_v1 }
0x3561   : > { %v7081_v23 = vpop.f32.mrb[32].mxu0 }
0x3562   : > { %v7082_v24 = vadd.f32 %v10927_v22, %v7081_v23  ;;  %v11750_v25 = vpop.f32.mrb[33].mxu0  ;;  %v7241_v22 = vld [vmem:[%s16996_s2 + $0x18] sm:$0xff] }
0x3563   : > { %v12244_v23 = vpack.c.bf16 %v7241_v22, %v7240_v20  ;;  %v7768_v20 = vrot.slane %v16304_v17, %v15923_v3  ;;  %v7808_v17 = vld [vmem:[%s16999_s8] sm:$0xff] }
0x3564   : > { %v7085_v26 = vadd.f32 %v7082_v24, %v6903_v47 }
0x3566   : > { %v7090_v28 = vsel %vm3309_vm1, %v7085_v26, 0.0 }
0x3567   : > { %7091 = vadd.xlane.f32.xlu1 %v7090_v28 }
0x35f4   : > { %v7092_v29 = vpop.xlane.xlu1 %7091 }
0x35f5   : > { %v7093_v30 = vmul.f32 0.03125, %v7092_v29 }
0x35f7   : > { %v7094_v31 = vsub.f32 %v7085_v26, %v7093_v30  ;;  %v7588_v30 = vld [vmem:[%s16997_s5] sm:$0xff] }
0x35f9   : > { %v7095_v51 = vmul.f32 %v7094_v31, %v7094_v31 }
0x35fb   : > { %v7096_v32 = vsel %vm3309_vm1, %v7095_v51, 0.0 }
0x35fc   : > { %7097 = vadd.xlane.f32.xlu1 %v7096_v32  ;;  %v10938_v32 = vld [vmem:[#allocation43] ss:$0 sm:$0xff] }
0x360d   : > { %7224 = vrot.lane.b32.xlu1 %v7222_v36, %s16983_s23  ;;  %v7590_v36 = vld [vmem:[%s16997_s5 + $0x10] sm:$0xff] }
0x360e   : > { %v12250_v38 = vpack.c.bf16 %v7591_v37, %v7590_v36 }
0x3689   : > { %v7098_v44 = vpop.xlane.xlu1 %7097 }
0x368a   : > { %v7099_v46 = vmul.f32 0.03125, %v7098_v44 }
0x368c   : > { %v7100_v47 = vadd.f32 1e-05, %v7099_v46  ;;  %v7581_v46 = vrot.slane %v7577_v42, %v15923_v3 }
0x368d   : > { %v7225_v54 = vpop.permute.xlu1 %7224 }
0x368e   : > { %12947 = vrsqrt.f32 %v7100_v47 }
0x3698   : > { %v12948_v48 = vpop.eup %12947 }
0x3699   : > { %v7102_v50 = vmul.f32 %v12948_v48, %v7094_v31  ;;  %v7589_v31 = vld [vmem:[%s16997_s5 + $0x8] sm:$0xff] }
0x369a   : > { %v12247_v51 = vpack.c.bf16 %v7589_v31, %v7588_v30 }
0x369b   : > { %v7109_v9 = vmul.f32 %v10929_v49, %v7102_v50  ;;  %v7677_v50 = vld [vmem:[%s16998_s6] sm:$0xff] }
0x369d   : > { %v16320_v53 = vadd.f32 %v10930_v45, %v7109_v9  ;;  %v7678_v45 = vld [vmem:[%s16998_s6 + $0x8] sm:$0xff] }
0x369e   : > { %v12253_v9 = vpack.c.bf16 %v7678_v45, %v7677_v50 }
0x369f   : > { %v7227_v56 = vmul.f32 %v7225_v54, %v16320_v53  ;;  %v7679_v54 = vld [vmem:[%s16998_s6 + $0x10] sm:$0xff] }
0x36a1   : > { %v7232_v57 = vadd.f32 %v16323_v55, %v7227_v56 }
0x36a3   : > { %11760 = vmatmul.mubr.msk.f32.vlgmr.msra.gmra.mrb[48].mxu1 %vm3309_vm1, %v7232_v57  ;;  %v7681_v57 = vld [vmem:[%s16998_s6 + $0x20] sm:$0xff] }
0x36a4   : > { %11769 = vmatprep.mubr.msk.f32.mxu1 %vm14624_vm0, %v14625_v1 }
0x3776   : > { %v7318_v58 = vpop.f32.mrb[48].mxu1 }
0x3777   : > { %v7319_v59 = vadd.f32 %v10933_v2, %v7318_v58  ;;  %v11761_v60 = vpop.f32.mrb[49].mxu1  ;;  %v7682_v2 = vld [vmem:[%s16998_s6 + $0x28] sm:$0xff] }
0x3778   : > { %v12259_v58 = vpack.c.bf16 %v7682_v2, %v7681_v57  ;;  %v7684_v60 = vld [vmem:[%s16998_s6 + $0x38] sm:$0xff] }
0x3779   : > { %7324 = vrot.lane.b32.xlu1 %v7319_v59, %s16983_s23  ;;  %v7322_v63 = vmul.f32 0.17677669, %v7319_v59 }
0x37eb   : > { %v7325_v61 = vpop.permute.xlu1 %7324 }
0x37ec   : > { %11763 = vmatpush3.xpose.msk.msra.mxu0 %vm3309_vm1, %v7325_v61 }
0x37ed   : > { %12240 = vmatprep.subr.bf16.mxu0 %v14623_v0 }
0x37ef   : > { %11765 = vmatmul.mubr.msk.f32.vlgmr.msra.gmra.mrb[34].mxu0 %vm3309_vm1, %v7322_v63  ;;  %v10940_v63 = vld [vmem:[#allocation40] ss:$0 sm:$0xff] }
0x37f0   : > { %11780 = vmatprep.mubr.msk.f32.mxu0 %vm14624_vm0, %v14625_v1  ;;  %12242 = vmatpush3.bf16.msra.mxu0 %v12241_v21 }
0x37f1   : > { %12243 = vmatprep.subr.bf16.mxu0 %v14623_v0 }
0x37f4   : > { %12245 = vmatpush3.bf16.msra.mxu0 %v12244_v23 }
0x37f5   : > { %12252 = vmatprep.subr.bf16.mxu0 %v14623_v0 }
0x38c2   : > { %v7397_v4 = vpop.f32.mrb[34].mxu0 }
0x38c3   : > { %v7398_v5 = vadd.f32 %v7397_v4, %v16090_v27  ;;  %v11766_v6 = vpop.f32.mrb[35].mxu0 }
0x38c5   : > { %v7401_v7 = vsel %vm3679_vm3, %v7398_v5, -inf }
0x38c6   : > { %7402 = vmax.xlane.f32.xlu0 %v7401_v7 }
0x38dc   : > { %7412 = vrot.lane.b32.xlu0 %v7319_v59, %s16984_s4  ;;  %v7683_v59 = vld [vmem:[%s16998_s6 + $0x30] sm:$0xff] }
0x38dd   : > { %v12262_v61 = vpack.c.bf16 %v7684_v60, %v7683_v59 }
0x3953   : > { %v7403_v8 = vpop.xlane.xlu0 %7402 }
0x3954   : > { %v7404_v11 = vsub.f32 %v7398_v5, %v7403_v8 }
0x3956   : > { %v7405_v12 = vmul.f32 1.442695, %v7404_v11 }
0x3957   : > { %v7413_v13 = vpop.permute.xlu0 %7412 }
0x3958   : > { %12949 = vpow2.f32 %v7405_v12  ;;  %11768 = vmatpush3.msra.mxu1 %v7413_v13 }
0x3959   : > { %12246 = vmatprep.subr.bf16.mxu1 %v14623_v0 }
0x3962   : > { %v12950_v15 = vpop.eup %12949 }
0x3963   : > { %v7407_v16 = vsel %vm3679_vm3, %v12950_v15, 0.0 }
0x3964   : > { %7408 = vadd.xlane.f32.xlu1 %v7407_v16 }
0x39f1   : > { %v7409_v24 = vpop.xlane.xlu1 %7408 }
0x39f2   : > { %12951 = vrcp.f32 %v7409_v24 }
0x39fc   : > { %v12952_v25 = vpop.eup %12951 }
0x39fd   : > { %v7411_v26 = vmul.f32 %v12952_v25, %v12950_v15  ;;  %v10942_v15 = vld [vmem:[#allocation41] ss:$0 sm:$0xff] }
0x39ff   : > { %11770 = vmatmul.mubr.msk.f32.vlgmr.msra.gmra.mrb[50].mxu1 %vm3679_vm3, %v7411_v26 }
0x3a00   : > { %11791 = vmatprep.mubr.msk.f32.mxu1 %vm14624_vm0, %v14625_v1  ;;  %12248 = vmatpush3.bf16.msra.mxu1 %v12247_v51  ;;  %v7809_v51 = vld [vmem:[%s16999_s8 + $0x8] sm:$0xff] }
0x3a01   : > { %12249 = vmatprep.subr.bf16.mxu1 %v14623_v0 }
0x3a04   : > { %12251 = vmatpush3.bf16.msra.mxu1 %v12250_v38 }
0x3a05   : > { %12264 = vmatprep.subr.bf16.mxu1 %v14623_v0 }
0x3ad2   : > { %v7484_v28 = vpop.f32.mrb[50].mxu1 }
0x3ad3   : > { %v11771_v29 = vpop.f32.mrb[51].mxu1  ;;  %11781 = vmatmul.mubr.msk.f32.vlgmr.msra.gmra.mrb[36].mxu0 %vm3309_vm1, %v7484_v28 }
0x3ad4   : > { %11810 = vmatprep.mubr.msk.f32.mxu0 %vm14624_vm0, %v14625_v1  ;;  %12254 = vmatpush3.bf16.msra.mxu0 %v12253_v9 }
0x3ad5   : > { %12255 = vmatprep.subr.bf16.mxu0 %v14623_v0 }
0x3ba6   : > { %v7563_v33 = vpop.f32.mrb[36].mxu0 }
0x3ba7   : > { %v7564_v34 = vadd.f32 %v10938_v32, %v7563_v33  ;;  %v11782_v35 = vpop.f32.mrb[37].mxu0  ;;  %v12265_v32 = vpack.c.bf16 %v7809_v51, %v7808_v17  ;;  %v7810_v33 = vld [vmem:[%s16999_s8 + $0x10] sm:$0xff] }
0x3ba9   : > { %7568 = vrot.lane.b32.xlu0 %v7564_v34, %s16984_s4 }
0x3c1b   : > { %v7569_v40 = vpop.permute.xlu0 %7568 }
0x3c1c   : > { %v7571_v41 = vmul.f32 %v7569_v40, %v16323_v55  ;;  %v10944_v40 = vld [vmem:[#allocation32] ss:$0 sm:$0xff] }
0x3c1e   : > { %7573 = vrot.lane.b32.xlu0 %v7571_v41, %s16984_s4 }
0x3c22   : > { %7584 = vrot.lane.b32.xlu0 %v16323_v55, %s16817_s7  ;;  %v7680_v55 = vld [vmem:[%s16998_s6 + $0x18] sm:$0xff] }
0x3c23   : > { %v12256_v56 = vpack.c.bf16 %v7680_v55, %v7679_v54  ;;  %v10946_v55 = vld [vmem:[#allocation49] ss:$0 sm:$0xff] }
0x3c25   : > { %12257 = vmatpush3.bf16.msra.mxu0 %v12256_v56  ;;  %v10948_v56 = vld [vmem:[#allocation46] ss:$0 sm:$0xff] }
0x3c26   : > { %12258 = vmatprep.subr.bf16.mxu0 %v14623_v0 }
0x3c29   : > { %12260 = vmatpush3.bf16.msra.mxu0 %v12259_v58 }
0x3c2a   : > { %12261 = vmatprep.subr.bf16.mxu0 %v14623_v0 }
0x3c2d   : > { %12263 = vmatpush3.bf16.msra.mxu0 %v12262_v61 }
0x3c2e   : > { %11835 = vmatprep.subr.mxu0 %v14625_v1 }
0x3c90   : > { %v7574_v43 = vpop.permute.xlu0 %7573 }
0x3c91   : > { %v7576_v44 = vadd.f32 %v7574_v43, %v16320_v53 }
0x3c93   : > { %v7582_v47 = vmul.f32 %v7581_v46, %v7576_v44  ;;  %v10945_v44 = vld [vmem:[#allocation31] ss:$0 sm:$0xff] }
0x3c94   : > { %v7585_v48 = vpop.permute.xlu0 %7584 }
0x3c95   : > { %v7587_v49 = vadd.f32 %v7585_v48, %v7582_v47 }
0x3c97   : > { %11792 = vmatmul.mubr.msk.f32.vlgmr.msra.gmra.mrb[52].mxu1 %vm3309_vm1, %v7587_v49 }
0x3c98   : > { %11821 = vmatprep.mubr.msk.f32.mxu1 %vm14624_vm0, %v14625_v1  ;;  %12266 = vmatpush3.bf16.msra.mxu1 %v12265_v32 }
0x3c99   : > { %12267 = vmatprep.subr.bf16.mxu1 %v14623_v0 }
0x3d6a   : > { %v7668_v4 = vpop.f32.mrb[52].mxu1 }
0x3d6b   : > { %v7669_v5 = vadd.f32 %v10940_v63, %v7668_v4  ;;  %v11793_v6 = vpop.f32.mrb[53].mxu1 }
0x3d6d   : > { %v7673_v7 = vmul.f32 0.70710677, %v7669_v5  ;;  %v7672_v11 = vmul.f32 0.5, %v7669_v5 }
0x3d6f   : > { %12953 = verf.f32 %v7673_v7 }
0x3d79   : > { %v12954_v8 = vpop.eup %12953 }
0x3d7a   : > { %v7675_v12 = vadd.f32 1.0, %v12954_v8 }
0x3d7c   : > { %v7676_v13 = vmul.f32 %v7675_v12, %v7672_v11 }
0x3d7e   : > { %11811 = vmatmul.mubr.msk.f32.vlgmr.msra.gmra.mrb[38].mxu0 %vm4343_vm4, %v7676_v13  ;;  %v7818_v13 = vld [vmem:[%s17001_s9] sm:$0xff] }
0x3d7f   : > { %11837 = vmatprep.mubr.msk.f32.mxu0 %vm14624_vm0, %v14625_v1 }
0x3e51   : > { %v7761_v16 = vpop.f32.mrb[38].mxu0 }
0x3e52   : > { %v7762_v19 = vadd.f32 %v10942_v15, %v7761_v16  ;;  %v11812_v18 = vpop.f32.mrb[39].mxu0  ;;  %v7819_v15 = vld [vmem:[%s17001_s9 + $0x8] sm:$0xff]  ;;  %v7820_v16 = vld [vmem:[%s17001_s9 + $0x10] sm:$0xff] }
0x3e53   : > { %v7821_v18 = vld [vmem:[%s17001_s9 + $0x18] sm:$0xff] }
0x3e54   : > { %7770 = vrot.lane.b32.xlu1 %v7762_v19, %s16817_s7  ;;  %s17000_s7 = sld [smem:[#allocation150_spill]]  ;;  %v12277_v19 = vpack.c.bf16 %v7819_v15, %v7818_v13  ;;  %v8344_v15 = vld [vmem:[%s17003_s11 + $0x20] sm:$0xff] }
0x3e5a   : > { %v7813_v42 = vld [vmem:[%s17000_s7] sm:$0xff]  ;;  %v7814_v43 = vld [vmem:[%s17000_s7 + $0x8] sm:$0xff]  ;;  %v7815_v49 = vld [vmem:[%s17000_s7 + $0x10] sm:$0xff] }
0x3e5b   : > { %v12271_v47 = vpack.c.bf16 %v7814_v43, %v7813_v42  ;;  %v7816_v50 = vld [vmem:[%s17000_s7 + $0x18] sm:$0xff]  ;;  %v10964_v43 = vld [vmem:[%s16994_s0 + $0x48] sm:$0xff] }
0x3e5c   : > { %v12274_v45 = vpack.c.bf16 %v7816_v50, %v7815_v49 }
0x3ec6   : > { %v7771_v21 = vpop.permute.xlu1 %7770 }
0x3ec7   : > { %v7773_v22 = vmul.f32 %v7771_v21, %v7768_v20  ;;  %v12280_v20 = vpack.c.bf16 %v7821_v18, %v7820_v16  ;;  %v8345_v16 = vld [vmem:[%s17003_s11 + $0x28] sm:$0xff]  ;;  %v8347_v18 = vld [vmem:[%s17003_s11 + $0x38] sm:$0xff] }
0x3ec9   : > { %7775 = vrot.lane.b32.xlu0 %v7773_v22, %s16983_s23 }
0x3f3b   : > { %v7776_v23 = vpop.permute.xlu0 %7775 }
0x3f3c   : > { %v7778_v24 = vadd.f32 %v7776_v23, %v16320_v53  ;;  %v7811_v53 = vld [vmem:[%s16999_s8 + $0x18] sm:$0xff] }
0x3f3d   : > { %v12268_v34 = vpack.c.bf16 %v7811_v53, %v7810_v33 }
0x3f3e   : > { %v7781_v25 = vsel %vm3309_vm1, %v7778_v24, 0.0 }
0x3f3f   : > { %7782 = vadd.xlane.f32.xlu0 %v7781_v25  ;;  %12269 = vmatpush3.bf16.msra.mxu1 %v12268_v34 }
0x3f40   : > { %12270 = vmatprep.subr.bf16.mxu1 %v14623_v0 }
0x3fcc   : > { %v7783_v26 = vpop.xlane.xlu0 %7782 }
0x3fcd   : > { %v7784_v28 = vmul.f32 0.03125, %v7783_v26 }
0x3fcf   : > { %v7785_v29 = vsub.f32 %v7778_v24, %v7784_v28  ;;  %v10953_v28 = vld [vmem:[#allocation47] ss:$0 sm:$0xff] }
0x3fd1   : > { %v7786_v30 = vmul.f32 %v7785_v29, %v7785_v29 }
0x3fd3   : > { %v7787_v31 = vsel %vm3309_vm1, %v7786_v30, 0.0 }
0x3fd4   : > { %7788 = vadd.xlane.f32.xlu1 %v7787_v31 }
0x4061   : > { %v7789_v35 = vpop.xlane.xlu1 %7788 }
0x4062   : > { %v7790_v36 = vmul.f32 0.03125, %v7789_v35 }
0x4064   : > { %v7791_v37 = vadd.f32 1e-05, %v7790_v36  ;;  %v8251_v36 = vld [vmem:[%s17002_s10] sm:$0xff] }
0x4066   : > { %12955 = vrsqrt.f32 %v7791_v37  ;;  %v8252_v37 = vld [vmem:[%s17002_s10 + $0x8] sm:$0xff] }
0x4070   : > { %v12956_v38 = vpop.eup %12955 }
0x4071   : > { %v7793_v41 = vmul.f32 %v12956_v38, %v7785_v29  ;;  %v12283_v38 = vpack.c.bf16 %v8252_v37, %v8251_v36 }
0x4073   : > { %v7800_v46 = vmul.f32 %v10944_v40, %v7793_v41  ;;  %v8253_v40 = vld [vmem:[%s17002_s10 + $0x10] sm:$0xff]  ;;  %v8254_v41 = vld [vmem:[%s17002_s10 + $0x18] sm:$0xff] }
0x4074   : > { %v12286_v42 = vpack.c.bf16 %v8254_v41, %v8253_v40 }
0x4075   : > { %v16400_v48 = vadd.f32 %v10945_v44, %v7800_v46  ;;  %v10966_v44 = vld [vmem:[%s16994_s0 + $0x58] sm:$0xff] }
0x4076   : > { %v12300_v46 = vpack.c.bf16 %v10966_v44, %v10964_v43 }
0x4077   : > { %11822 = vmatmul.mubr.msk.f32.vlgmr.msra.gmra.mrb[54].mxu1 %vm3309_vm1, %v16400_v48 }
0x4078   : > { %12272 = vmatpush3.bf16.msra.mxu1 %v12271_v47  ;;  %11832 = vmatprep.mubr.msk.f32.mxu1 %vm14624_vm0, %v14625_v1 }
0x4079   : > { %12273 = vmatprep.subr.bf16.mxu1 %v14623_v0 }
0x407c   : > { %12275 = vmatpush3.bf16.msra.mxu1 %v12274_v45  ;;  %v10955_v45 = vld [vmem:[#allocation35] ss:$0 sm:$0xff] }
0x407d   : > { %11840 = vmatprep.subr.mxu1 %v14625_v1 }
0x407f   : > { %11833 = vmatmul.mubr.msk.f32.vlgmr.msra.gmra.mrb[56].mxu1 %vm3309_vm1, %v16115_v14 }
0x4080   : > { %11842 = vmatprep.mubr.msk.f32.mxu1 %vm14624_vm0, %v14625_v1 }
0x414a   : > { %v7898_v9 = vpop.f32.mrb[54].mxu1 }
0x414b   : > { %v11823_v54 = vpop.f32.mrb[55].mxu1  ;;  %v7899_v57 = vadd.f32 %v10946_v55, %v7898_v9  ;;  %v10965_v55 = vld [vmem:[%s16994_s0 + $0x50] sm:$0xff] }
0x414c   : > { %v10963_v54 = vld [vmem:[%s16994_s0 + $0x40] sm:$0xff] }
0x414d   : > { %v7978_v60 = vmul.f32 0.17677669, %v7899_v57  ;;  %v10968_v57 = vld [vmem:[%s16994_s0 + $0x68] sm:$0xff] }
0x4152   : > { %v7974_v2 = vpop.f32.mrb[56].mxu1 }
0x4153   : > { %v7975_v58 = vadd.f32 %v10948_v56, %v7974_v2  ;;  %v11834_v59 = vpop.f32.mrb[57].mxu1  ;;  %v10956_v56 = vld [vmem:[#allocation34] ss:$0 sm:$0xff]  ;;  %v10970_v2 = vld [vmem:[%s16994_s0 + $0x78] sm:$0xff] }
0x4154   : > { %v12302_v59 = vpack.c.bf16 %v10965_v55, %v10963_v54 }
0x4155   : > { %11836 = vmatpush3.xpose.msk.msra.mxu0 %vm3309_vm1, %v7975_v58 }
0x4156   : > { %12276 = vmatprep.subr.bf16.mxu0 %v14623_v0 }
0x4158   : > { %11838 = vmatmul.mubr.msk.f32.vlgmr.msra.gmra.mrb[40].mxu0 %vm3309_vm1, %v7978_v60 }
0x4159   : > { %11853 = vmatprep.mubr.msk.f32.mxu0 %vm14624_vm0, %v14625_v1  ;;  %12278 = vmatpush3.bf16.msra.mxu0 %v12277_v19  ;;  %v8346_v19 = vld [vmem:[%s17003_s11 + $0x30] sm:$0xff] }
0x415a   : > { %12279 = vmatprep.subr.bf16.mxu0 %v14623_v0 }
0x415d   : > { %12281 = vmatpush3.bf16.msra.mxu0 %v12280_v20  ;;  %v12298_v20 = vpack.c.bf16 %v8347_v18, %v8346_v19 }
0x415e   : > { %12288 = vmatprep.subr.bf16.mxu0 %v14623_v0 }
0x422b   : > { %v8051_v61 = vpop.f32.mrb[40].mxu0 }
0x422c   : > { %v8052_v63 = vadd.f32 %v8051_v61, %v15948_v39  ;;  %v11839_v4 = vpop.f32.mrb[41].mxu0  ;;  %v12304_v61 = vpack.c.bf16 %v10970_v2, %v10968_v57 }
0x422d   : > { %v10969_v4 = vld [vmem:[%s16994_s0 + $0x70] sm:$0xff] }
0x422e   : > { %v8055_v5 = vsel %vm3679_vm3, %v8052_v63, -inf }
0x422f   : > { %8056 = vmax.xlane.f32.xlu0 %v8055_v5 }
0x42bc   : > { %v8057_v6 = vpop.xlane.xlu0 %8056 }
0x42bd   : > { %v8058_v7 = vsub.f32 %v8052_v63, %v8057_v6  ;;  %v10967_v63 = vld [vmem:[%s16994_s0 + $0x60] sm:$0xff]  ;;  %s17004_s0 = smov 32  }
0x42be   : > { %v12306_v5 = vpack.c.bf16 %v10969_v4, %v10967_v63  ;;  %v8340_v6 = vld [vmem:[%s17003_s11] sm:$0xff] }
0x42bf   : > { %v8059_v8 = vmul.f32 1.442695, %v8058_v7  ;;  %v8341_v7 = vld [vmem:[%s17003_s11 + $0x8] sm:$0xff] }
0x42c1   : > { %12957 = vpow2.f32 %v8059_v8  ;;  %v12289_v8 = vpack.c.bf16 %v8341_v7, %v8340_v6 }
0x42cb   : > { %v12958_v11 = vpop.eup %12957 }
0x42cc   : > { %v8061_v12 = vsel %vm3679_vm3, %v12958_v11, 0.0 }
0x42cd   : > { %8062 = vadd.xlane.f32.xlu0 %v8061_v12  ;;  %v8343_v12 = vld [vmem:[%s17003_s11 + $0x18] sm:$0xff] }
0x42e3   : > { %8066 = vrot.lane.b32.xlu0 %v7975_v58, %s16983_s23 }
0x435a   : > { %v8063_v21 = vpop.xlane.xlu0 %8062 }
0x435b   : > { %12959 = vrcp.f32 %v8063_v21  ;;  %v10957_v21 = vld [vmem:[#allocation28] ss:$0 sm:$0xff] }
0x435e   : > { %v8067_v22 = vpop.permute.xlu0 %8066 }
0x435f   : > { %11841 = vmatpush3.msra.mxu1 %v8067_v22 }
0x4360   : > { %12282 = vmatprep.subr.bf16.mxu1 %v14623_v0 }
0x4365   : > { %v12960_v23 = vpop.eup %12959 }
0x4366   : > { %v8065_v24 = vmul.f32 %v12960_v23, %v12958_v11  ;;  %v8342_v11 = vld [vmem:[%s17003_s11 + $0x10] sm:$0xff] }
0x4367   : > { %v12292_v13 = vpack.c.bf16 %v8343_v12, %v8342_v11 }
0x4368   : > { %11843 = vmatmul.mubr.msk.f32.vlgmr.msra.gmra.mrb[58].mxu1 %vm3679_vm3, %v8065_v24 }
0x4369   : > { %11864 = vmatprep.mubr.msk.f32.mxu1 %vm14624_vm0, %v14625_v1  ;;  %12284 = vmatpush3.bf16.msra.mxu1 %v12283_v38 }
0x436a   : > { %12285 = vmatprep.subr.bf16.mxu1 %v14623_v0 }
0x436d   : > { %12287 = vmatpush3.bf16.msra.mxu1 %v12286_v42 }
0x436e   : > { %12301 = vmatprep.subr.bf16.mxu1 %v12300_v46 }
0x443b   : > { %v8138_v25 = vpop.f32.mrb[58].mxu1 }
0x443c   : > { %v11844_v26 = vpop.f32.mrb[59].mxu1  ;;  %11854 = vmatmul.mubr.msk.f32.vlgmr.msra.gmra.mrb[42].mxu0 %vm3309_vm1, %v8138_v25  ;;  %v8468_v25 = vld [vmem:[#allocation26 + $0x2] sm:$0x3] }
0x443d   : > { %11883 = vmatprep.mubr.msk.f32.mxu0 %vm14624_vm0, %v14625_v1  ;;  %12290 = vmatpush3.bf16.msra.mxu0 %v12289_v8  ;;  %v10980_v8 = vld [vmem:[#allocation44 + $0x1] ss:$0 sm:$0xff] }
0x443e   : > { %12291 = vmatprep.subr.bf16.mxu0 %v14623_v0 }
0x4441   : > { %12293 = vmatpush3.bf16.msra.mxu0 %v12292_v13 }
0x4442   : > { %12294 = vmatprep.subr.bf16.mxu0 %v14623_v0 }
0x450f   : > { %v8217_v29 = vpop.f32.mrb[42].mxu0 }
0x4510   : > { %v8218_v30 = vadd.f32 %v10953_v28, %v8217_v29  ;;  %v11855_v31 = vpop.f32.mrb[43].mxu0  ;;  %v8473_v28 = vrot.slane %v8468_v25, %v15923_v3  ;;  %v8477_v29 = vrot.slane %v8468_v25, %v7140_v10 }
0x4512   : > { %v8221_v17 = vadd.f32 %v8218_v30, %v16400_v48 }
0x4514   : > { %v8224_v51 = vsel %vm3309_vm1, %v8221_v17, 0.0 }
0x4515   : > { %8225 = vadd.xlane.f32.xlu1 %v8224_v51 }
0x45a2   : > { %v8226_v32 = vpop.xlane.xlu1 %8225 }
0x45a3   : > { %v8227_v33 = vmul.f32 0.03125, %v8226_v32 }
0x45a5   : > { %v8228_v53 = vsub.f32 %v8221_v17, %v8227_v33 }
0x45a7   : > { %v8229_v34 = vmul.f32 %v8228_v53, %v8228_v53 }
0x45a9   : > { %v8230_v35 = vsel %vm3309_vm1, %v8229_v34, 0.0 }
0x45aa   : > { %8231 = vadd.xlane.f32.xlu1 %v8230_v35 }
0x4637   : > { %v8232_v47 = vpop.xlane.xlu1 %8231 }
0x4638   : > { %v8233_v48 = vmul.f32 0.03125, %v8232_v47 }
0x463a   : > { %v8234_v49 = vadd.f32 1e-05, %v8233_v48  ;;  %v10972_v48 = vld [vmem:[%s16995_s1 + $0x20] sm:$0xff] }
0x463c   : > { %12961 = vrsqrt.f32 %v8234_v49  ;;  %v10973_v49 = vld [vmem:[%s16995_s1 + $0x28] sm:$0xff] }
0x4646   : > { %v12962_v50 = vpop.eup %12961 }
0x4647   : > { %v8236_v9 = vmul.f32 %v12962_v50, %v8228_v53  ;;  %v12309_v50 = vpack.c.bf16 %v10973_v49, %v10972_v48 }
0x4649   : > { %v8243_v58 = vmul.f32 %v10955_v45, %v8236_v9  ;;  %v10974_v45 = vld [vmem:[%s16995_s1 + $0x30] sm:$0xff]  ;;  %v10975_v9 = vld [vmem:[%s16995_s1 + $0x38] sm:$0xff] }
0x464a   : > { %v12312_v54 = vpack.c.bf16 %v10975_v9, %v10974_v45 }
0x464b   : > { %v8250_v60 = vadd.f32 %v10956_v56, %v8243_v58  ;;  %v10961_v58 = vld [vmem:[#allocation38] ss:$0 sm:$0xff] }
0x464d   : > { %11865 = vmatmul.mubr.msk.f32.vlgmr.msra.gmra.mrb[60].mxu1 %vm3309_vm1, %v8250_v60 }
0x464e   : > { %12303 = vmatpush1.bf16.msra.mxu1 %v12302_v59  ;;  %8544 = vmatprep.mubr.f32.mxu1 %v14625_v1 }
0x464f   : > { %12305 = vmatprep.subr.bf16.mxu1 %v12304_v61 }
0x4652   : > { %12307 = vmatpush1.bf16.msra.mxu1 %v12306_v5 }
0x4653   : > { %12308 = vmatprep.subr.bf16.mxu1 %v14623_v0 }
0x4655   : > { %10971 = vmatmul.mubr.msk.f32.vlgmr.msra.gmra.mrb[62].mxu1 %vm3309_vm1, %v16282_v52  ;;  %v12295_v52 = vpack.c.bf16 %v8345_v16, %v8344_v15 }
0x4656   : > { %11894 = vmatprep.mubr.msk.f32.mxu1 %vm14624_vm0, %v14625_v1  ;;  %12310 = vmatpush3.bf16.msra.mxu1 %v12309_v50 }
0x4657   : > { %12296 = vmatpush3.bf16.msra.mxu0 %v12295_v52  ;;  %12311 = vmatprep.subr.bf16.mxu1 %v14623_v0 }
0x4658   : > { %12297 = vmatprep.subr.bf16.mxu0 %v14623_v0 }
0x465a   : > { %12313 = vmatpush3.bf16.msra.mxu1 %v12312_v54 }
0x465b   : > { %12299 = vmatpush3.bf16.msra.mxu0 %v12298_v20  ;;  %11902 = vmatprep.subr.mxu1 %v14625_v1 }
0x465c   : > { %11897 = vmatprep.subr.mxu0 %v14625_v1 }
0x4720   : > { %v8331_v22 = vpop.f32.mrb[60].mxu1 }
0x4721   : > { %v8332_v23 = vadd.f32 %v10957_v21, %v8331_v22  ;;  %v11866_v24 = vpop.f32.mrb[61].mxu1 }
0x4723   : > { %v8336_v26 = vmul.f32 0.70710677, %v8332_v23  ;;  %v8335_v34 = vmul.f32 0.5, %v8332_v23 }
0x4725   : > { %12963 = verf.f32 %v8336_v26  ;;  %v10976_v26 = vld [vmem:[%s16996_s2 + $0x20] sm:$0xff] }
0x4728   : > { %v8546_v30 = vpop.f32.mrb[62].mxu1 }
0x4729   : > { %v8547_v31 = vadd.f32 %v8546_v30, %v8473_v28  ;;  %v8548_v17 = vpop.f32.mrb[63].mxu1  ;;  %v10977_v28 = vld [vmem:[%s16996_s2 + $0x28] sm:$0xff] }
0x472a   : > { %v16474_v51 = vadd.f32 %v8548_v17, %v8477_v29  ;;  %v10978_v29 = vld [vmem:[%s16996_s2 + $0x30] sm:$0xff]  ;;  %v12315_v30 = vpack.c.bf16 %v10977_v28, %v10976_v26 }
0x472b   : > { %v8551_v32 = vadd.f32 1.0, %v8547_v31  ;;  %v16492_v5 = vrot.slane %v8547_v31, %v15923_v3  ;;  %v10979_v31 = vld [vmem:[%s16996_s2 + $0x38] sm:$0xff]  ;;  %s11051_s2 = sshll.u32 %s15096_s28, 7  ;;  %s14629_s28 = smov [#allocation80]  }
0x472c   : > { %v12318_v17 = vpack.c.bf16 %v10979_v31, %v10978_v29  ;;  %v8914_v48 = vadd.f32 1.0, %v16474_v51 }
0x472d   : > { %v8555_v33 = vrot.slane %v8551_v32, %v15923_v3 }
0x472e   : > { %v8918_v45 = vrot.slane %v8914_v48, %v15923_v3 }
0x472f   : > { %v12964_v53 = vpop.eup %12963  ;;  %8557 = vrot.lane.b32.xlu0 %v8555_v33, %s16983_s23 }
0x4730   : > { %v8338_v35 = vadd.f32 1.0, %v12964_v53 }
0x4732   : > { %v8339_v36 = vmul.f32 %v8338_v35, %v8335_v34 }
0x4734   : > { %11884 = vmatmul.mubr.msk.f32.vlgmr.msra.gmra.mrb[44].mxu0 %vm4343_vm4, %v8339_v36  ;;  %v10987_v36 = vld [vmem:[%s16997_s5 + $0x20] sm:$0xff] }
0x4735   : > { %11899 = vmatprep.mubr.msk.f32.mxu0 %vm14624_vm0, %v14625_v1 }
0x47a1   : > { %v8558_v4 = vpop.permute.xlu0 %8557 }
0x4807   : > { %v8424_v10 = vpop.f32.mrb[44].mxu0 }
0x4808   : > { %v8425_v37 = vadd.f32 %v10959_v62, %v8424_v10  ;;  %v11885_v38 = vpop.f32.mrb[45].mxu0  ;;  %v10988_v62 = vld [vmem:[%s16997_s5 + $0x28] sm:$0xff] }
0x4809   : > { %v12321_v10 = vpack.c.bf16 %v10988_v62, %v10987_v36 }
0x480a   : > { %v8428_v40 = vadd.f32 %v8425_v37, %v8250_v60  ;;  %v10962_v60 = vld [vmem:[#allocation37] ss:$0 sm:$0xff]  ;;  %v10985_v37 = vld [vmem:[#allocation43 + $0x1] ss:$0 sm:$0xff] }
0x480c   : > { %v8431_v41 = vsel %vm3309_vm1, %v8428_v40, 0.0 }
0x480d   : > { %8432 = vadd.xlane.f32.xlu1 %v8431_v41 }
0x489a   : > { %v8433_v42 = vpop.xlane.xlu1 %8432 }
0x489b   : > { %v8434_v43 = vmul.f32 0.03125, %v8433_v42  ;;  %v10989_v42 = vld [vmem:[%s16997_s5 + $0x30] sm:$0xff] }
0x489d   : > { %v8435_v44 = vsub.f32 %v8428_v40, %v8434_v43  ;;  %v10990_v43 = vld [vmem:[%s16997_s5 + $0x38] sm:$0xff]  ;;  %s16649_s5 = scalar_lea.hbm %s15073_s3, %s11051_s2 }
0x489f   : > { %v8436_v46 = vmul.f32 %v8435_v44, %v8435_v44 }
0x48a1   : > { %v8437_v47 = vsel %vm3309_vm1, %v8436_v46, 0.0 }
0x48a2   : > { %8438 = vadd.xlane.f32.xlu1 %v8437_v47 }
0x492f   : > { %v8439_v55 = vpop.xlane.xlu1 %8438 }
0x4930   : > { %v8440_v56 = vmul.f32 0.03125, %v8439_v55 }
0x4932   : > { %v8441_v57 = vadd.f32 1e-05, %v8440_v56  ;;  %v10993_v56 = vld [vmem:[%s16998_s6 + $0x40] sm:$0xff] }
0x4934   : > { %12965 = vrsqrt.f32 %v8441_v57  ;;  %v10994_v57 = vld [vmem:[%s16998_s6 + $0x48] sm:$0xff] }
0x493e   : > { %v12966_v2 = vpop.eup %12965 }
0x493f   : > { %v8443_v59 = vmul.f32 %v12966_v2, %v8435_v44  ;;  %v12324_v44 = vpack.c.bf16 %v10990_v43, %v10989_v42  ;;  %v12327_v2 = vpack.c.bf16 %v10994_v57, %v10993_v56  ;;  %v11009_v42 = vld [vmem:[%s17000_s7 + $0x20] sm:$0xff]  ;;  %v11010_v43 = vld [vmem:[%s17000_s7 + $0x28] sm:$0xff]  ;;  %v11019_v56 = vld [vmem:[#allocation46 + $0x1] ss:$0 sm:$0xff] }
0x4941   : > { %v8450_v61 = vmul.f32 %v10961_v58, %v8443_v59  ;;  %v10995_v58 = vld [vmem:[%s16998_s6 + $0x50] sm:$0xff]  ;;  %v10996_v59 = vld [vmem:[%s16998_s6 + $0x58] sm:$0xff] }
0x4943   : > { %v16489_v63 = vadd.f32 %v10962_v60, %v8450_v61  ;;  %v12330_v60 = vpack.c.bf16 %v10996_v59, %v10995_v58  ;;  %v10997_v61 = vld [vmem:[%s16998_s6 + $0x60] sm:$0xff] }
0x4945   : > { %v8560_v6 = vmul.f32 %v8558_v4, %v16489_v63  ;;  %v10998_v4 = vld [vmem:[%s16998_s6 + $0x68] sm:$0xff] }
0x4947   : > { %v8565_v7 = vadd.f32 %v16492_v5, %v8560_v6  ;;  %v10999_v6 = vld [vmem:[%s16998_s6 + $0x70] sm:$0xff] }
0x4949   : > { %11895 = vmatmul.mubr.msk.f32.vlgmr.msra.gmra.mrb[64].mxu1 %vm3309_vm1, %v8565_v7  ;;  %v11000_v7 = vld [vmem:[%s16998_s6 + $0x78] sm:$0xff] }
0x494a   : > { %11904 = vmatprep.mubr.msk.f32.mxu1 %vm14624_vm0, %v14625_v1 }
0x4a1c   : > { %v8655_v11 = vpop.f32.mrb[64].mxu1 }
0x4a1d   : > { %v8656_v12 = vadd.f32 %v10980_v8, %v8655_v11  ;;  %v11896_v13 = vpop.f32.mrb[65].mxu1  ;;  %v12336_v8 = vpack.c.bf16 %v11000_v7, %v10999_v6  ;;  %v10991_v11 = vld [vmem:[#allocation40 + $0x1] ss:$0 sm:$0xff] }
0x4a1f   : > { %8661 = vrot.lane.b32.xlu1 %v8656_v12, %s16983_s23  ;;  %v8659_v16 = vmul.f32 0.17677669, %v8656_v12 }
0x4a91   : > { %v8662_v15 = vpop.permute.xlu1 %8661 }
0x4a92   : > { %11898 = vmatpush3.xpose.msk.msra.mxu0 %vm3309_vm1, %v8662_v15 }
0x4a93   : > { %12314 = vmatprep.subr.bf16.mxu0 %v14623_v0 }
0x4a95   : > { %11900 = vmatmul.mubr.msk.f32.vlgmr.msra.gmra.mrb[46].mxu0 %vm3309_vm1, %v8659_v16 }
0x4a96   : > { %11915 = vmatprep.mubr.msk.f32.mxu0 %vm14624_vm0, %v14625_v1  ;;  %12316 = vmatpush3.bf16.msra.mxu0 %v12315_v30 }
0x4a97   : > { %12317 = vmatprep.subr.bf16.mxu0 %v14623_v0 }
0x4a9a   : > { %12319 = vmatpush3.bf16.msra.mxu0 %v12318_v17 }
0x4a9b   : > { %12326 = vmatprep.subr.bf16.mxu0 %v14623_v0 }
0x4b68   : > { %v8734_v52 = vpop.f32.mrb[46].mxu0 }
0x4b69   : > { %v8735_v19 = vadd.f32 %v8734_v52, %v16090_v27  ;;  %v11901_v18 = vpop.f32.mrb[47].mxu0 }
0x4b6b   : > { %v8738_v20 = vsel %vm3679_vm3, %v8735_v19, -inf }
0x4b6c   : > { %8739 = vmax.xlane.f32.xlu0 %v8738_v20 }
0x4b82   : > { %8749 = vrot.lane.b32.xlu0 %v8656_v12, %s16984_s4 }
0x4bf9   : > { %v8740_v21 = vpop.xlane.xlu0 %8739 }
0x4bfa   : > { %v8741_v22 = vsub.f32 %v8735_v19, %v8740_v21  ;;  %v11001_v21 = vld [vmem:[#allocation41 + $0x1] ss:$0 sm:$0xff] }
0x4bfc   : > { %v8742_v23 = vmul.f32 1.442695, %v8741_v22 }
0x4bfd   : > { %v8750_v24 = vpop.permute.xlu0 %8749 }
0x4bfe   : > { %12967 = vpow2.f32 %v8742_v23  ;;  %11903 = vmatpush3.msra.mxu1 %v8750_v24 }
0x4bff   : > { %12320 = vmatprep.subr.bf16.mxu1 %v14623_v0 }
0x4c08   : > { %v12968_v25 = vpop.eup %12967 }
0x4c09   : > { %v8744_v27 = vsel %vm3679_vm3, %v12968_v25, 0.0 }
0x4c0a   : > { %8745 = vadd.xlane.f32.xlu1 %v8744_v27 }
0x4c97   : > { %v8746_v32 = vpop.xlane.xlu1 %8745 }
0x4c98   : > { %12969 = vrcp.f32 %v8746_v32 }
0x4ca2   : > { %v12970_v33 = vpop.eup %12969 }
0x4ca3   : > { %v8748_v53 = vmul.f32 %v12970_v33, %v12968_v25  ;;  %v9109_v25 = vrot.slane %v16474_v51, %v15923_v3  ;;  %v11005_v3 = vld [vmem:[%s16999_s8 + $0x20] sm:$0xff]  ;;  %v11006_v51 = vld [vmem:[%s16999_s8 + $0x28] sm:$0xff] }
0x4ca5   : > { %11905 = vmatmul.mubr.msk.f32.vlgmr.msra.gmra.mrb[66].mxu1 %vm3679_vm3, %v8748_v53 }
0x4ca6   : > { %11926 = vmatprep.mubr.msk.f32.mxu1 %vm14624_vm0, %v14625_v1  ;;  %12322 = vmatpush3.bf16.msra.mxu1 %v12321_v10 }
0x4ca7   : > { %12323 = vmatprep.subr.bf16.mxu1 %v14623_v0 }
0x4caa   : > { %12325 = vmatpush3.bf16.msra.mxu1 %v12324_v44  ;;  %v11004_v44 = vld [vmem:[#allocation31 + $0x1] ss:$0 sm:$0xff] }
0x4cab   : > { %12338 = vmatprep.subr.bf16.mxu1 %v14623_v0 }
0x4d78   : > { %v8821_v34 = vpop.f32.mrb[66].mxu1 }
0x4d79   : > { %v11906_v35 = vpop.f32.mrb[67].mxu1  ;;  %11916 = vmatmul.mubr.msk.f32.vlgmr.msra.gmra.mrb[48].mxu0 %vm3309_vm1, %v8821_v34  ;;  %v12339_v34 = vpack.c.bf16 %v11006_v51, %v11005_v3  ;;  %v11028_v3 = vld [vmem:[%s17002_s10 + $0x20] sm:$0xff]  ;;  %v11029_v51 = vld [vmem:[%s17002_s10 + $0x28] sm:$0xff] }
0x4d7a   : > { %11945 = vmatprep.mubr.msk.f32.mxu0 %vm14624_vm0, %v14625_v1  ;;  %12328 = vmatpush3.bf16.msra.mxu0 %v12327_v2  ;;  %v11007_v35 = vld [vmem:[%s16999_s8 + $0x30] sm:$0xff] }
0x4d7b   : > { %12329 = vmatprep.subr.bf16.mxu0 %v14623_v0 }
0x4d7e   : > { %12331 = vmatpush3.bf16.msra.mxu0 %v12330_v60 }
0x4d7f   : > { %12332 = vmatprep.subr.bf16.mxu0 %v14623_v0 }
0x4e4c   : > { %v8900_v38 = vpop.f32.mrb[48].mxu0 }
0x4e4d   : > { %v8901_v40 = vadd.f32 %v10985_v37, %v8900_v38  ;;  %v11917_v41 = vpop.f32.mrb[49].mxu0 }
0x4e4f   : > { %8905 = vrot.lane.b32.xlu1 %v8901_v40, %s16984_s4  ;;  %v11003_v40 = vld [vmem:[#allocation32 + $0x1] ss:$0 sm:$0xff] }
0x4ec1   : > { %v8906_v46 = vpop.permute.xlu1 %8905 }
0x4ec2   : > { %v8908_v47 = vmul.f32 %v8906_v46, %v16492_v5 }
0x4ec4   : > { %8910 = vrot.lane.b32.xlu0 %v8908_v47, %s16984_s4  ;;  %v12345_v47 = vpack.c.bf16 %v11010_v43, %v11009_v42  ;;  %v11027_v42 = vld [vmem:[#allocation34 + $0x1] ss:$0 sm:$0xff]  ;;  %s17005_s4 = sld [smem:[#allocation156_spill]] }
0x4ec8   : > { %8921 = vrot.lane.b32.xlu0 %v16492_v5, %s17004_s0  ;;  %v12333_v5 = vpack.c.bf16 %v10998_v4, %v10997_v61 }
0x4eca   : > { %12334 = vmatpush3.bf16.msra.mxu0 %v12333_v5 }
0x4ecb   : > { %12335 = vmatprep.subr.bf16.mxu0 %v14623_v0 }
0x4ece   : > { %12337 = vmatpush3.bf16.msra.mxu0 %v12336_v8 }
0x4ecf   : > { %11970 = vmatprep.subr.mxu0 %v14625_v1 }
0x4f36   : > { %v8911_v49 = vpop.permute.xlu0 %8910 }
0x4f37   : > { %v8913_v50 = vadd.f32 %v8911_v49, %v16489_v63  ;;  %v11011_v49 = vld [vmem:[%s17000_s7 + $0x30] sm:$0xff] }
0x4f39   : > { %v8919_v9 = vmul.f32 %v8918_v45, %v8913_v50  ;;  %v11012_v50 = vld [vmem:[%s17000_s7 + $0x38] sm:$0xff] }
0x4f3a   : > { %v8922_v54 = vpop.permute.xlu0 %8921  ;;  %v12348_v45 = vpack.c.bf16 %v11012_v50, %v11011_v49  ;;  %v11036_v49 = vld [vmem:[%s17003_s11 + $0x50] sm:$0xff]  ;;  %v11037_v50 = vld [vmem:[%s17003_s11 + $0x58] sm:$0xff] }
0x4f3b   : > { %v8924_v55 = vadd.f32 %v8922_v54, %v8919_v9 }
0x4f3d   : > { %11927 = vmatmul.mubr.msk.f32.vlgmr.msra.gmra.mrb[68].mxu1 %vm3309_vm1, %v8924_v55  ;;  %v11017_v55 = vld [vmem:[#allocation49 + $0x1] ss:$0 sm:$0xff] }
0x4f3e   : > { %11956 = vmatprep.mubr.msk.f32.mxu1 %vm14624_vm0, %v14625_v1  ;;  %12340 = vmatpush3.bf16.msra.mxu1 %v12339_v34  ;;  %v12357_v34 = vpack.c.bf16 %v11029_v51, %v11028_v3 }
0x4f3f   : > { %12341 = vmatprep.subr.bf16.mxu1 %v14623_v0 }
0x5010   : > { %v9007_v12 = vpop.f32.mrb[68].mxu1 }
0x5011   : > { %v9008_v13 = vadd.f32 %v10991_v11, %v9007_v12  ;;  %v11928_v15 = vpop.f32.mrb[69].mxu1 }
0x5012   : > { %v11013_v15 = vld [vmem:[%s17001_s9 + $0x20] sm:$0xff] }
0x5013   : > { %v9012_v16 = vmul.f32 0.70710677, %v9008_v13  ;;  %v9011_v19 = vmul.f32 0.5, %v9008_v13 }
0x5015   : > { %12971 = verf.f32 %v9012_v16  ;;  %v11014_v16 = vld [vmem:[%s17001_s9 + $0x28] sm:$0xff] }
0x501f   : > { %v12972_v52 = vpop.eup %12971 }
0x5020   : > { %v9014_v18 = vadd.f32 1.0, %v12972_v52  ;;  %v11015_v52 = vld [vmem:[%s17001_s9 + $0x30] sm:$0xff] }
0x5022   : > { %v9015_v20 = vmul.f32 %v9014_v18, %v9011_v19  ;;  %v12351_v19 = vpack.c.bf16 %v11014_v16, %v11013_v15  ;;  %v11016_v18 = vld [vmem:[%s17001_s9 + $0x38] sm:$0xff] }
0x5024   : > { %11946 = vmatmul.mubr.msk.f32.vlgmr.msra.gmra.mrb[50].mxu0 %vm4343_vm4, %v9015_v20  ;;  %v12354_v20 = vpack.c.bf16 %v11016_v18, %v11015_v52 }
0x5025   : > { %11972 = vmatprep.mubr.msk.f32.mxu0 %vm14624_vm0, %v14625_v1 }
0x50f7   : > { %v9102_v22 = vpop.f32.mrb[50].mxu0 }
0x50f8   : > { %v9103_v23 = vadd.f32 %v11001_v21, %v9102_v22  ;;  %v11947_v24 = vpop.f32.mrb[51].mxu0 }
0x50fa   : > { %9111 = vrot.lane.b32.xlu0 %v9103_v23, %s17004_s0 }
0x516c   : > { %v9112_v27 = vpop.permute.xlu0 %9111 }
0x516d   : > { %v9114_v26 = vmul.f32 %v9112_v27, %v9109_v25  ;;  %v11024_v25 = vld [vmem:[#allocation47 + $0x1] ss:$0 sm:$0xff] }
0x516f   : > { %9116 = vrot.lane.b32.xlu0 %v9114_v26, %s16983_s23 }
0x51e1   : > { %v9117_v28 = vpop.permute.xlu0 %9116 }
0x51e2   : > { %v9119_v29 = vadd.f32 %v9117_v28, %v16489_v63  ;;  %v11008_v63 = vld [vmem:[%s16999_s8 + $0x38] sm:$0xff] }
0x51e3   : > { %v12342_v36 = vpack.c.bf16 %v11008_v63, %v11007_v35  ;;  %v11030_v35 = vld [vmem:[%s17002_s10 + $0x30] sm:$0xff]  ;;  %v11031_v63 = vld [vmem:[%s17002_s10 + $0x38] sm:$0xff] }
0x51e4   : > { %v9124_v30 = vsel %vm3309_vm1, %v9119_v29, 0.0 }
0x51e5   : > { %9125 = vadd.xlane.f32.xlu1 %v9124_v30  ;;  %12343 = vmatpush3.bf16.msra.mxu1 %v12342_v36  ;;  %v12360_v36 = vpack.c.bf16 %v11031_v63, %v11030_v35 }
0x51e6   : > { %12344 = vmatprep.subr.bf16.mxu1 %v14623_v0 }
0x5272   : > { %v9126_v31 = vpop.xlane.xlu1 %9125 }
0x5273   : > { %v9127_v17 = vmul.f32 0.03125, %v9126_v31 }
0x5275   : > { %v9128_v32 = vsub.f32 %v9119_v29, %v9127_v17 }
0x5277   : > { %v9129_v33 = vmul.f32 %v9128_v32, %v9128_v32 }
0x5279   : > { %v9130_v53 = vsel %vm3309_vm1, %v9129_v33, 0.0 }
0x527a   : > { %9131 = vadd.xlane.f32.xlu0 %v9130_v53 }
0x5307   : > { %v9132_v62 = vpop.xlane.xlu0 %9131 }
0x5308   : > { %v9133_v10 = vmul.f32 0.03125, %v9132_v62 }
0x530a   : > { %v9134_v37 = vadd.f32 1e-05, %v9133_v10 }
0x530c   : > { %12973 = vrsqrt.f32 %v9134_v37 }
0x5316   : > { %v12974_v38 = vpop.eup %12973 }
0x5317   : > { %v9136_v41 = vmul.f32 %v12974_v38, %v9128_v32 }
0x5319   : > { %v9143_v46 = vmul.f32 %v11003_v40, %v9136_v41  ;;  %v11026_v40 = vld [vmem:[#allocation35 + $0x1] ss:$0 sm:$0xff] }
0x531b   : > { %v16569_v48 = vadd.f32 %v11004_v44, %v9143_v46  ;;  %v11034_v46 = vld [vmem:[%s17003_s11 + $0x40] sm:$0xff] }
0x531d   : > { %11957 = vmatmul.mubr.msk.f32.vlgmr.msra.gmra.mrb[70].mxu1 %vm3309_vm1, %v16569_v48 }
0x531e   : > { %12346 = vmatpush3.bf16.msra.mxu1 %v12345_v47  ;;  %11967 = vmatprep.mubr.msk.f32.mxu1 %vm14624_vm0, %v14625_v1  ;;  %v11035_v47 = vld [vmem:[%s17003_s11 + $0x48] sm:$0xff] }
0x531f   : > { %12347 = vmatprep.subr.bf16.mxu1 %v14623_v0 }
0x5322   : > { %12349 = vmatpush3.bf16.msra.mxu1 %v12348_v45  ;;  %v12366_v45 = vpack.c.bf16 %v11037_v50, %v11036_v49 }
0x5323   : > { %11975 = vmatprep.subr.mxu1 %v14625_v1 }
0x5325   : > { %11968 = vmatmul.mubr.msk.f32.vlgmr.msra.gmra.mrb[72].mxu1 %vm3309_vm1, %v16115_v14 }
0x5326   : > { %11977 = vmatprep.mubr.msk.f32.mxu1 %vm14624_vm0, %v14625_v1 }
0x53f0   : > { %v9247_v9 = vpop.f32.mrb[70].mxu1 }
0x53f1   : > { %v11958_v54 = vpop.f32.mrb[71].mxu1  ;;  %v9248_v57 = vadd.f32 %v11017_v55, %v9247_v9  ;;  %v11038_v9 = vld [vmem:[%s17003_s11 + $0x60] sm:$0xff] }
0x53f2   : > { %v11039_v54 = vld [vmem:[%s17003_s11 + $0x68] sm:$0xff] }
0x53f3   : > { %v9327_v60 = vmul.f32 0.17677669, %v9248_v57  ;;  %v12369_v55 = vpack.c.bf16 %v11039_v54, %v11038_v9  ;;  %v11041_v57 = vld [vmem:[%s17003_s11 + $0x78] sm:$0xff] }
0x53f8   : > { %v9323_v2 = vpop.f32.mrb[72].mxu1 }
0x53f9   : > { %v9324_v58 = vadd.f32 %v11019_v56, %v9323_v2  ;;  %v11969_v59 = vpop.f32.mrb[73].mxu1  ;;  %v11040_v56 = vld [vmem:[%s17003_s11 + $0x70] sm:$0xff] }
0x53fa   : > { %v12372_v2 = vpack.c.bf16 %v11041_v57, %v11040_v56 }
0x53fb   : > { %9415 = vrot.lane.b32.xlu1 %v9324_v58, %s16983_s23  ;;  %11971 = vmatpush3.xpose.msk.msra.mxu0 %vm3309_vm1, %v9324_v58  ;;  %v11032_v58 = vld [vmem:[#allocation28 + $0x1] ss:$0 sm:$0xff]  ;;  %s17006_s23 = sld [smem:[#allocation158_spill]] }
0x53fc   : > { %12350 = vmatprep.subr.bf16.mxu0 %v14623_v0 }
0x53fe   : > { %11973 = vmatmul.mubr.msk.f32.vlgmr.msra.gmra.mrb[52].mxu0 %vm3309_vm1, %v9327_v60 }
0x53ff   : > { %11988 = vmatprep.mubr.msk.f32.mxu0 %vm14624_vm0, %v14625_v1  ;;  %12352 = vmatpush3.bf16.msra.mxu0 %v12351_v19 }
0x5400   : > { %12353 = vmatprep.subr.bf16.mxu0 %v14623_v0 }
0x5401   : > { %s17007_s0 = smov %s17006_s23  ;;  %v9900_v3 = vld [vmem:[%s17006_s23] sm:$0xff]  ;;  %s3273_s23 = sand.u32 1, %s14471_s22  }
0x5402   : > { %v9901_v51 = vld [vmem:[%s17007_s0 + $0x8] sm:$0xff]  ;;  %v9903_v63 = vld [vmem:[%s17007_s0 + $0x18] sm:$0xff]  ;;  %s10777_s1 = sshll.u32 %s3273_s23, 3  ;;  %s9986_s6 = scalar_lea.sflag [#allocation4], %s3273_s23 }
0x5403   : > { %12355 = vmatpush3.bf16.msra.mxu0 %v12354_v20  ;;  %v12381_v35 = vpack.c.bf16 %v9901_v51, %v9900_v3 }
0x5404   : > { %12362 = vmatprep.subr.bf16.mxu0 %v14623_v0 }
0x546d   : > { %v9416_v14 = vpop.permute.xlu1 %9415 }
0x546e   : > { %11976 = vmatpush3.msra.mxu1 %v9416_v14 }
0x546f   : > { %12356 = vmatprep.subr.bf16.mxu1 %v14623_v0 }
0x54d1   : > { %v9400_v61 = vpop.f32.mrb[52].mxu0 }
0x54d2   : > { %v9401_v4 = vadd.f32 %v9400_v61, %v15948_v39  ;;  %v11974_v5 = vpop.f32.mrb[53].mxu0 }
0x54d4   : > { %v9404_v6 = vsel %vm3679_vm3, %v9401_v4, -inf }
0x54d5   : > { %9405 = vmax.xlane.f32.xlu0 %v9404_v6 }
0x5562   : > { %v9406_v7 = vpop.xlane.xlu0 %9405 }
0x5563   : > { %v9407_v8 = vsub.f32 %v9401_v4, %v9406_v7 }
0x5565   : > { %v9408_v11 = vmul.f32 1.442695, %v9407_v8  ;;  %v11042_v8 = vld [vmem:[#allocation29 + $0x1] ss:$0 sm:$0xff] }
0x5567   : > { %12975 = vpow2.f32 %v9408_v11 }
0x5571   : > { %v12976_v12 = vpop.eup %12975 }
0x5572   : > { %v9410_v13 = vsel %vm3679_vm3, %v12976_v12, 0.0 }
0x5573   : > { %9411 = vadd.xlane.f32.xlu0 %v9410_v13 }
0x5600   : > { %v9412_v39 = vpop.xlane.xlu0 %9411 }
0x5601   : > { %12977 = vrcp.f32 %v9412_v39 }
0x560b   : > { %v12978_v21 = vpop.eup %12977 }
0x560c   : > { %v9414_v22 = vmul.f32 %v12978_v21, %v12976_v12  ;;  %v9815_v21 = vld [vmem:[%s17005_s4] sm:$0xff] }
0x560e   : > { %11978 = vmatmul.mubr.msk.f32.vlgmr.msra.gmra.mrb[74].mxu1 %vm3679_vm3, %v9414_v22  ;;  %v9816_v22 = vld [vmem:[%s17005_s4 + $0x8] sm:$0xff] }
0x560f   : > { %11999 = vmatprep.mubr.msk.f32.mxu1 %vm14624_vm0, %v14625_v1  ;;  %12358 = vmatpush3.bf16.msra.mxu1 %v12357_v34  ;;  %v9902_v34 = vld [vmem:[%s17007_s0 + $0x10] sm:$0xff]  ;;  %s3275_s0 = scalar_lea.vmem [#allocation80], %s10777_s1  ;;  %s14317_s1 = sshll.u32 %s14629_s28, 4  ;;  %s14318_s1 = int_to_ptr.vmem [resolvable:$false] %s14317_s1 }
0x5610   : > { %12359 = vmatprep.subr.bf16.mxu1 %v14623_v0  ;;  %s14319_s8 = scalar_lea.vmem %s14318_s1, 256 }
0x5613   : > { %12361 = vmatpush3.bf16.msra.mxu1 %v12360_v36  ;;  %v12384_v36 = vpack.c.bf16 %v9903_v63, %v9902_v34 }
0x5614   : > { %12374 = vmatprep.subr.bf16.mxu1 %v14623_v0 }
0x56e1   : > { %v9487_v23 = vpop.f32.mrb[74].mxu1 }
0x56e2   : > { %v11979_v24 = vpop.f32.mrb[75].mxu1  ;;  %11989 = vmatmul.mubr.msk.f32.vlgmr.msra.gmra.mrb[54].mxu0 %vm3309_vm1, %v9487_v23  ;;  %v12375_v23 = vpack.c.bf16 %v9816_v22, %v9815_v21 }
0x56e3   : > { %12018 = vmatprep.mubr.msk.f32.mxu0 %vm14624_vm0, %v14625_v1  ;;  %v9817_v24 = vld [vmem:[%s17005_s4 + $0x10] sm:$0xff] }
0x57b5   : > { %v9566_v27 = vpop.f32.mrb[54].mxu0 }
0x57b6   : > { %v9567_v26 = vadd.f32 %v11024_v25, %v9566_v27  ;;  %v11990_v28 = vpop.f32.mrb[55].mxu0  ;;  %v9818_v25 = vld [vmem:[%s17005_s4 + $0x18] sm:$0xff]  ;;  %s9999_s4 = sshll.u32 %s3275_s0, 4  ;;  %s16651_s4 = int_to_ptr.vmem [resolvable:$true] %s9999_s4 }
0x57b7   : > { %v12378_v27 = vpack.c.bf16 %v9818_v25, %v9817_v24  ;;  %s14313_s7 = scalar_lea.vmem %s16651_s4, 128  ;;  %p14320_p13 = scmp.lt.s32.totalorder %s16651_s4, %s14318_s1 }
0x57b8   : > { %v9570_v29 = vadd.f32 %v9567_v26, %v16569_v48  ;;  %v12363_v48 = vpack.c.bf16 %v11035_v47, %v11034_v46  ;;  %p14314_p10 = scmp.ne.s32.totalorder %s16651_s4, %s14313_s7  ;;  %p14321_p0 = scmp.lt.s32.totalorder %s14319_s8, %s14313_s7 }
0x57ba   : > { %v9575_v30 = vsel %vm3309_vm1, %v9570_v29, 0.0  ;;  %12364 = vmatpush3.bf16.msra.mxu0 %v12363_v48  ;;  %p14315_p6 = pnand %p14314_p10, %p17008_p12  ;;  %p14322_p1 = por %p14321_p0, %p14320_p13 }
0x57bb   : > { %9576 = vadd.xlane.f32.xlu0 %v9575_v30  ;;  %12365 = vmatprep.subr.bf16.mxu0 %v14623_v0 }
0x57bc   : > { %p14316_p5 = pneg %p14315_p6 }
0x57be   : > { %12367 = vmatpush3.bf16.msra.mxu0 %v12366_v45  ;;  %p14323_p2 = pnand %p14322_p1, %p14316_p5 }
0x57bf   : > { %12368 = vmatprep.subr.bf16.mxu0 %v14623_v0 }
0x57c2   : > { %12370 = vmatpush3.bf16.msra.mxu0 %v12369_v55 }
0x57c3   : > { %12371 = vmatprep.subr.bf16.mxu0 %v14623_v0 }
0x57c6   : > { %12373 = vmatpush3.bf16.msra.mxu0 %v12372_v2 }
0x5848   : > { %v9577_v31 = vpop.xlane.xlu0 %9576 }
0x5849   : > { %v9578_v17 = vmul.f32 0.03125, %v9577_v31  ;;  %v11044_v31 = vld [vmem:[#allocation38 + $0x1] ss:$0 sm:$0xff] }
0x584b   : > { %v9579_v32 = vsub.f32 %v9570_v29, %v9578_v17 }
0x584d   : > { %v9580_v33 = vmul.f32 %v9579_v32, %v9579_v32 }
0x584f   : > { %v9581_v53 = vsel %vm3309_vm1, %v9580_v33, 0.0 }
0x5850   : > { %9582 = vadd.xlane.f32.xlu0 %v9581_v53 }
0x58dd   : > { %v9583_v62 = vpop.xlane.xlu0 %9582 }
0x58de   : > { %v9584_v10 = vmul.f32 0.03125, %v9583_v62  ;;  %v11046_v62 = vld [vmem:[#allocation50] ss:$0 sm:$0xff] }
0x58e0   : > { %v9585_v37 = vadd.f32 1e-05, %v9584_v10 }
0x58e2   : > { %12979 = vrsqrt.f32 %v9585_v37 }
0x58ec   : > { %v12980_v38 = vpop.eup %12979 }
0x58ed   : > { %v9587_v41 = vmul.f32 %v12980_v38, %v9579_v32  ;;  %v11045_v32 = vld [vmem:[#allocation37 + $0x1] ss:$0 sm:$0xff] }
0x58ef   : > { %v9594_v43 = vmul.f32 %v11026_v40, %v9587_v41 }
0x58f1   : > { %v9601_v44 = vadd.f32 %v11027_v42, %v9594_v43 }
0x58f3   : > { %12000 = vmatmul.mubr.msk.f32.vlgmr.msra.gmra.mrb[76].mxu1 %vm3309_vm1, %v9601_v44 }
0x58f4   : > { %12029 = vmatprep.mubr.msk.f32.mxu1 %vm14624_vm0, %v14625_v1  ;;  %12376 = vmatpush3.bf16.msra.mxu1 %v12375_v23 }
0x58f5   : > { %12377 = vmatprep.subr.bf16.mxu1 %v14623_v0 }
0x58f8   : > { %12379 = vmatpush3.bf16.msra.mxu1 %v12378_v27 }
0x58f9   : > { %12380 = vmatprep.subr.bf16.mxu1 %v14623_v0 }
0x59c6   : > { %v9684_v59 = vpop.f32.mrb[76].mxu1 }
0x59c7   : > { %v9685_v60 = vadd.f32 %v11032_v58, %v9684_v59  ;;  %v12001_v14 = vpop.f32.mrb[77].mxu1 }
0x59c9   : > { %v9689_v61 = vmul.f32 0.70710677, %v9685_v60  ;;  %v9688_v5 = vmul.f32 0.5, %v9685_v60 }
0x59cb   : > { %12981 = verf.f32 %v9689_v61 }
0x59d5   : > { %v12982_v4 = vpop.eup %12981 }
0x59d6   : > { %v9691_v6 = vadd.f32 1.0, %v12982_v4 }
0x59d8   : > { %v9692_v7 = vmul.f32 %v9691_v6, %v9688_v5 }
0x59da   : > { %12019 = vmatmul.mubr.msk.f32.vlgmr.msra.gmra.mrb[56].mxu0 %vm4343_vm4, %v9692_v7 }
0x5aad   : > { %v9779_v11 = vpop.f32.mrb[56].mxu0 }
0x5aae   : > { %v9780_v12 = vadd.f32 %v11042_v8, %v9779_v11  ;;  %v12020_v13 = vpop.f32.mrb[57].mxu0 }
0x5ab0   : > { %v9783_v15 = vadd.f32 %v9780_v12, %v9601_v44 }
0x5ab2   : > { %v9788_v16 = vsel %vm3309_vm1, %v9783_v15, 0.0 }
0x5ab3   : > { %9789 = vadd.xlane.f32.xlu0 %v9788_v16 }
0x5b40   : > { %v9790_v52 = vpop.xlane.xlu0 %9789 }
0x5b41   : > { %v9791_v19 = vmul.f32 0.03125, %v9790_v52 }
0x5b43   : > { %v9792_v18 = vsub.f32 %v9783_v15, %v9791_v19 }
0x5b45   : > { %v9793_v20 = vmul.f32 %v9792_v18, %v9792_v18 }
0x5b47   : > { %v9794_v39 = vsel %vm3309_vm1, %v9793_v20, 0.0 }
0x5b48   : > { %9795 = vadd.xlane.f32.xlu0 %v9794_v39 }
0x5bd5   : > { %v9796_v26 = vpop.xlane.xlu0 %9795 }
0x5bd6   : > { %v9797_v28 = vmul.f32 0.03125, %v9796_v26 }
0x5bd8   : > { %v9798_v29 = vadd.f32 1e-05, %v9797_v28 }
0x5bda   : > { %12983 = vrsqrt.f32 %v9798_v29 }
0x5be4   : > { %v12984_v30 = vpop.eup %12983 }
0x5be5   : > { %v9800_v17 = vmul.f32 %v12984_v30, %v9792_v18 }
0x5be7   : > { %v9807_v33 = vmul.f32 %v11044_v31, %v9800_v17 }
0x5be9   : > { %v9814_v53 = vadd.f32 %v11045_v32, %v9807_v33 }
0x5beb   : > { %12030 = vmatmul.mubr.msk.f32.vlgmr.msra.gmra.mrb[78].mxu1 %vm3309_vm1, %v9814_v53 }
0x5bec   : > { %12040 = vmatprep.mubr.msk.f32.mxu1 %vm14624_vm0, %v14625_v1  ;;  %12382 = vmatpush3.bf16.msra.mxu1 %v12381_v35  ;;  %v11048_v1 = vld [vmem:[#allocation52] ss:$0 sm:$0xff] }
0x5bed   : > { %12383 = vmatprep.subr.bf16.mxu1 %v14623_v0 }
0x5bf0   : > { %12385 = vmatpush3.bf16.msra.mxu1 %v12384_v36 }
0x5cbe   : > { %v9895_v10 = vpop.f32.mrb[78].mxu1 }
0x5cbf   : > { %v9896_v37 = vadd.f32 %v11046_v62, %v9895_v10  ;;  %v12031_v38 = vpop.f32.mrb[79].mxu1 }
0x5cc1   : > { %12985 = vtanh.f32 %v9896_v37 }
0x5ccb   : > { %v12986_v40 = vpop.eup %12985 }
0x5ccc   : > { %12041 = vmatmul.mubr.msk.f32.vlgmr.msra.gmra.mrb[80].mxu1 %vm3309_vm1, %v12986_v40 }
0x5d9f   : > { %v9980_v41 = vpop.f32.mrb[80].mxu1 }
0x5da0   : > { %v9981_v42 = vadd.f32 %v11048_v1, %v9980_v41  ;;  %v12042_v0 = vpop.f32.mrb[81].mxu1 }
0x5da2   : > { %9984 = vst.msk [vmem:[%s3275_s0] sm:$0xff] %vm3679_vm3, %v9981_v42 }
0x5da3   : > { %14326 = shalt.err (!%p14323_p2)
}
0x5da4   : > { %s14327_s2 = scalar_lea.hbm %s16649_s5, 128  ;;  %s14331_s0 = scalar_lea.hbm %s15073_s3, 256 }
0x5da5   : > { %p14328_p3 = scmp.ne.s32.totalorder %s16649_s5, %s14327_s2  ;;  %p14332_p8 = scmp.lt.u32.totalorder %s16649_s5, %s15073_s3 }
0x5da6   : > { %p14333_p11 = scmp.lt.u32.totalorder %s14331_s0, %s14327_s2  ;;  %p14335_p10 = scmp.lt.u32.totalorder %s14327_s2, %s16649_s5 }
0x5da7   : > { %p14329_p4 = pnand %p14328_p3, %p17008_p12 }
0x5da8   : > { %p14334_p9 = por %p14333_p11, %p14332_p8 }
0x5da9   : > { %p14330_p7 = pneg %p14329_p4 }
0x5daa   : > { %p14336_p6 = por %p14335_p10, %p14334_p9 }
0x5dac   : > { %p14337_p5 = pnand %p14336_p6, %p14330_p7 }
0x5dae   : > { %14340 = shalt.err (!%p14337_p5)
}
0x5daf   : > { %12590 = dma.vmem_to_hbm [thread:$0]  (%p17008_p12), %s16651_s4, 128, %s16649_s5, %s9986_s6  }
0x5db0 PF: > { %s17009_s7 = sld [smem:[#allocation185_spill]]  ;;  %s17010_s8 = sld [smem:[#allocation189_spill]] }
0x5db1   : > { %p12698_p13 = scmp.ge.s32.totalorder %s14479_s26, 2 }
0x5db6   : > { %s10011_s23 = sand.u32 1, %s17009_s7   ;;  %p17011_p0 = scmp.ne.s32.totalorder %s17010_s8, 0 }
0x5db7   : > { %s10012_s28 = scalar_lea.sflag [#allocation4], %s10011_s23 }
0x5db8   : > { %p12593_p1 = pnand %p12698_p13, %p17011_p0 }
0x5dba   : > { %14462 = dma.done.wait (!%p12593_p1), %s10012_s28, 128  }
0x5dbb   : > { %14464 = vsyncadd (!%p12593_p1), %s10012_s28, 4294967168  ;;  %s17012_s26 = sld [smem:[#allocation187_spill]]  ;;  %s17013_s1 = sld [smem:[#allocation186_spill]] }
0x5dbc   : > { %s17014_s23 = sld [smem:[#allocation188_spill]]  ;;  %17015 = sst [smem:[#allocation185_spill]] %s14471_s22 }
0x5dc1   : > { %p211_p2 = scmp.ge.s32.totalorder %s17012_s26, 4   ;;  %s17016_s22 = smov %s17013_s1 }
0x5dc3   :  { %213 = sbr.rel (!%p211_p2) target bundleno = 199 (0xc7), region = 765 }
0x5dca   :  { %10017 = vsyncpa [#allocation3], 1 }
0x5dcb   :  { %10019 = vsyncpa [#allocation3 + $0x1], 1 }
0x5dcc   :  { %10020 = vsyncpa [#allocation6], 1 }
0x5dcd   :  { %10021 = vsyncpa [#allocation9], 1 }
0x5dce   :  { %10022 = vsyncpa [#allocation12], 1 }
0x5dcf   :  { %10023 = vsyncpa [#allocation15], 1 }
0x5dd0   :  { %10024 = vsyncpa [#allocation18], 1 }
0x5dd1   :  { %10025 = vsyncpa [#allocation21], 1 }
0x5dd2   :  { %10026 = vsyncpa [#allocation24], 1 }
0x5dd3   :  { %10027 = vsyncpa [#allocation27], 1 }
0x5dd4   :  { %10028 = vsyncpa [#allocation30], 1 }
0x5dd5   :  { %10029 = vsyncpa [#allocation33], 1 }
0x5dd6   :  { %10030 = vsyncpa [#allocation36], 1 }
0x5dd7   :  { %10031 = vsyncpa [#allocation39], 1 }
0x5dd8   :  { %10032 = vsyncpa [#allocation42], 1 }
0x5dd9   :  { %10033 = vsyncpa [#allocation45], 1 }
0x5dda   :  { %10034 = vsyncpa [#allocation48], 1 }
0x5ddb   :  { %10035 = vsyncpa [#allocation51], 1 }
0x5ddc   :  { %10036 = vsyncpa [#allocation54], 1 }
0x5ddd   :  { %10037 = vsyncpa [#allocation57], 1 }
0x5dde   :  { %10038 = vsyncpa [#allocation60], 1 }
0x5ddf   :  { %10039 = vsyncpa [#allocation63], 1 }
0x5de0   :  { %10040 = vsyncpa [#allocation66], 1 }
0x5de1   :  { %10041 = vsyncpa [#allocation69], 1 }
0x5de2   :  { %10042 = vsyncpa [#allocation72], 1 }
0x5de3   :  { %10043 = vsyncpa [#allocation75], 1 }
0x5de4   :  { %10044 = vsyncpa [#allocation78], 1 }
0x5de5   :  { %10045 = vsyncpa [#allocation4], 1 }
0x5de6   :  { %10047 = vsyncpa [#allocation4 + $0x1], 1 }

</bundles_post_ra>
